<compile_context>
chip_gen: v7x
topology: tpu7x:2x2x1
jax: 0.10.0
libtpu: 0.0.40
codegen_flags: <defaults>
</compile_context>

<pallas_src>
import functools
import math

import jax
import jax.numpy as jnp
from jax import lax
from jax.experimental import pallas as pl
from jax.experimental.pallas import tpu as pltpu

# ----------------------- problem constants (ToyRobust, dim=1, m=2) -----------------------
DIM = 1
NUM_OBJ = 2
LB, UB = 0.0, 0.7                      # base_function.bounds
ALPHA = 0.9
STD_DEV = 0.1
SCALED_STD = STD_DEV / (UB - LB)       # std_dev / search_space_range
MVAR_REF = (-14.1951, -3.1887)         # mvar_ref_point

_NEG_BIG = -1e30                       # "no level point" sentinel
_NEG_BIG_THRESH = -1e29


def _objectives(x_un):
    """Stand-in 2-objective toy problem (negate=True)."""
    # TODO(synk): exact botorch ToyRobust formula not reproduced; deterministic Levy-1d-based
    #             stand-in with the same signature (1 input dim, 2 negated objectives).
    pi = math.pi
    z = -10.0 + (x_un / (UB - LB)) * 20.0
    w = 1.0 + (z - 1.0) / 4.0
    levy = jnp.sin(pi * w) ** 2 + (w - 1.0) ** 2 * (1.0 + jnp.sin(2.0 * pi * w) ** 2)
    f1 = 0.1 * levy - x_un
    f2 = 3.0 * (x_un - 0.35) ** 2 + 0.5 * jnp.sin(10.0 * x_un)
    return -f1, -f2                    # negate=True


# ----------------------- fused kernel: perturb + eval + MVaR + hypervolume ----------------
def _fused_mvar_hv_kernel(x_ref, pert_ref, hv_ref, *, q, n_w, k_alpha, r1, r2):
    pert = pert_ref[...]                               # (1, n_w), input dim d=1 squeezed
    k = jnp.float32(k_alpha)
    neg_big = jnp.float32(_NEG_BIG)
    thresh = jnp.float32(_NEG_BIG_THRESH)
    r1f = jnp.float32(r1)
    r2f = jnp.float32(r2)

    y1_rows = []    # per-group obj-1 sample values           (1, n_w)
    y1_cols = []    # same, column layout (reused in stage 2) (n_w, 1)
    b_rows = []     # per-group MVaR candidate obj-2 values   (1, n_w)

    # ---- stage 1: per q-group perturbation + unnormalize + objective eval + MVaR ----
    for g in range(q):
        xg = x_ref[g]                                  # scalar candidate (SMEM)
        xp = xg + pert                                 # InputPerturbation (additive)
        x_un = LB + xp * (UB - LB)                     # unnormalize(X, base_function.bounds)
        y1, y2 = _objectives(x_un)                     # (1, n_w) each

        y1c = jnp.transpose(y1)                        # (n_w, 1)
        y2c = jnp.transpose(y2)                        # (n_w, 1)
        # 0/1 dominance indicators cast straight to bf16; f32 MXU accumulation is exact.
        B = (y2 >= y2c).astype(jnp.bfloat16)           # (n_w, n_w): 1[y2_l >= y2_j]
        AT = (y1c >= y1).astype(jnp.bfloat16)          # (n_w, n_w): 1[y1_l >= y1_i]
        # D[j, i] = #{l : y1_l >= y1_i  and  y2_l >= y2_j}   (counting CDF via MXU matmul)
        D = jnp.dot(B, AT, preferred_element_type=jnp.float32)

        # alpha-level count with the botorch fallback rule  ==  min count >= k
        target = jnp.min(jnp.where(D >= k, D, jnp.float32(n_w + 1)))
        level = D == target                            # alpha-level grid points
        # For a fixed obj-1 value only the max obj-2 level point matters for HV.
        b_g = jnp.max(jnp.where(level, y2c, neg_big), axis=0, keepdims=True)   # (1, n_w)

        y1_rows.append(y1)
        y1_cols.append(y1c)
        b_rows.append(b_g)

    # ---- stage 2: exact 2-D hypervolume of the union of all Q = q*n_w MVaR candidates ----
    # Single flattened sweep: one (Q, Q) precedence mask, one sublane-axis reduction.
    Q = q * n_w
    a_row = jnp.concatenate(y1_rows, axis=1)           # (1, Q) obj-1 per candidate
    b_row = jnp.concatenate(b_rows, axis=1)            # (1, Q) obj-2 per candidate
    a_col = jnp.concatenate(y1_cols, axis=0)           # (Q, 1) reused stage-1 transposes

    ok_row = (b_row > thresh) & (a_row > r1f) & (b_row > r2f)      # valid & dominates ref
    beff_row = jnp.where(ok_row, b_row, r2f)           # invalid points clamped to r2
    beff_col = jnp.transpose(beff_row)                 # (Q, 1)

    iota_row = lax.broadcasted_iota(jnp.int32, (1, Q), 1)   # "this" candidate index
    iota_col = lax.broadcasted_iota(jnp.int32, (Q, 1), 0)   # "preceding" candidate index

    # prec[j, i]: candidate j precedes candidate i in the descending-obj1 sweep
    # (ties broken by global index).  No ok-mask needed: beff is already r2 when invalid.
    prec = (a_col > a_row) | ((a_col == a_row) & (iota_col < iota_row))        # (Q, Q)
    # Running max of preceding obj-2 values; reduction over sublanes (axis=0).
    base = jnp.max(jnp.where(prec, beff_col, r2f), axis=0, keepdims=True)      # (1, Q)

    contrib = jnp.where(
        ok_row,
        jnp.maximum(a_row - r1f, 0.0) * jnp.maximum(b_row - base, 0.0),
        0.0)
    hv_ref[0] = jnp.sum(contrib)                       # scalar HV straight to SMEM


# ----------------------- wrapper ----------------------------------------------------------
def mvar_hv_forward(new_X, perturbation_set, *, alpha=ALPHA, ref_point=MVAR_REF):
    """Returns the MVaR hypervolume for the candidate set `new_X` (first call, empty archive)."""
    q, d = new_X.shape
    assert d == DIM
    n_w = perturbation_set.shape[0]
    k_alpha = math.ceil(alpha * n_w)

    x = new_X.reshape(q).astype(jnp.float32)                         # (q,) scalars -> SMEM
    pert = perturbation_set.reshape(1, n_w).astype(jnp.float32)      # (1, n_w), d=1 squeezed

    hv = pl.pallas_call(
        functools.partial(
            _fused_mvar_hv_kernel, q=q, n_w=n_w, k_alpha=k_alpha,
            r1=float(ref_point[0]), r2=float(ref_point[1])),
        out_shape=jax.ShapeDtypeStruct((1,), jnp.float32),
        in_specs=[
            pl.BlockSpec(memory_space=pltpu.MemorySpace.SMEM),   # q candidate scalars
            pl.BlockSpec(memory_space=pltpu.MemorySpace.VMEM),   # (1, n_w) perturbation row
        ],
        out_specs=pl.BlockSpec(memory_space=pltpu.MemorySpace.SMEM),  # scalar HV
    )(x, pert)
    return hv[0]


if __name__ == "__main__":
    key = jax.random.PRNGKey(0)
    k1, k2 = jax.random.split(key)

    q, n_w = 4, 128                                   # small: q candidates, hv_n_w perturbations
    new_X = jax.random.uniform(k1, (q, DIM), dtype=jnp.float32)           # normalized candidates
    # TODO(synk): draw_sobol_normal_samples (quasi-MC) replaced by deterministic jax.random.normal.
    perturbation_set = (
        jax.random.normal(k2, (n_w, DIM), dtype=jnp.float32) * SCALED_STD
    )

    hv = mvar_hv_forward(new_X, perturbation_set)
    hv = jax.block_until_ready(hv)
    hv_val = float(hv)                                # mirrors `.item()` in the torch module
    assert math.isfinite(hv_val) and hv_val >= 0.0
    print("KERNEL_OK")
</pallas_src>

<mosaic_0001>
module attributes {stable_mosaic.version = 11 : i64} {
  func.func @_fused_mvar_hv_kernel(%arg0: memref<4xf32, #tpu.memory_space<smem>>, %arg1: memref<1x128xf32, #tpu.memory_space<vmem>>, %arg2: memref<1xf32, #tpu.memory_space<smem>>) attributes {dimension_semantics = [], scalar_prefetch = 0 : i64, scratch_operands = 0 : i64, tpu.core_type = #tpu.core_type<tc>} {
    %c0 = arith.constant 0 : index
    %c0_0 = arith.constant 0 : index
    %0 = vector.load %arg1[%c0, %c0_0] : memref<1x128xf32, #tpu.memory_space<vmem>>, vector<1x128xf32>
    %c0_1 = arith.constant 0 : index
    %1 = memref.load %arg0[%c0_1] : memref<4xf32, #tpu.memory_space<smem>>
    %2 = vector.broadcast %1 : f32 to vector<1x128xf32>
    %3 = arith.addf %2, %0 : vector<1x128xf32>
    %cst = arith.constant 0.699999988 : f32
    %4 = vector.broadcast %cst : f32 to vector<1x128xf32>
    %5 = arith.mulf %3, %4 : vector<1x128xf32>
    %cst_2 = arith.constant 0.000000e+00 : f32
    %6 = vector.broadcast %cst_2 : f32 to vector<1x128xf32>
    %7 = arith.addf %6, %5 : vector<1x128xf32>
    %cst_3 = arith.constant 0.699999988 : f32
    %8 = vector.broadcast %cst_3 : f32 to vector<1x128xf32>
    %9 = arith.divf %7, %8 : vector<1x128xf32>
    %cst_4 = arith.constant 2.000000e+01 : f32
    %10 = vector.broadcast %cst_4 : f32 to vector<1x128xf32>
    %11 = arith.mulf %9, %10 : vector<1x128xf32>
    %cst_5 = arith.constant -1.000000e+01 : f32
    %12 = vector.broadcast %cst_5 : f32 to vector<1x128xf32>
    %13 = arith.addf %12, %11 : vector<1x128xf32>
    %cst_6 = arith.constant 1.000000e+00 : f32
    %14 = vector.broadcast %cst_6 : f32 to vector<1x128xf32>
    %15 = arith.subf %13, %14 : vector<1x128xf32>
    %cst_7 = arith.constant 4.000000e+00 : f32
    %16 = vector.broadcast %cst_7 : f32 to vector<1x128xf32>
    %17 = arith.divf %15, %16 : vector<1x128xf32>
    %cst_8 = arith.constant 1.000000e+00 : f32
    %18 = vector.broadcast %cst_8 : f32 to vector<1x128xf32>
    %19 = arith.addf %18, %17 : vector<1x128xf32>
    %cst_9 = arith.constant 3.14159274 : f32
    %20 = vector.broadcast %cst_9 : f32 to vector<1x128xf32>
    %21 = arith.mulf %20, %19 : vector<1x128xf32>
    %22 = math.sin %21 : vector<1x128xf32>
    %23 = arith.mulf %22, %22 : vector<1x128xf32>
    %cst_10 = arith.constant 1.000000e+00 : f32
    %24 = vector.broadcast %cst_10 : f32 to vector<1x128xf32>
    %25 = arith.subf %19, %24 : vector<1x128xf32>
    %26 = arith.mulf %25, %25 : vector<1x128xf32>
    %cst_11 = arith.constant 6.28318548 : f32
    %27 = vector.broadcast %cst_11 : f32 to vector<1x128xf32>
    %28 = arith.mulf %27, %19 : vector<1x128xf32>
    %29 = math.sin %28 : vector<1x128xf32>
    %30 = arith.mulf %29, %29 : vector<1x128xf32>
    %cst_12 = arith.constant 1.000000e+00 : f32
    %31 = vector.broadcast %cst_12 : f32 to vector<1x128xf32>
    %32 = arith.addf %31, %30 : vector<1x128xf32>
    %33 = arith.mulf %26, %32 : vector<1x128xf32>
    %34 = arith.addf %23, %33 : vector<1x128xf32>
    %cst_13 = arith.constant 1.000000e-01 : f32
    %35 = vector.broadcast %cst_13 : f32 to vector<1x128xf32>
    %36 = arith.mulf %35, %34 : vector<1x128xf32>
    %37 = arith.subf %36, %7 : vector<1x128xf32>
    %cst_14 = arith.constant 3.500000e-01 : f32
    %38 = vector.broadcast %cst_14 : f32 to vector<1x128xf32>
    %39 = arith.subf %7, %38 : vector<1x128xf32>
    %40 = arith.mulf %39, %39 : vector<1x128xf32>
    %cst_15 = arith.constant 3.000000e+00 : f32
    %41 = vector.broadcast %cst_15 : f32 to vector<1x128xf32>
    %42 = arith.mulf %41, %40 : vector<1x128xf32>
    %cst_16 = arith.constant 1.000000e+01 : f32
    %43 = vector.broadcast %cst_16 : f32 to vector<1x128xf32>
    %44 = arith.mulf %43, %7 : vector<1x128xf32>
    %45 = math.sin %44 : vector<1x128xf32>
    %cst_17 = arith.constant 5.000000e-01 : f32
    %46 = vector.broadcast %cst_17 : f32 to vector<1x128xf32>
    %47 = arith.mulf %46, %45 : vector<1x128xf32>
    %48 = arith.addf %42, %47 : vector<1x128xf32>
    %cst_18 = arith.constant 0.000000e+00 : f32
    %49 = vector.broadcast %cst_18 : f32 to vector<1x128xf32>
    %50 = arith.subf %49, %37 : vector<1x128xf32>
    %cst_19 = arith.constant 0.000000e+00 : f32
    %51 = vector.broadcast %cst_19 : f32 to vector<1x128xf32>
    %52 = arith.subf %51, %48 : vector<1x128xf32>
    %53 = tpu.transpose %50, [1, 0] : vector<1x128xf32> -> vector<128x1xf32>
    %54 = tpu.transpose %52, [1, 0] : vector<1x128xf32> -> vector<128x1xf32>
    %55 = vector.broadcast %52 : vector<1x128xf32> to vector<128x128xf32>
    %56 = vector.broadcast %54 : vector<128x1xf32> to vector<128x128xf32>
    %57 = arith.cmpf oge, %55, %56 : vector<128x128xf32>
    %58 = arith.extui %57 : vector<128x128xi1> to vector<128x128xi32>
    %59 = arith.sitofp %58 : vector<128x128xi32> to vector<128x128xf32>
    %60 = arith.truncf %59 : vector<128x128xf32> to vector<128x128xbf16>
    %61 = vector.broadcast %53 : vector<128x1xf32> to vector<128x128xf32>
    %62 = vector.broadcast %50 : vector<1x128xf32> to vector<128x128xf32>
    %63 = arith.cmpf oge, %61, %62 : vector<128x128xf32>
    %64 = arith.extui %63 : vector<128x128xi1> to vector<128x128xi32>
    %65 = arith.sitofp %64 : vector<128x128xi32> to vector<128x128xf32>
    %66 = arith.truncf %65 : vector<128x128xf32> to vector<128x128xbf16>
    %cst_20 = arith.constant dense<0.000000e+00> : vector<128x128xf32>
    %67 = tpu.matmul %60, %66, %cst_20 {dimension_numbers = #tpu.dot_dimension_numbers<[1], [0], [0], [1], [0, 0, 1, 1], [], []>} : vector<128x128xbf16>, vector<128x128xbf16>, vector<128x128xf32> -> vector<128x128xf32>
    %cst_21 = arith.constant 1.160000e+02 : f32
    %68 = vector.broadcast %cst_21 : f32 to vector<128x128xf32>
    %69 = arith.cmpf oge, %67, %68 : vector<128x128xf32>
    %cst_22 = arith.constant 1.290000e+02 : f32
    %70 = vector.broadcast %cst_22 : f32 to vector<128x128xf32>
    %71 = arith.select %69, %67, %70 : vector<128x128xi1>, vector<128x128xf32>
    %72 = vector.shape_cast %71 : vector<128x128xf32> to vector<1x128x128xf32>
    %cst_23 = arith.constant dense<0x7F800000> : vector<1xf32>
    %73 = vector.multi_reduction <minimumf>, %72, %cst_23 [1, 2] : vector<1x128x128xf32> to vector<1xf32>
    %74 = vector.shape_cast %73 : vector<1xf32> to vector<1x1x1xf32>
    %75 = vector.extract %74[0, 0, 0] : f32 from vector<1x1x1xf32>
    %76 = vector.broadcast %75 : f32 to vector<128x128xf32>
    %77 = arith.cmpf oeq, %67, %76 : vector<128x128xf32>
    %cst_24 = arith.constant -1.000000e+30 : f32
    %78 = vector.shape_cast %54 : vector<128x1xf32> to vector<128x1xf32>
    %79 = vector.broadcast %78 : vector<128x1xf32> to vector<128x128xf32>
    %80 = vector.broadcast %cst_24 : f32 to vector<128x128xf32>
    %81 = arith.select %77, %79, %80 : vector<128x128xi1>, vector<128x128xf32>
    %cst_25 = arith.constant dense<0xFF800000> : vector<128xf32>
    %82 = vector.multi_reduction <maximumf>, %81, %cst_25 [0] : vector<128x128xf32> to vector<128xf32>
    %83 = vector.shape_cast %82 : vector<128xf32> to vector<1x128xf32>
    %c1 = arith.constant 1 : index
    %84 = memref.load %arg0[%c1] : memref<4xf32, #tpu.memory_space<smem>>
    %85 = vector.broadcast %84 : f32 to vector<1x128xf32>
    %86 = arith.addf %85, %0 : vector<1x128xf32>
    %cst_26 = arith.constant 0.699999988 : f32
    %87 = vector.broadcast %cst_26 : f32 to vector<1x128xf32>
    %88 = arith.mulf %86, %87 : vector<1x128xf32>
    %cst_27 = arith.constant 0.000000e+00 : f32
    %89 = vector.broadcast %cst_27 : f32 to vector<1x128xf32>
    %90 = arith.addf %89, %88 : vector<1x128xf32>
    %cst_28 = arith.constant 0.699999988 : f32
    %91 = vector.broadcast %cst_28 : f32 to vector<1x128xf32>
    %92 = arith.divf %90, %91 : vector<1x128xf32>
    %cst_29 = arith.constant 2.000000e+01 : f32
    %93 = vector.broadcast %cst_29 : f32 to vector<1x128xf32>
    %94 = arith.mulf %92, %93 : vector<1x128xf32>
    %cst_30 = arith.constant -1.000000e+01 : f32
    %95 = vector.broadcast %cst_30 : f32 to vector<1x128xf32>
    %96 = arith.addf %95, %94 : vector<1x128xf32>
    %cst_31 = arith.constant 1.000000e+00 : f32
    %97 = vector.broadcast %cst_31 : f32 to vector<1x128xf32>
    %98 = arith.subf %96, %97 : vector<1x128xf32>
    %cst_32 = arith.constant 4.000000e+00 : f32
    %99 = vector.broadcast %cst_32 : f32 to vector<1x128xf32>
    %100 = arith.divf %98, %99 : vector<1x128xf32>
    %cst_33 = arith.constant 1.000000e+00 : f32
    %101 = vector.broadcast %cst_33 : f32 to vector<1x128xf32>
    %102 = arith.addf %101, %100 : vector<1x128xf32>
    %cst_34 = arith.constant 3.14159274 : f32
    %103 = vector.broadcast %cst_34 : f32 to vector<1x128xf32>
    %104 = arith.mulf %103, %102 : vector<1x128xf32>
    %105 = math.sin %104 : vector<1x128xf32>
    %106 = arith.mulf %105, %105 : vector<1x128xf32>
    %cst_35 = arith.constant 1.000000e+00 : f32
    %107 = vector.broadcast %cst_35 : f32 to vector<1x128xf32>
    %108 = arith.subf %102, %107 : vector<1x128xf32>
    %109 = arith.mulf %108, %108 : vector<1x128xf32>
    %cst_36 = arith.constant 6.28318548 : f32
    %110 = vector.broadcast %cst_36 : f32 to vector<1x128xf32>
    %111 = arith.mulf %110, %102 : vector<1x128xf32>
    %112 = math.sin %111 : vector<1x128xf32>
    %113 = arith.mulf %112, %112 : vector<1x128xf32>
    %cst_37 = arith.constant 1.000000e+00 : f32
    %114 = vector.broadcast %cst_37 : f32 to vector<1x128xf32>
    %115 = arith.addf %114, %113 : vector<1x128xf32>
    %116 = arith.mulf %109, %115 : vector<1x128xf32>
    %117 = arith.addf %106, %116 : vector<1x128xf32>
    %cst_38 = arith.constant 1.000000e-01 : f32
    %118 = vector.broadcast %cst_38 : f32 to vector<1x128xf32>
    %119 = arith.mulf %118, %117 : vector<1x128xf32>
    %120 = arith.subf %119, %90 : vector<1x128xf32>
    %cst_39 = arith.constant 3.500000e-01 : f32
    %121 = vector.broadcast %cst_39 : f32 to vector<1x128xf32>
    %122 = arith.subf %90, %121 : vector<1x128xf32>
    %123 = arith.mulf %122, %122 : vector<1x128xf32>
    %cst_40 = arith.constant 3.000000e+00 : f32
    %124 = vector.broadcast %cst_40 : f32 to vector<1x128xf32>
    %125 = arith.mulf %124, %123 : vector<1x128xf32>
    %cst_41 = arith.constant 1.000000e+01 : f32
    %126 = vector.broadcast %cst_41 : f32 to vector<1x128xf32>
    %127 = arith.mulf %126, %90 : vector<1x128xf32>
    %128 = math.sin %127 : vector<1x128xf32>
    %cst_42 = arith.constant 5.000000e-01 : f32
    %129 = vector.broadcast %cst_42 : f32 to vector<1x128xf32>
    %130 = arith.mulf %129, %128 : vector<1x128xf32>
    %131 = arith.addf %125, %130 : vector<1x128xf32>
    %cst_43 = arith.constant 0.000000e+00 : f32
    %132 = vector.broadcast %cst_43 : f32 to vector<1x128xf32>
    %133 = arith.subf %132, %120 : vector<1x128xf32>
    %cst_44 = arith.constant 0.000000e+00 : f32
    %134 = vector.broadcast %cst_44 : f32 to vector<1x128xf32>
    %135 = arith.subf %134, %131 : vector<1x128xf32>
    %136 = tpu.transpose %133, [1, 0] : vector<1x128xf32> -> vector<128x1xf32>
    %137 = tpu.transpose %135, [1, 0] : vector<1x128xf32> -> vector<128x1xf32>
    %138 = vector.broadcast %135 : vector<1x128xf32> to vector<128x128xf32>
    %139 = vector.broadcast %137 : vector<128x1xf32> to vector<128x128xf32>
    %140 = arith.cmpf oge, %138, %139 : vector<128x128xf32>
    %141 = arith.extui %140 : vector<128x128xi1> to vector<128x128xi32>
    %142 = arith.sitofp %141 : vector<128x128xi32> to vector<128x128xf32>
    %143 = arith.truncf %142 : vector<128x128xf32> to vector<128x128xbf16>
    %144 = vector.broadcast %136 : vector<128x1xf32> to vector<128x128xf32>
    %145 = vector.broadcast %133 : vector<1x128xf32> to vector<128x128xf32>
    %146 = arith.cmpf oge, %144, %145 : vector<128x128xf32>
    %147 = arith.extui %146 : vector<128x128xi1> to vector<128x128xi32>
    %148 = arith.sitofp %147 : vector<128x128xi32> to vector<128x128xf32>
    %149 = arith.truncf %148 : vector<128x128xf32> to vector<128x128xbf16>
    %cst_45 = arith.constant dense<0.000000e+00> : vector<128x128xf32>
    %150 = tpu.matmul %143, %149, %cst_45 {dimension_numbers = #tpu.dot_dimension_numbers<[1], [0], [0], [1], [0, 0, 1, 1], [], []>} : vector<128x128xbf16>, vector<128x128xbf16>, vector<128x128xf32> -> vector<128x128xf32>
    %cst_46 = arith.constant 1.160000e+02 : f32
    %151 = vector.broadcast %cst_46 : f32 to vector<128x128xf32>
    %152 = arith.cmpf oge, %150, %151 : vector<128x128xf32>
    %cst_47 = arith.constant 1.290000e+02 : f32
    %153 = vector.broadcast %cst_47 : f32 to vector<128x128xf32>
    %154 = arith.select %152, %150, %153 : vector<128x128xi1>, vector<128x128xf32>
    %155 = vector.shape_cast %154 : vector<128x128xf32> to vector<1x128x128xf32>
    %cst_48 = arith.constant dense<0x7F800000> : vector<1xf32>
    %156 = vector.multi_reduction <minimumf>, %155, %cst_48 [1, 2] : vector<1x128x128xf32> to vector<1xf32>
    %157 = vector.shape_cast %156 : vector<1xf32> to vector<1x1x1xf32>
    %158 = vector.extract %157[0, 0, 0] : f32 from vector<1x1x1xf32>
    %159 = vector.broadcast %158 : f32 to vector<128x128xf32>
    %160 = arith.cmpf oeq, %150, %159 : vector<128x128xf32>
    %cst_49 = arith.constant -1.000000e+30 : f32
    %161 = vector.shape_cast %137 : vector<128x1xf32> to vector<128x1xf32>
    %162 = vector.broadcast %161 : vector<128x1xf32> to vector<128x128xf32>
    %163 = vector.broadcast %cst_49 : f32 to vector<128x128xf32>
    %164 = arith.select %160, %162, %163 : vector<128x128xi1>, vector<128x128xf32>
    %cst_50 = arith.constant dense<0xFF800000> : vector<128xf32>
    %165 = vector.multi_reduction <maximumf>, %164, %cst_50 [0] : vector<128x128xf32> to vector<128xf32>
    %166 = vector.shape_cast %165 : vector<128xf32> to vector<1x128xf32>
    %c2 = arith.constant 2 : index
    %167 = memref.load %arg0[%c2] : memref<4xf32, #tpu.memory_space<smem>>
    %168 = vector.broadcast %167 : f32 to vector<1x128xf32>
    %169 = arith.addf %168, %0 : vector<1x128xf32>
    %cst_51 = arith.constant 0.699999988 : f32
    %170 = vector.broadcast %cst_51 : f32 to vector<1x128xf32>
    %171 = arith.mulf %169, %170 : vector<1x128xf32>
    %cst_52 = arith.constant 0.000000e+00 : f32
    %172 = vector.broadcast %cst_52 : f32 to vector<1x128xf32>
    %173 = arith.addf %172, %171 : vector<1x128xf32>
    %cst_53 = arith.constant 0.699999988 : f32
    %174 = vector.broadcast %cst_53 : f32 to vector<1x128xf32>
    %175 = arith.divf %173, %174 : vector<1x128xf32>
    %cst_54 = arith.constant 2.000000e+01 : f32
    %176 = vector.broadcast %cst_54 : f32 to vector<1x128xf32>
    %177 = arith.mulf %175, %176 : vector<1x128xf32>
    %cst_55 = arith.constant -1.000000e+01 : f32
    %178 = vector.broadcast %cst_55 : f32 to vector<1x128xf32>
    %179 = arith.addf %178, %177 : vector<1x128xf32>
    %cst_56 = arith.constant 1.000000e+00 : f32
    %180 = vector.broadcast %cst_56 : f32 to vector<1x128xf32>
    %181 = arith.subf %179, %180 : vector<1x128xf32>
    %cst_57 = arith.constant 4.000000e+00 : f32
    %182 = vector.broadcast %cst_57 : f32 to vector<1x128xf32>
    %183 = arith.divf %181, %182 : vector<1x128xf32>
    %cst_58 = arith.constant 1.000000e+00 : f32
    %184 = vector.broadcast %cst_58 : f32 to vector<1x128xf32>
    %185 = arith.addf %184, %183 : vector<1x128xf32>
    %cst_59 = arith.constant 3.14159274 : f32
    %186 = vector.broadcast %cst_59 : f32 to vector<1x128xf32>
    %187 = arith.mulf %186, %185 : vector<1x128xf32>
    %188 = math.sin %187 : vector<1x128xf32>
    %189 = arith.mulf %188, %188 : vector<1x128xf32>
    %cst_60 = arith.constant 1.000000e+00 : f32
    %190 = vector.broadcast %cst_60 : f32 to vector<1x128xf32>
    %191 = arith.subf %185, %190 : vector<1x128xf32>
    %192 = arith.mulf %191, %191 : vector<1x128xf32>
    %cst_61 = arith.constant 6.28318548 : f32
    %193 = vector.broadcast %cst_61 : f32 to vector<1x128xf32>
    %194 = arith.mulf %193, %185 : vector<1x128xf32>
    %195 = math.sin %194 : vector<1x128xf32>
    %196 = arith.mulf %195, %195 : vector<1x128xf32>
    %cst_62 = arith.constant 1.000000e+00 : f32
    %197 = vector.broadcast %cst_62 : f32 to vector<1x128xf32>
    %198 = arith.addf %197, %196 : vector<1x128xf32>
    %199 = arith.mulf %192, %198 : vector<1x128xf32>
    %200 = arith.addf %189, %199 : vector<1x128xf32>
    %cst_63 = arith.constant 1.000000e-01 : f32
    %201 = vector.broadcast %cst_63 : f32 to vector<1x128xf32>
    %202 = arith.mulf %201, %200 : vector<1x128xf32>
    %203 = arith.subf %202, %173 : vector<1x128xf32>
    %cst_64 = arith.constant 3.500000e-01 : f32
    %204 = vector.broadcast %cst_64 : f32 to vector<1x128xf32>
    %205 = arith.subf %173, %204 : vector<1x128xf32>
    %206 = arith.mulf %205, %205 : vector<1x128xf32>
    %cst_65 = arith.constant 3.000000e+00 : f32
    %207 = vector.broadcast %cst_65 : f32 to vector<1x128xf32>
    %208 = arith.mulf %207, %206 : vector<1x128xf32>
    %cst_66 = arith.constant 1.000000e+01 : f32
    %209 = vector.broadcast %cst_66 : f32 to vector<1x128xf32>
    %210 = arith.mulf %209, %173 : vector<1x128xf32>
    %211 = math.sin %210 : vector<1x128xf32>
    %cst_67 = arith.constant 5.000000e-01 : f32
    %212 = vector.broadcast %cst_67 : f32 to vector<1x128xf32>
    %213 = arith.mulf %212, %211 : vector<1x128xf32>
    %214 = arith.addf %208, %213 : vector<1x128xf32>
    %cst_68 = arith.constant 0.000000e+00 : f32
    %215 = vector.broadcast %cst_68 : f32 to vector<1x128xf32>
    %216 = arith.subf %215, %203 : vector<1x128xf32>
    %cst_69 = arith.constant 0.000000e+00 : f32
    %217 = vector.broadcast %cst_69 : f32 to vector<1x128xf32>
    %218 = arith.subf %217, %214 : vector<1x128xf32>
    %219 = tpu.transpose %216, [1, 0] : vector<1x128xf32> -> vector<128x1xf32>
    %220 = tpu.transpose %218, [1, 0] : vector<1x128xf32> -> vector<128x1xf32>
    %221 = vector.broadcast %218 : vector<1x128xf32> to vector<128x128xf32>
    %222 = vector.broadcast %220 : vector<128x1xf32> to vector<128x128xf32>
    %223 = arith.cmpf oge, %221, %222 : vector<128x128xf32>
    %224 = arith.extui %223 : vector<128x128xi1> to vector<128x128xi32>
    %225 = arith.sitofp %224 : vector<128x128xi32> to vector<128x128xf32>
    %226 = arith.truncf %225 : vector<128x128xf32> to vector<128x128xbf16>
    %227 = vector.broadcast %219 : vector<128x1xf32> to vector<128x128xf32>
    %228 = vector.broadcast %216 : vector<1x128xf32> to vector<128x128xf32>
    %229 = arith.cmpf oge, %227, %228 : vector<128x128xf32>
    %230 = arith.extui %229 : vector<128x128xi1> to vector<128x128xi32>
    %231 = arith.sitofp %230 : vector<128x128xi32> to vector<128x128xf32>
    %232 = arith.truncf %231 : vector<128x128xf32> to vector<128x128xbf16>
    %cst_70 = arith.constant dense<0.000000e+00> : vector<128x128xf32>
    %233 = tpu.matmul %226, %232, %cst_70 {dimension_numbers = #tpu.dot_dimension_numbers<[1], [0], [0], [1], [0, 0, 1, 1], [], []>} : vector<128x128xbf16>, vector<128x128xbf16>, vector<128x128xf32> -> vector<128x128xf32>
    %cst_71 = arith.constant 1.160000e+02 : f32
    %234 = vector.broadcast %cst_71 : f32 to vector<128x128xf32>
    %235 = arith.cmpf oge, %233, %234 : vector<128x128xf32>
    %cst_72 = arith.constant 1.290000e+02 : f32
    %236 = vector.broadcast %cst_72 : f32 to vector<128x128xf32>
    %237 = arith.select %235, %233, %236 : vector<128x128xi1>, vector<128x128xf32>
    %238 = vector.shape_cast %237 : vector<128x128xf32> to vector<1x128x128xf32>
    %cst_73 = arith.constant dense<0x7F800000> : vector<1xf32>
    %239 = vector.multi_reduction <minimumf>, %238, %cst_73 [1, 2] : vector<1x128x128xf32> to vector<1xf32>
    %240 = vector.shape_cast %239 : vector<1xf32> to vector<1x1x1xf32>
    %241 = vector.extract %240[0, 0, 0] : f32 from vector<1x1x1xf32>
    %242 = vector.broadcast %241 : f32 to vector<128x128xf32>
    %243 = arith.cmpf oeq, %233, %242 : vector<128x128xf32>
    %cst_74 = arith.constant -1.000000e+30 : f32
    %244 = vector.shape_cast %220 : vector<128x1xf32> to vector<128x1xf32>
    %245 = vector.broadcast %244 : vector<128x1xf32> to vector<128x128xf32>
    %246 = vector.broadcast %cst_74 : f32 to vector<128x128xf32>
    %247 = arith.select %243, %245, %246 : vector<128x128xi1>, vector<128x128xf32>
    %cst_75 = arith.constant dense<0xFF800000> : vector<128xf32>
    %248 = vector.multi_reduction <maximumf>, %247, %cst_75 [0] : vector<128x128xf32> to vector<128xf32>
    %249 = vector.shape_cast %248 : vector<128xf32> to vector<1x128xf32>
    %c3 = arith.constant 3 : index
    %250 = memref.load %arg0[%c3] : memref<4xf32, #tpu.memory_space<smem>>
    %251 = vector.broadcast %250 : f32 to vector<1x128xf32>
    %252 = arith.addf %251, %0 : vector<1x128xf32>
    %cst_76 = arith.constant 0.699999988 : f32
    %253 = vector.broadcast %cst_76 : f32 to vector<1x128xf32>
    %254 = arith.mulf %252, %253 : vector<1x128xf32>
    %cst_77 = arith.constant 0.000000e+00 : f32
    %255 = vector.broadcast %cst_77 : f32 to vector<1x128xf32>
    %256 = arith.addf %255, %254 : vector<1x128xf32>
    %cst_78 = arith.constant 0.699999988 : f32
    %257 = vector.broadcast %cst_78 : f32 to vector<1x128xf32>
    %258 = arith.divf %256, %257 : vector<1x128xf32>
    %cst_79 = arith.constant 2.000000e+01 : f32
    %259 = vector.broadcast %cst_79 : f32 to vector<1x128xf32>
    %260 = arith.mulf %258, %259 : vector<1x128xf32>
    %cst_80 = arith.constant -1.000000e+01 : f32
    %261 = vector.broadcast %cst_80 : f32 to vector<1x128xf32>
    %262 = arith.addf %261, %260 : vector<1x128xf32>
    %cst_81 = arith.constant 1.000000e+00 : f32
    %263 = vector.broadcast %cst_81 : f32 to vector<1x128xf32>
    %264 = arith.subf %262, %263 : vector<1x128xf32>
    %cst_82 = arith.constant 4.000000e+00 : f32
    %265 = vector.broadcast %cst_82 : f32 to vector<1x128xf32>
    %266 = arith.divf %264, %265 : vector<1x128xf32>
    %cst_83 = arith.constant 1.000000e+00 : f32
    %267 = vector.broadcast %cst_83 : f32 to vector<1x128xf32>
    %268 = arith.addf %267, %266 : vector<1x128xf32>
    %cst_84 = arith.constant 3.14159274 : f32
    %269 = vector.broadcast %cst_84 : f32 to vector<1x128xf32>
    %270 = arith.mulf %269, %268 : vector<1x128xf32>
    %271 = math.sin %270 : vector<1x128xf32>
    %272 = arith.mulf %271, %271 : vector<1x128xf32>
    %cst_85 = arith.constant 1.000000e+00 : f32
    %273 = vector.broadcast %cst_85 : f32 to vector<1x128xf32>
    %274 = arith.subf %268, %273 : vector<1x128xf32>
    %275 = arith.mulf %274, %274 : vector<1x128xf32>
    %cst_86 = arith.constant 6.28318548 : f32
    %276 = vector.broadcast %cst_86 : f32 to vector<1x128xf32>
    %277 = arith.mulf %276, %268 : vector<1x128xf32>
    %278 = math.sin %277 : vector<1x128xf32>
    %279 = arith.mulf %278, %278 : vector<1x128xf32>
    %cst_87 = arith.constant 1.000000e+00 : f32
    %280 = vector.broadcast %cst_87 : f32 to vector<1x128xf32>
    %281 = arith.addf %280, %279 : vector<1x128xf32>
    %282 = arith.mulf %275, %281 : vector<1x128xf32>
    %283 = arith.addf %272, %282 : vector<1x128xf32>
    %cst_88 = arith.constant 1.000000e-01 : f32
    %284 = vector.broadcast %cst_88 : f32 to vector<1x128xf32>
    %285 = arith.mulf %284, %283 : vector<1x128xf32>
    %286 = arith.subf %285, %256 : vector<1x128xf32>
    %cst_89 = arith.constant 3.500000e-01 : f32
    %287 = vector.broadcast %cst_89 : f32 to vector<1x128xf32>
    %288 = arith.subf %256, %287 : vector<1x128xf32>
    %289 = arith.mulf %288, %288 : vector<1x128xf32>
    %cst_90 = arith.constant 3.000000e+00 : f32
    %290 = vector.broadcast %cst_90 : f32 to vector<1x128xf32>
    %291 = arith.mulf %290, %289 : vector<1x128xf32>
    %cst_91 = arith.constant 1.000000e+01 : f32
    %292 = vector.broadcast %cst_91 : f32 to vector<1x128xf32>
    %293 = arith.mulf %292, %256 : vector<1x128xf32>
    %294 = math.sin %293 : vector<1x128xf32>
    %cst_92 = arith.constant 5.000000e-01 : f32
    %295 = vector.broadcast %cst_92 : f32 to vector<1x128xf32>
    %296 = arith.mulf %295, %294 : vector<1x128xf32>
    %297 = arith.addf %291, %296 : vector<1x128xf32>
    %cst_93 = arith.constant 0.000000e+00 : f32
    %298 = vector.broadcast %cst_93 : f32 to vector<1x128xf32>
    %299 = arith.subf %298, %286 : vector<1x128xf32>
    %cst_94 = arith.constant 0.000000e+00 : f32
    %300 = vector.broadcast %cst_94 : f32 to vector<1x128xf32>
    %301 = arith.subf %300, %297 : vector<1x128xf32>
    %302 = tpu.transpose %299, [1, 0] : vector<1x128xf32> -> vector<128x1xf32>
    %303 = tpu.transpose %301, [1, 0] : vector<1x128xf32> -> vector<128x1xf32>
    %304 = vector.broadcast %301 : vector<1x128xf32> to vector<128x128xf32>
    %305 = vector.broadcast %303 : vector<128x1xf32> to vector<128x128xf32>
    %306 = arith.cmpf oge, %304, %305 : vector<128x128xf32>
    %307 = arith.extui %306 : vector<128x128xi1> to vector<128x128xi32>
    %308 = arith.sitofp %307 : vector<128x128xi32> to vector<128x128xf32>
    %309 = arith.truncf %308 : vector<128x128xf32> to vector<128x128xbf16>
    %310 = vector.broadcast %302 : vector<128x1xf32> to vector<128x128xf32>
    %311 = vector.broadcast %299 : vector<1x128xf32> to vector<128x128xf32>
    %312 = arith.cmpf oge, %310, %311 : vector<128x128xf32>
    %313 = arith.extui %312 : vector<128x128xi1> to vector<128x128xi32>
    %314 = arith.sitofp %313 : vector<128x128xi32> to vector<128x128xf32>
    %315 = arith.truncf %314 : vector<128x128xf32> to vector<128x128xbf16>
    %cst_95 = arith.constant dense<0.000000e+00> : vector<128x128xf32>
    %316 = tpu.matmul %309, %315, %cst_95 {dimension_numbers = #tpu.dot_dimension_numbers<[1], [0], [0], [1], [0, 0, 1, 1], [], []>} : vector<128x128xbf16>, vector<128x128xbf16>, vector<128x128xf32> -> vector<128x128xf32>
    %cst_96 = arith.constant 1.160000e+02 : f32
    %317 = vector.broadcast %cst_96 : f32 to vector<128x128xf32>
    %318 = arith.cmpf oge, %316, %317 : vector<128x128xf32>
    %cst_97 = arith.constant 1.290000e+02 : f32
    %319 = vector.broadcast %cst_97 : f32 to vector<128x128xf32>
    %320 = arith.select %318, %316, %319 : vector<128x128xi1>, vector<128x128xf32>
    %321 = vector.shape_cast %320 : vector<128x128xf32> to vector<1x128x128xf32>
    %cst_98 = arith.constant dense<0x7F800000> : vector<1xf32>
    %322 = vector.multi_reduction <minimumf>, %321, %cst_98 [1, 2] : vector<1x128x128xf32> to vector<1xf32>
    %323 = vector.shape_cast %322 : vector<1xf32> to vector<1x1x1xf32>
    %324 = vector.extract %323[0, 0, 0] : f32 from vector<1x1x1xf32>
    %325 = vector.broadcast %324 : f32 to vector<128x128xf32>
    %326 = arith.cmpf oeq, %316, %325 : vector<128x128xf32>
    %cst_99 = arith.constant -1.000000e+30 : f32
    %327 = vector.shape_cast %303 : vector<128x1xf32> to vector<128x1xf32>
    %328 = vector.broadcast %327 : vector<128x1xf32> to vector<128x128xf32>
    %329 = vector.broadcast %cst_99 : f32 to vector<128x128xf32>
    %330 = arith.select %326, %328, %329 : vector<128x128xi1>, vector<128x128xf32>
    %cst_100 = arith.constant dense<0xFF800000> : vector<128xf32>
    %331 = vector.multi_reduction <maximumf>, %330, %cst_100 [0] : vector<128x128xf32> to vector<128xf32>
    %332 = vector.shape_cast %331 : vector<128xf32> to vector<1x128xf32>
    %333 = tpu.concatenate %50, %133, %216, %299 in 1 : vector<1x128xf32>, vector<1x128xf32>, vector<1x128xf32>, vector<1x128xf32> -> vector<1x512xf32>
    %334 = tpu.concatenate %83, %166, %249, %332 in 1 : vector<1x128xf32>, vector<1x128xf32>, vector<1x128xf32>, vector<1x128xf32> -> vector<1x512xf32>
    %335 = tpu.concatenate %53, %136, %219, %302 in 0 : vector<128x1xf32>, vector<128x1xf32>, vector<128x1xf32>, vector<128x1xf32> -> vector<512x1xf32>
    %cst_101 = arith.constant -1.000000e+29 : f32
    %336 = vector.broadcast %cst_101 : f32 to vector<1x512xf32>
    %337 = arith.cmpf ogt, %334, %336 : vector<1x512xf32>
    %cst_102 = arith.constant -1.419510e+01 : f32
    %338 = vector.broadcast %cst_102 : f32 to vector<1x512xf32>
    %339 = arith.cmpf ogt, %333, %338 : vector<1x512xf32>
    %340 = arith.andi %337, %339 : vector<1x512xi1>
    %cst_103 = arith.constant -3.188700e+00 : f32
    %341 = vector.broadcast %cst_103 : f32 to vector<1x512xf32>
    %342 = arith.cmpf ogt, %334, %341 : vector<1x512xf32>
    %343 = arith.andi %340, %342 : vector<1x512xi1>
    %cst_104 = arith.constant -3.188700e+00 : f32
    %344 = vector.broadcast %cst_104 : f32 to vector<1x512xf32>
    %345 = arith.select %343, %334, %344 : vector<1x512xi1>, vector<1x512xf32>
    %346 = tpu.transpose %345, [1, 0] : vector<1x512xf32> -> vector<512x1xf32>
    %347 = tpu.iota {dimensions = array<i32: 1>} : vector<1x512xi32>
    %348 = tpu.iota {dimensions = array<i32: 0>} : vector<512x1xi32>
    %349 = vector.broadcast %335 : vector<512x1xf32> to vector<512x512xf32>
    %350 = vector.broadcast %333 : vector<1x512xf32> to vector<512x512xf32>
    %351 = arith.cmpf ogt, %349, %350 : vector<512x512xf32>
    %352 = vector.broadcast %335 : vector<512x1xf32> to vector<512x512xf32>
    %353 = vector.broadcast %333 : vector<1x512xf32> to vector<512x512xf32>
    %354 = arith.cmpf oeq, %352, %353 : vector<512x512xf32>
    %355 = vector.broadcast %348 : vector<512x1xi32> to vector<512x512xi32>
    %356 = vector.broadcast %347 : vector<1x512xi32> to vector<512x512xi32>
    %357 = arith.cmpi slt, %355, %356 : vector<512x512xi32>
    %358 = arith.andi %354, %357 : vector<512x512xi1>
    %359 = arith.ori %351, %358 : vector<512x512xi1>
    %cst_105 = arith.constant -3.188700e+00 : f32
    %360 = vector.shape_cast %346 : vector<512x1xf32> to vector<512x1xf32>
    %361 = vector.broadcast %360 : vector<512x1xf32> to vector<512x512xf32>
    %362 = vector.broadcast %cst_105 : f32 to vector<512x512xf32>
    %363 = arith.select %359, %361, %362 : vector<512x512xi1>, vector<512x512xf32>
    %cst_106 = arith.constant dense<0xFF800000> : vector<512xf32>
    %364 = vector.multi_reduction <maximumf>, %363, %cst_106 [0] : vector<512x512xf32> to vector<512xf32>
    %365 = vector.shape_cast %364 : vector<512xf32> to vector<1x512xf32>
    %cst_107 = arith.constant -1.419510e+01 : f32
    %366 = vector.broadcast %cst_107 : f32 to vector<1x512xf32>
    %367 = arith.subf %333, %366 : vector<1x512xf32>
    %cst_108 = arith.constant 0.000000e+00 : f32
    %368 = vector.broadcast %cst_108 : f32 to vector<1x512xf32>
    %369 = arith.maximumf %367, %368 : vector<1x512xf32>
    %370 = arith.subf %334, %365 : vector<1x512xf32>
    %cst_109 = arith.constant 0.000000e+00 : f32
    %371 = vector.broadcast %cst_109 : f32 to vector<1x512xf32>
    %372 = arith.maximumf %370, %371 : vector<1x512xf32>
    %373 = arith.mulf %369, %372 : vector<1x512xf32>
    %cst_110 = arith.constant 0.000000e+00 : f32
    %374 = vector.broadcast %cst_110 : f32 to vector<1x512xf32>
    %375 = arith.select %343, %373, %374 : vector<1x512xi1>, vector<1x512xf32>
    %376 = vector.shape_cast %375 : vector<1x512xf32> to vector<1x1x512xf32>
    %cst_111 = arith.constant dense<0.000000e+00> : vector<1xf32>
    %377 = vector.multi_reduction <add>, %376, %cst_111 [1, 2] : vector<1x1x512xf32> to vector<1xf32>
    %378 = vector.shape_cast %377 : vector<1xf32> to vector<1x1x1xf32>
    %379 = vector.extract %378[0, 0, 0] : f32 from vector<1x1x1xf32>
    %c0_112 = arith.constant 0 : index
    %380 = memref.load %arg2[%c0_112] : memref<1xf32, #tpu.memory_space<smem>>
    memref.store %379, %arg2[%c0_112] : memref<1xf32, #tpu.memory_space<smem>>
    return
  }
}

</mosaic_0001>

<bundles_post_ra>
// kernel: tpu_custom_call.1
= control target key start
LH: loop header
LB: loop body
LE: loop exit
PB: predicated region body
PF: predicated region fallthrough
CT: control target
= control target key end

     0   :  { %7 = vsyncpa [#allocation3], 0  ;;  %s12897_s0 = inlined_call_operand.hbm [shape: f32[4], index: 0, kind: input, shape index: {}]   ;;  %s12898_s1 = inlined_call_operand.vmem [shape: f32[1,128], index: 1, kind: input, shape index: {}]   ;;  %s12899_s2 = inlined_call_operand.hbm [shape: f32[1], index: 2, kind: output, shape index: {}]  }
   0x1   :  { %8 = vsyncpa [#allocation4], 0  ;;  %s6677_s11 = scalar_lea.hbm %s12897_s0, 16 }
   0x2   :  { %p6678_p0 = scmp.ne.s32.totalorder %s12897_s0, %s6677_s11  ;;  %p6681_p1 = scmp.lt.u32.totalorder %s6677_s11, %s12897_s0 }
   0x4   :  { %p6683_p2 = pnand %p6681_p1, %p6678_p0 }
   0x6   :  { %6686 = shalt.err (!%p6683_p2)
}
   0x7   :  { %s6701_s16 = smov [#allocation2]  }
   0x8   :  { %16 = dma.hbm_to_smem %s12897_s0, 16, %s6701_s16, [#allocation3]  }
   0x9   :  { %6697 = dma.done.wait [#allocation3], 16  }
   0xa   :  { %6698 = vsyncadd [#allocation3], 4294967280 }
   0xb   :  { %22 = sfence }
   0xc   :  { %s25_s19 = sld [smem:[#allocation2]]  ;;  %s6121_s20 = sld [smem:[#allocation2 + $0x1]]  ;;  %v24_v0 = vld [vmem:[%s12898_s1] sm:$0x1]  ;;  %v6702_v33 = vmov 683565275  }
   0xd   :  { %s6281_s23 = sld [smem:[#allocation2 + $0x3]]  ;;  %v6703_v35 = vmov 2475754826   ;;  %v6704_v37 = vmov 2131351028   ;;  %s7439_s0 = sld [smem:[#allocation2 + $0x2]] }
   0xe   :  { %v6705_v39 = vmov 2102212464   ;;  %v12905_v41 = vmov 920167782   ;;  %v12904_v50 = vmov 1326507024  }
   0xf   :  { %s6687_s4 = scalar_lea.hbm %s12899_s2, 16 }
  0x10   :  { %p6688_p3 = scmp.ne.s32.totalorder %s12899_s2, %s6687_s4  ;;  %p6691_p4 = scmp.lt.u32.totalorder %s6687_s4, %s12899_s2 }
  0x12   :  { %v26_v1 = vstv %s25_s19  ;;  %v925_v4 = vstv %s6121_s20  ;;  %p6693_p5 = pnand %p6691_p4, %p6688_p3 }
  0x13   :  { %v27_v2 = vadd.f32 %v26_v1, %v24_v0  ;;  %v926_v5 = vadd.f32 %v925_v4, %v24_v0  ;;  %v2719_v10 = vstv %s6281_s23 }
  0x14   :  { %v2720_v16 = vadd.f32 %v2719_v10, %v24_v0 }
  0x15   :  { %v6741_v3 = vmul.f32 0.7, %v27_v2  ;;  %v6746_v7 = vmul.f32 0.7, %v926_v5 }
  0x16   :  { %v6757_v23 = vmul.f32 0.7, %v2720_v16 }
  0x17   :  { %v6744_v6 = vmul.f32 10.0, %v6741_v3  ;;  %v929_v11 = vmul.f32 1.4285715, %v6746_v7  ;;  %v6752_v12 = vmul.f32 10.0, %v6746_v7  ;;  %v6052_v10 = vadd.f32 -0.35, %v6741_v3 }
  0x18   :  { %v2723_v31 = vmul.f32 1.4285715, %v6757_v23 }
  0x19   :  { %v261_v8 = vand.u32 2147483647, %v6744_v6  ;;  %v264_v9 = vand.u32 2139095040, %v6744_v6  ;;  %v930_v15 = vmul.f32 20.0, %v929_v11  ;;  %v1161_v19 = vand.u32 2139095040, %v6752_v12 }
  0x1a   :  { %v1158_v30 = vand.u32 2147483647, %v6752_v12  ;;  %vm263_vm8 = vcmp.lt.s32.totalorder %v6744_v6, 0 }
  0x1b   :  { %v265_v13 = vshrl.u32 %v264_v9, 23  ;;  %v268_v14 = vand.u32 8388607, %v261_v8  ;;  %v931_v18 = vadd.f32 -10.0, %v930_v15  ;;  %v1162_v26 = vshrl.u32 %v1161_v19, 23 }
  0x1c   :  { %vm6861_vm10 = vcmp.le.f32.partialorder %v261_v8, 0.7853982 }
  0x1d   :  { %v6053_v17 = vadd.s32 4294967169, %v265_v13  ;;  %v269_v21 = vor.u32 8388608, %v268_v14  ;;  %v6122_v22 = vadd.f32 -1.0, %v931_v18  ;;  %v6133_v44 = vadd.s32 4294967169, %v1162_v26 }
  0x1f   :  { %v271_v20 = vadd.s32 1, %v6053_v17  ;;  %v933_v25 = vmul.f32 0.25, %v6122_v22  ;;  %v6759_v29 = vshll.u32 %v269_v21, 8  ;;  %v1168_v1 = vadd.s32 1, %v6133_v44 }
  0x20   :  { %v2724_v21 = vmul.f32 20.0, %v2723_v31 }
  0x21   :  { %vm272_vm0 = vcmp.gt.s32.totalorder %v271_v20, 0  ;;  %v6768_v43 = vadd.f32 1.0, %v933_v25  ;;  %vm1169_vm5 = vcmp.gt.s32.totalorder %v1168_v1, 0 }
  0x22   :  { %v273_v24 = vsel %vm272_vm0, %v271_v20, 0  ;;  %v1165_v20 = vand.u32 8388607, %v1158_v30 }
  0x23   :  { %v275_v27 = vand.u32 31, %v273_v24  ;;  %v274_v28 = vshrl.u32 %v273_v24, 5  ;;  %v6777_v57 = vmul.f32 3.1415927, %v6768_v43  ;;  %v6781_v9 = vmul.f32 6.2831855, %v6768_v43 }
  0x25   :  { %v276_v32 = vsub.s32 32, %v275_v27  ;;  %v278_v34 = vshll.u32 %v6702_v33, %v275_v27  ;;  %v281_v36 = vshll.u32 %v6703_v35, %v275_v27  ;;  %v284_v38 = vshll.u32 %v6704_v37, %v275_v27 }
  0x26   :  { %v287_v40 = vshll.u32 %v6705_v39, %v275_v27  ;;  %v290_v42 = vshll.u32 %v12905_v41, %v275_v27  ;;  %vm293_vm1 = vcmp.lt.s32.totalorder %v274_v28, 1  ;;  %vm294_vm2 = vcmp.lt.s32.totalorder %v274_v28, 2 }
  0x27   :  { %v277_v45 = vshrl.u32 %v6702_v33, %v276_v32  ;;  %v279_v46 = vshrl.u32 %v6703_v35, %v276_v32  ;;  %v282_v47 = vshrl.u32 %v6704_v37, %v276_v32  ;;  %v285_v48 = vshrl.u32 %v6705_v39, %v276_v32 }
  0x28   :  { %v288_v49 = vshrl.u32 %v12905_v41, %v276_v32  ;;  %v291_v51 = vshrl.u32 %v12904_v50, %v276_v32  ;;  %vm296_vm3 = vcmp.lt.s32.totalorder %v274_v28, 4  ;;  %vm295_vm4 = vcmp.lt.s32.totalorder %v274_v28, 3 }
  0x29   :  { %v280_v52 = vor.u32 %v279_v46, %v278_v34  ;;  %v283_v53 = vor.u32 %v282_v47, %v281_v36  ;;  %v286_v54 = vor.u32 %v285_v48, %v284_v38  ;;  %v936_v5 = vand.u32 2147483647, %v6777_v57 }
  0x2a   :  { %v289_v55 = vor.u32 %v288_v49, %v287_v40  ;;  %v292_v56 = vor.u32 %v291_v51, %v290_v42  ;;  %v939_v19 = vand.u32 2139095040, %v6777_v57  ;;  %v1044_v24 = vand.u32 2147483647, %v6781_v9 }
  0x2b   :  { %v297_v58 = vsel %vm293_vm1, %v277_v45, %v280_v52  ;;  %v298_v59 = vsel %vm296_vm3, %v286_v54, 2102212464  ;;  %v301_v60 = vsel %vm293_vm1, %v280_v52, %v283_v53  ;;  %v305_v61 = vsel %vm293_vm1, %v283_v53, %v286_v54 }
  0x2c   :  { %v299_v62 = vsel %vm295_vm4, %v283_v53, %v298_v59  ;;  %v302_v63 = vsel %vm296_vm3, %v289_v55, 920167782  ;;  %v306_v0 = vsel %vm296_vm3, %v292_v56, 1326507024  ;;  %v943_v22 = vand.u32 8388607, %v936_v5 }
  0x2d   :  { %v303_v2 = vsel %vm295_vm4, %v286_v54, %v302_v63  ;;  %v307_v4 = vsel %vm295_vm4, %v289_v55, %v306_v0  ;;  %v300_v11 = vsel %vm294_vm2, %v297_v58, %v299_v62  ;;  %v1047_v25 = vand.u32 2139095040, %v6781_v9 }
  0x2e   :  { %v304_v13 = vsel %vm294_vm2, %v301_v60, %v303_v2  ;;  %v308_v14 = vsel %vm294_vm2, %v305_v61, %v307_v4  ;;  %v316_v26 = vmul.u32 %v6759_v29, %v300_v11  ;;  %v940_v27 = vshrl.u32 %v939_v19, 23 }
  0x2f   :  { %v6788_v15 = vmul.u32.u64.low %v6759_v29, %v308_v14  ;;  %v6789_v16 = vmul.u32.u64.high %v6759_v29, %v308_v14, %v6788_v15  ;;  %v6792_v17 = vmul.u32.u64.low %v6759_v29, %v304_v13  ;;  %v6793_v18 = vmul.u32.u64.high %v6759_v29, %v304_v13, %v6792_v17 }
  0x30   :  { %v258_v28 = vmul.f32 %v6052_v10, %v6052_v10  ;;  %v1170_v34 = vsel %vm1169_vm5, %v1168_v1, 0  ;;  %v6123_v36 = vadd.s32 4294967169, %v940_v27  ;;  %v1048_v38 = vshrl.u32 %v1047_v25, 23 }
  0x31   :  { %vm318_vm6 = vc.u32 %v6789_v16, %v6792_v17  ;;  %v319_v32 = vadd.s32 1, %v6793_v18  ;;  %v1051_v31 = vand.u32 8388607, %v1044_v24  ;;  %v2725_v40 = vadd.f32 -10.0, %v2724_v21 }
  0x32   :  { %v944_v44 = vor.u32 8388608, %v943_v22  ;;  %v1166_v45 = vor.u32 8388608, %v1165_v20  ;;  %v946_v47 = vadd.s32 1, %v6123_v36  ;;  %v6808_v29 = vand.u32 31, %v1170_v34 }
  0x33   :  { %v320_v42 = vsel %vm318_vm6, %v319_v32, %v6793_v18  ;;  %v6810_v48 = vmul.f32 3.0, %v258_v28  ;;  %v6128_v49 = vadd.s32 4294967169, %v1048_v38  ;;  %v1052_v52 = vor.u32 8388608, %v1051_v31 }
  0x34   :  { %v321_v46 = vadd.s32 %v320_v42, %v316_v26  ;;  %vm947_vm7 = vcmp.gt.s32.totalorder %v946_v47, 0  ;;  %v6812_v53 = vadd.f32 -1.0, %v2725_v40  ;;  %v6815_v54 = vadd.s32 %v6792_v17, %v6789_v16 }
  0x35   :  { %v948_v55 = vsel %vm947_vm7, %v946_v47, 0  ;;  %v6817_v56 = vshll.u32 %v944_v44, 8  ;;  %v6819_v58 = vshll.u32 %v1166_v45, 8  ;;  %v6821_v61 = vshrl.u32 %v1170_v34, 5 }
  0x36   :  { %v322_v51 = vadd.s32 536870912, %v321_v46  ;;  %v950_v60 = vand.u32 31, %v948_v55  ;;  %v6824_v62 = vsub.s32 32, %v6808_v29  ;;  %v1054_v63 = vadd.s32 1, %v6128_v49 }
  0x37   :  { %v6828_v0 = vshll.u32 %v6702_v33, %v6808_v29  ;;  %v6832_v1 = vshll.u32 %v6703_v35, %v6808_v29  ;;  %v6836_v2 = vshll.u32 %v6704_v37, %v6808_v29  ;;  %v6839_v13 = vshll.u32 %v1052_v52, 8 }
  0x38   :  { %v323_v59 = vshrl.u32 %v322_v51, 30  ;;  %v951_v10 = vsub.s32 32, %v950_v60  ;;  %v953_v11 = vshll.u32 %v6702_v33, %v950_v60  ;;  %v949_v14 = vshrl.u32 %v948_v55, 5 }
  0x39   :  { %v956_v15 = vshll.u32 %v6703_v35, %v950_v60  ;;  %v959_v16 = vshll.u32 %v6704_v37, %v950_v60  ;;  %v962_v17 = vshll.u32 %v6705_v39, %v950_v60  ;;  %v965_v20 = vshll.u32 %v12905_v41, %v950_v60 }
  0x3a   :  { %v324_v4 = vshll.u32 %v323_v59, 30  ;;  %v954_v19 = vshrl.u32 %v6703_v35, %v951_v10  ;;  %v6851_v21 = vshrl.u32 %v6702_v33, %v6824_v62  ;;  %v957_v22 = vshrl.u32 %v6704_v37, %v951_v10 }
  0x3b   :  { %v960_v25 = vshrl.u32 %v6705_v39, %v951_v10  ;;  %v963_v26 = vshrl.u32 %v12905_v41, %v951_v10  ;;  %vm1055_vm9 = vcmp.gt.s32.totalorder %v1054_v63, 0  ;;  %v952_v28 = vshrl.u32 %v6702_v33, %v951_v10 }
  0x3c   :  { %v6845_v18 = vsub.s32 %v321_v46, %v324_v4  ;;  %v955_v32 = vor.u32 %v954_v19, %v953_v11  ;;  %v966_v34 = vshrl.u32 %v12904_v50, %v951_v10  ;;  %v958_v38 = vor.u32 %v957_v22, %v956_v15 }
  0x3d   :  { %v961_v31 = vor.u32 %v960_v25, %v959_v16  ;;  %v964_v40 = vor.u32 %v963_v26, %v962_v17  ;;  %vm968_vm11 = vcmp.lt.s32.totalorder %v949_v14, 1  ;;  %v6868_v45 = vshrl.u32 %v6703_v35, %v6824_v62 }
  0x3e   :  { %v327_v27 = vsub.s32 0, %v6845_v18  ;;  %v967_v44 = vor.u32 %v966_v34, %v965_v20  ;;  %v6872_v46 = vshrl.u32 %v6704_v37, %v6824_v62  ;;  %v347_v47 = vsub.s32 4, %v323_v59 }
  0x3f   :  { %vm970_vm12 = vcmp.lt.s32.totalorder %v949_v14, 3  ;;  %vm971_vm13 = vcmp.lt.s32.totalorder %v949_v14, 4  ;;  %v1056_v8 = vsel %vm1055_vm9, %v1054_v63, 0  ;;  %vm969_vm14 = vcmp.lt.s32.totalorder %v949_v14, 2 }
  0x40   :  { %v6054_v42 = vmin.u32 %v327_v27, %v6845_v18  ;;  %v972_v51 = vsel %vm968_vm11, %v952_v28, %v955_v32  ;;  %v976_v52 = vsel %vm968_vm11, %v955_v32, %v958_v38  ;;  %v973_v55 = vsel %vm971_vm13, %v961_v31, 2102212464 }
  0x41   :  { %v977_v60 = vsel %vm971_vm13, %v964_v40, 920167782  ;;  %v980_v4 = vsel %vm968_vm11, %v958_v38, %v961_v31  ;;  %v981_v10 = vsel %vm971_vm13, %v967_v44, 1326507024  ;;  %v974_v15 = vsel %vm970_vm12, %v958_v38, %v973_v55 }
  0x42   :  { %v329_v49 = vclz %v6054_v42  ;;  %v978_v16 = vsel %vm970_vm12, %v961_v31, %v977_v60  ;;  %v982_v17 = vsel %vm970_vm12, %v964_v40, %v981_v10  ;;  %v348_v19 = vsel %vm263_vm8, %v347_v47, %v323_v59 }
  0x43   :  { %v975_v20 = vsel %vm969_vm14, %v972_v51, %v974_v15  ;;  %v979_v22 = vsel %vm969_vm14, %v976_v52, %v978_v16  ;;  %v983_v25 = vsel %vm969_vm14, %v980_v4, %v982_v17  ;;  %v6881_v26 = vshrl.u32 %v1056_v8, 5 }
  0x44   :  { %v6055_v11 = vadd.s32 4294967294, %v329_v49  ;;  %v6878_v63 = vmul.u32.u64.low %v6817_v56, %v983_v25  ;;  %v6879_v14 = vmul.u32.u64.high %v6817_v56, %v983_v25, %v6878_v63  ;;  %v1058_v34 = vand.u32 31, %v1056_v8 }
  0x45   :  { %v6884_v28 = vmul.u32.u64.low %v6817_v56, %v979_v22  ;;  %v6885_v32 = vmul.u32.u64.high %v6817_v56, %v979_v22, %v6884_v28  ;;  %v350_v40 = vsel %vm6861_vm10, 0, %v348_v19  ;;  %v991_v42 = vmul.u32 %v6817_v56, %v975_v20 }
  0x46   :  { %vm6056_vm15 = vcmp.lt.s32.totalorder %v6055_v11, 0  ;;  %v1059_v44 = vsub.s32 32, %v1058_v34  ;;  %v1061_v47 = vshll.u32 %v6702_v33, %v1058_v34  ;;  %v1064_v49 = vshll.u32 %v6703_v35, %v1058_v34 }
  0x47   :  { %v332_v27 = vsel %vm6056_vm15, 0, %v6055_v11  ;;  %vm993_vm0 = vc.u32 %v6879_v14, %v6884_v28  ;;  %vm1076_vm1 = vcmp.lt.s32.totalorder %v6881_v26, 1  ;;  %v1067_v56 = vshll.u32 %v6704_v37, %v1058_v34 }
  0x48   :  { %v333_v38 = vsub.s32 32, %v332_v27  ;;  %v334_v59 = vshll.u32 %v6845_v18, %v332_v27  ;;  %v337_v31 = vsub.s32 4294967266, %v332_v27  ;;  %v994_v18 = vadd.s32 1, %v6885_v32 }
  0x49   :  { %v1062_v8 = vshrl.u32 %v6703_v35, %v1059_v44  ;;  %v1065_v55 = vshrl.u32 %v6704_v37, %v1059_v44  ;;  %v1068_v10 = vshrl.u32 %v6705_v39, %v1059_v44  ;;  %v1071_v17 = vshrl.u32 %v12905_v41, %v1059_v44 }
  0x4a   :  { %v335_v51 = vshrl.u32 %v6815_v54, %v333_v38  ;;  %v338_v52 = vadd.s32 127, %v337_v31  ;;  %v1070_v54 = vshll.u32 %v6705_v39, %v1058_v34  ;;  %v995_v11 = vsel %vm993_vm0, %v994_v18, %v6885_v32 }
  0x4b   :  { %v1063_v15 = vor.u32 %v1062_v8, %v1061_v47  ;;  %v1066_v16 = vor.u32 %v1065_v55, %v1064_v49  ;;  %v996_v22 = vadd.s32 %v995_v11, %v991_v42  ;;  %v1060_v25 = vshrl.u32 %v6702_v33, %v1059_v44 }
  0x4c   :  { %v336_v60 = vor.u32 %v335_v51, %v334_v59  ;;  %v339_v4 = vshll.u32 %v338_v52, 23  ;;  %v1069_v63 = vor.u32 %v1068_v10, %v1067_v56  ;;  %v1072_v27 = vor.u32 %v1071_v17, %v1070_v54 }
  0x4d   :  { %v1073_v38 = vshll.u32 %v12905_v41, %v1058_v34  ;;  %v1074_v59 = vshrl.u32 %v12904_v50, %v1059_v44  ;;  %v997_v51 = vadd.s32 536870912, %v996_v22  ;;  %vm1078_vm2 = vcmp.lt.s32.totalorder %v6881_v26, 3 }
  0x4e   :  { %v340_v19 = vor.u32 4788187, %v339_v4  ;;  %v343_v20 = vcvt.s32.f32 %v336_v60  ;;  %vm1079_vm3 = vcmp.lt.s32.totalorder %v6881_v26, 4  ;;  %vm1077_vm4 = vcmp.lt.s32.totalorder %v6881_v26, 2 }
  0x4f   :  { %v1075_v32 = vor.u32 %v1074_v59, %v1073_v38  ;;  %v1081_v47 = vsel %vm1079_vm3, %v1069_v63, 2102212464  ;;  %v1084_v42 = vsel %vm1076_vm1, %v1063_v15, %v1066_v16  ;;  %v354_v52 = vadd.s32 3, %v350_v40 }
  0x50   :  { %v341_v31 = vand.u32 2147483647, %v340_v19  ;;  %v6914_v18 = vshrl.u32 %v997_v51, 30  ;;  %v1085_v34 = vsel %vm1079_vm3, %v1072_v27, 920167782  ;;  %v1080_v44 = vsel %vm1076_vm1, %v1060_v25, %v1063_v15 }
  0x51   :  { %v1086_v8 = vsel %vm1078_vm2, %v1069_v63, %v1085_v34  ;;  %v1088_v55 = vsel %vm1076_vm1, %v1066_v16, %v1069_v63  ;;  %v1089_v56 = vsel %vm1079_vm3, %v1075_v32, 1326507024  ;;  %v1082_v10 = vsel %vm1078_vm2, %v1066_v16, %v1081_v47 }
  0x52   :  { %v344_v49 = vmul.f32 %v343_v20, %v341_v31  ;;  %v999_v4 = vshll.u32 %v6914_v18, 30  ;;  %v1087_v40 = vsel %vm1077_vm4, %v1084_v42, %v1086_v8  ;;  %v1090_v54 = vsel %vm1078_vm2, %v1072_v27, %v1089_v56 }
  0x53   :  { %v6930_v11 = vmul.u32.u64.low %v6839_v13, %v1087_v40  ;;  %v6931_v15 = vmul.u32.u64.high %v6839_v13, %v1087_v40, %v6930_v11  ;;  %v1177_v17 = vor.u32 %v6868_v45, %v6828_v0  ;;  %v6938_v20 = vand.u32 3, %v354_v52 }
  0x54   :  { %v345_v60 = vxor.u32 2147483648, %v344_v49  ;;  %v6940_v16 = vsub.s32 %v996_v22, %v999_v4  ;;  %v1091_v25 = vsel %vm1077_vm4, %v1088_v55, %v1090_v54  ;;  %v1083_v27 = vsel %vm1077_vm4, %v1080_v44, %v1082_v10 }
  0x55   :  { %v6950_v38 = vmul.u32.u64.low %v6839_v13, %v1091_v25  ;;  %v6951_v0 = vmul.u32.u64.high %v6839_v13, %v1091_v25, %v6950_v38  ;;  %v1180_v22 = vor.u32 %v6872_v46, %v6832_v1  ;;  %v1182_v59 = vshrl.u32 %v6705_v39, %v6824_v62 }
  0x56   :  { %v346_v19 = vsel %vm263_vm8, %v345_v60, %v344_v49  ;;  %v1002_v45 = vsub.s32 0, %v6940_v16  ;;  %v1102_v36 = vadd.s32 1, %v6931_v15  ;;  %v1184_v26 = vshll.u32 %v6705_v39, %v6808_v29 }
  0x57   :  { %v349_v63 = vsel %vm6861_vm10, %v6744_v6, %v346_v19  ;;  %v1185_v31 = vshrl.u32 %v12905_v41, %v6824_v62  ;;  %v1099_v32 = vmul.u32 %v6839_v13, %v1083_v27  ;;  %v1187_v47 = vshll.u32 %v12905_v41, %v6808_v29 }
  0x58   :  { %6628 = vcosq.f32 %v349_v63  ;;  %v6124_v51 = vmin.u32 %v1002_v45, %v6940_v16  ;;  %v1188_v1 = vshrl.u32 %v12904_v50, %v6824_v62  ;;  %vm357_vm5 = vcmp.eq.s32.totalorder %v6938_v20, 0 }
  0x59   :  { %6630 = vsinq.f32 %v349_v63  ;;  %vm360_vm6 = vcmp.eq.s32.totalorder %v6938_v20, 2  ;;  %vm1101_vm7 = vc.u32 %v6951_v0, %v6930_v11  ;;  %v1186_v46 = vor.u32 %v1185_v31, %v1184_v26 }
  0x5a   :  { %vm356_vm8 = vcmp.lt.s32.totalorder %v6938_v20, 2  ;;  %v992_v42 = vadd.s32 %v6884_v28, %v6879_v14  ;;  %v1004_v13 = vclz %v6124_v51  ;;  %v1183_v49 = vor.u32 %v1182_v59, %v6836_v2 }
  0x5b   :  { %vm1190_vm9 = vcmp.lt.s32.totalorder %v6821_v61, 1  ;;  %vm353_vm10 = vweird.f32 %v6744_v6  ;;  %v1022_v29 = vsub.s32 4, %v6914_v18  ;;  %v1103_v62 = vsel %vm1101_vm7, %v1102_v36, %v6931_v15 }
  0x5c   :  { %v1189_v52 = vor.u32 %v1188_v1, %v1187_v47  ;;  %vm1192_vm11 = vcmp.lt.s32.totalorder %v6821_v61, 3  ;;  %v6125_v34 = vadd.s32 4294967294, %v1004_v13  ;;  %v1104_v44 = vadd.s32 %v1103_v62, %v1099_v32 }
  0x5d   :  { %vm1191_vm12 = vcmp.lt.s32.totalorder %v6821_v61, 2  ;;  %vm1193_vm13 = vcmp.lt.s32.totalorder %v6821_v61, 4  ;;  %v1194_v2 = vsel %vm1190_vm9, %v6851_v21, %v1177_v17  ;;  %v1198_v28 = vsel %vm1190_vm9, %v1177_v17, %v1180_v22 }
  0x5e   :  { %v1195_v14 = vsel %vm1193_vm13, %v1183_v49, 2102212464  ;;  %v1199_v8 = vsel %vm1193_vm13, %v1186_v46, 920167782  ;;  %vm6126_vm14 = vcmp.lt.s32.totalorder %v6125_v34, 0  ;;  %v1105_v55 = vadd.s32 536870912, %v1104_v44 }
  0x5f   :  { %v1200_v56 = vsel %vm1192_vm11, %v1183_v49, %v1199_v8  ;;  %v1202_v60 = vsel %vm1190_vm9, %v1180_v22, %v1183_v49  ;;  %v1007_v4 = vsel %vm6126_vm14, 0, %v6125_v34  ;;  %v1196_v10 = vsel %vm1192_vm11, %v1180_v22, %v1195_v14 }
  0x60   :  { %v1201_v21 = vsel %vm1191_vm12, %v1198_v28, %v1200_v56  ;;  %v1203_v40 = vsel %vm1193_vm13, %v1189_v52, 1326507024  ;;  %v1008_v15 = vsub.s32 32, %v1007_v4  ;;  %v1009_v17 = vshll.u32 %v6940_v16, %v1007_v4 }
  0x61   :  { %v1012_v19 = vsub.s32 4294967266, %v1007_v4  ;;  %v1106_v25 = vshrl.u32 %v1105_v55, 30  ;;  %v1204_v38 = vsel %vm1192_vm11, %v1186_v46, %v1203_v40  ;;  %vm938_vm15 = vcmp.lt.s32.totalorder %v6777_v57, 0 }
  0x62   :  { %v6629_v54 = vpop.eup %6628  ;;  %v7001_v45 = vmul.u32.u64.low %v6819_v58, %v1201_v21  ;;  %v7002_v59 = vmul.u32.u64.high %v6819_v58, %v1201_v21, %v7001_v45  ;;  %v1010_v36 = vshrl.u32 %v992_v42, %v1008_v15  ;;  %v1197_v16 = vsel %vm1191_vm12, %v1194_v2, %v1196_v10 }
  0x63   :  { %v6631_v63 = vpop.eup %6630  ;;  %v361_v27 = vxor.u32 2147483648, %v6629_v54  ;;  %v1013_v26 = vadd.s32 127, %v1012_v19  ;;  %v1107_v31 = vshll.u32 %v1106_v25, 30  ;;  %v1205_v32 = vsel %vm1191_vm12, %v1202_v60, %v1204_v38 }
  0x64   :  { %v358_v22 = vxor.u32 2147483648, %v6631_v63  ;;  %v1011_v1 = vor.u32 %v1010_v36, %v1009_v17  ;;  %v1023_v49 = vsel %vm938_vm15, %v1022_v29, %v6914_v18  ;;  %v1216_v20 = vadd.s32 1, %v7002_v59 }
  0x65   :  { %v362_v51 = vsel %vm360_vm6, %v361_v27, %v6631_v63  ;;  %v1014_v46 = vshll.u32 %v1013_v26, 23  ;;  %v1108_v13 = vsub.s32 %v1104_v44, %v1107_v31  ;;  %v1213_v44 = vmul.u32 %v6819_v58, %v1197_v16 }
  0x66   :  { %v359_v47 = vsel %vm357_vm5, %v6629_v54, %v358_v22  ;;  %v7020_v62 = vmul.u32.u64.low %v6819_v58, %v1205_v32  ;;  %v7021_v52 = vmul.u32.u64.high %v6819_v58, %v1205_v32, %v7020_v62  ;;  %v1018_v2 = vcvt.s32.f32 %v1011_v1 }
  0x67   :  { %v363_v42 = vsel %vm356_vm8, %v359_v47, %v362_v51  ;;  %v1015_v34 = vor.u32 4788187, %v1014_v46  ;;  %v1110_v14 = vsub.s32 0, %v1108_v13  ;;  %v2727_v8 = vmul.f32 0.25, %v6812_v53 }
  0x68   :  { %v364_v61 = vsel %vm353_vm10, nan, %v363_v42  ;;  %vm7030_vm0 = vcmp.le.f32.partialorder %v936_v5, 0.7853982  ;;  %vm1215_vm1 = vc.u32 %v7021_v52, %v7001_v45  ;;  %v1130_v4 = vsub.s32 4, %v1106_v25 }
  0x69   :  { %v365_v28 = vmul.f32 0.5, %v364_v61  ;;  %v1016_v29 = vand.u32 2147483647, %v1015_v34  ;;  %v6129_v55 = vmin.u32 %v1110_v14, %v1108_v13  ;;  %v1025_v56 = vsel %vm7030_vm0, 0, %v1023_v49 }
  0x6a   :  { %v7041_v58 = vadd.f32 1.0, %v2727_v8  ;;  %v1217_v5 = vsel %vm1215_vm1, %v1216_v20, %v7002_v59  ;;  %v6132_v17 = vadd.f32 -0.35, %v6746_v7  ;;  %v1029_v19 = vadd.s32 3, %v1025_v56 }
  0x6b   :  { %v7035_v6 = vadd.f32 %v365_v28, %v6810_v48  ;;  %v1019_v53 = vmul.f32 %v1018_v2, %v1016_v29  ;;  %v1112_v60 = vclz %v6129_v55  ;;  %v1218_v21 = vadd.s32 %v1217_v5, %v1213_v44 }
  0x6c   :  { %v7046_v40 = vmul.f32 3.1415927, %v7041_v58  ;;  %v31_v48 = vmul.f32 1.4285715, %v6741_v3  ;;  %vm1046_vm2 = vcmp.lt.s32.totalorder %v6781_v9, 0  ;;  %v1100_v63 = vadd.s32 %v6930_v11, %v6951_v0 }
  0x6d   :  { %v12901_v10 = vsub.f32 0.0, %v7035_v6  ;;  %v1020_v54 = vxor.u32 2147483648, %v1019_v53  ;;  %v6130_v15 = vadd.s32 4294967294, %v1112_v60  ;;  %v1219_v27 = vadd.s32 536870912, %v1218_v21 }
  0x6e   :  { %v1131_v59 = vsel %vm1046_vm2, %v1130_v4, %v1106_v25  ;;  %v2733_v22 = vand.u32 2139095040, %v7046_v40  ;;  %v2730_v51 = vand.u32 2147483647, %v7046_v40  ;;  %v6127_v25 = vadd.f32 -1.0, %v6768_v43 }
  0x6f   :  { %401 = vxpose.xlu0.b32.start.end [1/1] (short) %v12901_v10, 128  ;;  %v1021_v38 = vsel %vm938_vm15, %v1020_v54, %v1019_v53  ;;  %vm6131_vm3 = vcmp.lt.s32.totalorder %v6130_v15, 0  ;;  %v1220_v31 = vshrl.u32 %v1219_v27, 30  ;;  %vm1160_vm4 = vcmp.lt.s32.totalorder %v6752_v12, 0 }
  0x70   :  { %v1024_v36 = vsel %vm7030_vm0, %v6777_v57, %v1021_v38  ;;  %v1115_v26 = vsel %vm6131_vm3, 0, %v6130_v15  ;;  %v2734_v1 = vshrl.u32 %v2733_v22, 23  ;;  %v7066_v49 = vand.u32 3, %v1029_v19 }
  0x71   :  { %6632 = vcosq.f32 %v1024_v36  ;;  %v1116_v11 = vsub.s32 32, %v1115_v26  ;;  %v1117_v0 = vshll.u32 %v1108_v13, %v1115_v26  ;;  %v1120_v16 = vsub.s32 4294967266, %v1115_v26 }
  0x72   :  { %6634 = vsinq.f32 %v1024_v36  ;;  %v1221_v32 = vshll.u32 %v1220_v31, 30  ;;  %v1244_v47 = vsub.s32 4, %v1220_v31  ;;  %vm7070_vm5 = vcmp.le.f32.partialorder %v1044_v24, 0.7853982 }
  0x73   :  { %v1118_v46 = vshrl.u32 %v1100_v63, %v1116_v11  ;;  %v1121_v42 = vadd.s32 127, %v1120_v16  ;;  %v6283_v61 = vadd.s32 4294967169, %v2734_v1  ;;  %v1133_v43 = vsel %vm7070_vm5, 0, %v1131_v59 }
  0x74   :  { %v7074_v13 = vsub.s32 %v1218_v21, %v1221_v32  ;;  %v2737_v14 = vand.u32 8388607, %v2730_v51  ;;  %v1245_v44 = vsel %vm1160_vm4, %v1244_v47, %v1220_v31  ;;  %v7084_v20 = vmul.f32 6.2831855, %v7041_v58 }
  0x75   :  { %v1119_v34 = vor.u32 %v1118_v46, %v1117_v0  ;;  %v1122_v2 = vshll.u32 %v1121_v42, 23  ;;  %v2740_v24 = vadd.s32 1, %v6283_v61  ;;  %v7086_v8 = vmul.f32 %v6127_v25, %v6127_v25 }
  0x76   :  { %v1224_v28 = vsub.s32 0, %v7074_v13  ;;  %vm7090_vm6 = vcmp.le.f32.partialorder %v1158_v30, 0.7853982  ;;  %v1137_v56 = vadd.s32 3, %v1133_v43  ;;  %v7094_v53 = vmul.f32 %v6132_v17, %v6132_v17 }
  0x77   :  { %v1123_v18 = vor.u32 4788187, %v1122_v2  ;;  %v1126_v29 = vcvt.s32.f32 %v1119_v34  ;;  %vm2741_vm7 = vcmp.gt.s32.totalorder %v2740_v24, 0  ;;  %v1247_v5 = vsel %vm7090_vm6, 0, %v1245_v44 }
  0x78   :  { %v6134_v60 = vmin.u32 %v1224_v28, %v7074_v13  ;;  %v2738_v21 = vor.u32 8388608, %v2737_v14  ;;  %v2742_v54 = vsel %vm2741_vm7, %v2740_v24, 0  ;;  %vm1032_vm8 = vcmp.eq.s32.totalorder %v7066_v49, 0 }
  0x79   :  { %v1124_v4 = vand.u32 2147483647, %v1123_v18  ;;  %vm1035_vm9 = vcmp.eq.s32.totalorder %v7066_v49, 2  ;;  %v2841_v15 = vand.u32 2139095040, %v7084_v20  ;;  %v1214_v17 = vadd.s32 %v7001_v45, %v7021_v52 }
  0x7a   :  { %v1226_v30 = vclz %v6134_v60  ;;  %v2744_v27 = vand.u32 31, %v2742_v54  ;;  %v7104_v38 = vmul.f32 20.0, %v31_v48  ;;  %v7106_v36 = vand.u32 3, %v1137_v56 }
  0x7b   :  { %v6633_v19 = vpop.eup %6632  ;;  %v1127_v63 = vmul.f32 %v1126_v29, %v1124_v4  ;;  %v7108_v31 = vadd.s32 3, %v1247_v5  ;;  %v7110_v32 = vshll.u32 %v2738_v21, 8  ;;  %v2743_v47 = vshrl.u32 %v2742_v54, 5 }
  0x7c   :  { %v6635_v59 = vpop.eup %6634  ;;  %v1036_v22 = vxor.u32 2147483648, %v6633_v19  ;;  %v6135_v26 = vadd.s32 4294967294, %v1226_v30  ;;  %v2745_v16 = vsub.s32 32, %v2744_v27  ;;  %v2747_v1 = vshll.u32 %v6702_v33, %v2744_v27 }
  0x7d   :  { %v1033_v11 = vxor.u32 2147483648, %v6635_v59  ;;  %v1128_v0 = vxor.u32 2147483648, %v1127_v63  ;;  %v2842_v45 = vshrl.u32 %v2841_v15, 23  ;;  %v2750_v46 = vshll.u32 %v6703_v35, %v2744_v27 }
  0x7e   :  { %vm6136_vm10 = vcmp.lt.s32.totalorder %v6135_v26, 0  ;;  %v1037_v52 = vsel %vm1035_vm9, %v1036_v22, %v6635_v59  ;;  %v2753_v2 = vshll.u32 %v6704_v37, %v2744_v27  ;;  %v2748_v28 = vshrl.u32 %v6703_v35, %v2745_v16 }
  0x7f   :  { %v1129_v48 = vsel %vm1046_vm2, %v1128_v0, %v1127_v63  ;;  %v1229_v25 = vsel %vm6136_vm10, 0, %v6135_v26  ;;  %v1034_v43 = vsel %vm1032_vm8, %v6633_v19, %v1033_v11  ;;  %vm1031_vm11 = vcmp.lt.s32.totalorder %v7066_v49, 2 }
  0x80   :  { %v1132_v42 = vsel %vm7070_vm5, %v6781_v9, %v1129_v48  ;;  %v1230_v61 = vsub.s32 32, %v1229_v25  ;;  %v1231_v34 = vshll.u32 %v7074_v13, %v1229_v25  ;;  %v1234_v14 = vsub.s32 4294967266, %v1229_v25 }
  0x81   :  { %6636 = vcosq.f32 %v1132_v42  ;;  %v2746_v24 = vshrl.u32 %v6702_v33, %v2745_v16  ;;  %v2751_v62 = vshrl.u32 %v6704_v37, %v2745_v16  ;;  %vm1143_vm12 = vcmp.eq.s32.totalorder %v7106_v36, 2 }
  0x82   :  { %6638 = vsinq.f32 %v1132_v42  ;;  %v1232_v44 = vshrl.u32 %v1214_v17, %v1230_v61  ;;  %v1235_v13 = vadd.s32 127, %v1234_v14  ;;  %v2749_v18 = vor.u32 %v2748_v28, %v2747_v1 }
  0x83   :  { %v2754_v29 = vshrl.u32 %v6705_v39, %v2745_v16  ;;  %v2756_v56 = vshll.u32 %v6705_v39, %v2744_v27  ;;  %v2752_v4 = vor.u32 %v2751_v62, %v2750_v46  ;;  %v2757_v5 = vshrl.u32 %v12905_v41, %v2745_v16 }
  0x84   :  { %v1233_v60 = vor.u32 %v1232_v44, %v1231_v34  ;;  %v2759_v21 = vshll.u32 %v12905_v41, %v2744_v27  ;;  %vm1028_vm13 = vweird.f32 %v6777_v57  ;;  %vm1139_vm14 = vcmp.lt.s32.totalorder %v7106_v36, 2 }
  0x85   :  { %v1236_v54 = vshll.u32 %v1235_v13, 23  ;;  %v2755_v30 = vor.u32 %v2754_v29, %v2753_v2  ;;  %v2760_v15 = vshrl.u32 %v12904_v50, %v2745_v16  ;;  %vm2762_vm15 = vcmp.lt.s32.totalorder %v2743_v47, 1 }
  0x86   :  { %vm1136_vm0 = vweird.f32 %v6781_v9  ;;  %v1240_v19 = vcvt.s32.f32 %v1233_v60  ;;  %v2758_v63 = vor.u32 %v2757_v5, %v2756_v56  ;;  %vm2763_vm1 = vcmp.lt.s32.totalorder %v2743_v47, 2 }
  0x87   :  { %vm2764_vm2 = vcmp.lt.s32.totalorder %v2743_v47, 3  ;;  %v1237_v17 = vor.u32 4788187, %v1236_v54  ;;  %v2761_v59 = vor.u32 %v2760_v15, %v2759_v21  ;;  %vm2765_vm3 = vcmp.lt.s32.totalorder %v2743_v47, 4 }
  0x88   :  { %v2766_v22 = vsel %vm2762_vm15, %v2746_v24, %v2749_v18  ;;  %v2767_v27 = vsel %vm2765_vm3, %v2755_v30, 2102212464  ;;  %v2770_v26 = vsel %vm2762_vm15, %v2749_v18, %v2752_v4  ;;  %v2771_v11 = vsel %vm2765_vm3, %v2758_v63, 920167782 }
  0x89   :  { %v2774_v0 = vsel %vm2762_vm15, %v2752_v4, %v2755_v30  ;;  %v1238_v1 = vand.u32 2147483647, %v1237_v17  ;;  %v2768_v48 = vsel %vm2764_vm2, %v2752_v4, %v2767_v27  ;;  %v2772_v25 = vsel %vm2764_vm2, %v2755_v30, %v2771_v11 }
  0x8a   :  { %v2775_v46 = vsel %vm2765_vm3, %v2761_v59, 1326507024  ;;  %v2769_v16 = vsel %vm2763_vm1, %v2766_v22, %v2768_v48  ;;  %v2773_v42 = vsel %vm2763_vm1, %v2770_v26, %v2772_v25  ;;  %v6288_v34 = vadd.s32 4294967169, %v2842_v45 }
  0x8b   :  { %v2776_v61 = vsel %vm2764_vm2, %v2758_v63, %v2775_v46  ;;  %v6637_v2 = vpop.eup %6636  ;;  %v1241_v14 = vmul.f32 %v1240_v19, %v1238_v1  ;;  %v7142_v44 = vmul.u32.u64.low %v7110_v32, %v2773_v42  ;;  %v7143_v24 = vmul.u32.u64.high %v7110_v32, %v2773_v42, %v7142_v44 }
  0x8c   :  { %v2777_v28 = vsel %vm2763_vm1, %v2774_v0, %v2776_v61  ;;  %v6639_v62 = vpop.eup %6638  ;;  %vm1140_vm5 = vcmp.eq.s32.totalorder %v7106_v36, 0  ;;  %v1144_v13 = vxor.u32 2147483648, %v6637_v2  ;;  %v1038_v56 = vsel %vm1031_vm11, %v1034_v43, %v1037_v52 }
  0x8d   :  { %v7147_v18 = vmul.u32.u64.low %v7110_v32, %v2777_v28  ;;  %v7148_v29 = vmul.u32.u64.high %v7110_v32, %v2777_v28, %v7147_v18  ;;  %v1141_v45 = vxor.u32 2147483648, %v6639_v62  ;;  %v1242_v60 = vxor.u32 2147483648, %v1241_v14 }
  0x8e   :  { %v2848_v4 = vadd.s32 1, %v6288_v34  ;;  %v1145_v47 = vsel %vm1143_vm12, %v1144_v13, %v6639_v62  ;;  %v7155_v5 = vand.u32 3, %v7108_v31  ;;  %v2785_v21 = vmul.u32 %v7110_v32, %v2769_v16 }
  0x8f   :  { %v2838_v54 = vand.u32 2147483647, %v7084_v20  ;;  %v1142_v30 = vsel %vm1140_vm5, %v6637_v2, %v1141_v45  ;;  %v1243_v15 = vsel %vm1160_vm4, %v1242_v60, %v1241_v14  ;;  %v2788_v49 = vadd.s32 1, %v7143_v24 }
  0x90   :  { %vm2849_vm7 = vcmp.gt.s32.totalorder %v2848_v4, 0  ;;  %v1039_v52 = vsel %vm1028_vm13, nan, %v1038_v56  ;;  %v1146_v43 = vsel %vm1139_vm14, %v1142_v30, %v1145_v47  ;;  %v1246_v31 = vsel %vm7090_vm6, %v6752_v12, %v1243_v15 }
  0x91   :  { %vm2787_vm8 = vc.u32 %v7148_v29, %v7142_v44  ;;  %v1147_v32 = vsel %vm1136_vm0, nan, %v1146_v43  ;;  %6640 = vcosq.f32 %v1246_v31  ;;  %v2850_v63 = vsel %vm2849_vm7, %v2848_v4, 0 }
  0x92   :  { %v2789_v19 = vsel %vm2787_vm8, %v2788_v49, %v7143_v24  ;;  %v1148_v17 = vmul.f32 %v1147_v32, %v1147_v32  ;;  %6642 = vsinq.f32 %v1246_v31  ;;  %v2845_v36 = vand.u32 8388607, %v2838_v54 }
  0x93   :  { %v2790_v57 = vadd.s32 %v2789_v19, %v2785_v21  ;;  %v2852_v59 = vand.u32 31, %v2850_v63  ;;  %v33_v22 = vadd.f32 -10.0, %v7104_v38  ;;  %v1040_v55 = vmul.f32 %v1039_v52, %v1039_v52 }
  0x94   :  { %v1149_v27 = vadd.f32 1.0, %v1148_v17  ;;  %v7177_v11 = vmul.f32 3.0, %v7094_v53  ;;  %vm1253_vm4 = vcmp.lt.s32.totalorder %v7155_v5, 2  ;;  %vm1254_vm6 = vcmp.eq.s32.totalorder %v7155_v5, 0 }
  0x95   :  { %v2791_v26 = vadd.s32 536870912, %v2790_v57  ;;  %v2853_v9 = vsub.s32 32, %v2852_v59  ;;  %vm1250_vm9 = vweird.f32 %v6752_v12  ;;  %vm1257_vm10 = vcmp.eq.s32.totalorder %v7155_v5, 2 }
  0x96   :  { %v1150_v0 = vmul.f32 %v1149_v27, %v7086_v8  ;;  %v2846_v38 = vor.u32 8388608, %v2845_v36  ;;  %v7186_v48 = vshrl.u32 %v2850_v63, 5  ;;  %v2855_v25 = vshll.u32 %v6702_v33, %v2852_v59 }
  0x97   :  { %v7184_v1 = vshrl.u32 %v2791_v26, 30  ;;  %v2864_v53 = vshll.u32 %v6705_v39, %v2852_v59  ;;  %v6042_v46 = vadd.f32 -1.0, %v33_v22  ;;  %v2858_v61 = vshll.u32 %v6703_v35, %v2852_v59 }
  0x98   :  { %v1151_v16 = vadd.f32 %v1150_v0, %v1040_v55  ;;  %v2865_v8 = vshrl.u32 %v12905_v41, %v2853_v9  ;;  %v2856_v34 = vshrl.u32 %v6703_v35, %v2853_v9  ;;  %v2859_v2 = vshrl.u32 %v6704_v37, %v2853_v9 }
  0x99   :  { %v2793_v42 = vshll.u32 %v7184_v1, 30  ;;  %v2861_v14 = vshll.u32 %v6704_v37, %v2852_v59  ;;  %v2862_v28 = vshrl.u32 %v6705_v39, %v2853_v9  ;;  %v2867_v13 = vshll.u32 %v12905_v41, %v2852_v59 }
  0x9a   :  { %v1152_v24 = vmul.f32 0.1, %v1151_v16  ;;  %v2868_v18 = vshrl.u32 %v12904_v50, %v2853_v9  ;;  %v2786_v45 = vadd.s32 %v7142_v44, %v7148_v29  ;;  %v2866_v60 = vor.u32 %v2865_v8, %v2864_v53 }
  0x9b   :  { %v7197_v62 = vsub.s32 %v2790_v57, %v2793_v42  ;;  %v6641_v56 = vpop.eup %6640  ;;  %vm2870_vm11 = vcmp.lt.s32.totalorder %v7186_v48, 1  ;;  %v36_v4 = vmul.f32 0.25, %v6042_v46  ;;  %vm2873_vm12 = vcmp.lt.s32.totalorder %v7186_v48, 4 }
  0x9c   :  { %v6643_v47 = vpop.eup %6642  ;;  %v1153_v21 = vsub.f32 %v1152_v24, %v6746_v7  ;;  %v1258_v30 = vxor.u32 2147483648, %v6641_v56  ;;  %v2857_v52 = vor.u32 %v2856_v34, %v2855_v25  ;;  %v2860_v43 = vor.u32 %v2859_v2, %v2858_v61 }
  0x9d   :  { %v2796_v15 = vsub.s32 0, %v7197_v62  ;;  %v1255_v49 = vxor.u32 2147483648, %v6643_v47  ;;  %v2863_v31 = vor.u32 %v2862_v28, %v2861_v14  ;;  %v2869_v19 = vor.u32 %v2868_v18, %v2867_v13 }
  0x9e   :  { %v7206_v32 = vsub.f32 0.0, %v1153_v21  ;;  %v1259_v44 = vsel %vm1257_vm10, %v1258_v30, %v6643_v47  ;;  %v2854_v63 = vshrl.u32 %v6702_v33, %v2853_v9  ;;  %vm2872_vm13 = vcmp.lt.s32.totalorder %v7186_v48, 3 }
  0x9f   :  { %v6284_v29 = vmin.u32 %v2796_v15, %v7197_v62  ;;  %v1256_v7 = vsel %vm1254_vm6, %v6641_v56, %v1255_v49  ;;  %v2879_v17 = vsel %vm2873_vm12, %v2866_v60, 920167782  ;;  %v2875_v59 = vsel %vm2873_vm12, %v2863_v31, 2102212464 }
  0xa0   :  { %13164 = vst [vmem:[#allocation8_spill] sm:$0xff] %v7206_v32  ;;  %1266 = vxpose.xlu1.b32.start.end [1/1] (short) %v7206_v32, 128  ;;  %v1260_v57 = vsel %vm1253_vm4, %v1256_v7, %v1259_v44  ;;  %v2886_v22 = vshll.u32 %v2846_v38, 8  ;;  %vm2871_vm14 = vcmp.lt.s32.totalorder %v7186_v48, 2  ;;  %v2878_v27 = vsel %vm2870_vm11, %v2857_v52, %v2860_v43 }
  0xa1   :  { %v2798_v36 = vclz %v6284_v29  ;;  %v1261_v55 = vsel %vm1250_vm9, nan, %v1260_v57  ;;  %v2882_v26 = vsel %vm2870_vm11, %v2860_v43, %v2863_v31  ;;  %v2880_v5 = vsel %vm2872_vm13, %v2863_v31, %v2879_v17 }
  0xa2   :  { %v1262_v9 = vmul.f32 0.5, %v1261_v55  ;;  %v2883_v25 = vsel %vm2873_vm12, %v2869_v19, 1326507024  ;;  %v2874_v12 = vsel %vm2870_vm11, %v2854_v63, %v2857_v52  ;;  %v2876_v38 = vsel %vm2872_vm13, %v2860_v43, %v2875_v59 }
  0xa3   :  { %v6285_v0 = vadd.s32 4294967294, %v2798_v36  ;;  %v2884_v53 = vsel %vm2872_vm13, %v2866_v60, %v2883_v25  ;;  %v7239_v46 = vadd.f32 1.0, %v36_v4  ;;  %v2881_v42 = vsel %vm2871_vm14, %v2878_v27, %v2880_v5 }
  0xa4   :  { %v7242_v16 = vadd.f32 %v1262_v9, %v7177_v11  ;;  %v2885_v61 = vsel %vm2871_vm14, %v2882_v26, %v2884_v53  ;;  %v2877_v11 = vsel %vm2871_vm14, %v2874_v12, %v2876_v38  ;;  %v2816_v56 = vsub.s32 4, %v7184_v1 }
  0xa5   :  { %vm6286_vm15 = vcmp.lt.s32.totalorder %v6285_v0, 0  ;;  %v7248_v34 = vmul.u32.u64.low %v2886_v22, %v2885_v61  ;;  %v7249_v2 = vmul.u32.u64.high %v2886_v22, %v2885_v61, %v7248_v34  ;;  %v7252_v14 = vmul.f32 3.1415927, %v7239_v46 }
  0xa6   :  { %13165 = vst [vmem:[#allocation9_spill] sm:$0xff] %v7242_v16  ;;  %v2801_v8 = vsel %vm6286_vm15, 0, %v6285_v0  ;;  %v12900_v18 = vsub.f32 0.0, %v7242_v16  ;;  %v7259_v60 = vmul.u32.u64.low %v2886_v22, %v2881_v42  ;;  %v7260_v4 = vmul.u32.u64.high %v2886_v22, %v2881_v42, %v7259_v60 }
  0xa7   :  { %v2802_v28 = vsub.s32 32, %v2801_v8  ;;  %v2803_v24 = vshll.u32 %v7197_v62, %v2801_v8  ;;  %v2806_v13 = vsub.s32 4294967266, %v2801_v8  ;;  %v42_v30 = vand.u32 2139095040, %v7252_v14 }
  0xa8   :  { %vm2732_vm0 = vcmp.lt.s32.totalorder %v7046_v40, 0  ;;  %v2893_v15 = vmul.u32 %v2886_v22, %v2877_v11  ;;  %vm2895_vm1 = vc.u32 %v7249_v2, %v7259_v60  ;;  %vm7273_vm2 = vcmp.le.f32.partialorder %v2730_v51, 0.7853982 }
  0xa9   :  { %v2804_v47 = vshrl.u32 %v2786_v45, %v2802_v28  ;;  %v2807_v21 = vadd.s32 127, %v2806_v13  ;;  %v43_v48 = vshrl.u32 %v42_v30, 23  ;;  %v2817_v52 = vsel %vm2732_vm0, %v2816_v56, %v7184_v1 }
  0xaa   :  { %v2896_v45 = vadd.s32 1, %v7260_v4  ;;  %v39_v7 = vand.u32 2147483647, %v7252_v14  ;;  %v7280_v63 = vmul.f32 6.2831855, %v7239_v46  ;;  %v2819_v1 = vsel %vm7273_vm2, 0, %v2817_v52 }
  0xab   :  { %v2805_v49 = vor.u32 %v2804_v47, %v2803_v24  ;;  %v2808_v62 = vshll.u32 %v2807_v21, 23  ;;  %v6043_v44 = vadd.s32 4294967169, %v43_v48  ;;  %v2823_v51 = vadd.s32 3, %v2819_v1 }
  0xac   :  { %1298 = vxpose.xlu0.b32.start.end [1/1] (short) %v12900_v18, 128  ;;  %v2897_v19 = vsel %vm2895_vm1, %v2896_v45, %v7260_v4  ;;  %v46_v55 = vand.u32 8388607, %v39_v7  ;;  %v150_v26 = vand.u32 2139095040, %v7280_v63  ;;  %v7288_v25 = vadd.f32 -1.0, %v7041_v58 }
  0xad   :  { %v2809_v43 = vor.u32 4788187, %v2808_v62  ;;  %v2812_v31 = vcvt.s32.f32 %v2805_v49  ;;  %v2898_v57 = vadd.s32 %v2897_v19, %v2893_v15  ;;  %v49_v36 = vadd.s32 1, %v6043_v44 }
  0xae   :  { %v7291_v12 = vmul.f32 10.0, %v6757_v23  ;;  %v147_v61 = vand.u32 2147483647, %v7280_v63  ;;  %v7296_v8 = vand.u32 3, %v2823_v51  ;;  %v2894_v34 = vadd.s32 %v7259_v60, %v7249_v2 }
  0xaf   :  { %v2810_v17 = vand.u32 2147483647, %v2809_v43  ;;  %v2899_v22 = vadd.s32 536870912, %v2898_v57  ;;  %vm50_vm3 = vcmp.gt.s32.totalorder %v49_v36, 0  ;;  %v47_v28 = vor.u32 8388608, %v46_v55 }
  0xb0   :  { %v51_v27 = vsel %vm50_vm3, %v49_v36, 0  ;;  %v151_v24 = vshrl.u32 %v150_v26, 23  ;;  %vm2840_vm5 = vcmp.lt.s32.totalorder %v7084_v20, 0  ;;  %v154_v49 = vand.u32 8388607, %v147_v61 }
  0xb1   :  { %v2813_v59 = vmul.f32 %v2812_v31, %v2810_v17  ;;  %v2900_v0 = vshrl.u32 %v2899_v22, 30  ;;  %v53_v5 = vand.u32 31, %v51_v27  ;;  %v52_v4 = vshrl.u32 %v51_v27, 5 }
  0xb2   :  { %v7317_v52 = vshll.u32 %v47_v28, 8  ;;  %vm7321_vm7 = vcmp.le.f32.partialorder %v2838_v54, 0.7853982  ;;  %v6048_v1 = vadd.s32 4294967169, %v151_v24  ;;  %vm2826_vm1 = vcmp.eq.s32.totalorder %v7296_v8, 0 }
  0xb3   :  { %v2814_v9 = vxor.u32 2147483648, %v2813_v59  ;;  %v2901_v53 = vshll.u32 %v2900_v0, 30  ;;  %v54_v42 = vsub.s32 32, %v53_v5  ;;  %v59_v11 = vshll.u32 %v6703_v35, %v53_v5 }
  0xb4   :  { %v62_v56 = vshll.u32 %v6704_v37, %v53_v5  ;;  %v56_v47 = vshll.u32 %v6702_v33, %v53_v5  ;;  %v65_v15 = vshll.u32 %v6705_v39, %v53_v5  ;;  %v68_v48 = vshll.u32 %v12905_v41, %v53_v5 }
  0xb5   :  { %v2815_v38 = vsel %vm2732_vm0, %v2814_v9, %v2813_v59  ;;  %v7302_v13 = vsub.s32 %v2898_v57, %v2901_v53  ;;  %v57_v21 = vshrl.u32 %v6703_v35, %v54_v42  ;;  %v60_v2 = vshrl.u32 %v6704_v37, %v54_v42 }
  0xb6   :  { %v2818_v58 = vsel %vm7273_vm2, %v7046_v40, %v2815_v38  ;;  %v63_v30 = vshrl.u32 %v6705_v39, %v54_v42  ;;  %v66_v62 = vshrl.u32 %v12905_v41, %v54_v42  ;;  %v69_v29 = vshrl.u32 %v12904_v50, %v54_v42 }
  0xb7   :  { %v2904_v60 = vsub.s32 0, %v7302_v13  ;;  %6644 = vcosq.f32 %v2818_v58  ;;  %v61_v31 = vor.u32 %v60_v2, %v59_v11  ;;  %v58_v19 = vor.u32 %v57_v21, %v56_v47 }
  0xb8   :  { %v64_v44 = vor.u32 %v63_v30, %v62_v56  ;;  %v67_v17 = vor.u32 %v66_v62, %v65_v15  ;;  %vm71_vm8 = vcmp.lt.s32.totalorder %v52_v4, 1  ;;  %v2924_v36 = vsub.s32 4, %v2900_v0 }
  0xb9   :  { %v6289_v43 = vmin.u32 %v2904_v60, %v7302_v13  ;;  %vm73_vm4 = vcmp.lt.s32.totalorder %v52_v4, 3  ;;  %v155_v59 = vor.u32 8388608, %v154_v49  ;;  %v55_v22 = vshrl.u32 %v6702_v33, %v54_v42 }
  0xba   :  { %v70_v54 = vor.u32 %v69_v29, %v68_v48  ;;  %vm72_vm6 = vcmp.lt.s32.totalorder %v52_v4, 2  ;;  %vm74_vm9 = vcmp.lt.s32.totalorder %v52_v4, 4  ;;  %v83_v26 = vsel %vm71_vm8, %v61_v31, %v64_v44 }
  0xbb   :  { %v2906_v57 = vclz %v6289_v43  ;;  %v76_v55 = vsel %vm74_vm9, %v64_v44, 2102212464  ;;  %v80_v27 = vsel %vm74_vm9, %v67_v17, 920167782  ;;  %v79_v9 = vsel %vm71_vm8, %v58_v19, %v61_v31 }
  0xbc   :  { %v81_v5 = vsel %vm73_vm4, %v64_v44, %v80_v27  ;;  %v84_v38 = vsel %vm74_vm9, %v70_v54, 1326507024  ;;  %v157_v53 = vadd.s32 1, %v6048_v1  ;;  %6646 = vsinq.f32 %v2818_v58 }
  0xbd   :  { %v6290_v51 = vadd.s32 4294967294, %v2906_v57  ;;  %v2925_v28 = vsel %vm2840_vm5, %v2924_v36, %v2900_v0  ;;  %v85_v42 = vsel %vm73_vm4, %v67_v17, %v84_v38  ;;  %v75_v11 = vsel %vm71_vm8, %v55_v22, %v58_v19 }
  0xbe   :  { %v77_v56 = vsel %vm73_vm4, %v61_v31, %v76_v55  ;;  %v86_v47 = vsel %vm72_vm6, %v83_v26, %v85_v42  ;;  %v82_v30 = vsel %vm72_vm6, %v79_v9, %v81_v5  ;;  %v2927_v0 = vsel %vm7321_vm7, 0, %v2925_v28 }
  0xbf   :  { %vm6291_vm10 = vcmp.lt.s32.totalorder %v6290_v51, 0  ;;  %v7344_v15 = vmul.u32.u64.low %v7317_v52, %v86_v47  ;;  %v7345_v49 = vmul.u32.u64.high %v7317_v52, %v86_v47, %v7344_v15  ;;  %vm158_vm11 = vcmp.gt.s32.totalorder %v157_v53, 0 }
  0xc0   :  { %v2909_v24 = vsel %vm6291_vm10, 0, %v6290_v51  ;;  %v78_v43 = vsel %vm72_vm6, %v75_v11, %v77_v56  ;;  %v159_v31 = vsel %vm158_vm11, %v157_v53, 0  ;;  %v7353_v29 = vshll.u32 %v155_v59, 8 }
  0xc1   :  { %v2910_v21 = vsub.s32 32, %v2909_v24  ;;  %v2911_v2 = vshll.u32 %v7302_v13, %v2909_v24  ;;  %v2914_v60 = vsub.s32 4294967266, %v2909_v24  ;;  %v7339_v58 = vpop.eup %6644  ;;  %v2955_v19 = vand.u32 2139095040, %v7291_v12 }
  0xc2   :  { %v7349_v13 = vmul.u32.u64.low %v7317_v52, %v82_v30  ;;  %v7350_v44 = vmul.u32.u64.high %v7317_v52, %v82_v30, %v7349_v13  ;;  %v7356_v57 = vshrl.u32 %v159_v31, 5  ;;  %v161_v36 = vand.u32 31, %v159_v31 }
  0xc3   :  { %v2912_v62 = vshrl.u32 %v2894_v34, %v2910_v21  ;;  %v2915_v48 = vadd.s32 127, %v2914_v60  ;;  %v2830_v34 = vxor.u32 2147483648, %v7339_v58  ;;  %v2931_v22 = vadd.s32 3, %v2927_v0 }
  0xc4   :  { %v94_v4 = vmul.u32 %v7317_v52, %v78_v43  ;;  %vm96_vm12 = vc.u32 %v7345_v49, %v7349_v13  ;;  %v162_v55 = vsub.s32 32, %v161_v36  ;;  %v164_v59 = vshll.u32 %v6702_v33, %v161_v36 }
  0xc5   :  { %v2913_v17 = vor.u32 %v2912_v62, %v2911_v2  ;;  %v2916_v1 = vshll.u32 %v2915_v48, 23  ;;  %v97_v27 = vadd.s32 1, %v7350_v44  ;;  %v167_v26 = vshll.u32 %v6703_v35, %v161_v36 }
  0xc6   :  { %v170_v9 = vshll.u32 %v6704_v37, %v161_v36  ;;  %v173_v5 = vshll.u32 %v6705_v39, %v161_v36  ;;  %v6647_v38 = vpop.eup %6646  ;;  %v165_v52 = vshrl.u32 %v6703_v35, %v162_v55  ;;  %v168_v28 = vshrl.u32 %v6704_v37, %v162_v55 }
  0xc7   :  { %v2917_v54 = vor.u32 4788187, %v2916_v1  ;;  %v2920_v51 = vcvt.s32.f32 %v2913_v17  ;;  %vm179_vm13 = vcmp.lt.s32.totalorder %v7356_v57, 1  ;;  %v98_v42 = vsel %vm96_vm12, %v97_v27, %v7350_v44 }
  0xc8   :  { %v171_v24 = vshrl.u32 %v6705_v39, %v162_v55  ;;  %v174_v11 = vshrl.u32 %v12905_v41, %v162_v55  ;;  %v176_v56 = vshll.u32 %v12905_v41, %v161_v36  ;;  %v99_v21 = vadd.s32 %v98_v42, %v94_v4 }
  0xc9   :  { %v2918_v53 = vand.u32 2147483647, %v2917_v54  ;;  %v166_v2 = vor.u32 %v165_v52, %v164_v59  ;;  %v169_v60 = vor.u32 %v168_v28, %v167_v26  ;;  %v163_v30 = vshrl.u32 %v6702_v33, %v162_v55 }
  0xca   :  { %v172_v0 = vor.u32 %v171_v24, %v170_v9  ;;  %v175_v15 = vor.u32 %v174_v11, %v173_v5  ;;  %v177_v62 = vshrl.u32 %v12904_v50, %v162_v55  ;;  %v100_v43 = vadd.s32 536870912, %v99_v21 }
  0xcb   :  { %v2921_v47 = vmul.f32 %v2920_v51, %v2918_v53  ;;  %vm181_vm14 = vcmp.lt.s32.totalorder %v7356_v57, 3  ;;  %vm182_vm15 = vcmp.lt.s32.totalorder %v7356_v57, 4  ;;  %vm180_vm0 = vcmp.lt.s32.totalorder %v7356_v57, 2 }
  0xcc   :  { %v178_v31 = vor.u32 %v177_v62, %v176_v56  ;;  %v184_v44 = vsel %vm182_vm15, %v172_v0, 2102212464  ;;  %v187_v17 = vsel %vm179_vm13, %v166_v2, %v169_v60  ;;  %v2827_v1 = vxor.u32 2147483648, %v6647_v38 }
  0xcd   :  { %v2922_v48 = vxor.u32 2147483648, %v2921_v47  ;;  %v101_v4 = vshrl.u32 %v100_v43, 30  ;;  %v188_v54 = vsel %vm182_vm15, %v175_v15, 920167782  ;;  %v183_v55 = vsel %vm179_vm13, %v163_v30, %v166_v2 }
  0xce   :  { %v185_v59 = vsel %vm181_vm14, %v169_v60, %v184_v44  ;;  %v189_v27 = vsel %vm181_vm14, %v172_v0, %v188_v54  ;;  %v191_v5 = vsel %vm179_vm13, %v169_v60, %v172_v0  ;;  %v192_v45 = vsel %vm182_vm15, %v178_v31, 1326507024 }
  0xcf   :  { %v2923_v36 = vsel %vm2840_vm5, %v2922_v48, %v2921_v47  ;;  %v102_v26 = vshll.u32 %v101_v4, 30  ;;  %v190_v9 = vsel %vm180_vm0, %v187_v17, %v189_v27  ;;  %vm2829_vm2 = vcmp.eq.s32.totalorder %v7296_v8, 2 }
  0xd0   :  { %v2926_v51 = vsel %vm7321_vm7, %v7084_v20, %v2923_v36  ;;  %v7403_v53 = vmul.u32.u64.low %v7353_v29, %v190_v9  ;;  %v7404_v52 = vmul.u32.u64.high %v7353_v29, %v190_v9, %v7403_v53  ;;  %v193_v42 = vsel %vm181_vm14, %v175_v15, %v192_v45 }
  0xd1   :  { %6648 = vcosq.f32 %v2926_v51  ;;  %v7409_v28 = vsub.s32 %v99_v21, %v102_v26  ;;  %v2932_v24 = vand.u32 3, %v2931_v22  ;;  %v194_v11 = vsel %vm180_vm0, %v191_v5, %v193_v42 }
  0xd2   :  { %6650 = vsinq.f32 %v2926_v51  ;;  %v2952_v56 = vand.u32 2147483647, %v7291_v12  ;;  %v2956_v47 = vshrl.u32 %v2955_v19, 23  ;;  %v186_v60 = vsel %vm180_vm0, %v183_v55, %v185_v59 }
  0xd3   :  { %v105_v2 = vsub.s32 0, %v7409_v28  ;;  %v7422_v21 = vmul.u32.u64.low %v7353_v29, %v194_v11  ;;  %v7423_v30 = vmul.u32.u64.high %v7353_v29, %v194_v11, %v7422_v21  ;;  %vm2825_vm3 = vcmp.lt.s32.totalorder %v7296_v8, 2 }
  0xd4   :  { %v2828_v22 = vsel %vm2826_vm1, %v7339_v58, %v2827_v1  ;;  %v2831_v0 = vsel %vm2829_vm2, %v2830_v34, %v6647_v38  ;;  %v6293_v15 = vadd.s32 4294967169, %v2956_v47  ;;  %vm2822_vm5 = vweird.f32 %v7046_v40 }
  0xd5   :  { %v7432_v19 = vmul.f32 %v7288_v25, %v7288_v25  ;;  %v6044_v57 = vmin.u32 %v105_v2, %v7409_v28  ;;  %v205_v62 = vadd.s32 1, %v7404_v52  ;;  %vm2930_vm7 = vweird.f32 %v7084_v20  ;;  %v6676_v20 = vld [vmem:[%s12898_s1] sm:$0x1] }
  0xd6   :  { %vm41_vm8 = vcmp.lt.s32.totalorder %v7252_v14, 0  ;;  %v202_v8 = vmul.u32 %v7353_v29, %v186_v60  ;;  %v2962_v48 = vadd.s32 1, %v6293_v15  ;;  %v2832_v58 = vsel %vm2825_vm3, %v2828_v22, %v2831_v0 }
  0xd7   :  { %vm2933_vm4 = vcmp.lt.s32.totalorder %v2932_v24, 2  ;;  %vm7443_vm6 = vcmp.le.f32.partialorder %v39_v7, 0.7853982  ;;  %v107_v34 = vclz %v6044_v57  ;;  %v125_v38 = vsub.s32 4, %v101_v4 }
  0xd8   :  { %vm2934_vm9 = vcmp.eq.s32.totalorder %v2932_v24, 0  ;;  %vm204_vm10 = vc.u32 %v7423_v30, %v7403_v53  ;;  %v2959_v29 = vand.u32 8388607, %v2952_v56  ;;  %vm2963_vm11 = vcmp.gt.s32.totalorder %v2962_v48, 0 }
  0xd9   :  { %vm2937_vm12 = vcmp.eq.s32.totalorder %v2932_v24, 2  ;;  %v6045_v31 = vadd.s32 4294967294, %v107_v34  ;;  %v206_v44 = vsel %vm204_vm10, %v205_v62, %v7404_v52  ;;  %v2964_v17 = vsel %vm2963_vm11, %v2962_v48, 0 }
  0xda   :  { %v2833_v1 = vsel %vm2822_vm5, nan, %v2832_v58  ;;  %v207_v54 = vadd.s32 %v206_v44, %v202_v8  ;;  %v2966_v51 = vand.u32 31, %v2964_v17  ;;  %v95_v59 = vadd.s32 %v7349_v13, %v7345_v49 }
  0xdb   :  { %v6649_v43 = vpop.eup %6648  ;;  %vm6046_vm13 = vcmp.lt.s32.totalorder %v6045_v31, 0  ;;  %v7458_v27 = vsel %vm41_vm8, %v125_v38, %v101_v4  ;;  %v2960_v45 = vor.u32 8388608, %v2959_v29  ;;  %v1822_v13 = vstv %s7439_s0 }
  0xdc   :  { %v6651_v7 = vpop.eup %6650  ;;  %v2938_v36 = vxor.u32 2147483648, %v6649_v43  ;;  %v110_v9 = vsel %vm6046_vm13, 0, %v6045_v31  ;;  %v208_v5 = vadd.s32 536870912, %v207_v54  ;;  %v2967_v49 = vsub.s32 32, %v2966_v51 }
  0xdd   :  { %v2935_v55 = vxor.u32 2147483648, %v6651_v7  ;;  %v111_v52 = vsub.s32 32, %v110_v9  ;;  %v112_v42 = vshll.u32 %v7409_v28, %v110_v9  ;;  %v115_v11 = vsub.s32 4294967266, %v110_v9 }
  0xde   :  { %v2939_v26 = vsel %vm2937_vm12, %v2938_v36, %v6651_v7  ;;  %v7463_v2 = vshrl.u32 %v208_v5, 30  ;;  %v2834_v60 = vmul.f32 %v2833_v1, %v2833_v1  ;;  %v128_v15 = vsel %vm7443_vm6, 0, %v7458_v27 }
  0xdf   :  { %v2936_v40 = vsel %vm2934_vm9, %v6649_v43, %v2935_v55  ;;  %v113_v21 = vshrl.u32 %v95_v59, %v111_v52  ;;  %v116_v22 = vadd.s32 127, %v115_v11  ;;  %v7472_v57 = vshll.u32 %v2960_v45, 8 }
  0xe0   :  { %v2940_v47 = vsel %vm2933_vm4, %v2936_v40, %v2939_v26  ;;  %v210_v28 = vshll.u32 %v7463_v2, 30  ;;  %v7474_v8 = vshrl.u32 %v2964_v17, 5  ;;  %v1823_v48 = vadd.f32 %v6676_v20, %v1822_v13 }
  0xe1   :  { %v2941_v4 = vsel %vm2930_vm7, nan, %v2940_v47  ;;  %v114_v24 = vor.u32 %v113_v21, %v112_v42  ;;  %v117_v62 = vshll.u32 %v116_v22, 23  ;;  %v2969_v38 = vshll.u32 %v6702_v33, %v2966_v51 }
  0xe2   :  { %v2942_v0 = vmul.f32 %v2941_v4, %v2941_v4  ;;  %v7479_v34 = vsub.s32 %v207_v54, %v210_v28  ;;  %v2970_v29 = vshrl.u32 %v6703_v35, %v2967_v49  ;;  %v2972_v44 = vshll.u32 %v6703_v35, %v2966_v51 }
  0xe3   :  { %v118_v43 = vor.u32 4788187, %v117_v62  ;;  %v121_v31 = vcvt.s32.f32 %v114_v24  ;;  %v2973_v7 = vshrl.u32 %v6704_v37, %v2967_v49  ;;  %v2975_v36 = vshll.u32 %v6704_v37, %v2966_v51 }
  0xe4   :  { %v2943_v58 = vadd.f32 1.0, %v2942_v0  ;;  %v213_v1 = vsub.s32 0, %v7479_v34  ;;  %v2976_v55 = vshrl.u32 %v6705_v39, %v2967_v49  ;;  %v2978_v59 = vshll.u32 %v6705_v39, %v2966_v51 }
  0xe5   :  { %v119_v54 = vand.u32 2147483647, %v118_v43  ;;  %v2979_v26 = vshrl.u32 %v12905_v41, %v2967_v49  ;;  %v2981_v9 = vshll.u32 %v12905_v41, %v2966_v51  ;;  %v203_v45 = vadd.s32 %v7403_v53, %v7423_v30 }
  0xe6   :  { %v2944_v17 = vmul.f32 %v2943_v58, %v7432_v19  ;;  %v6049_v40 = vmin.u32 %v213_v1, %v7479_v34  ;;  %v7495_v19 = vmul.f32 0.7, %v1823_v48  ;;  %v2968_v42 = vshrl.u32 %v6702_v33, %v2967_v49 }
  0xe7   :  { %v122_v52 = vmul.f32 %v121_v31, %v119_v54  ;;  %v2971_v11 = vor.u32 %v2970_v29, %v2969_v38  ;;  %v2982_v47 = vshrl.u32 %v12904_v50, %v2967_v49  ;;  %v2974_v21 = vor.u32 %v2973_v7, %v2972_v44 }
  0xe8   :  { %v2945_v5 = vadd.f32 %v2944_v17, %v2834_v60  ;;  %v215_v4 = vclz %v6049_v40  ;;  %v2977_v22 = vor.u32 %v2976_v55, %v2975_v36  ;;  %v2980_v51 = vor.u32 %v2979_v26, %v2978_v59 }
  0xe9   :  { %v123_v0 = vxor.u32 2147483648, %v122_v52  ;;  %v2983_v60 = vor.u32 %v2982_v47, %v2981_v9  ;;  %vm2984_vm14 = vcmp.lt.s32.totalorder %v7474_v8, 1  ;;  %vm2985_vm15 = vcmp.lt.s32.totalorder %v7474_v8, 2 }
  0xea   :  { %v2946_v13 = vmul.f32 0.1, %v2945_v5  ;;  %v6050_v30 = vadd.s32 4294967294, %v215_v4  ;;  %vm2987_vm0 = vcmp.lt.s32.totalorder %v7474_v8, 4  ;;  %vm2986_vm1 = vcmp.lt.s32.totalorder %v7474_v8, 3 }
  0xeb   :  { %v124_v28 = vsel %vm41_vm8, %v123_v0, %v122_v52  ;;  %v2988_v24 = vsel %vm2984_vm14, %v2968_v42, %v2971_v11  ;;  %v2989_v62 = vsel %vm2987_vm0, %v2977_v22, 2102212464  ;;  %v2992_v58 = vsel %vm2984_vm14, %v2971_v11, %v2974_v21 }
  0xec   :  { %v2947_v53 = vsub.f32 %v2946_v13, %v6757_v23  ;;  %v127_v48 = vsel %vm7443_vm6, %v7252_v14, %v124_v28  ;;  %vm6051_vm2 = vcmp.lt.s32.totalorder %v6050_v30, 0  ;;  %v2990_v29 = vsel %vm2986_vm1, %v2974_v21, %v2989_v62 }
  0xed   :  { %6652 = vcosq.f32 %v127_v48  ;;  %v218_v38 = vsel %vm6051_vm2, 0, %v6050_v30  ;;  %v2993_v43 = vsel %vm2987_vm0, %v2980_v51, 920167782  ;;  %v1826_v7 = vmul.f32 1.4285715, %v7495_v19 }
  0xee   :  { %v7512_v20 = vsub.f32 0.0, %v2947_v53  ;;  %6654 = vsinq.f32 %v127_v48  ;;  %v219_v31 = vsub.s32 32, %v218_v38  ;;  %v220_v44 = vshll.u32 %v7479_v34, %v218_v38 }
  0xef   :  { %v7505_v49 = vpop.trf.xlu0  ;;  %v223_v17 = vsub.s32 4294967266, %v218_v38  ;;  %v2994_v36 = vsel %vm2986_vm1, %v2977_v22, %v2993_v43  ;;  %v2996_v55 = vsel %vm2984_vm14, %v2974_v21, %v2977_v22  ;;  %v2997_v54 = vsel %vm2987_vm0, %v2983_v60, 1326507024 }
  0xf0   :  { %13172 = vst [vmem:[#allocation10_spill] sm:$0xff] %v7512_v20  ;;  %3060 = vxpose.xlu1.b32.start.end [1/1] (short) %v7512_v20, 128  ;;  %v221_v59 = vshrl.u32 %v203_v45, %v219_v31  ;;  %v2991_v26 = vsel %vm2985_vm15, %v2988_v24, %v2990_v29  ;;  %v2995_v34 = vsel %vm2985_vm15, %v2992_v58, %v2994_v36  ;;  %v1827_v13 = vmul.f32 20.0, %v1826_v7 }
  0xf1   :  { %v2998_v9 = vsel %vm2986_vm1, %v2980_v51, %v2997_v54  ;;  %v224_v5 = vadd.s32 127, %v223_v17  ;;  %v7543_v52 = vmul.u32.u64.low %v7472_v57, %v2995_v34  ;;  %v7544_v42 = vmul.u32.u64.high %v7472_v57, %v2995_v34, %v7543_v52 }
  0xf2   :  { %v2999_v40 = vsel %vm2985_vm15, %v2996_v55, %v2998_v9  ;;  %v222_v11 = vor.u32 %v221_v59, %v220_v44  ;;  %v132_v4 = vadd.s32 3, %v128_v15  ;;  %v233_v8 = vsub.s32 4, %v7463_v2 }
  0xf3   :  { %v7526_v1 = vpop.trf.xlu0  ;;  %v7548_v45 = vmul.u32.u64.low %v7472_v57, %v2999_v40  ;;  %v7549_v47 = vmul.u32.u64.high %v7472_v57, %v2999_v40, %v7548_v45  ;;  %v225_v21 = vshll.u32 %v224_v5, 23  ;;  %v3007_v0 = vmul.u32 %v7472_v57, %v2991_v26 }
  0xf4   :  { %v1828_v51 = vadd.f32 -10.0, %v1827_v13  ;;  %v229_v53 = vcvt.s32.f32 %v222_v11  ;;  %v3010_v30 = vadd.s32 1, %v7544_v42  ;;  %vm149_vm3 = vcmp.lt.s32.totalorder %v7280_v63, 0 }
  0xf5   :  { %v226_v60 = vor.u32 4788187, %v225_v21  ;;  %vm3009_vm5 = vc.u32 %v7549_v47, %v7543_v52  ;;  %v7564_v27 = vmul.f32 10.0, %v7495_v19  ;;  %v133_v28 = vand.u32 3, %v132_v4 }
  0xf6   :  { %v6202_v25 = vadd.f32 -1.0, %v1828_v51  ;;  %v234_v57 = vsel %vm149_vm3, %v233_v8, %v7463_v2  ;;  %v3011_v48 = vsel %vm3009_vm5, %v3010_v30, %v7544_v42  ;;  %vm7574_vm7 = vcmp.le.f32.partialorder %v147_v61, 0.7853982 }
  0xf7   :  { %v7556_v22 = vpop.trf.xlu0  ;;  %v6653_v15 = vpop.eup %6652  ;;  %v227_v24 = vand.u32 2147483647, %v226_v60  ;;  %v3012_v38 = vadd.s32 %v3011_v48, %v3007_v0  ;;  %v236_v44 = vsel %vm7574_vm7, 0, %v234_v57  ;;  %v2058_v2 = vand.u32 2139095040, %v7564_v27 }
  0xf8   :  { %v6655_v58 = vpop.eup %6654  ;;  %v1830_v29 = vmul.f32 0.25, %v6202_v25  ;;  %vm134_vm8 = vcmp.lt.s32.totalorder %v133_v28, 2  ;;  %v6047_v36 = vadd.f32 -1.0, %v7239_v46  ;;  %v6292_v54 = vadd.f32 -0.35, %v6757_v23 }
  0xf9   :  { %v230_v31 = vmul.f32 %v229_v53, %v227_v24  ;;  %v3013_v7 = vadd.s32 536870912, %v3012_v38  ;;  %v136_v61 = vxor.u32 2147483648, %v6655_v58  ;;  %v139_v26 = vxor.u32 2147483648, %v6653_v15 }
  0xfa   :  { %v7580_v17 = vadd.f32 1.0, %v1830_v29  ;;  %vm135_vm4 = vcmp.eq.s32.totalorder %v133_v28, 0  ;;  %vm138_vm6 = vcmp.eq.s32.totalorder %v133_v28, 2  ;;  %v240_v40 = vadd.s32 3, %v236_v44 }
  0xfb   :  { %v7569_v62 = vpop.trf.xlu0  ;;  %v231_v55 = vxor.u32 2147483648, %v230_v31  ;;  %v3014_v34 = vshrl.u32 %v3013_v7, 30  ;;  %v2059_v11 = vshrl.u32 %v2058_v2, 23  ;;  %v137_v8 = vsel %vm135_vm4, %v6653_v15, %v136_v61 }
  0xfc   :  { %v7588_v9 = vmul.f32 3.1415927, %v7580_v17  ;;  %v7596_v23 = vmul.f32 6.2831855, %v7580_v17  ;;  %v140_v0 = vsel %vm138_vm6, %v139_v26, %v6655_v58  ;;  %vm131_vm9 = vweird.f32 %v7252_v14 }
  0xfd   :  { %v232_v5 = vsel %vm149_vm3, %v231_v55, %v230_v31  ;;  %v3015_v42 = vshll.u32 %v3014_v34, 30  ;;  %v3038_v45 = vsub.s32 4, %v3014_v34  ;;  %v241_v30 = vand.u32 3, %v240_v40 }
  0xfe   :  { %v235_v46 = vsel %vm7574_vm7, %v7280_v63, %v232_v5  ;;  %v12903_v4 = vand.u32 2147483647, %v7588_v9  ;;  %v1836_v21 = vand.u32 2139095040, %v7588_v9  ;;  %v7607_v25 = vmul.f32 %v6292_v54, %v6292_v54 }
  0xff   :  { %v7585_v59 = vpop.trf.xlu0  ;;  %6656 = vcosq.f32 %v235_v46  ;;  %v7602_v51 = vsub.s32 %v3012_v38, %v3015_v42  ;;  %vm2954_vm10 = vcmp.lt.s32.totalorder %v7291_v12, 0  ;;  %v141_v57 = vsel %vm134_vm8, %v137_v8, %v140_v0 }
 0x100   :  { %6658 = vsinq.f32 %v235_v46  ;;  %v1837_v60 = vshrl.u32 %v1836_v21, 23  ;;  %v1840_v53 = vand.u32 8388607, %v12903_v4  ;;  %v3039_v15 = vsel %vm2954_vm10, %v3038_v45, %v3014_v34 }
 0x101   :  { %v3018_v24 = vsub.s32 0, %v7602_v51  ;;  %v1944_v58 = vand.u32 2139095040, %v7596_v23  ;;  %v7615_v38 = vmul.f32 %v6047_v36, %v6047_v36  ;;  %vm239_vm11 = vweird.f32 %v7280_v63 }
 0x102   :  { %v6203_v48 = vadd.s32 4294967169, %v1837_v60  ;;  %v6213_v31 = vadd.s32 4294967169, %v2059_v11  ;;  %vm7623_vm12 = vcmp.le.f32.partialorder %v2952_v56, 0.7853982  ;;  %v1841_v44 = vor.u32 8388608, %v1840_v53 }
 0x103   :  { %v7598_v13 = vpop.trf.xlu0  ;;  %v6294_v29 = vmin.u32 %v3018_v24, %v7602_v51  ;;  %v1945_v2 = vshrl.u32 %v1944_v58, 23  ;;  %v142_v36 = vsel %vm131_vm9, nan, %v141_v57  ;;  %vm242_vm13 = vcmp.lt.s32.totalorder %v241_v30, 2 }
 0x104   :  { %v1843_v7 = vadd.s32 1, %v6203_v48  ;;  %v3041_v54 = vsel %vm7623_vm12, 0, %v3039_v15  ;;  %vm243_vm14 = vcmp.eq.s32.totalorder %v241_v30, 0  ;;  %vm246_vm15 = vcmp.eq.s32.totalorder %v241_v30, 2 }
 0x105   :  { %v3020_v55 = vclz %v6294_v29  ;;  %v6208_v61 = vadd.s32 4294967169, %v1945_v2  ;;  %v3008_v56 = vadd.s32 %v7543_v52, %v7549_v47  ;;  %v7633_v5 = vadd.s32 1, %v6213_v31 }
 0x106   :  { %vm1844_vm0 = vcmp.gt.s32.totalorder %v1843_v7, 0  ;;  %v143_v46 = vmul.f32 %v142_v36, %v142_v36  ;;  %v7635_v14 = vadd.s32 3, %v3041_v54  ;;  %v7637_v11 = vshll.u32 %v1841_v44, 8 }
 0x107   :  { %v7619_v43 = vpop.trf.xlu0  ;;  %v6295_v26 = vadd.s32 4294967294, %v3020_v55  ;;  %v1845_v34 = vsel %vm1844_vm0, %v1843_v7, 0  ;;  %v7641_v60 = vadd.s32 1, %v6208_v61  ;;  %vm2066_vm6 = vcmp.gt.s32.totalorder %v7633_v5, 0 }
 0x108   :  { %v1847_v42 = vand.u32 31, %v1845_v34  ;;  %v1846_v0 = vshrl.u32 %v1845_v34, 5 }
 0x109   :  { %v6657_v40 = vpop.eup %6656  ;;  %vm6296_vm1 = vcmp.lt.s32.totalorder %v6295_v26, 0  ;;  %vm1952_vm8 = vcmp.gt.s32.totalorder %v7641_v60, 0 }
 0x10a   :  { %v6659_v45 = vpop.eup %6658  ;;  %v247_v21 = vxor.u32 2147483648, %v6657_v40  ;;  %v3023_v47 = vsel %vm6296_vm1, 0, %v6295_v26  ;;  %v1848_v53 = vsub.s32 32, %v1847_v42  ;;  %v1850_v24 = vshll.u32 %v6702_v33, %v1847_v42 }
 0x10b   :  { %v7639_v8 = vpop.trf.xlu0  ;;  %v244_v52 = vxor.u32 2147483648, %v6659_v45  ;;  %v3024_v15 = vsub.s32 32, %v3023_v47  ;;  %v3025_v48 = vshll.u32 %v7602_v51, %v3023_v47  ;;  %v3028_v58 = vsub.s32 4294967266, %v3023_v47 }
 0x10c   :  { %v248_v57 = vsel %vm246_vm15, %v247_v21, %v6659_v45  ;;  %v1849_v31 = vshrl.u32 %v6702_v33, %v1848_v53  ;;  %v1851_v44 = vshrl.u32 %v6703_v35, %v1848_v53  ;;  %v1853_v7 = vshll.u32 %v6703_v35, %v1847_v42 }
 0x10d   :  { %v245_v29 = vsel %vm243_vm14, %v6657_v40, %v244_v52  ;;  %v3026_v36 = vshrl.u32 %v3008_v56, %v3024_v15  ;;  %v3029_v55 = vadd.s32 127, %v3028_v58  ;;  %v1854_v54 = vshrl.u32 %v6704_v37, %v1848_v53 }
 0x10e   :  { %v249_v2 = vsel %vm242_vm13, %v245_v29, %v248_v57  ;;  %v1852_v26 = vor.u32 %v1851_v44, %v1850_v24  ;;  %v1856_v51 = vshll.u32 %v6704_v37, %v1847_v42  ;;  %v1857_v34 = vshrl.u32 %v6705_v39, %v1848_v53 }
 0x10f   :  { %v250_v61 = vsel %vm239_vm11, nan, %v249_v2  ;;  %v3027_v45 = vor.u32 %v3026_v36, %v3025_v48  ;;  %v3030_v21 = vshll.u32 %v3029_v55, 23  ;;  %v7656_v52 = vpop.trf.xlu0  ;;  %v1855_v47 = vor.u32 %v1854_v54, %v1853_v7 }
 0x110   :  { %v251_v40 = vmul.f32 %v250_v61, %v250_v61  ;;  %v1858_v30 = vor.u32 %v1857_v34, %v1856_v51  ;;  %v1859_v56 = vshll.u32 %v6705_v39, %v1847_v42  ;;  %v1860_v57 = vshrl.u32 %v12905_v41, %v1848_v53 }
 0x111   :  { %v1862_v15 = vshll.u32 %v12905_v41, %v1847_v42  ;;  %v3031_v58 = vor.u32 4788187, %v3030_v21  ;;  %v3034_v24 = vcvt.s32.f32 %v3027_v45  ;;  %v1863_v29 = vshrl.u32 %v12904_v50, %v1848_v53 }
 0x112   :  { %v252_v63 = vadd.f32 1.0, %v251_v40  ;;  %v1861_v44 = vor.u32 %v1860_v57, %v1859_v56  ;;  %vm1865_vm2 = vcmp.lt.s32.totalorder %v1846_v0, 1  ;;  %vm1866_vm3 = vcmp.lt.s32.totalorder %v1846_v0, 2 }
 0x113   :  { %vm1867_vm5 = vcmp.lt.s32.totalorder %v1846_v0, 3  ;;  %v3032_v2 = vand.u32 2147483647, %v3031_v58  ;;  %v1864_v7 = vor.u32 %v1863_v29, %v1862_v15  ;;  %vm1868_vm7 = vcmp.lt.s32.totalorder %v1846_v0, 4  ;;  %v7665_v34 = vpop.trf.xlu0 }
 0x114   :  { %v253_v48 = vmul.f32 %v252_v63, %v7615_v38  ;;  %v1869_v36 = vsel %vm1865_vm2, %v1849_v31, %v1852_v26  ;;  %v1870_v55 = vsel %vm1868_vm7, %v1858_v30, 2102212464  ;;  %v1873_v54 = vsel %vm1865_vm2, %v1852_v26, %v1855_v47 }
 0x115   :  { %v1874_v42 = vsel %vm1868_vm7, %v1861_v44, 920167782  ;;  %v3035_v51 = vmul.f32 %v3034_v24, %v3032_v2  ;;  %v1871_v53 = vsel %vm1867_vm5, %v1855_v47, %v1870_v55  ;;  %v1877_v38 = vsel %vm1865_vm2, %v1855_v47, %v1858_v30 }
 0x116   :  { %v254_v61 = vadd.f32 %v253_v48, %v143_v46  ;;  %v1875_v40 = vsel %vm1867_vm5, %v1858_v30, %v1874_v42  ;;  %v1878_v21 = vsel %vm1868_vm7, %v1864_v7, 1326507024  ;;  %v12902_v56 = vand.u32 2147483647, %v7596_v23 }
 0x117   :  { %v1876_v45 = vsel %vm1866_vm3, %v1873_v54, %v1875_v40  ;;  %v3036_v57 = vxor.u32 2147483648, %v3035_v51  ;;  %v1872_v26 = vsel %vm1866_vm3, %v1869_v36, %v1871_v53  ;;  %v1879_v46 = vsel %vm1867_vm5, %v1861_v44, %v1878_v21  ;;  %v7699_v7 = vpop.trf.xlu0 }
 0x118   :  { %v255_v31 = vmul.f32 0.1, %v254_v61  ;;  %v1880_v15 = vsel %vm1866_vm3, %v1877_v38, %v1879_v46  ;;  %v7676_v63 = vmul.u32.u64.low %v7637_v11, %v1876_v45  ;;  %v7677_v58 = vmul.u32.u64.high %v7637_v11, %v1876_v45, %v7676_v63 }
 0x119   :  { %v3037_v30 = vsel %vm2954_vm10, %v3036_v57, %v3035_v51  ;;  %v7685_v24 = vmul.u32.u64.low %v7637_v11, %v1880_v15  ;;  %v7686_v29 = vmul.u32.u64.high %v7637_v11, %v1880_v15, %v7685_v24  ;;  %v7692_v44 = vand.u32 3, %v7635_v14 }
 0x11a   :  { %v256_v47 = vsub.f32 %v255_v31, %v6741_v3  ;;  %v3040_v0 = vsel %vm7623_vm12, %v7291_v12, %v3037_v30  ;;  %v1948_v48 = vand.u32 8388607, %v12902_v56  ;;  %v1953_v2 = vsel %vm1952_vm8, %v7641_v60, 0 }
 0x11b   :  { %6660 = vcosq.f32 %v3040_v0  ;;  %v1888_v36 = vmul.u32 %v7637_v11, %v1872_v26  ;;  %v1955_v55 = vand.u32 31, %v1953_v2  ;;  %v7703_v54 = vmul.f32 3.0, %v7607_v25 }
 0x11c   :  { %v7697_v3 = vsub.f32 0.0, %v256_v47  ;;  %6662 = vsinq.f32 %v3040_v0  ;;  %v1891_v14 = vadd.s32 1, %v7677_v58  ;;  %v12907_v42 = vand.u32 2147483647, %v7564_v27 }
 0x11d   :  { %vm1890_vm4 = vc.u32 %v7686_v29, %v7676_v63  ;;  %v7712_v60 = vshrl.u32 %v1953_v2, 5  ;;  %v1956_v61 = vsub.s32 32, %v1955_v55  ;;  %vm3048_vm9 = vcmp.eq.s32.totalorder %v7692_v44, 0 }
 0x11e   :  { %13177 = vst [vmem:[#allocation11_spill] sm:$0xff] %v7697_v3  ;;  %369 = vxpose.xlu0.b32.start.end [1/1] (short) %v7697_v3, 128  ;;  %v1892_v25 = vsel %vm1890_vm4, %v1891_v14, %v7677_v58  ;;  %v1958_v11 = vshll.u32 %v6702_v33, %v1955_v55  ;;  %v1961_v51 = vshll.u32 %v6703_v35, %v1955_v55  ;;  %v1949_v45 = vor.u32 8388608, %v1948_v48  ;;  %v7729_v58 = vpop.trf.xlu0 }
 0x11f   :  { %v1964_v53 = vshll.u32 %v6704_v37, %v1955_v55  ;;  %v1893_v40 = vadd.s32 %v1892_v25, %v1888_v36  ;;  %v1959_v38 = vshrl.u32 %v6703_v35, %v1956_v61  ;;  %v1962_v21 = vshrl.u32 %v6704_v37, %v1956_v61 }
 0x120   :  { %v7705_v28 = vpop.trf.xlu1  ;;  %vm3044_vm10 = vweird.f32 %v7291_v12  ;;  %v1965_v57 = vshrl.u32 %v6705_v39, %v1956_v61  ;;  %v1967_v26 = vshll.u32 %v6705_v39, %v1955_v55  ;;  %v1968_v46 = vshrl.u32 %v12905_v41, %v1956_v61 }
 0x121   :  { %v1970_v15 = vshll.u32 %v12905_v41, %v1955_v55  ;;  %v1894_v47 = vadd.s32 536870912, %v1893_v40  ;;  %v1960_v30 = vor.u32 %v1959_v38, %v1958_v11  ;;  %v1971_v24 = vshrl.u32 %v12904_v50, %v1956_v61 }
 0x122   :  { %v2067_v0 = vsel %vm2066_vm6, %v7633_v5, 0  ;;  %v1963_v48 = vor.u32 %v1962_v21, %v1961_v51  ;;  %v1966_v2 = vor.u32 %v1965_v57, %v1964_v53  ;;  %v1969_v36 = vor.u32 %v1968_v46, %v1967_v26  ;;  %v7757_v18 = vpop.trf.xlu0 }
 0x123   :  { %vm1973_vm11 = vcmp.lt.s32.totalorder %v7712_v60, 1  ;;  %v7736_v14 = vshrl.u32 %v1894_v47, 30  ;;  %v1972_v25 = vor.u32 %v1971_v24, %v1970_v15  ;;  %vm1975_vm12 = vcmp.lt.s32.totalorder %v7712_v60, 3 }
 0x124   :  { %v7723_v31 = vpop.trf.xlu1  ;;  %vm1976_vm13 = vcmp.lt.s32.totalorder %v7712_v60, 4  ;;  %vm3051_vm14 = vcmp.eq.s32.totalorder %v7692_v44, 2  ;;  %v1957_v11 = vshrl.u32 %v6702_v33, %v1956_v61  ;;  %v2069_v51 = vand.u32 31, %v2067_v0 }
 0x125   :  { %v1982_v5 = vsel %vm1976_vm13, %v1969_v36, 920167782  ;;  %v6661_v53 = vpop.eup %6660  ;;  %v1896_v38 = vshll.u32 %v7736_v14, 30  ;;  %vm1974_vm15 = vcmp.lt.s32.totalorder %v7712_v60, 2  ;;  %v1978_v21 = vsel %vm1976_vm13, %v1966_v2, 2102212464 }
 0x126   :  { %v1989_v57 = vshll.u32 %v1949_v45, 8  ;;  %v6663_v26 = vpop.eup %6662  ;;  %v3052_v46 = vxor.u32 2147483648, %v6661_v53  ;;  %v1981_v15 = vsel %vm1973_vm11, %v1960_v30, %v1963_v48  ;;  %v1983_v61 = vsel %vm1975_vm12, %v1966_v2, %v1982_v5 }
 0x127   :  { %v1985_v47 = vsel %vm1973_vm11, %v1963_v48, %v1966_v2  ;;  %vm3047_vm0 = vcmp.lt.s32.totalorder %v7692_v44, 2  ;;  %v3049_v24 = vxor.u32 2147483648, %v6663_v26  ;;  %v7759_v10 = vsub.s32 %v1893_v40, %v1896_v38 }
 0x128   :  { %v7741_v55 = vpop.trf.xlu1  ;;  %v1986_v45 = vsel %vm1976_vm13, %v1972_v25, 1326507024  ;;  %v3053_v56 = vsel %vm3051_vm14, %v3052_v46, %v6663_v26  ;;  %v1977_v5 = vsel %vm1973_vm11, %v1957_v11, %v1960_v30  ;;  %v1979_v2 = vsel %vm1975_vm12, %v1963_v48, %v1978_v21 }
 0x129   :  { %v1987_v50 = vsel %vm1975_vm12, %v1969_v36, %v1986_v45  ;;  %v3050_v40 = vsel %vm3048_vm9, %v6661_v53, %v3049_v24  ;;  %v1899_v38 = vsub.s32 0, %v7759_v10  ;;  %v1984_v25 = vsel %vm1974_vm15, %v1981_v15, %v1983_v61 }
 0x12a   :  { %v1988_v26 = vsel %vm1974_vm15, %v1985_v47, %v1987_v50  ;;  %v3054_v46 = vsel %vm3047_vm0, %v3050_v40, %v3053_v56  ;;  %v2070_v11 = vsub.s32 32, %v2069_v51  ;;  %v1980_v44 = vsel %vm1974_vm15, %v1977_v5, %v1979_v2  ;;  %v7794_v50 = vpop.trf.xlu0 }
 0x12b   :  { %v7780_v41 = vmul.u32.u64.low %v1989_v57, %v1988_v26  ;;  %v7781_v30 = vmul.u32.u64.high %v1989_v57, %v1988_v26, %v7780_v41  ;;  %v3055_v48 = vsel %vm3044_vm10, nan, %v3054_v46  ;;  %v6204_v36 = vmin.u32 %v1899_v38, %v7759_v10 }
 0x12c   :  { %v7765_v4 = vpop.trf.xlu1  ;;  %v3056_v53 = vmul.f32 0.5, %v3055_v48  ;;  %v7790_v15 = vmul.u32.u64.low %v1989_v57, %v1984_v25  ;;  %v7791_v61 = vmul.u32.u64.high %v1989_v57, %v1984_v25, %v7790_v15  ;;  %v2062_v41 = vand.u32 8388607, %v12907_v42 }
 0x12d   :  { %v1901_v56 = vclz %v6204_v36  ;;  %v7798_v12 = vshrl.u32 %v2067_v0, 5  ;;  %v2072_v47 = vshll.u32 %v6702_v33, %v2069_v51  ;;  %v1996_v24 = vmul.u32 %v1989_v57, %v1980_v44 }
 0x12e   :  { %v7802_v60 = vadd.f32 %v3056_v53, %v7703_v54  ;;  %vm1998_vm1 = vc.u32 %v7781_v30, %v7790_v15  ;;  %v2073_v45 = vshrl.u32 %v6703_v35, %v2070_v11  ;;  %v2075_v2 = vshll.u32 %v6703_v35, %v2069_v51 }
 0x12f   :  { %v6205_v5 = vadd.s32 4294967294, %v1901_v56  ;;  %v2076_v40 = vshrl.u32 %v6704_v37, %v2070_v11  ;;  %v2078_v38 = vshll.u32 %v6704_v37, %v2069_v51  ;;  %v1999_v54 = vadd.s32 1, %v7791_v61  ;;  %v7827_v56 = vpop.trf.xlu0 }
 0x130   :  { %v7788_v21 = vpop.trf.xlu1  ;;  %13178 = vst [vmem:[#allocation12_spill] sm:$0xff] %v7802_v60  ;;  %v12912_v0 = vsub.f32 0.0, %v7802_v60  ;;  %v2079_v57 = vshrl.u32 %v6705_v39, %v2070_v11  ;;  %v2081_v26 = vshll.u32 %v6705_v39, %v2069_v51  ;;  %v1889_v46 = vadd.s32 %v7676_v63, %v7686_v29 }
 0x131   :  { %vm6206_vm2 = vcmp.lt.s32.totalorder %v6205_v5, 0  ;;  %v2071_v35 = vshrl.u32 %v6702_v33, %v2070_v11  ;;  %v13180_v48 = vmov 920167782   ;;  %v2000_v44 = vsel %vm1998_vm1, %v1999_v54, %v7791_v61 }
 0x132   :  { %v2082_v36 = vshrl.u32 %v13180_v48, %v2070_v11  ;;  %3092 = vxpose.xlu1.b32.start.end [1/1] (short) %v12912_v0, 128  ;;  %v1904_v37 = vsel %vm6206_vm2, 0, %v6205_v5  ;;  %v2074_v53 = vor.u32 %v2073_v45, %v2072_v47  ;;  %v2084_v39 = vshll.u32 %v13180_v48, %v2069_v51 }
 0x133   :  { %v1905_v63 = vsub.s32 32, %v1904_v37  ;;  %v1909_v29 = vsub.s32 4294967266, %v1904_v37  ;;  %v2001_v42 = vadd.s32 %v2000_v44, %v1996_v24  ;;  %v2077_v33 = vor.u32 %v2076_v40, %v2075_v2 }
 0x134   :  { %v7811_v25 = vpop.trf.xlu1  ;;  %v1906_v20 = vshll.u32 %v7759_v10, %v1904_v37  ;;  %v2080_v0 = vor.u32 %v2079_v57, %v2078_v38  ;;  %v2083_v5 = vor.u32 %v2082_v36, %v2081_v26  ;;  %v13181_v60 = vmov 1326507024  }
 0x135   :  { %13179 = vst [vmem:[#allocation13_spill] sm:$0xff] %v7811_v25  ;;  %v2085_v16 = vshrl.u32 %v13181_v60, %v2070_v11  ;;  %v1907_v3 = vshrl.u32 %v1889_v46, %v1905_v63  ;;  %v1910_v25 = vadd.s32 127, %v1909_v29  ;;  %v2002_v61 = vadd.s32 536870912, %v2001_v42 }
 0x136   :  { %vm2087_vm3 = vcmp.lt.s32.totalorder %v7798_v12, 1  ;;  %v2063_v51 = vor.u32 8388608, %v2062_v41  ;;  %vm2088_vm5 = vcmp.lt.s32.totalorder %v7798_v12, 2  ;;  %vm2090_vm7 = vcmp.lt.s32.totalorder %v7798_v12, 4 }
 0x137   :  { %v2086_v47 = vor.u32 %v2085_v16, %v2084_v39  ;;  %v1911_v24 = vshll.u32 %v1910_v25, 23  ;;  %v7836_v45 = vshrl.u32 %v2002_v61, 30  ;;  %vm2089_vm8 = vcmp.lt.s32.totalorder %v7798_v12, 3  ;;  %v7846_v25 = vpop.trf.xlu0 }
 0x138   :  { %v7830_v32 = vpop.trf.xlu1  ;;  %v2092_v10 = vsel %vm2090_vm7, %v2080_v0, 2102212464  ;;  %v2091_v11 = vsel %vm2087_vm3, %v2071_v35, %v2074_v53  ;;  %v2095_v60 = vsel %vm2087_vm3, %v2074_v53, %v2077_v33  ;;  %v2096_v41 = vsel %vm2090_vm7, %v2083_v5, 920167782 }
 0x139   :  { %v2100_v16 = vsel %vm2090_vm7, %v2086_v47, 1326507024  ;;  %v1908_v40 = vor.u32 %v1907_v3, %v1906_v20  ;;  %v1912_v38 = vor.u32 4788187, %v1911_v24  ;;  %v2004_v54 = vshll.u32 %v7836_v45, 30 }
 0x13a   :  { %v2099_v57 = vsel %vm2087_vm3, %v2077_v33, %v2080_v0  ;;  %v2093_v26 = vsel %vm2089_vm8, %v2077_v33, %v2092_v10  ;;  %v2097_v46 = vsel %vm2089_vm8, %v2080_v0, %v2096_v41  ;;  %v2101_v48 = vsel %vm2089_vm8, %v2083_v5, %v2100_v16 }
 0x13b   :  { %v2103_v36 = vshll.u32 %v2063_v51, 8  ;;  %v2005_v37 = vsub.s32 %v2001_v42, %v2004_v54  ;;  %v2098_v35 = vsel %vm2088_vm5, %v2095_v60, %v2097_v46  ;;  %v2102_v44 = vsel %vm2088_vm5, %v2099_v57, %v2101_v48  ;;  %v7865_v61 = vpop.trf.xlu0 }
 0x13c   :  { %v7839_v2 = vpop.trf.xlu1  ;;  %v1913_v53 = vand.u32 2147483647, %v1912_v38  ;;  %v1915_v39 = vcvt.s32.f32 %v1908_v40  ;;  %v2094_v0 = vsel %vm2088_vm5, %v2091_v11, %v2093_v26  ;;  %v1997_v40 = vadd.s32 %v7790_v15, %v7781_v30 }
 0x13d   :  { %13182 = vst [vmem:[#allocation14_spill] sm:$0xff] %v7839_v2  ;;  %v7854_v20 = vmul.u32.u64.low %v2103_v36, %v2098_v35  ;;  %v7855_v3 = vmul.u32.u64.high %v2103_v36, %v2098_v35, %v7854_v20  ;;  %v2007_v63 = vsub.s32 0, %v2005_v37  ;;  %v2110_v51 = vmul.u32 %v2103_v36, %v2094_v0 }
 0x13e   :  { %v7862_v33 = vmul.u32.u64.low %v2103_v36, %v2102_v44  ;;  %v7863_v42 = vmul.u32.u64.high %v2103_v36, %v2102_v44, %v7862_v33  ;;  %v1916_v24 = vmul.f32 %v1915_v39, %v1913_v53  ;;  %vm1835_vm9 = vcmp.lt.s32.totalorder %v7588_v9, 0 }
 0x13f   :  { %v6209_v5 = vmin.u32 %v2007_v63, %v2005_v37  ;;  %v2113_v47 = vadd.s32 1, %v7855_v3  ;;  %v7875_v38 = vpop.trf.xlu0  ;;  %v13184_v35 = vand.u32 2147483647, %v7588_v9  ;;  %vm1943_vm11 = vcmp.lt.s32.totalorder %v7596_v23, 0 }
 0x140   :  { %v7858_v29 = vpop.trf.xlu1  ;;  %vm2112_vm4 = vc.u32 %v7863_v42, %v7854_v20  ;;  %v1917_v16 = vxor.u32 2147483648, %v1916_v24  ;;  %vm1925_vm2 = vweird.f32 %v7588_v9  ;;  %vm2033_vm5 = vweird.f32 %v7596_v23 }
 0x141   :  { %v2009_v10 = vclz %v6209_v5  ;;  %v2114_v12 = vsel %vm2112_vm4, %v2113_v47, %v7855_v3  ;;  %vm7882_vm10 = vcmp.le.f32.partialorder %v13184_v35, 0.7853982  ;;  %vm2057_vm8 = vcmp.lt.s32.totalorder %v7564_v27, 0 }
 0x142   :  { %v2115_v11 = vadd.s32 %v2114_v12, %v2110_v51  ;;  %v1918_v30 = vsel %vm1835_vm9, %v1917_v16, %v1916_v24  ;;  %v12917_v16 = vmov 0  }
 0x143   :  { %v6210_v60 = vadd.s32 4294967294, %v2009_v10  ;;  %v7890_v0 = vpop.trf.xlu0  ;;  %v1921_v33 = vsel %vm7882_vm10, %v7588_v9, %v1918_v30  ;;  %v2027_v10 = vsub.s32 4, %v7836_v45 }
 0x144   :  { %v7870_v41 = vpop.trf.xlu1  ;;  %v2116_v57 = vadd.s32 536870912, %v2115_v11  ;;  %6664 = vcosq.f32 %v1921_v33 }
 0x145   :  { %13183 = vst [vmem:[#allocation15_spill] sm:$0xff] %v7870_v41  ;;  %vm6211_vm6 = vcmp.lt.s32.totalorder %v6210_v60, 0  ;;  %6666 = vsinq.f32 %v1921_v33 }
 0x146   :  { %v2012_v54 = vsel %vm6211_vm6, 0, %v6210_v60  ;;  %v7878_v36 = vshrl.u32 %v2116_v57, 30 }
 0x147   :  { %v2013_v26 = vsub.s32 32, %v2012_v54  ;;  %v2014_v46 = vshll.u32 %v2005_v37, %v2012_v54  ;;  %v2017_v48 = vsub.s32 4294967266, %v2012_v54  ;;  %v1919_v37 = vsub.s32 4, %v7736_v14  ;;  %v7906_v57 = vpop.trf.xlu0 }
 0x148   :  { %v7888_v53 = vpop.trf.xlu1  ;;  %v2118_v5 = vshll.u32 %v7878_v36, 30 }
 0x149   :  { %v2015_v15 = vshrl.u32 %v1997_v40, %v2013_v26  ;;  %v2018_v3 = vadd.s32 127, %v2017_v48  ;;  %v1920_v12 = vsel %vm1835_vm9, %v1919_v37, %v7736_v14  ;;  %v2028_v14 = vsel %vm1943_vm11, %v2027_v10, %v7836_v45 }
 0x14a   :  { %v7904_v40 = vsub.s32 %v2115_v11, %v2118_v5  ;;  %v1922_v26 = vsel %vm7882_vm10, 0, %v1920_v12 }
 0x14b   :  { %v2016_v39 = vor.u32 %v2015_v15, %v2014_v46  ;;  %v2019_v63 = vshll.u32 %v2018_v3, 23  ;;  %v13188_v46 = vand.u32 2147483647, %v7596_v23  ;;  %v1926_v11 = vadd.s32 3, %v1922_v26 }
 0x14c   :  { %v7898_v60 = vpop.trf.xlu1  ;;  %v2121_v35 = vsub.s32 0, %v7904_v40 }
 0x14d   :  { %v2020_v51 = vor.u32 4788187, %v2019_v63  ;;  %v2023_v47 = vcvt.s32.f32 %v2016_v39  ;;  %13187 = vst [vmem:[#allocation16_spill] sm:$0xff] %v7898_v60  ;;  %vm1942_vm12 = vcmp.le.f32.partialorder %v13188_v46, 0.7853982  ;;  %v7918_v63 = vpop.trf.xlu0 }
 0x14e   :  { %v2030_v39 = vsel %vm1942_vm12, 0, %v2028_v14  ;;  %v6214_v44 = vmin.u32 %v2121_v35, %v7904_v40  ;;  %v6665_v37 = vpop.eup %6664 }
 0x14f   :  { %v2021_v24 = vand.u32 2147483647, %v2020_v51  ;;  %v2034_v33 = vadd.s32 3, %v2030_v39  ;;  %v6667_v5 = vpop.eup %6666  ;;  %v1927_v51 = vand.u32 3, %v1926_v11  ;;  %v1933_v10 = vxor.u32 2147483648, %v6665_v37 }
 0x150   :  { %6627 = vset.pattern.permute.xlu1 %v12917_v16  ;;  %v7915_v15 = vpop.trf.xlu1 }
 0x151   :  { %v2024_v54 = vmul.f32 %v2023_v47, %v2021_v24  ;;  %v2123_v47 = vclz %v6214_v44  ;;  %v1930_v24 = vxor.u32 2147483648, %v6667_v5  ;;  %v2035_v12 = vand.u32 3, %v2034_v33 }
 0x152   :  { %vm1929_vm13 = vcmp.eq.s32.totalorder %v1927_v51, 0  ;;  %vm1932_vm14 = vcmp.eq.s32.totalorder %v1927_v51, 2  ;;  %vm1928_vm15 = vcmp.lt.s32.totalorder %v1927_v51, 2 }
 0x153   :  { %v2025_v48 = vxor.u32 2147483648, %v2024_v54  ;;  %v6215_v26 = vadd.s32 4294967294, %v2123_v47  ;;  %v1934_v14 = vsel %vm1932_vm14, %v1933_v10, %v6667_v5  ;;  %vm2040_vm0 = vcmp.eq.s32.totalorder %v2035_v12, 2 }
 0x154   :  { %v7921_v45 = vpop.trf.xlu1  ;;  %vm2037_vm1 = vcmp.eq.s32.totalorder %v2035_v12, 0  ;;  %vm2036_vm3 = vcmp.lt.s32.totalorder %v2035_v12, 2 }
 0x155   :  { %v2026_v30 = vsel %vm1943_vm11, %v2025_v48, %v2024_v54  ;;  %13189 = vst [vmem:[#allocation17_spill] sm:$0xff] %v7921_v45  ;;  %v7923_v54 = vpop.trf.xlu0  ;;  %v1931_v48 = vsel %vm1929_vm13, %v6665_v37, %v1930_v24  ;;  %vm6216_vm7 = vcmp.lt.s32.totalorder %v6215_v26, 0  ;;  %vm2147_vm11 = vweird.f32 %v7564_v27 }
 0x156   :  { %v2029_v3 = vsel %vm1942_vm12, %v7596_v23, %v2026_v30  ;;  %v1935_v33 = vsel %vm1928_vm15, %v1931_v48, %v1934_v14  ;;  %v2126_v16 = vsel %vm6216_vm7, 0, %v6215_v26 }
 0x157   :  { %6668 = vcosq.f32 %v2029_v3  ;;  %v1936_v47 = vsel %vm1925_vm2, nan, %v1935_v33  ;;  %v2131_v41 = vsub.s32 4294967266, %v2126_v16  ;;  %v2127_v14 = vsub.s32 32, %v2126_v16 }
 0x158   :  { %6670 = vsinq.f32 %v2029_v3  ;;  %v7925_v35 = vpop.trf.xlu1  ;;  %v6207_v3 = vadd.f32 -1.0, %v7580_v17  ;;  %v1937_v17 = vmul.f32 %v1936_v47, %v1936_v47  ;;  %v2128_v33 = vshll.u32 %v7904_v40, %v2126_v16 }
 0x159   :  { %v7929_v44 = vpop.trf.xlu0 }
 0x15a   :  { %v1939_v45 = vmul.f32 %v6207_v3, %v6207_v3 }
 0x15c   :  { %v7932_v10 = vpop.trf.xlu1 }
 0x15d   :  { %v7934_v60 = vpop.trf.xlu0 }
 0x161   :  { %v6669_v46 = vpop.eup %6668 }
 0x162   :  { %v6671_v30 = vpop.eup %6670  ;;  %v2041_v11 = vxor.u32 2147483648, %v6669_v46 }
 0x163   :  { %v2038_v39 = vxor.u32 2147483648, %v6671_v30 }
 0x164   :  { %v2042_v51 = vsel %vm2040_vm0, %v2041_v11, %v6671_v30  ;;  %v2132_v30 = vadd.s32 127, %v2131_v41  ;;  %v7940_v11 = vpop.trf.xlu0 }
 0x165   :  { %v2039_v37 = vsel %vm2037_vm1, %v6669_v46, %v2038_v39  ;;  %v2111_v46 = vadd.s32 %v7854_v20, %v7863_v42 }
 0x166   :  { %v2043_v5 = vsel %vm2036_vm3, %v2039_v37, %v2042_v51  ;;  %v2133_v37 = vshll.u32 %v2132_v30, 23 }
 0x167   :  { %v2044_v24 = vsel %vm2033_vm5, nan, %v2043_v5  ;;  %v2129_v51 = vshrl.u32 %v2111_v46, %v2127_v14  ;;  %v13192_v14 = vand.u32 2147483647, %v7564_v27 }
 0x168   :  { %v2045_v9 = vmul.f32 %v2044_v24, %v2044_v24  ;;  %v7948_v5 = vpop.trf.xlu0  ;;  %v2134_v42 = vor.u32 4788187, %v2133_v37 }
 0x169   :  { %v2130_v20 = vor.u32 %v2129_v51, %v2128_v33  ;;  %vm7968_vm4 = vcmp.le.f32.partialorder %v13192_v14, 0.7853982  ;;  %v2141_v33 = vsub.s32 4, %v7878_v36 }
 0x16a   :  { %v2046_v12 = vadd.f32 1.0, %v2045_v9  ;;  %v2135_v47 = vand.u32 2147483647, %v2134_v42 }
 0x16b   :  { %v2137_v24 = vcvt.s32.f32 %v2130_v20  ;;  %v2142_v42 = vsel %vm2057_vm8, %v2141_v33, %v7878_v36 }
 0x16c   :  { %v2047_v2 = vmul.f32 %v2046_v12, %v1939_v45  ;;  %v7955_v9 = vpop.trf.xlu0 }
 0x16d   :  { %v2138_v16 = vmul.f32 %v2137_v24, %v2135_v47  ;;  %v2144_v24 = vsel %vm7968_vm4, 0, %v2142_v42 }
 0x16e   :  { %v2048_v23 = vadd.f32 %v2047_v2, %v1937_v17  ;;  %v2148_v14 = vadd.s32 3, %v2144_v24 }
 0x170   :  { %v7936_v48 = vpop.trf.xlu1  ;;  %v2049_v39 = vmul.f32 0.1, %v2048_v23  ;;  %v7959_v40 = vpop.trf.xlu0  ;;  %v2139_v23 = vxor.u32 2147483648, %v2138_v16  ;;  %v2149_v36 = vand.u32 3, %v2148_v14  ;;  %v6212_v14 = vadd.f32 -0.35, %v7495_v19 }
 0x172   :  { %v2050_v3 = vsub.f32 %v2049_v39, %v7495_v19  ;;  %v2140_v39 = vsel %vm2057_vm8, %v2139_v23, %v2138_v16  ;;  %vm2151_vm6 = vcmp.eq.s32.totalorder %v2149_v36, 0  ;;  %vm2154_vm9 = vcmp.eq.s32.totalorder %v2149_v36, 2 }
 0x173   :  { %v2143_v51 = vsel %vm7968_vm4, %v7564_v27, %v2140_v39  ;;  %vm2150_vm10 = vcmp.lt.s32.totalorder %v2149_v36, 2 }
 0x174   :  { %v7942_v26 = vpop.trf.xlu1  ;;  %v7946_v45 = vsub.f32 0.0, %v2050_v3  ;;  %v7972_v3 = vpop.trf.xlu0  ;;  %6672 = vcosq.f32 %v2143_v51 }
 0x175   :  { %6674 = vsinq.f32 %v2143_v51 }
 0x176   :  { %13190 = vst [vmem:[#allocation18_spill] sm:$0xff] %v7946_v45  ;;  %2163 = vxpose.xlu0.b32.start.end [1/1] (short) %v7946_v45, 128 }
 0x178   :  { %v7950_v2 = vpop.trf.xlu1  ;;  %v7981_v20 = vpop.trf.xlu0 }
 0x17c   :  { %v7953_v41 = vpop.trf.xlu1  ;;  %v7991_v23 = vpop.trf.xlu0 }
 0x17d   :  { %13191 = vst [vmem:[#allocation19_spill] sm:$0xff] %v7953_v41 }
 0x17e   :  { %v6673_v39 = vpop.eup %6672 }
 0x17f   :  { %v6675_v41 = vpop.eup %6674  ;;  %v2155_v51 = vxor.u32 2147483648, %v6673_v39 }
 0x180   :  { %v7957_v17 = vpop.trf.xlu1  ;;  %v7996_v33 = vpop.trf.xlu0  ;;  %v2152_v30 = vxor.u32 2147483648, %v6675_v41 }
 0x181   :  { %v2156_v45 = vsel %vm2154_vm9, %v2155_v51, %v6675_v41 }
 0x182   :  { %v2153_v24 = vsel %vm2151_vm6, %v6673_v39, %v2152_v30 }
 0x184   :  { %v7961_v12 = vpop.trf.xlu1 }
 0x188   :  { %v7964_v46 = vpop.trf.xlu1 }
 0x18c   :  { %v7978_v37 = vpop.trf.xlu1  ;;  %441 = vperm.xlu1 %6627, %v7505_v49  }
 0x190   :  { %v7984_v47 = vpop.trf.xlu1  ;;  %446 = vperm.xlu1 %6627, %v7526_v1  }
 0x191   :  { %13195 = vst [vmem:[#allocation20_spill] sm:$0xff] %v7984_v47 }
 0x194   :  { %v7989_v16 = vpop.trf.xlu1  ;;  %451 = vperm.xlu1 %6627, %v7556_v22  }
 0x195   :  { %13196 = vst [vmem:[#allocation21_spill] sm:$0xff] %v7989_v16  ;;  %v2052_v16 = vmul.f32 %v6212_v14, %v6212_v14 }
 0x197   :  { %v2053_v39 = vmul.f32 3.0, %v2052_v16 }
 0x198   :  { %v7994_v49 = vpop.trf.xlu1  ;;  %456 = vperm.xlu1 %6627, %v7569_v62   ;;  %v2157_v62 = vsel %vm2150_vm10, %v2153_v24, %v2156_v45 }
 0x199   :  { %13197 = vst [vmem:[#allocation22_spill] sm:$0xff] %v7994_v49  ;;  %v2158_v47 = vsel %vm2147_vm11, nan, %v2157_v62 }
 0x19a   :  { %v2159_v41 = vmul.f32 0.5, %v2158_v47 }
 0x19c   :  { %v7999_v1 = vpop.trf.xlu1  ;;  %461 = vperm.xlu1 %6627, %v7585_v59  }
 0x19d   :  { %13198 = vst [vmem:[#allocation23_spill] sm:$0xff] %v7999_v1 }
 0x19e   :  { %v385_v22 = vpop.trf.xlu0 }
 0x1a0   :  { %v8002_v42 = vpop.trf.xlu1  ;;  %466 = vperm.xlu1 %6627, %v7598_v13   ;;  %v8015_v13 = vadd.f32 %v2159_v41, %v2053_v39 }
 0x1a1   :  { %13199 = vst [vmem:[#allocation24_spill] sm:$0xff] %v8002_v42 }
 0x1a2   :  { %v8009_v49 = vpop.trf.xlu0  ;;  %13201 = vst [vmem:[#allocation26_spill] sm:$0xff] %v8015_v13  ;;  %v12920_v36 = vsub.f32 0.0, %v8015_v13 }
 0x1a4   :  { %v8007_v1 = vpop.trf.xlu1  ;;  %471 = vperm.xlu1 %6627, %v7619_v43  }
 0x1a6   :  { %v387_v59 = vpop.trf.xlu0 }
 0x1a8   :  { %v8012_v42 = vpop.trf.xlu1  ;;  %476 = vperm.xlu1 %6627, %v7639_v8  }
 0x1a9   :  { %13200 = vst [vmem:[#allocation25_spill] sm:$0xff] %v8012_v42 }
 0x1aa   :  { %v388_v19 = vpop.trf.xlu0 }
 0x1ac   :  { %481 = vperm.xlu1 %6627, %v7656_v52   ;;  %v8018_v27 = vpop.trf.xlu1 }
 0x1ae   :  { %v389_v45 = vpop.trf.xlu0 }
 0x1b0   :  { %486 = vperm.xlu1 %6627, %v7665_v34  }
 0x1b2   :  { %v8022_v43 = vpop.trf.xlu1  ;;  %v390_v8 = vpop.trf.xlu0 }
 0x1b3   :  { %13202 = vst [vmem:[#allocation27_spill] sm:$0xff] %v8022_v43  ;;  %2195 = vxpose.xlu0.b32.start.end [1/1] (short) %v12920_v36, 128 }
 0x1b4   :  { %491 = vperm.xlu1 %6627, %v7699_v7  }
 0x1b6   :  { %v8027_v47 = vpop.trf.xlu1  ;;  %v391_v16 = vpop.trf.xlu0 }
 0x1b8   :  { %496 = vperm.xlu1 %6627, %v7729_v58  }
 0x1ba   :  { %v8030_v52 = vpop.trf.xlu1  ;;  %v392_v34 = vpop.trf.xlu0 }
 0x1bb   :  { %13203 = vst [vmem:[#allocation28_spill] sm:$0xff] %v8030_v52  ;;  %v13226_v52 = vld [vmem:[#allocation15_spill] sm:$0xff] }
 0x1bc   :  { %501 = vperm.xlu1 %6627, %v7757_v18  }
 0x1be   :  { %v8033_v30 = vpop.trf.xlu1  ;;  %v393_v7 = vpop.trf.xlu0 }
 0x1bf   :  { %13204 = vst [vmem:[#allocation29_spill] sm:$0xff] %v8033_v30 }
 0x1c0   :  { %506 = vperm.xlu1 %6627, %v7794_v50  }
 0x1c2   :  { %v8036_v51 = vpop.trf.xlu1  ;;  %v394_v58 = vpop.trf.xlu0 }
 0x1c3   :  { %13205 = vst [vmem:[#allocation30_spill] sm:$0xff] %v8036_v51  ;;  %v13224_v51 = vld [vmem:[#allocation14_spill] sm:$0xff] }
 0x1c4   :  { %511 = vperm.xlu1 %6627, %v7827_v56   ;;  %v13210_v56 = vmov 0  }
 0x1c6   :  { %v8040_v24 = vpop.trf.xlu1  ;;  %v395_v18 = vpop.trf.xlu0 }
 0x1c7   :  { %13206 = vst [vmem:[#allocation31_spill] sm:$0xff] %v8040_v24 }
 0x1c8   :  { %516 = vperm.xlu1 %6627, %v7846_v25  }
 0x1ca   :  { %v8042_v14 = vpop.trf.xlu1  ;;  %v396_v50 = vpop.trf.xlu0 }
 0x1cb   :  { %13207 = vst [vmem:[#allocation32_spill] sm:$0xff] %v8042_v14 }
 0x1cc   :  { %577 = vperm.xlu1 %6627, %v385_v22  }
 0x1ce   :  { %v8044_v62 = vpop.trf.xlu1  ;;  %v397_v41 = vpop.trf.xlu0 }
 0x1cf   :  { %13208 = vst [vmem:[#allocation33_spill] sm:$0xff] %v8044_v62 }
 0x1d0   :  { %587 = vperm.xlu1 %6627, %v387_v59  }
 0x1d2   :  { %v8046_v39 = vpop.trf.xlu1  ;;  %v398_v22 = vpop.trf.xlu0 }
 0x1d3   :  { %13209 = vst [vmem:[#allocation34_spill] sm:$0xff] %v8046_v39 }
 0x1d4   :  { %592 = vperm.xlu1 %6627, %v388_v19  }
 0x1d6   :  { %v8049_v25 = vpop.trf.xlu1  ;;  %v399_v59 = vpop.trf.xlu0 }
 0x1d7   :  { %13211 = vst [vmem:[#allocation35_spill] sm:$0xff] %v8049_v25 }
 0x1d8   :  { %597 = vperm.xlu1 %6627, %v389_v45  }
 0x1da   :  { %v8051_v36 = vpop.trf.xlu1  ;;  %v400_v45 = vpop.trf.xlu0 }
 0x1db   :  { %13212 = vst [vmem:[#allocation36_spill] sm:$0xff] %v8051_v36 }
 0x1dc   :  { %602 = vperm.xlu1 %6627, %v390_v8   ;;  %6626 = vset.pattern.permute.xlu0 %v13210_v56 }
 0x1de   :  { %v8053_v19 = vpop.trf.xlu1 }
 0x1df   :  { %13213 = vst [vmem:[#allocation37_spill] sm:$0xff] %v8053_v19 }
 0x1e0   :  { %607 = vperm.xlu1 %6627, %v391_v16  }
 0x1e2   :  { %v8055_v14 = vpop.trf.xlu1 }
 0x1e3   :  { %13214 = vst [vmem:[#allocation38_spill] sm:$0xff] %v8055_v14 }
 0x1e4   :  { %612 = vperm.xlu1 %6627, %v392_v34  }
 0x1e6   :  { %v8059_v16 = vpop.trf.xlu1 }
 0x1e7   :  { %13215 = vst [vmem:[#allocation39_spill] sm:$0xff] %v8059_v16 }
 0x1e8   :  { %617 = vperm.xlu1 %6627, %v393_v7  }
 0x1ea   :  { %v8065_v7 = vpop.trf.xlu1 }
 0x1eb   :  { %13216 = vst [vmem:[#allocation40_spill] sm:$0xff] %v8065_v7 }
 0x1ec   :  { %622 = vperm.xlu1 %6627, %v394_v58   ;;  %v12921_v58 = vlaneseq }
 0x1f0   :  { %627 = vperm.xlu1 %6627, %v395_v18   ;;  %v8070_v18 = vshrl.u32 %v12921_v58, 7 }
 0x1f2   :  { %13217 = vst [vmem:[#allocation41_spill] sm:$0xff] %v8070_v18  ;;  %v8077_v14 = vsub.s32 0, %v8070_v18 }
 0x1f4   :  { %632 = vperm.xlu1 %6627, %v396_v50   ;;  %v8072_v50 = vpop.trf.xlu1 }
 0x1f5   :  { %13218 = vst [vmem:[#allocation42_spill] sm:$0xff] %v8072_v50 }
 0x1f6   :  { %v8057_v8 = vpop.trf.xlu0 }
 0x1f8   :  { %637 = vperm.xlu1 %6627, %v397_v41  }
 0x1fa   :  { %v8061_v56 = vpop.trf.xlu0 }
 0x1fc   :  { %642 = vperm.xlu1 %6627, %v398_v22  }
 0x1fe   :  { %v8063_v34 = vpop.trf.xlu0 }
 0x200   :  { %647 = vperm.xlu1 %6627, %v399_v59   ;;  %v13220_v59 = vsub.f32 0.0, %v7035_v6 }
 0x202   :  { %v8067_v36 = vpop.trf.xlu0  ;;  %v8087_v39 = vrot.slane %v13220_v59, %v8077_v14 }
 0x204   :  { %652 = vperm.xlu1 %6627, %v400_v45  }
 0x206   :  { %v8074_v41 = vpop.trf.xlu0 }
 0x208   :  { %1343 = vperm.xlu1 %6627, %v7875_v38   ;;  %v12925_v38 = vmov 1.0|1.0  }
 0x20a   :  { %v8080_v22 = vpop.trf.xlu0 }
 0x20b   :  { %v8082_v7 = vpop.permute.xlu1 %441 }
 0x20c   :  { %13219 = vst [vmem:[#allocation43_spill] sm:$0xff] %v8082_v7  ;;  %1358 = vperm.xlu1 %6627, %v7918_v63   ;;  %vm519_vm12 = vcmp.ge.f32.partialorder %v8087_v39, %v8082_v7 }
 0x20e   :  { %v8090_v45 = vpop.trf.xlu0 }
 0x20f   :  { %v8092_v58 = vpop.permute.xlu1 %446 }
 0x210   :  { %13221 = vst [vmem:[#allocation44_spill] sm:$0xff] %v8092_v58  ;;  %1368 = vperm.xlu1 %6627, %v7929_v44   ;;  %vm520_vm13 = vcmp.ge.f32.partialorder %v8087_v39, %v8092_v58 }
 0x211   :  { %vm6105_vm14 = vmpackc.low %vm520_vm13, %vm519_vm12 }
 0x212   :  { %6445 = vmatprep.mubr.msk.bf16.mxu0 %vm6105_vm14, %v12925_v38  ;;  %v8100_v6 = vpop.trf.xlu0 }
 0x213   :  { %v8102_v59 = vpop.permute.xlu1 %451 }
 0x214   :  { %1378 = vperm.xlu1 %6627, %v7940_v11  }
 0x216   :  { %v8105_v63 = vpop.trf.xlu0 }
 0x217   :  { %v8107_v18 = vpop.permute.xlu1 %456 }
 0x218   :  { %582 = vperm.xlu0 %6626, %v8009_v49   ;;  %1388 = vperm.xlu1 %6627, %v7955_v9  }
 0x21a   :  { %v8111_v44 = vpop.trf.xlu0 }
 0x21b   :  { %v8113_v58 = vpop.permute.xlu1 %461 }
 0x21c   :  { %1338 = vperm.xlu0 %6626, %v7865_v61   ;;  %1398 = vperm.xlu1 %6627, %v7972_v3  }
 0x21e   :  { %v2189_v38 = vpop.trf.xlu0 }
 0x21f   :  { %v8117_v7 = vpop.permute.xlu1 %466 }
 0x220   :  { %1348 = vperm.xlu0 %6626, %v7890_v0   ;;  %1408 = vperm.xlu1 %6627, %v7991_v23  }
 0x222   :  { %v8121_v11 = vpop.trf.xlu0 }
 0x223   :  { %v8123_v49 = vpop.permute.xlu1 %471 }
 0x224   :  { %1353 = vperm.xlu0 %6626, %v7906_v57   ;;  %1474 = vperm.xlu1 %6627, %v7705_v28  }
 0x226   :  { %v8127_v9 = vpop.trf.xlu0 }
 0x227   :  { %v8129_v61 = vpop.permute.xlu1 %476 }
 0x228   :  { %1363 = vperm.xlu0 %6626, %v7923_v54   ;;  %1484 = vperm.xlu1 %6627, %v7741_v55  }
 0x22a   :  { %v8133_v3 = vpop.trf.xlu0 }
 0x22b   :  { %v8135_v0 = vpop.permute.xlu1 %481 }
 0x22c   :  { %1373 = vperm.xlu0 %6626, %v7934_v60   ;;  %1494 = vperm.xlu1 %6627, %v7788_v21  }
 0x22e   :  { %v8139_v23 = vpop.trf.xlu0 }
 0x22f   :  { %v8141_v57 = vpop.permute.xlu1 %486 }
 0x230   :  { %1383 = vperm.xlu0 %6626, %v7948_v5   ;;  %1504 = vperm.xlu1 %6627, %v7830_v32  }
 0x232   :  { %v8145_v28 = vpop.trf.xlu0 }
 0x233   :  { %v8147_v54 = vpop.permute.xlu1 %491 }
 0x234   :  { %1393 = vperm.xlu0 %6626, %v7959_v40   ;;  %1514 = vperm.xlu1 %6627, %v7858_v29  }
 0x236   :  { %v2211_v60 = vpop.trf.xlu0 }
 0x237   :  { %v8151_v55 = vpop.permute.xlu1 %496 }
 0x238   :  { %1403 = vperm.xlu0 %6626, %v7981_v20   ;;  %1524 = vperm.xlu1 %6627, %v7888_v53   ;;  %v13222_v20 = vld [vmem:[#allocation13_spill] sm:$0xff] }
 0x23a   :  { %v2212_v32 = vpop.trf.xlu0 }
 0x23b   :  { %v8155_v21 = vpop.permute.xlu1 %501 }
 0x23c   :  { %1413 = vperm.xlu0 %6626, %v7996_v33   ;;  %1534 = vperm.xlu1 %6627, %v7915_v15  }
 0x23e   :  { %v2213_v40 = vpop.trf.xlu0 }
 0x23f   :  { %v8159_v5 = vpop.permute.xlu1 %506 }
 0x240   :  { %1479 = vperm.xlu0 %6626, %v7723_v31   ;;  %1544 = vperm.xlu1 %6627, %v7925_v35  }
 0x242   :  { %v2214_v15 = vpop.trf.xlu0 }
 0x243   :  { %v8163_v29 = vpop.permute.xlu1 %511 }
 0x244   :  { %1489 = vperm.xlu0 %6626, %v7765_v4   ;;  %2235 = vperm.xlu1 %6627, %v2211_v60   ;;  %v13228_v60 = vld [vmem:[#allocation16_spill] sm:$0xff] }
 0x246   :  { %v8176_v35 = vpop.trf.xlu0 }
 0x247   :  { %v8166_v53 = vpop.permute.xlu1 %516 }
 0x248   :  { %1499 = vperm.xlu0 %6626, %v13222_v20   ;;  %2371 = vperm.xlu1 %6627, %v8057_v8  }
 0x24a   :  { %v8184_v8 = vpop.trf.xlu0 }
 0x24b   :  { %v8170_v33 = vpop.permute.xlu1 %577 }
 0x24c   :  { %13223 = vst [vmem:[#allocation13_spill] sm:$0xff] %v8170_v33  ;;  %1509 = vperm.xlu0 %6626, %v13224_v51   ;;  %2381 = vperm.xlu1 %6627, %v8063_v34   ;;  %v13230_v51 = vld [vmem:[#allocation17_spill] sm:$0xff] }
 0x24e   :  { %v8190_v34 = vpop.trf.xlu0 }
 0x24f   :  { %v8174_v31 = vpop.permute.xlu1 %587 }
 0x250   :  { %13225 = vst [vmem:[#allocation14_spill] sm:$0xff] %v8174_v31  ;;  %1519 = vperm.xlu0 %6626, %v13226_v52   ;;  %2386 = vperm.xlu1 %6627, %v8067_v36  }
 0x252   :  { %v8199_v52 = vpop.trf.xlu0 }
 0x253   :  { %v8180_v4 = vpop.permute.xlu1 %592 }
 0x254   :  { %13227 = vst [vmem:[#allocation15_spill] sm:$0xff] %v8180_v4  ;;  %1529 = vperm.xlu0 %6626, %v13228_v60   ;;  %2391 = vperm.xlu1 %6627, %v8074_v41  }
 0x257   :  { %v8186_v20 = vpop.permute.xlu1 %597 }
 0x258   :  { %13229 = vst [vmem:[#allocation16_spill] sm:$0xff] %v8186_v20  ;;  %1539 = vperm.xlu0 %6626, %v13230_v51   ;;  %2401 = vperm.xlu1 %6627, %v8090_v45   ;;  %v8204_v45 = vpop.trf.xlu0 }
 0x25b   :  { %v8192_v43 = vpop.permute.xlu1 %602 }
 0x25c   :  { %13231 = vst [vmem:[#allocation17_spill] sm:$0xff] %v8192_v43  ;;  %1549 = vperm.xlu0 %6626, %v7932_v10   ;;  %2411 = vperm.xlu1 %6627, %v8105_v63   ;;  %v8212_v63 = vpop.trf.xlu0 }
 0x25f   :  { %v8196_v36 = vpop.permute.xlu1 %607 }
 0x260   :  { %13232 = vst [vmem:[#allocation45_spill] sm:$0xff] %v8196_v36  ;;  %2376 = vperm.xlu0 %6626, %v8061_v56   ;;  %2421 = vperm.xlu1 %6627, %v2189_v38   ;;  %v8217_v38 = vpop.trf.xlu0 }
 0x263   :  { %v8201_v41 = vpop.permute.xlu1 %612 }
 0x264   :  { %13233 = vst [vmem:[#allocation46_spill] sm:$0xff] %v8201_v41  ;;  %2396 = vperm.xlu0 %6626, %v8080_v22  }
 0x267   :  { %v8206_v60 = vpop.permute.xlu1 %617 }
 0x268   :  { %13234 = vst [vmem:[#allocation47_spill] sm:$0xff] %v8206_v60  ;;  %2406 = vperm.xlu0 %6626, %v8100_v6   ;;  %v8225_v6 = vpop.trf.xlu0 }
 0x26b   :  { %v8209_v10 = vpop.permute.xlu1 %622 }
 0x26c   :  { %13235 = vst [vmem:[#allocation48_spill] sm:$0xff] %v8209_v10  ;;  %2416 = vperm.xlu0 %6626, %v8111_v44   ;;  %v8230_v44 = vpop.trf.xlu0 }
 0x26f   :  { %v8214_v56 = vpop.permute.xlu1 %627 }
 0x270   :  { %13236 = vst [vmem:[#allocation49_spill] sm:$0xff] %v8214_v56  ;;  %2426 = vperm.xlu0 %6626, %v8121_v11  }
 0x273   :  { %v8219_v51 = vpop.permute.xlu1 %632 }
 0x274   :  { %13237 = vst [vmem:[#allocation50_spill] sm:$0xff] %v8219_v51  ;;  %2431 = vperm.xlu0 %6626, %v8127_v9   ;;  %v8237_v9 = vpop.trf.xlu0 }
 0x277   :  { %v8222_v22 = vpop.permute.xlu1 %637 }
 0x278   :  { %13238 = vst [vmem:[#allocation51_spill] sm:$0xff] %v8222_v22  ;;  %2436 = vperm.xlu0 %6626, %v8133_v3   ;;  %v8241_v3 = vpop.trf.xlu0 }
 0x27b   :  { %v8227_v42 = vpop.permute.xlu1 %642 }
 0x27c   :  { %13239 = vst [vmem:[#allocation52_spill] sm:$0xff] %v8227_v42  ;;  %2441 = vperm.xlu0 %6626, %v8139_v23   ;;  %v8248_v25 = vpop.trf.xlu0 }
 0x27f   :  { %v8232_v50 = vpop.permute.xlu1 %647 }
 0x280   :  { %13240 = vst [vmem:[#allocation53_spill] sm:$0xff] %v8232_v50  ;;  %2446 = vperm.xlu0 %6626, %v8145_v28  }
 0x283   :  { %v8235_v11 = vpop.permute.xlu1 %652 }
 0x284   :  { %13241 = vst [vmem:[#allocation54_spill] sm:$0xff] %v8235_v11  ;;  %2240 = vperm.xlu0 %6626, %v2212_v32   ;;  %v13246_v32 = vld [vmem:[#allocation11_spill] sm:$0xff] }
 0x285   :  { %v8254_v62 = vrot.slane %v13246_v32, %v8077_v14 }
 0x287   :  { %v8239_v16 = vpop.permute.xlu1 %1343  ;;  %13247 = vst [vmem:[#allocation59_spill] sm:$0xff] %v8254_v62  ;;  %vm661_vm15 = vcmp.ge.f32.partialorder %v8170_v33, %v8254_v62  ;;  %vm664_vm1 = vcmp.ge.f32.partialorder %v8180_v4, %v8254_v62  ;;  %vm663_vm3 = vcmp.ge.f32.partialorder %v8174_v31, %v8254_v62  ;;  %vm666_vm8 = vcmp.ge.f32.partialorder %v8192_v43, %v8254_v62 }
 0x288   :  { %13242 = vst [vmem:[#allocation55_spill] sm:$0xff] %v8239_v16  ;;  %2245 = vperm.xlu0 %6626, %v2213_v40   ;;  %vm6091_vm7 = vmpackc.low %vm664_vm1, %vm663_vm3  ;;  %vm665_vm9 = vcmp.ge.f32.partialorder %v8186_v20, %v8254_v62  ;;  %vm668_vm11 = vcmp.ge.f32.partialorder %v8201_v41, %v8254_v62  ;;  %vm667_vm12 = vcmp.ge.f32.partialorder %v8196_v36, %v8254_v62 }
 0x289   :  { %vm6093_vm10 = vmpackc.low %vm666_vm8, %vm665_vm9  ;;  %vm670_vm14 = vcmp.ge.f32.partialorder %v8209_v10, %v8254_v62  ;;  %vm672_vm1 = vcmp.ge.f32.partialorder %v8219_v51, %v8254_v62 }
 0x28a   :  { %vm6095_vm13 = vmpackc.low %vm668_vm11, %vm667_vm12  ;;  %vm524_vm11 = vcmp.ge.f32.partialorder %v8087_v39, %v8117_v7  ;;  %vm521_vm12 = vcmp.ge.f32.partialorder %v8087_v39, %v8102_v59 }
 0x28b   :  { %v8243_v19 = vpop.permute.xlu1 %1358 }
 0x28c   :  { %13243 = vst [vmem:[#allocation56_spill] sm:$0xff] %v8243_v19  ;;  %2250 = vperm.xlu0 %6626, %v2214_v15   ;;  %v13250_v15 = vld [vmem:[#allocation9_spill] sm:$0xff] }
 0x28d   :  { %v13251_v13 = vsub.f32 0.0, %v13250_v15 }
 0x28f   :  { %v8245_v23 = vpop.permute.xlu1 %1368  ;;  %v8264_v30 = vrot.slane %v13251_v13, %v8077_v14 }
 0x290   :  { %13244 = vst [vmem:[#allocation57_spill] sm:$0xff] %v8245_v23  ;;  %3268 = vperm.xlu0 %6626, %v7936_v48   ;;  %v13252_v48 = vmov 1.0|1.0  }
 0x291   :  { %vm1417_vm5 = vcmp.ge.f32.partialorder %v8264_v30, %v8239_v16 }
 0x293   :  { %v8250_v28 = vpop.permute.xlu1 %1378 }
 0x294   :  { %13245 = vst [vmem:[#allocation58_spill] sm:$0xff] %v8250_v28  ;;  %3273 = vperm.xlu0 %6626, %v7942_v26  }
 0x297   :  { %v8257_v40 = vpop.permute.xlu0 %582  ;;  %v8259_v24 = vpop.permute.xlu1 %1388 }
 0x298   :  { %13248 = vst [vmem:[#allocation60_spill] sm:$0xff] %v8257_v40  ;;  %13249 = vst [vmem:[#allocation61_spill] sm:$0xff] %v8259_v24  ;;  %3278 = vperm.xlu0 %6626, %v7950_v2   ;;  %vm662_vm0 = vcmp.ge.f32.partialorder %v8257_v40, %v8254_v62 }
 0x299   :  { %vm6089_vm2 = vmpackc.low %vm662_vm0, %vm661_vm15  ;;  %vm669_vm15 = vcmp.ge.f32.partialorder %v8206_v60, %v8254_v62 }
 0x29a   :  { %6429 = vmatprep.subr.msk.bf16.mxu0 %vm6089_vm2, %v13252_v48  ;;  %vm6097_vm0 = vmpackc.low %vm670_vm14, %vm669_vm15 }
 0x29b   :  { %v8278_v26 = vpop.permute.xlu0 %1338  ;;  %6430 = vmatpush3.bf16.msk.msra.mxu0 %vm6089_vm2, %v13252_v48  ;;  %v8281_v2 = vpop.permute.xlu1 %1398  ;;  %vm671_vm2 = vcmp.ge.f32.partialorder %v8214_v56, %v8254_v62 }
 0x29c   :  { %13253 = vst [vmem:[#allocation9_spill] sm:$0xff] %v8278_v26  ;;  %13254 = vst [vmem:[#allocation62_spill] sm:$0xff] %v8281_v2  ;;  %2255 = vperm.xlu0 %6626, %v8176_v35   ;;  %6431 = vmatprep.subr.msk.bf16.mxu0 %vm6091_vm7, %v13252_v48  ;;  %vm1416_vm4 = vcmp.ge.f32.partialorder %v8264_v30, %v8278_v26 }
 0x29d   :  { %vm6185_vm6 = vmpackc.low %vm1417_vm5, %vm1416_vm4  ;;  %vm674_vm5 = vcmp.ge.f32.partialorder %v8227_v42, %v8254_v62  ;;  %vm676_vm4 = vcmp.ge.f32.partialorder %v8235_v11, %v8254_v62 }
 0x29e   :  { %6477 = vmatprep.mubr.msk.bf16.mxu1 %vm6185_vm6, %v13252_v48  ;;  %vm6099_vm3 = vmpackc.low %vm672_vm1, %vm671_vm2  ;;  %vm675_vm6 = vcmp.ge.f32.partialorder %v8232_v50, %v8254_v62  ;;  %vm525_vm1 = vcmp.ge.f32.partialorder %v8087_v39, %v8123_v49  ;;  %vm528_vm2 = vcmp.ge.f32.partialorder %v8087_v39, %v8141_v57 }
 0x29f   :  { %v8292_v13 = vpop.permute.xlu0 %1348  ;;  %6432 = vmatpush3.bf16.msk.msra.mxu0 %vm6091_vm7, %v13252_v48  ;;  %v8295_v35 = vpop.permute.xlu1 %1408  ;;  %vm673_vm7 = vcmp.ge.f32.partialorder %v8222_v22, %v8254_v62  ;;  %vm6103_vm9 = vmpackc.low %vm676_vm4, %vm675_vm6 }
 0x2a0   :  { %13255 = vst [vmem:[#allocation63_spill] sm:$0xff] %v8292_v13  ;;  %13256 = vst [vmem:[#allocation64_spill] sm:$0xff] %v8295_v35  ;;  %2260 = vperm.xlu0 %6626, %v8184_v8   ;;  %6433 = vmatprep.subr.msk.bf16.mxu0 %vm6093_vm10, %v13252_v48 }
 0x2a1   :  { %vm6101_vm8 = vmpackc.low %vm674_vm5, %vm673_vm7 }
 0x2a3   :  { %v8303_v15 = vpop.permute.xlu0 %1353  ;;  %6434 = vmatpush3.bf16.msk.msra.mxu0 %vm6093_vm10, %v13252_v48  ;;  %v8306_v40 = vpop.permute.xlu1 %1474  ;;  %vm522_vm10 = vcmp.ge.f32.partialorder %v8087_v39, %v8107_v18 }
 0x2a4   :  { %13257 = vst [vmem:[#allocation65_spill] sm:$0xff] %v8303_v15  ;;  %13258 = vst [vmem:[#allocation66_spill] sm:$0xff] %v8306_v40  ;;  %2265 = vperm.xlu0 %6626, %v8190_v34   ;;  %6435 = vmatprep.subr.msk.bf16.mxu0 %vm6095_vm13, %v13252_v48 }
 0x2a5   :  { %vm6107_vm14 = vmpackc.low %vm522_vm10, %vm521_vm12 }
 0x2a7   :  { %v8314_v8 = vpop.permute.xlu0 %1363  ;;  %6436 = vmatpush3.bf16.msk.msra.mxu0 %vm6095_vm13, %v13252_v48  ;;  %v8317_v41 = vpop.permute.xlu1 %1484  ;;  %vm523_vm13 = vcmp.ge.f32.partialorder %v8087_v39, %v8113_v58 }
 0x2a8   :  { %13259 = vst [vmem:[#allocation67_spill] sm:$0xff] %v8314_v8  ;;  %13260 = vst [vmem:[#allocation68_spill] sm:$0xff] %v8317_v41  ;;  %2270 = vperm.xlu0 %6626, %v8199_v52   ;;  %6437 = vmatprep.subr.msk.bf16.mxu0 %vm6097_vm0, %v13252_v48 }
 0x2a9   :  { %vm6109_vm15 = vmpackc.low %vm524_vm11, %vm523_vm13  ;;  %vm530_vm11 = vcmp.ge.f32.partialorder %v8087_v39, %v8151_v55  ;;  %vm529_vm13 = vcmp.ge.f32.partialorder %v8087_v39, %v8147_v54 }
 0x2ab   :  { %v8325_v34 = vpop.permute.xlu0 %1373  ;;  %6438 = vmatpush3.bf16.msk.msra.mxu0 %vm6097_vm0, %v13252_v48  ;;  %v8328_v10 = vpop.permute.xlu1 %1494  ;;  %vm526_vm0 = vcmp.ge.f32.partialorder %v8087_v39, %v8129_v61 }
 0x2ac   :  { %13261 = vst [vmem:[#allocation69_spill] sm:$0xff] %v8325_v34  ;;  %13262 = vst [vmem:[#allocation70_spill] sm:$0xff] %v8328_v10  ;;  %3288 = vperm.xlu0 %6626, %v7957_v17   ;;  %6439 = vmatprep.subr.msk.bf16.mxu0 %vm6099_vm3, %v13252_v48 }
 0x2af   :  { %v8336_v52 = vpop.permute.xlu0 %1383  ;;  %6440 = vmatpush3.bf16.msk.msra.mxu0 %vm6099_vm3, %v13252_v48  ;;  %v8339_v51 = vpop.permute.xlu1 %1504  ;;  %vm6111_vm3 = vmpackc.low %vm526_vm0, %vm525_vm1 }
 0x2b0   :  { %13263 = vst [vmem:[#allocation71_spill] sm:$0xff] %v8336_v52  ;;  %13264 = vst [vmem:[#allocation72_spill] sm:$0xff] %v8339_v51  ;;  %3293 = vperm.xlu0 %6626, %v7961_v12   ;;  %6441 = vmatprep.subr.msk.bf16.mxu0 %vm6101_vm8, %v13252_v48 }
 0x2b3   :  { %v8347_v17 = vpop.permute.xlu0 %1393  ;;  %6442 = vmatpush3.bf16.msk.msra.mxu0 %vm6101_vm8, %v13252_v48  ;;  %v8350_v42 = vpop.permute.xlu1 %1514  ;;  %vm527_vm8 = vcmp.ge.f32.partialorder %v8087_v39, %v8135_v0 }
 0x2b4   :  { %13265 = vst [vmem:[#allocation73_spill] sm:$0xff] %v8347_v17  ;;  %13266 = vst [vmem:[#allocation74_spill] sm:$0xff] %v8350_v42  ;;  %3298 = vperm.xlu0 %6626, %v7964_v46   ;;  %6443 = vmatprep.subr.msk.bf16.mxu0 %vm6103_vm9, %v13252_v48 }
 0x2b5   :  { %vm6113_vm6 = vmpackc.low %vm528_vm2, %vm527_vm8  ;;  %vm531_vm2 = vcmp.ge.f32.partialorder %v8087_v39, %v8155_v21 }
 0x2b7   :  { %v8358_v12 = vpop.permute.xlu0 %1403  ;;  %6444 = vmatpush3.bf16.msk.msra.mxu0 %vm6103_vm9, %v13252_v48  ;;  %v8361_v11 = vpop.permute.xlu1 %1524 }
 0x2b8   :  { %13267 = vst [vmem:[#allocation75_spill] sm:$0xff] %v8358_v12  ;;  %13268 = vst [vmem:[#allocation76_spill] sm:$0xff] %v8361_v11  ;;  %3303 = vperm.xlu0 %6626, %v7978_v37   ;;  %v13271_v37 = vld [vmem:[#allocation8_spill] sm:$0xff] }
 0x2b9   :  { %v8379_v22 = vrot.slane %v13271_v37, %v8077_v14 }
 0x2ba   :  { %6446 = vmatmul.mubr.msk.bf16.vlgmr.msra.gmra.mrb[0].mxu0 %vm6107_vm14, %v13252_v48  ;;  %vm532_vm14 = vcmp.ge.f32.partialorder %v8087_v39, %v8159_v5 }
 0x2bb   :  { %v8369_v46 = vpop.permute.xlu0 %1413  ;;  %6449 = vmatprep.mubr.msk.bf16.mxu0 %vm6109_vm15, %v13252_v48  ;;  %v8372_v50 = vpop.permute.xlu1 %1534  ;;  %13272 = vst [vmem:[#allocation79_spill] sm:$0xff] %v8379_v22  ;;  %vm1558_vm5 = vcmp.ge.f32.partialorder %v8306_v40, %v8379_v22  ;;  %vm1560_vm9 = vcmp.ge.f32.partialorder %v8317_v41, %v8379_v22  ;;  %vm6115_vm15 = vmpackc.low %vm530_vm11, %vm529_vm13  ;;  %vm1562_vm0 = vcmp.ge.f32.partialorder %v8328_v10, %v8379_v22  ;;  %v13283_v10 = vld [vmem:[#allocation21_spill] sm:$0xff] }
 0x2bc   :  { %13269 = vst [vmem:[#allocation77_spill] sm:$0xff] %v8369_v46  ;;  %13270 = vst [vmem:[#allocation78_spill] sm:$0xff] %v8372_v50  ;;  %2275 = vperm.xlu0 %6626, %v8204_v45   ;;  %vm1566_vm11 = vcmp.ge.f32.partialorder %v8350_v42, %v8379_v22 }
 0x2bf   :  { %v8385_v56 = vpop.permute.xlu0 %1479  ;;  %v8387_v60 = vpop.permute.xlu1 %1544 }
 0x2c0   :  { %13273 = vst [vmem:[#allocation80_spill] sm:$0xff] %v8385_v56  ;;  %13274 = vst [vmem:[#allocation81_spill] sm:$0xff] %v8387_v60  ;;  %2280 = vperm.xlu0 %6626, %v8212_v63   ;;  %vm1559_vm7 = vcmp.ge.f32.partialorder %v8385_v56, %v8379_v22 }
 0x2c1   :  { %vm6169_vm4 = vmpackc.low %vm1559_vm7, %vm1558_vm5  ;;  %vm1564_vm7 = vcmp.ge.f32.partialorder %v8339_v51, %v8379_v22  ;;  %v13286_v51 = vld [vmem:[#allocation22_spill] sm:$0xff] }
 0x2c2   :  { %6450 = vmatmul.mubr.msk.bf16.gmra.mrb[4].mxu0 %vm6111_vm3, %v13252_v48  ;;  %6461 = vmatprep.subr.msk.bf16.mxu1 %vm6169_vm4, %v13252_v48  ;;  %vm6117_vm5 = vmpackc.low %vm532_vm14, %vm531_vm2  ;;  %vm1568_vm14 = vcmp.ge.f32.partialorder %v8361_v11, %v8379_v22 }
 0x2c3   :  { %6462 = vmatpush3.bf16.msk.msra.mxu1 %vm6169_vm4, %v13252_v48  ;;  %v8399_v45 = vpop.permute.xlu0 %1489  ;;  %6453 = vmatprep.mubr.msk.bf16.mxu0 %vm6113_vm6, %v13252_v48  ;;  %v8402_v63 = vpop.permute.xlu1 %2235  ;;  %vm534_vm4 = vcmp.ge.f32.partialorder %v8087_v39, %v8166_v53 }
 0x2c4   :  { %13275 = vst [vmem:[#allocation82_spill] sm:$0xff] %v8399_v45  ;;  %13276 = vst [vmem:[#allocation83_spill] sm:$0xff] %v8402_v63  ;;  %2285 = vperm.xlu0 %6626, %v8217_v38   ;;  %vm1561_vm10 = vcmp.ge.f32.partialorder %v8399_v45, %v8379_v22 }
 0x2c5   :  { %vm6171_vm12 = vmpackc.low %vm1561_vm10, %vm1560_vm9  ;;  %vm533_vm9 = vcmp.ge.f32.partialorder %v8087_v39, %v8163_v29 }
 0x2c6   :  { %6463 = vmatprep.subr.msk.bf16.mxu1 %vm6171_vm12, %v13252_v48  ;;  %vm6119_vm10 = vmpackc.low %vm534_vm4, %vm533_vm9  ;;  %vm1418_vm9 = vcmp.ge.f32.partialorder %v8264_v30, %v8292_v13 }
 0x2c7   :  { %6464 = vmatpush3.bf16.msk.msra.mxu1 %vm6171_vm12, %v13252_v48  ;;  %v8417_v38 = vpop.permute.xlu0 %1499  ;;  %v8419_v41 = vpop.permute.xlu1 %2371 }
 0x2c8   :  { %13277 = vst [vmem:[#allocation84_spill] sm:$0xff] %v8417_v38  ;;  %13278 = vst [vmem:[#allocation85_spill] sm:$0xff] %v8419_v41  ;;  %2290 = vperm.xlu0 %6626, %v8225_v6   ;;  %vm1563_vm1 = vcmp.ge.f32.partialorder %v8417_v38, %v8379_v22  ;;  %v13280_v6 = vld [vmem:[#allocation20_spill] sm:$0xff] }
 0x2c9   :  { %vm6173_vm3 = vmpackc.low %vm1563_vm1, %vm1562_vm0  ;;  %vm1570_vm1 = vcmp.ge.f32.partialorder %v8372_v50, %v8379_v22 }
 0x2ca   :  { %6454 = vmatmul.mubr.msk.bf16.gmra.mrb[8].mxu0 %vm6115_vm15, %v13252_v48  ;;  %6465 = vmatprep.subr.msk.bf16.mxu1 %vm6173_vm3, %v13252_v48 }
 0x2cb   :  { %6466 = vmatpush3.bf16.msk.msra.mxu1 %vm6173_vm3, %v13252_v48  ;;  %v8431_v36 = vpop.permute.xlu0 %1509  ;;  %6457 = vmatprep.mubr.msk.bf16.mxu0 %vm6117_vm5, %v13252_v48  ;;  %v8441_v38 = vpop.permute.xlu1 %2381  ;;  %vm1419_vm5 = vcmp.ge.f32.partialorder %v8264_v30, %v8303_v15 }
 0x2cc   :  { %13279 = vst [vmem:[#allocation86_spill] sm:$0xff] %v8431_v36  ;;  %3308 = vperm.xlu0 %6626, %v13280_v6   ;;  %vm1565_vm8 = vcmp.ge.f32.partialorder %v8431_v36, %v8379_v22  ;;  %13281 = vst [vmem:[#allocation20_spill] sm:$0xff] %v8441_v38 }
 0x2cd   :  { %vm6175_vm6 = vmpackc.low %vm1565_vm8, %vm1564_vm7  ;;  %vm1572_vm7 = vcmp.ge.f32.partialorder %v8387_v60, %v8379_v22 }
 0x2ce   :  { %6467 = vmatprep.subr.msk.bf16.mxu1 %vm6175_vm6, %v13252_v48 }
 0x2cf   :  { %6468 = vmatpush3.bf16.msk.msra.mxu1 %vm6175_vm6, %v13252_v48  ;;  %v8447_v6 = vpop.permute.xlu0 %1519  ;;  %v8459_v36 = vpop.permute.xlu1 %2386 }
 0x2d0   :  { %13282 = vst [vmem:[#allocation87_spill] sm:$0xff] %v8447_v6  ;;  %3313 = vperm.xlu0 %6626, %v13283_v10   ;;  %vm1567_vm12 = vcmp.ge.f32.partialorder %v8447_v6, %v8379_v22  ;;  %13285 = vst [vmem:[#allocation88_spill] sm:$0xff] %v8459_v36  ;;  %v13288_v6 = vld [vmem:[#allocation23_spill] sm:$0xff] }
 0x2d1   :  { %vm6177_vm13 = vmpackc.low %vm1567_vm12, %vm1566_vm11  ;;  %vm1421_vm11 = vcmp.ge.f32.partialorder %v8264_v30, %v8314_v8 }
 0x2d2   :  { %6458 = vmatmul.mubr.msk.bf16.gmra.mrb[12].mxu0 %vm6119_vm10, %v13252_v48  ;;  %6469 = vmatprep.subr.msk.bf16.mxu1 %vm6177_vm13, %v13252_v48  ;;  %vm6187_vm12 = vmpackc.low %vm1419_vm5, %vm1418_vm9  ;;  %vm1425_vm9 = vcmp.ge.f32.partialorder %v8264_v30, %v8336_v52 }
 0x2d3   :  { %6470 = vmatpush3.bf16.msk.msra.mxu1 %vm6177_vm13, %v13252_v48  ;;  %v8457_v39 = vpop.permute.xlu0 %1529 }
 0x2d4   :  { %13284 = vst [vmem:[#allocation21_spill] sm:$0xff] %v8457_v39  ;;  %3318 = vperm.xlu0 %6626, %v13286_v51   ;;  %vm1569_vm15 = vcmp.ge.f32.partialorder %v8457_v39, %v8379_v22  ;;  %v8475_v51 = vpop.permute.xlu1 %2391  ;;  %v13290_v39 = vld [vmem:[#allocation18_spill] sm:$0xff] }
 0x2d5   :  { %vm6179_vm0 = vmpackc.low %vm1569_vm15, %vm1568_vm14  ;;  %13289 = vst [vmem:[#allocation23_spill] sm:$0xff] %v8475_v51  ;;  %v8480_v11 = vrot.slane %v13290_v39, %v8077_v14 }
 0x2d6   :  { %6471 = vmatprep.subr.msk.bf16.mxu1 %vm6179_vm0, %v13252_v48 }
 0x2d7   :  { %6472 = vmatpush3.bf16.msk.msra.mxu1 %vm6179_vm0, %v13252_v48  ;;  %v8468_v10 = vpop.permute.xlu0 %1539  ;;  %13291 = vst [vmem:[#allocation89_spill] sm:$0xff] %v8480_v11  ;;  %vm2458_vm6 = vcmp.ge.f32.partialorder %v8459_v36, %v8480_v11  ;;  %vm2455_vm10 = vcmp.ge.f32.partialorder %v8419_v41, %v8480_v11  ;;  %vm2457_vm13 = vcmp.ge.f32.partialorder %v8441_v38, %v8480_v11 }
 0x2d8   :  { %13287 = vst [vmem:[#allocation22_spill] sm:$0xff] %v8468_v10  ;;  %3323 = vperm.xlu0 %6626, %v13288_v6   ;;  %vm1571_vm2 = vcmp.ge.f32.partialorder %v8468_v10, %v8379_v22  ;;  %v8506_v6 = vpop.permute.xlu1 %2401  ;;  %vm8511_vm15 = vmpackc.low %vm2458_vm6, %vm2457_vm13  ;;  %vm1420_vm0 = vcmp.ge.f32.partialorder %v8264_v30, %v8243_v19  ;;  %vm1422_vm6 = vcmp.ge.f32.partialorder %v8264_v30, %v8245_v23 }
 0x2d9   :  { %vm6181_vm3 = vmpackc.low %vm1571_vm2, %vm1570_vm1  ;;  %13294 = vst [vmem:[#allocation92_spill] sm:$0xff] %v8506_v6 }
 0x2da   :  { %6473 = vmatprep.subr.msk.bf16.mxu1 %vm6181_vm3, %v13252_v48  ;;  %vm6189_vm2 = vmpackc.low %vm1421_vm11, %vm1420_vm0 }
 0x2db   :  { %6474 = vmatpush3.bf16.msk.msra.mxu1 %vm6181_vm3, %v13252_v48  ;;  %v8483_v42 = vpop.permute.xlu0 %1549  ;;  %vm2459_vm3 = vcmp.ge.f32.partialorder %v8475_v51, %v8480_v11 }
 0x2dc   :  { %13292 = vst [vmem:[#allocation90_spill] sm:$0xff] %v8483_v42  ;;  %2295 = vperm.xlu0 %6626, %v8230_v44   ;;  %vm1573_vm8 = vcmp.ge.f32.partialorder %v8483_v42, %v8379_v22  ;;  %v8537_v36 = vpop.permute.xlu1 %2411 }
 0x2dd   :  { %vm6183_vm4 = vmpackc.low %vm1573_vm8, %vm1572_vm7  ;;  %vm1423_vm7 = vcmp.ge.f32.partialorder %v8264_v30, %v8325_v34  ;;  %13300 = vst [vmem:[#allocation94_spill] sm:$0xff] %v8537_v36 }
 0x2de   :  { %6475 = vmatprep.subr.msk.bf16.mxu1 %vm6183_vm4, %v13252_v48 }
 0x2df   :  { %6476 = vmatpush3.bf16.msk.msra.mxu1 %vm6183_vm4, %v13252_v48  ;;  %v8502_v44 = vpop.permute.xlu0 %2376  ;;  %vm2461_vm4 = vcmp.ge.f32.partialorder %v8506_v6, %v8480_v11 }
 0x2e0   :  { %13293 = vst [vmem:[#allocation91_spill] sm:$0xff] %v8502_v44  ;;  %2300 = vperm.xlu0 %6626, %v8237_v9   ;;  %vm2456_vm14 = vcmp.ge.f32.partialorder %v8502_v44, %v8480_v11  ;;  %v8571_v10 = vpop.permute.xlu1 %2421 }
 0x2e1   :  { %vm6249_vm1 = vmpackc.low %vm2456_vm14, %vm2455_vm10  ;;  %13305 = vst [vmem:[#allocation97_spill] sm:$0xff] %v8571_v10 }
 0x2e2   :  { %6478 = vmatmul.mubr.msk.bf16.vlgmr.msra.gmra.mrb[0].mxu1 %vm6187_vm12, %v13252_v48  ;;  %6493 = vmatprep.subr.msk.bf16.mxu0 %vm6249_vm1, %v13252_v48  ;;  %vm6191_vm10 = vmpackc.low %vm1423_vm7, %vm1422_vm6  ;;  %vm1424_vm12 = vcmp.ge.f32.partialorder %v8264_v30, %v8250_v28  ;;  %vm1429_vm7 = vcmp.ge.f32.partialorder %v8264_v30, %v8358_v12  ;;  %vm1428_vm6 = vcmp.ge.f32.partialorder %v8264_v30, %v8281_v2 }
 0x2e3   :  { %6481 = vmatprep.mubr.msk.bf16.mxu1 %vm6189_vm2, %v13252_v48  ;;  %v8522_v9 = vpop.permute.xlu0 %2396  ;;  %6494 = vmatpush3.bf16.msk.msra.mxu0 %vm6249_vm1, %v13252_v48  ;;  %vm6193_vm14 = vmpackc.low %vm1425_vm9, %vm1424_vm12  ;;  %vm1427_vm1 = vcmp.ge.f32.partialorder %v8264_v30, %v8347_v17  ;;  %vm1430_vm12 = vcmp.ge.f32.partialorder %v8264_v30, %v8295_v35 }
 0x2e4   :  { %13297 = vst [vmem:[#allocation93_spill] sm:$0xff] %v8522_v9  ;;  %2305 = vperm.xlu0 %6626, %v8241_v3   ;;  %6495 = vmatprep.subr.msk.bf16.mxu0 %vm8511_vm15, %v13252_v48  ;;  %vm2460_vm5 = vcmp.ge.f32.partialorder %v8522_v9, %v8480_v11  ;;  %v13328_v9 = vld [vmem:[#allocation42_spill] sm:$0xff] }
 0x2e5   :  { %vm8533_vm8 = vmpackc.low %vm2460_vm5, %vm2459_vm3  ;;  %vm2465_vm3 = vcmp.ge.f32.partialorder %v8571_v10, %v8480_v11  ;;  %vm1426_vm5 = vcmp.ge.f32.partialorder %v8264_v30, %v8259_v24 }
 0x2e7   :  { %v8545_v3 = vpop.permute.xlu0 %2406  ;;  %6496 = vmatpush3.bf16.msk.msra.mxu0 %vm8511_vm15, %v13252_v48  ;;  %vm2463_vm15 = vcmp.ge.f32.partialorder %v8537_v36, %v8480_v11 }
 0x2e8   :  { %13301 = vst [vmem:[#allocation95_spill] sm:$0xff] %v8545_v3  ;;  %2310 = vperm.xlu0 %6626, %v8248_v25   ;;  %6497 = vmatprep.subr.msk.bf16.mxu0 %vm8533_vm8, %v13252_v48  ;;  %vm2462_vm11 = vcmp.ge.f32.partialorder %v8545_v3, %v8480_v11  ;;  %v13306_v3 = vld [vmem:[#allocation24_spill] sm:$0xff] }
 0x2e9   :  { %vm8558_vm13 = vmpackc.low %vm2462_vm11, %vm2461_vm4  ;;  %vm1431_vm11 = vcmp.ge.f32.partialorder %v8264_v30, %v8369_v46  ;;  %v13313_v30 = vld [vmem:[#allocation29_spill] sm:$0xff] }
 0x2ea   :  { %6482 = vmatmul.mubr.msk.bf16.gmra.mrb[4].mxu1 %vm6191_vm10, %v13252_v48  ;;  %vm6197_vm10 = vmpackc.low %vm1429_vm7, %vm1428_vm6 }
 0x2eb   :  { %6485 = vmatprep.mubr.msk.bf16.mxu1 %vm6193_vm14, %v13252_v48  ;;  %v8566_v25 = vpop.permute.xlu0 %2416  ;;  %6498 = vmatpush3.bf16.msk.msra.mxu0 %vm8533_vm8, %v13252_v48  ;;  %vm6195_vm8 = vmpackc.low %vm1427_vm1, %vm1426_vm5 }
 0x2ec   :  { %13304 = vst [vmem:[#allocation96_spill] sm:$0xff] %v8566_v25  ;;  %3328 = vperm.xlu0 %6626, %v13306_v3   ;;  %6499 = vmatprep.subr.msk.bf16.mxu0 %vm8558_vm13, %v13252_v48  ;;  %vm2464_vm0 = vcmp.ge.f32.partialorder %v8566_v25, %v8480_v11 }
 0x2ed   :  { %vm8581_vm2 = vmpackc.low %vm2464_vm0, %vm2463_vm15 }
 0x2ef   :  { %v8591_v51 = vpop.permute.xlu0 %2426  ;;  %6500 = vmatpush3.bf16.msk.msra.mxu0 %vm8558_vm13, %v13252_v48  ;;  %vm6199_vm13 = vmpackc.low %vm1431_vm11, %vm1430_vm12 }
 0x2f0   :  { %13309 = vst [vmem:[#allocation24_spill] sm:$0xff] %v8591_v51  ;;  %3333 = vperm.xlu0 %6626, %v8007_v1   ;;  %6501 = vmatprep.subr.msk.bf16.mxu0 %vm8581_vm2, %v13252_v48  ;;  %vm2466_vm4 = vcmp.ge.f32.partialorder %v8591_v51, %v8480_v11  ;;  %v13326_v51 = vld [vmem:[#allocation10_spill] sm:$0xff] }
 0x2f1   :  { %vm6259_vm9 = vmpackc.low %vm2466_vm4, %vm2465_vm3 }
 0x2f2   :  { %6486 = vmatmul.mubr.msk.bf16.gmra.mrb[8].mxu1 %vm6195_vm8, %v13252_v48 }
 0x2f3   :  { %6489 = vmatprep.mubr.msk.bf16.mxu1 %vm6197_vm10, %v13252_v48  ;;  %v8606_v6 = vpop.permute.xlu0 %2431  ;;  %6502 = vmatpush3.bf16.msk.msra.mxu0 %vm8581_vm2, %v13252_v48 }
 0x2f4   :  { %13310 = vst [vmem:[#allocation98_spill] sm:$0xff] %v8606_v6  ;;  %3343 = vperm.xlu0 %6626, %v8018_v27   ;;  %6503 = vmatprep.subr.msk.bf16.mxu0 %vm6259_vm9, %v13252_v48  ;;  %vm2467_vm14 = vcmp.ge.f32.partialorder %v8606_v6, %v8480_v11  ;;  %v13317_v6 = vld [vmem:[#allocation31_spill] sm:$0xff] }
 0x2f7   :  { %v8617_v1 = vpop.permute.xlu0 %2436  ;;  %6504 = vmatpush3.bf16.msk.msra.mxu0 %vm6259_vm9, %v13252_v48 }
 0x2f8   :  { %13311 = vst [vmem:[#allocation99_spill] sm:$0xff] %v8617_v1  ;;  %3137 = vperm.xlu0 %6626, %v8027_v47   ;;  %vm2468_vm15 = vcmp.ge.f32.partialorder %v8617_v1, %v8480_v11  ;;  %v13315_v47 = vld [vmem:[#allocation26_spill] sm:$0xff] }
 0x2f9   :  { %vm6261_vm0 = vmpackc.low %vm2468_vm15, %vm2467_vm14  ;;  %v13316_v3 = vsub.f32 0.0, %v13315_v47  ;;  %v13321_v47 = vld [vmem:[#allocation35_spill] sm:$0xff] }
 0x2fa   :  { %6490 = vmatmul.mubr.msk.bf16.gmra.mrb[12].mxu1 %vm6199_vm13, %v13252_v48  ;;  %6505 = vmatprep.subr.msk.bf16.mxu0 %vm6261_vm0, %v13252_v48 }
 0x2fb   :  { %v8627_v27 = vpop.permute.xlu0 %2441  ;;  %6506 = vmatpush3.bf16.msk.msra.mxu0 %vm6261_vm0, %v13252_v48  ;;  %v8636_v25 = vrot.slane %v13316_v3, %v8077_v14 }
 0x2fc   :  { %13312 = vst [vmem:[#allocation100_spill] sm:$0xff] %v8627_v27  ;;  %3147 = vperm.xlu0 %6626, %v13313_v30   ;;  %vm2469_vm1 = vcmp.ge.f32.partialorder %v8627_v27, %v8480_v11  ;;  %v13325_v27 = vld [vmem:[#allocation39_spill] sm:$0xff] }
 0x2fd   :  { %vm2313_vm5 = vcmp.ge.f32.partialorder %v8636_v25, %v8402_v63 }
 0x2ff   :  { %v8631_v36 = vpop.permute.xlu0 %2446 }
 0x300   :  { %13314 = vst [vmem:[#allocation29_spill] sm:$0xff] %v8631_v36  ;;  %3157 = vperm.xlu0 %6626, %v13317_v6   ;;  %vm2470_vm2 = vcmp.ge.f32.partialorder %v8631_v36, %v8480_v11  ;;  %v13319_v6 = vld [vmem:[#allocation33_spill] sm:$0xff] }
 0x301   :  { %vm6263_vm3 = vmpackc.low %vm2470_vm2, %vm2469_vm1  ;;  %v13323_v36 = vld [vmem:[#allocation37_spill] sm:$0xff] }
 0x302   :  { %6507 = vmatprep.subr.msk.bf16.mxu0 %vm6263_vm3, %v13252_v48 }
 0x303   :  { %v8644_v1 = vpop.permute.xlu0 %2240  ;;  %6508 = vmatpush3.bf16.msk.msra.mxu0 %vm6263_vm3, %v13252_v48 }
 0x304   :  { %13318 = vst [vmem:[#allocation26_spill] sm:$0xff] %v8644_v1  ;;  %vm2314_vm7 = vcmp.ge.f32.partialorder %v8636_v25, %v8644_v1  ;;  %3167 = vperm.xlu0 %6626, %v13319_v6  }
 0x305   :  { %vm6265_vm8 = vmpackc.low %vm2314_vm7, %vm2313_vm5 }
 0x306   :  { %6509 = vmatprep.mubr.msk.bf16.mxu0 %vm6265_vm8, %v13252_v48 }
 0x307   :  { %v8653_v30 = vpop.permute.xlu0 %2245 }
 0x308   :  { %13320 = vst [vmem:[#allocation31_spill] sm:$0xff] %v8653_v30  ;;  %3177 = vperm.xlu0 %6626, %v13321_v47   ;;  %vm2315_vm4 = vcmp.ge.f32.partialorder %v8636_v25, %v8653_v30  ;;  %v8669_v47 = vrot.slane %v13326_v51, %v8077_v14 }
 0x30b   :  { %v8656_v3 = vpop.permute.xlu0 %2250 }
 0x30c   :  { %13322 = vst [vmem:[#allocation33_spill] sm:$0xff] %v8656_v3  ;;  %vm2316_vm6 = vcmp.ge.f32.partialorder %v8636_v25, %v8656_v3  ;;  %3187 = vperm.xlu0 %6626, %v13323_v36  }
 0x30d   :  { %vm6267_vm9 = vmpackc.low %vm2316_vm6, %vm2315_vm4 }
 0x30e   :  { %6510 = vmatmul.mubr.msk.bf16.vlgmr.msra.gmra.mrb[16].mxu0 %vm6267_vm9, %v13252_v48 }
 0x30f   :  { %v8664_v6 = vpop.permute.xlu0 %3268 }
 0x310   :  { %13324 = vst [vmem:[#allocation35_spill] sm:$0xff] %v8664_v6  ;;  %3197 = vperm.xlu0 %6626, %v13325_v27   ;;  %vm3352_vm10 = vcmp.ge.f32.partialorder %v8664_v6, %v8669_v47 }
 0x313   :  { %v8671_v10 = vpop.permute.xlu0 %3273 }
 0x314   :  { %13327 = vst [vmem:[#allocation37_spill] sm:$0xff] %v8671_v10  ;;  %3207 = vperm.xlu0 %6626, %v13328_v9   ;;  %vm3353_vm11 = vcmp.ge.f32.partialorder %v8671_v10, %v8669_v47 }
 0x315   :  { %vm6329_vm12 = vmpackc.low %vm3353_vm11, %vm3352_vm10 }
 0x316   :  { %6525 = vmatprep.subr.msk.bf16.mxu1 %vm6329_vm12, %v13252_v48 }
 0x317   :  { %6526 = vmatpush3.bf16.msk.msra.mxu1 %vm6329_vm12, %v13252_v48  ;;  %v8680_v27 = vpop.permute.xlu0 %3278 }
 0x318   :  { %13329 = vst [vmem:[#allocation39_spill] sm:$0xff] %v8680_v27 }
 0x31b   :  { %v8682_v36 = vpop.permute.xlu0 %2255 }
 0x31c   :  { %13330 = vst [vmem:[#allocation42_spill] sm:$0xff] %v8682_v36  ;;  %vm2317_vm13 = vcmp.ge.f32.partialorder %v8636_v25, %v8682_v36 }
 0x31f   :  { %v8684_v38 = vpop.permute.xlu0 %2260 }
 0x320   :  { %13331 = vst [vmem:[#allocation101_spill] sm:$0xff] %v8684_v38  ;;  %vm2318_vm14 = vcmp.ge.f32.partialorder %v8636_v25, %v8684_v38 }
 0x321   :  { %vm6269_vm15 = vmpackc.low %vm2318_vm14, %vm2317_vm13 }
 0x322   :  { %6513 = vmatprep.mubr.msk.bf16.mxu0 %vm6269_vm15, %v13252_v48 }
 0x323   :  { %v8691_v9 = vpop.permute.xlu0 %2265 }
 0x324   :  { %13332 = vst [vmem:[#allocation102_spill] sm:$0xff] %v8691_v9  ;;  %vm2319_vm0 = vcmp.ge.f32.partialorder %v8636_v25, %v8691_v9 }
 0x327   :  { %v8693_v10 = vpop.permute.xlu0 %2270 }
 0x328   :  { %13333 = vst [vmem:[#allocation103_spill] sm:$0xff] %v8693_v10  ;;  %vm2320_vm1 = vcmp.ge.f32.partialorder %v8636_v25, %v8693_v10 }
 0x329   :  { %vm6271_vm2 = vmpackc.low %vm2320_vm1, %vm2319_vm0 }
 0x32a   :  { %6514 = vmatmul.mubr.msk.bf16.gmra.mrb[20].mxu0 %vm6271_vm2, %v13252_v48 }
 0x32b   :  { %v8700_v6 = vpop.permute.xlu0 %3288 }
 0x32c   :  { %13334 = vst [vmem:[#allocation104_spill] sm:$0xff] %v8700_v6  ;;  %vm3356_vm3 = vcmp.ge.f32.partialorder %v8700_v6, %v8669_v47 }
 0x32f   :  { %v8702_v44 = vpop.permute.xlu0 %3293 }
 0x330   :  { %13335 = vst [vmem:[#allocation105_spill] sm:$0xff] %v8702_v44  ;;  %vm3357_vm5 = vcmp.ge.f32.partialorder %v8702_v44, %v8669_v47 }
 0x331   :  { %vm8708_vm7 = vmpackc.low %vm3357_vm5, %vm3356_vm3 }
 0x333   :  { %v8712_v42 = vpop.permute.xlu0 %3298 }
 0x334   :  { %13338 = vst [vmem:[#allocation106_spill] sm:$0xff] %v8712_v42  ;;  %vm3358_vm8 = vcmp.ge.f32.partialorder %v8712_v42, %v8669_v47 }
 0x337   :  { %v8714_v60 = vpop.permute.xlu0 %3303 }
 0x338   :  { %13339 = vst [vmem:[#allocation107_spill] sm:$0xff] %v8714_v60  ;;  %vm3359_vm4 = vcmp.ge.f32.partialorder %v8714_v60, %v8669_v47 }
 0x339   :  { %vm8720_vm6 = vmpackc.low %vm3359_vm4, %vm3358_vm8 }
 0x33b   :  { %v8724_v6 = vpop.permute.xlu0 %2275 }
 0x33c   :  { %13342 = vst [vmem:[#allocation108_spill] sm:$0xff] %v8724_v6  ;;  %vm2321_vm9 = vcmp.ge.f32.partialorder %v8636_v25, %v8724_v6 }
 0x33f   :  { %v8726_v44 = vpop.permute.xlu0 %2280 }
 0x340   :  { %13343 = vst [vmem:[#allocation109_spill] sm:$0xff] %v8726_v44  ;;  %vm2322_vm10 = vcmp.ge.f32.partialorder %v8636_v25, %v8726_v44 }
 0x341   :  { %vm6273_vm11 = vmpackc.low %vm2322_vm10, %vm2321_vm9 }
 0x342   :  { %6517 = vmatprep.mubr.msk.bf16.mxu0 %vm6273_vm11, %v13252_v48 }
 0x343   :  { %v8733_v42 = vpop.permute.xlu0 %2285 }
 0x344   :  { %13344 = vst [vmem:[#allocation110_spill] sm:$0xff] %v8733_v42  ;;  %vm2323_vm12 = vcmp.ge.f32.partialorder %v8636_v25, %v8733_v42 }
 0x347   :  { %v8735_v60 = vpop.permute.xlu0 %2290 }
 0x348   :  { %13345 = vst [vmem:[#allocation111_spill] sm:$0xff] %v8735_v60  ;;  %vm2324_vm13 = vcmp.ge.f32.partialorder %v8636_v25, %v8735_v60 }
 0x349   :  { %vm6275_vm14 = vmpackc.low %vm2324_vm13, %vm2323_vm12 }
 0x34a   :  { %6518 = vmatmul.mubr.msk.bf16.gmra.mrb[24].mxu0 %vm6275_vm14, %v13252_v48 }
 0x34b   :  { %v8742_v45 = vpop.permute.xlu0 %3308 }
 0x34c   :  { %13346 = vst [vmem:[#allocation112_spill] sm:$0xff] %v8742_v45  ;;  %vm3360_vm15 = vcmp.ge.f32.partialorder %v8742_v45, %v8669_v47 }
 0x34f   :  { %v8744_v43 = vpop.permute.xlu0 %3313 }
 0x350   :  { %13347 = vst [vmem:[#allocation113_spill] sm:$0xff] %v8744_v43  ;;  %vm3361_vm0 = vcmp.ge.f32.partialorder %v8744_v43, %v8669_v47 }
 0x351   :  { %vm8750_vm1 = vmpackc.low %vm3361_vm0, %vm3360_vm15 }
 0x353   :  { %v8754_v56 = vpop.permute.xlu0 %3318 }
 0x354   :  { %13350 = vst [vmem:[#allocation114_spill] sm:$0xff] %v8754_v56 }
 0x357   :  { %v8756_v4 = vpop.permute.xlu0 %3323 }
 0x358   :  { %13351 = vst [vmem:[#allocation115_spill] sm:$0xff] %v8756_v4 }
 0x35b   :  { %v8758_v31 = vpop.permute.xlu0 %2295 }
 0x35c   :  { %13352 = vst [vmem:[#allocation116_spill] sm:$0xff] %v8758_v31  ;;  %vm2325_vm2 = vcmp.ge.f32.partialorder %v8636_v25, %v8758_v31 }
 0x35f   :  { %v8760_v40 = vpop.permute.xlu0 %2300 }
 0x360   :  { %13353 = vst [vmem:[#allocation117_spill] sm:$0xff] %v8760_v40  ;;  %vm2326_vm3 = vcmp.ge.f32.partialorder %v8636_v25, %v8760_v40 }
 0x361   :  { %vm6277_vm5 = vmpackc.low %vm2326_vm3, %vm2325_vm2 }
 0x362   :  { %6521 = vmatprep.mubr.msk.bf16.mxu0 %vm6277_vm5, %v13252_v48 }
 0x363   :  { %v8767_v43 = vpop.permute.xlu0 %2305 }
 0x364   :  { %13354 = vst [vmem:[#allocation118_spill] sm:$0xff] %v8767_v43  ;;  %vm2327_vm8 = vcmp.ge.f32.partialorder %v8636_v25, %v8767_v43 }
 0x367   :  { %v8769_v45 = vpop.permute.xlu0 %2310 }
 0x368   :  { %13355 = vst [vmem:[#allocation119_spill] sm:$0xff] %v8769_v45  ;;  %vm2328_vm4 = vcmp.ge.f32.partialorder %v8636_v25, %v8769_v45 }
 0x369   :  { %vm6279_vm9 = vmpackc.low %vm2328_vm4, %vm2327_vm8 }
 0x36a   :  { %6522 = vmatmul.mubr.msk.bf16.gmra.mrb[28].mxu0 %vm6279_vm9, %v13252_v48 }
 0x38d   :  { %v8776_v11 = vpop.f32.mrb[0].mxu0 }
 0x38e   :  { %v8778_v22 = vpop.f32.mrb[1].mxu0  ;;  %vm816_vm10 = vcmp.ge.f32.partialorder %v8776_v11, 116.0 }
 0x38f   :  { %v8780_v51 = vpop.f32.mrb[2].mxu0  ;;  %vm814_vm11 = vcmp.ge.f32.partialorder %v8778_v22, 116.0  ;;  %v832_v39 = vsel %vm816_vm10, %v8776_v11, 129.0 }
 0x390   :  { %v8782_v33 = vpop.f32.mrb[3].mxu0  ;;  %vm817_vm12 = vcmp.ge.f32.partialorder %v8780_v51, 116.0  ;;  %v830_v43 = vsel %vm814_vm11, %v8778_v22, 129.0 }
 0x391   :  { %vm815_vm14 = vcmp.ge.f32.partialorder %v8782_v33, 116.0  ;;  %v833_v42 = vsel %vm817_vm12, %v8780_v51, 129.0 }
 0x392   :  { %v831_v10 = vsel %vm815_vm14, %v8782_v33, 129.0 }
 0x395   :  { %v8786_v62 = vpop.f32.mrb[4].mxu0 }
 0x396   :  { %vm820_vm13 = vcmp.ge.f32.partialorder %v8786_v62, 116.0  ;;  %v8790_v25 = vpop.f32.mrb[5].mxu0 }
 0x397   :  { %v836_v32 = vsel %vm820_vm13, %v8786_v62, 129.0  ;;  %vm818_vm15 = vcmp.ge.f32.partialorder %v8790_v25, 116.0  ;;  %v8796_v45 = vpop.f32.mrb[6].mxu0 }
 0x398   :  { %v848_v40 = vmin.f32 %v832_v39, %v836_v32  ;;  %v834_v31 = vsel %vm818_vm15, %v8790_v25, 129.0  ;;  %vm821_vm0 = vcmp.ge.f32.partialorder %v8796_v45, 116.0  ;;  %v8801_v60 = vpop.f32.mrb[7].mxu0 }
 0x399   :  { %v846_v44 = vmin.f32 %v830_v43, %v834_v31  ;;  %v837_v6 = vsel %vm821_vm0, %v8796_v45, 129.0  ;;  %vm819_vm2 = vcmp.ge.f32.partialorder %v8801_v60, 116.0 }
 0x39a   :  { %v849_v9 = vmin.f32 %v833_v42, %v837_v6  ;;  %v835_v3 = vsel %vm819_vm2, %v8801_v60, 129.0 }
 0x39b   :  { %v847_v38 = vmin.f32 %v831_v10, %v835_v3 }
 0x39d   :  { %v8808_v32 = vpop.f32.mrb[8].mxu0 }
 0x39e   :  { %vm824_vm3 = vcmp.ge.f32.partialorder %v8808_v32, 116.0  ;;  %v8811_v39 = vpop.f32.mrb[9].mxu0 }
 0x39f   :  { %v840_v36 = vsel %vm824_vm3, %v8808_v32, 129.0  ;;  %vm822_vm5 = vcmp.ge.f32.partialorder %v8811_v39, 116.0  ;;  %v8815_v43 = vpop.f32.mrb[10].mxu0 }
 0x3a0   :  { %v852_v31 = vmin.f32 %v848_v40, %v840_v36  ;;  %v838_v30 = vsel %vm822_vm5, %v8811_v39, 129.0  ;;  %vm825_vm8 = vcmp.ge.f32.partialorder %v8815_v43, 116.0  ;;  %v8819_v42 = vpop.f32.mrb[11].mxu0 }
 0x3a1   :  { %v850_v10 = vmin.f32 %v846_v44, %v838_v30  ;;  %v841_v3 = vsel %vm825_vm8, %v8815_v43, 129.0  ;;  %vm823_vm4 = vcmp.ge.f32.partialorder %v8819_v42, 116.0 }
 0x3a2   :  { %v853_v6 = vmin.f32 %v849_v9, %v841_v3  ;;  %v839_v1 = vsel %vm823_vm4, %v8819_v42, 129.0 }
 0x3a3   :  { %v851_v63 = vmin.f32 %v847_v38, %v839_v1 }
 0x3a5   :  { %v8824_v37 = vpop.f32.mrb[12].mxu0 }
 0x3a6   :  { %vm828_vm9 = vcmp.ge.f32.partialorder %v8824_v37, 116.0  ;;  %v8827_v40 = vpop.f32.mrb[13].mxu0 }
 0x3a7   :  { %v844_v36 = vsel %vm828_vm9, %v8824_v37, 129.0  ;;  %vm826_vm10 = vcmp.ge.f32.partialorder %v8827_v40, 116.0  ;;  %v8831_v46 = vpop.f32.mrb[14].mxu0 }
 0x3a8   :  { %v856_v44 = vmin.f32 %v852_v31, %v844_v36  ;;  %v842_v30 = vsel %vm826_vm10, %v8827_v40, 129.0  ;;  %vm829_vm11 = vcmp.ge.f32.partialorder %v8831_v46, 116.0  ;;  %v8835_v9 = vpop.f32.mrb[15].mxu0 }
 0x3a9   :  { %v854_v38 = vmin.f32 %v850_v10, %v842_v30  ;;  %v845_v1 = vsel %vm829_vm11, %v8831_v46, 129.0  ;;  %vm827_vm12 = vcmp.ge.f32.partialorder %v8835_v9, 116.0 }
 0x3aa   :  { %v857_v3 = vmin.f32 %v853_v6, %v845_v1  ;;  %v843_v35 = vsel %vm827_vm12, %v8835_v9, 129.0 }
 0x3ab   :  { %v855_v12 = vmin.f32 %v851_v63, %v843_v35 }
 0x3ac   :  { %v859_v2 = vmin.f32 %v856_v44, %v857_v3 }
 0x3ad   :  { %v858_v17 = vmin.f32 %v854_v38, %v855_v12 }
 0x3af   :  { %v860_v24 = vmin.f32 %v858_v17, %v859_v2 }
 0x3b1   :  { %861 = vmin.xlane.f32.xlu1 %v860_v24 }
 0x3b5   :  { %v8840_v31 = vpop.f32.mrb[0].mxu1 }
 0x3b6   :  { %13356 = vst [vmem:[#allocation120_spill] sm:$0xff] %v8840_v31  ;;  %v8842_v36 = vpop.f32.mrb[1].mxu1  ;;  %vm1713_vm13 = vcmp.ge.f32.partialorder %v8840_v31, 116.0 }
 0x3b7   :  { %v8844_v52 = vpop.f32.mrb[2].mxu1  ;;  %vm1711_vm14 = vcmp.ge.f32.partialorder %v8842_v36, 116.0  ;;  %v1729_v24 = vsel %vm1713_vm13, %v8840_v31, 129.0  ;;  %v8978_v31 = vpop.permute.xlu0 %3328 }
 0x3b8   :  { %13357 = vst [vmem:[#allocation121_spill] sm:$0xff] %v8844_v52  ;;  %v8846_v28 = vpop.f32.mrb[3].mxu1  ;;  %vm1714_vm15 = vcmp.ge.f32.partialorder %v8844_v52, 116.0  ;;  %v1727_v12 = vsel %vm1711_vm14, %v8842_v36, 129.0  ;;  %13394 = vst [vmem:[#allocation138_spill] sm:$0xff] %v8978_v31 }
 0x3b9   :  { %vm1712_vm2 = vcmp.ge.f32.partialorder %v8846_v28, 116.0  ;;  %v1730_v30 = vsel %vm1714_vm15, %v8844_v52, 129.0 }
 0x3ba   :  { %v1728_v3 = vsel %vm1712_vm2, %v8846_v28, 129.0 }
 0x3bd   :  { %v8850_v10 = vpop.f32.mrb[4].mxu1 }
 0x3be   :  { %13358 = vst [vmem:[#allocation122_spill] sm:$0xff] %v8850_v10  ;;  %vm1717_vm0 = vcmp.ge.f32.partialorder %v8850_v10, 116.0  ;;  %v8854_v2 = vpop.f32.mrb[5].mxu1 }
 0x3bf   :  { %13359 = vst [vmem:[#allocation123_spill] sm:$0xff] %v8854_v2  ;;  %v1733_v35 = vsel %vm1717_vm0, %v8850_v10, 129.0  ;;  %vm1715_vm3 = vcmp.ge.f32.partialorder %v8854_v2, 116.0  ;;  %v8860_v17 = vpop.f32.mrb[6].mxu1 }
 0x3c0   :  { %13360 = vst [vmem:[#allocation124_spill] sm:$0xff] %v8860_v17  ;;  %v1745_v63 = vmin.f32 %v1729_v24, %v1733_v35  ;;  %v1731_v6 = vsel %vm1715_vm3, %v8854_v2, 129.0  ;;  %vm1718_vm5 = vcmp.ge.f32.partialorder %v8860_v17, 116.0  ;;  %v8865_v44 = vpop.f32.mrb[7].mxu1 }
 0x3c1   :  { %13361 = vst [vmem:[#allocation125_spill] sm:$0xff] %v8865_v44  ;;  %v1743_v38 = vmin.f32 %v1727_v12, %v1731_v6  ;;  %v1734_v1 = vsel %vm1718_vm5, %v8860_v17, 129.0  ;;  %vm1716_vm8 = vcmp.ge.f32.partialorder %v8865_v44, 116.0 }
 0x3c2   :  { %v1746_v34 = vmin.f32 %v1730_v30, %v1734_v1  ;;  %v1732_v23 = vsel %vm1716_vm8, %v8865_v44, 129.0 }
 0x3c3   :  { %v1744_v15 = vmin.f32 %v1728_v3, %v1732_v23 }
 0x3c5   :  { %v8872_v24 = vpop.f32.mrb[8].mxu1 }
 0x3c6   :  { %13362 = vst [vmem:[#allocation126_spill] sm:$0xff] %v8872_v24  ;;  %vm1721_vm4 = vcmp.ge.f32.partialorder %v8872_v24, 116.0  ;;  %v8875_v35 = vpop.f32.mrb[9].mxu1 }
 0x3c7   :  { %13363 = vst [vmem:[#allocation127_spill] sm:$0xff] %v8875_v35  ;;  %v1737_v8 = vsel %vm1721_vm4, %v8872_v24, 129.0  ;;  %vm1719_vm9 = vcmp.ge.f32.partialorder %v8875_v35, 116.0  ;;  %v8879_v12 = vpop.f32.mrb[10].mxu1 }
 0x3c8   :  { %13364 = vst [vmem:[#allocation128_spill] sm:$0xff] %v8879_v12  ;;  %v1749_v6 = vmin.f32 %v1745_v63, %v1737_v8  ;;  %v1735_v19 = vsel %vm1719_vm9, %v8875_v35, 129.0  ;;  %vm1722_vm10 = vcmp.ge.f32.partialorder %v8879_v12, 116.0  ;;  %v8883_v30 = vpop.f32.mrb[11].mxu1 }
 0x3c9   :  { %13365 = vst [vmem:[#allocation129_spill] sm:$0xff] %v8883_v30  ;;  %v1747_v23 = vmin.f32 %v1743_v38, %v1735_v19  ;;  %v1738_v1 = vsel %vm1722_vm10, %v8879_v12, 129.0  ;;  %vm1720_vm11 = vcmp.ge.f32.partialorder %v8883_v30, 116.0 }
 0x3ca   :  { %v1750_v3 = vmin.f32 %v1746_v34, %v1738_v1  ;;  %v1736_v13 = vsel %vm1720_vm11, %v8883_v30, 129.0 }
 0x3cb   :  { %v1748_v16 = vmin.f32 %v1744_v15, %v1736_v13 }
 0x3cd   :  { %v8888_v26 = vpop.f32.mrb[12].mxu1 }
 0x3ce   :  { %13366 = vst [vmem:[#allocation130_spill] sm:$0xff] %v8888_v26  ;;  %vm1725_vm12 = vcmp.ge.f32.partialorder %v8888_v26, 116.0  ;;  %v8891_v8 = vpop.f32.mrb[13].mxu1 }
 0x3cf   :  { %13367 = vst [vmem:[#allocation131_spill] sm:$0xff] %v8891_v8  ;;  %v1741_v63 = vsel %vm1725_vm12, %v8888_v26, 129.0  ;;  %vm1723_vm13 = vcmp.ge.f32.partialorder %v8891_v8, 116.0  ;;  %v8895_v24 = vpop.f32.mrb[14].mxu1 }
 0x3d0   :  { %13368 = vst [vmem:[#allocation132_spill] sm:$0xff] %v8895_v24  ;;  %v1753_v19 = vmin.f32 %v1749_v6, %v1741_v63  ;;  %v1739_v38 = vsel %vm1723_vm13, %v8891_v8, 129.0  ;;  %vm1726_vm14 = vcmp.ge.f32.partialorder %v8895_v24, 116.0  ;;  %v8899_v34 = vpop.f32.mrb[15].mxu1 }
 0x3d1   :  { %13369 = vst [vmem:[#allocation133_spill] sm:$0xff] %v8899_v34  ;;  %v1751_v13 = vmin.f32 %v1747_v23, %v1739_v38  ;;  %v1742_v15 = vsel %vm1726_vm14, %v8895_v24, 129.0  ;;  %vm1724_vm15 = vcmp.ge.f32.partialorder %v8899_v34, 116.0  ;;  %v13374_v23 = vld [vmem:[#allocation19_spill] sm:$0xff]  ;;  %v13375_v38 = vld [vmem:[#allocation25_spill] sm:$0xff]  ;;  %v13387_v24 = vld [vmem:[#allocation40_spill] sm:$0xff] }
 0x3d2   :  { %v1754_v1 = vmin.f32 %v1750_v3, %v1742_v15  ;;  %v1740_v12 = vsel %vm1724_vm15, %v8899_v34, 129.0  ;;  %v13376_v3 = vld [vmem:[#allocation27_spill] sm:$0xff]  ;;  %v13377_v15 = vld [vmem:[#allocation28_spill] sm:$0xff] }
 0x3d3   :  { %v1752_v26 = vmin.f32 %v1748_v16, %v1740_v12  ;;  %v13378_v16 = vld [vmem:[#allocation30_spill] sm:$0xff] }
 0x3d4   :  { %v1756_v30 = vmin.f32 %v1753_v19, %v1754_v1 }
 0x3d5   :  { %v1755_v35 = vmin.f32 %v1751_v13, %v1752_v26 }
 0x3d7   :  { %v1757_v17 = vmin.f32 %v1755_v35, %v1756_v30  ;;  %v13381_v35 = vld [vmem:[#allocation32_spill] sm:$0xff] }
 0x3d9   :  { %1758 = vmin.xlane.f32.xlu1 %v1757_v17 }
 0x3e1   :  { %v8904_v6 = vpop.f32.mrb[16].mxu0 }
 0x3e2   :  { %13370 = vst [vmem:[#allocation134_spill] sm:$0xff] %v8904_v6  ;;  %v8906_v63 = vpop.f32.mrb[17].mxu0  ;;  %vm2610_vm0 = vcmp.ge.f32.partialorder %v8904_v6, 116.0 }
 0x3e3   :  { %13371 = vst [vmem:[#allocation135_spill] sm:$0xff] %v8906_v63  ;;  %v8908_v8 = vpop.f32.mrb[18].mxu0  ;;  %vm2608_vm2 = vcmp.ge.f32.partialorder %v8906_v63, 116.0  ;;  %v2626_v12 = vsel %vm2610_vm0, %v8904_v6, 129.0 }
 0x3e4   :  { %13372 = vst [vmem:[#allocation136_spill] sm:$0xff] %v8908_v8  ;;  %v8910_v10 = vpop.f32.mrb[19].mxu0  ;;  %vm2611_vm3 = vcmp.ge.f32.partialorder %v8908_v8, 116.0  ;;  %v2624_v13 = vsel %vm2608_vm2, %v8906_v63, 129.0  ;;  %v13384_v63 = vld [vmem:[#allocation34_spill] sm:$0xff] }
 0x3e5   :  { %13373 = vst [vmem:[#allocation137_spill] sm:$0xff] %v8910_v10  ;;  %vm2609_vm8 = vcmp.ge.f32.partialorder %v8910_v10, 116.0 }
 0x3ea   :  { %3283 = vperm.xlu1 %6627, %v13374_v23  }
 0x3ee   :  { %3338 = vperm.xlu1 %6627, %v13375_v38  }
 0x3f2   :  { %3132 = vperm.xlu1 %6627, %v13376_v3   ;;  %v2627_v3 = vsel %vm2611_vm3, %v8908_v8, 129.0 }
 0x3f6   :  { %3142 = vperm.xlu1 %6627, %v13377_v15  }
 0x3fa   :  { %3152 = vperm.xlu1 %6627, %v13378_v16  }
 0x3fd   :  { %v8919_v26 = vpop.f32.mrb[20].mxu0 }
 0x3fe   :  { %13379 = vst [vmem:[#allocation19_spill] sm:$0xff] %v8919_v26  ;;  %vm2614_vm5 = vcmp.ge.f32.partialorder %v8919_v26, 116.0  ;;  %v8923_v17 = vpop.f32.mrb[21].mxu0  ;;  %3162 = vperm.xlu1 %6627, %v13381_v35   ;;  %v2625_v35 = vsel %vm2609_vm8, %v8910_v10, 129.0 }
 0x3ff   :  { %13380 = vst [vmem:[#allocation25_spill] sm:$0xff] %v8923_v17  ;;  %v2630_v30 = vsel %vm2614_vm5, %v8919_v26, 129.0  ;;  %vm2612_vm4 = vcmp.ge.f32.partialorder %v8923_v17, 116.0  ;;  %v8930_v19 = vpop.f32.mrb[22].mxu0  ;;  %vm3354_vm5 = vcmp.ge.f32.partialorder %v8680_v27, %v8669_v47 }
 0x400   :  { %13382 = vst [vmem:[#allocation27_spill] sm:$0xff] %v8930_v19  ;;  %v2642_v1 = vmin.f32 %v2626_v12, %v2630_v30  ;;  %v2628_v23 = vsel %vm2612_vm4, %v8923_v17, 129.0  ;;  %vm2615_vm9 = vcmp.ge.f32.partialorder %v8930_v19, 116.0  ;;  %v8935_v38 = vpop.f32.mrb[23].mxu0  ;;  %v13385_v30 = vld [vmem:[#allocation36_spill] sm:$0xff]  ;;  %v13386_v17 = vld [vmem:[#allocation38_spill] sm:$0xff] }
 0x401   :  { %13383 = vst [vmem:[#allocation28_spill] sm:$0xff] %v8935_v38  ;;  %v2640_v15 = vmin.f32 %v2624_v13, %v2628_v23  ;;  %v2631_v16 = vsel %vm2615_vm9, %v8930_v19, 129.0  ;;  %vm2613_vm10 = vcmp.ge.f32.partialorder %v8935_v38, 116.0 }
 0x402   :  { %v2643_v26 = vmin.f32 %v2627_v3, %v2631_v16  ;;  %v2629_v6 = vsel %vm2613_vm10, %v8935_v38, 129.0  ;;  %3172 = vperm.xlu1 %6627, %v13384_v63  }
 0x403   :  { %v2641_v12 = vmin.f32 %v2625_v35, %v2629_v6 }
 0x406   :  { %3182 = vperm.xlu1 %6627, %v13385_v30  }
 0x40a   :  { %3192 = vperm.xlu1 %6627, %v13386_v17  }
 0x40e   :  { %3202 = vperm.xlu1 %6627, %v13387_v24  }
 0x41d   :  { %v8946_v8 = vpop.f32.mrb[24].mxu0 }
 0x41e   :  { %13388 = vst [vmem:[#allocation30_spill] sm:$0xff] %v8946_v8  ;;  %vm2618_vm11 = vcmp.ge.f32.partialorder %v8946_v8, 116.0  ;;  %v8949_v13 = vpop.f32.mrb[25].mxu0 }
 0x41f   :  { %13389 = vst [vmem:[#allocation32_spill] sm:$0xff] %v8949_v13  ;;  %v2634_v23 = vsel %vm2618_vm11, %v8946_v8, 129.0  ;;  %vm2616_vm12 = vcmp.ge.f32.partialorder %v8949_v13, 116.0  ;;  %v8953_v3 = vpop.f32.mrb[26].mxu0 }
 0x420   :  { %13390 = vst [vmem:[#allocation34_spill] sm:$0xff] %v8953_v3  ;;  %v2646_v63 = vmin.f32 %v2642_v1, %v2634_v23  ;;  %v2632_v6 = vsel %vm2616_vm12, %v8949_v13, 129.0  ;;  %vm2619_vm13 = vcmp.ge.f32.partialorder %v8953_v3, 116.0  ;;  %v8957_v17 = vpop.f32.mrb[27].mxu0  ;;  %vm3362_vm12 = vcmp.ge.f32.partialorder %v8754_v56, %v8669_v47 }
 0x421   :  { %13391 = vst [vmem:[#allocation36_spill] sm:$0xff] %v8957_v17  ;;  %v2644_v24 = vmin.f32 %v2640_v15, %v2632_v6  ;;  %v2635_v16 = vsel %vm2619_vm13, %v8953_v3, 129.0  ;;  %vm2617_vm14 = vcmp.ge.f32.partialorder %v8957_v17, 116.0 }
 0x422   :  { %v2647_v35 = vmin.f32 %v2643_v26, %v2635_v16  ;;  %v2633_v30 = vsel %vm2617_vm14, %v8957_v17, 129.0  ;;  %vm3364_vm14 = vcmp.ge.f32.partialorder %v8978_v31, %v8669_v47 }
 0x423   :  { %v2645_v8 = vmin.f32 %v2641_v12, %v2633_v30 }
 0x43d   :  { %v8962_v19 = vpop.f32.mrb[28].mxu0 }
 0x43e   :  { %13392 = vst [vmem:[#allocation38_spill] sm:$0xff] %v8962_v19  ;;  %vm2622_vm15 = vcmp.ge.f32.partialorder %v8962_v19, 116.0  ;;  %v8965_v1 = vpop.f32.mrb[29].mxu0  ;;  %v862_v23 = vpop.xlane.xlu1 %861 }
 0x43f   :  { %13393 = vst [vmem:[#allocation40_spill] sm:$0xff] %v8965_v1  ;;  %v2638_v13 = vsel %vm2622_vm15, %v8962_v19, 129.0  ;;  %vm2620_vm0 = vcmp.ge.f32.partialorder %v8965_v1, 116.0  ;;  %v863_v15 = vrot.slane %v862_v23, 4  ;;  %v8969_v6 = vpop.f32.mrb[30].mxu0 }
 0x440   :  { %v2650_v3 = vmin.f32 %v2646_v63, %v2638_v13  ;;  %v2636_v26 = vsel %vm2620_vm0, %v8965_v1, 129.0  ;;  %vm2623_vm2 = vcmp.ge.f32.partialorder %v8969_v6, 116.0  ;;  %v8973_v12 = vpop.f32.mrb[31].mxu0 }
 0x441   :  { %v2648_v16 = vmin.f32 %v2644_v24, %v2636_v26  ;;  %v864_v30 = vmin.f32 %v862_v23, %v863_v15  ;;  %v2639_v17 = vsel %vm2623_vm2, %v8969_v6, 129.0  ;;  %vm2621_vm3 = vcmp.ge.f32.partialorder %v8973_v12, 116.0  ;;  %v8980_v24 = vpop.permute.xlu0 %3333 }
 0x442   :  { %v2651_v38 = vmin.f32 %v2647_v35, %v2639_v17  ;;  %v2637_v19 = vsel %vm2621_vm3, %v8973_v12, 129.0  ;;  %13395 = vst [vmem:[#allocation139_spill] sm:$0xff] %v8980_v24 }
 0x443   :  { %v2649_v10 = vmin.f32 %v2645_v8, %v2637_v19  ;;  %v865_v34 = vrot.slane %v864_v30, 2 }
 0x444   :  { %v2653_v52 = vmin.f32 %v2650_v3, %v2651_v38 }
 0x445   :  { %v2652_v44 = vmin.f32 %v2648_v16, %v2649_v10  ;;  %v866_v13 = vmin.f32 %v864_v30, %v865_v34  ;;  %v8982_v17 = vpop.permute.xlu0 %3343 }
 0x446   :  { %13396 = vst [vmem:[#allocation140_spill] sm:$0xff] %v8982_v17  ;;  %vm3367_vm15 = vcmp.ge.f32.partialorder %v8982_v17, %v8669_v47  ;;  %v13577_v17 = vld [vmem:[#allocation82_spill] sm:$0xff] }
 0x447   :  { %v2654_v63 = vmin.f32 %v2652_v44, %v2653_v52  ;;  %v867_v1 = vrot.slane %v866_v13, 1  ;;  %v13399_v44 = vld [vmem:[#allocation12_spill] sm:$0xff] }
 0x448   :  { %v13400_v8 = vsub.f32 0.0, %v13399_v44 }
 0x449   :  { %2655 = vmin.xlane.f32.xlu1 %v2654_v63  ;;  %v868_v2 = vmin.f32 %v866_v13, %v867_v1  ;;  %v9002_v38 = vpop.permute.xlu0 %3137 }
 0x44a   :  { %v8997_v34 = vrot.slane %v13400_v8, %v8077_v14 }
 0x44b   :  { %6569 = vpush %v868_v2 }
 0x44c   :  { %vm3211_vm9 = vcmp.ge.f32.partialorder %v8997_v34, %v9002_v38 }
 0x44d   :  { %v9022_v41 = vpop.permute.xlu0 %3147 }
 0x451   :  { %v9039_v16 = vpop.permute.xlu0 %3157 }
 0x466   :  { %v1759_v23 = vpop.xlane.xlu1 %1758 }
 0x467   :  { %v1760_v15 = vrot.slane %v1759_v23, 4 }
 0x469   :  { %v1761_v26 = vmin.f32 %v1759_v23, %v1760_v15  ;;  %v13405_v23 = vld [vmem:[#allocation43_spill] sm:$0xff] }
 0x46a   :  { %v8984_v35 = vpop.permute.xlu1 %3283 }
 0x46b   :  { %13397 = vst [vmem:[#allocation141_spill] sm:$0xff] %v8984_v35  ;;  %vm3355_vm8 = vcmp.ge.f32.partialorder %v8984_v35, %v8669_v47  ;;  %v1762_v52 = vrot.slane %v1761_v26, 2  ;;  %v13707_v35 = vmov 0 }
 0x46c   :  { %vm6331_vm4 = vmpackc.low %vm3355_vm8, %vm3354_vm5 }
 0x46d   :  { %6527 = vmatprep.subr.msk.bf16.mxu1 %vm6331_vm4, %v13252_v48  ;;  %v1763_v10 = vmin.f32 %v1761_v26, %v1762_v52  ;;  %v13406_v26 = vld [vmem:[#allocation44_spill] sm:$0xff] }
 0x46e   :  { %6528 = vmatpush3.bf16.msk.msra.mxu1 %vm6331_vm4, %v13252_v48  ;;  %v8992_v2 = vpop.permute.xlu1 %3338 }
 0x46f   :  { %13398 = vst [vmem:[#allocation142_spill] sm:$0xff] %v8992_v2  ;;  %6529 = vmatprep.subr.msk.bf16.mxu1 %vm8708_vm7, %v13252_v48  ;;  %v1764_v19 = vrot.slane %v1763_v10, 1  ;;  %vm3366_vm8 = vcmp.ge.f32.partialorder %v8992_v2, %v8669_v47 }
 0x471   :  { %v1765_v3 = vmin.f32 %v1763_v10, %v1764_v19  ;;  %v9109_v10 = vpop.permute.xlu0 %3167 }
 0x472   :  { %6530 = vmatpush3.bf16.msk.msra.mxu1 %vm8708_vm7, %v13252_v48  ;;  %v9007_v1 = vpop.permute.xlu1 %3132  ;;  %vm3363_vm7 = vcmp.ge.f32.partialorder %v8756_v4, %v8669_v47  ;;  %v13587_v4 = vld [vmem:[#allocation46_spill] sm:$0xff] }
 0x473   :  { %vm3210_vm10 = vcmp.ge.f32.partialorder %v8997_v34, %v9007_v1  ;;  %6583 = vpush %v1765_v3  ;;  %6531 = vmatprep.subr.msk.bf16.mxu1 %vm8720_vm6, %v13252_v48  ;;  %vm6339_vm13 = vmpackc.low %vm3363_vm7, %vm3362_vm12 }
 0x474   :  { %vm6345_vm11 = vmpackc.low %vm3211_vm9, %vm3210_vm10 }
 0x475   :  { %6541 = vmatprep.mubr.msk.bf16.mxu1 %vm6345_vm11, %v13252_v48 }
 0x476   :  { %6532 = vmatpush3.bf16.msk.msra.mxu1 %vm8720_vm6, %v13252_v48  ;;  %v9020_v14 = vpop.permute.xlu1 %3142  ;;  %vm3365_vm6 = vcmp.ge.f32.partialorder %v8980_v24, %v8669_v47 }
 0x477   :  { %6533 = vmatprep.subr.msk.bf16.mxu1 %vm8750_vm1, %v13252_v48 }
 0x47a   :  { %6534 = vmatpush3.bf16.msk.msra.mxu1 %vm8750_vm1, %v13252_v48  ;;  %v9034_v50 = vpop.permute.xlu1 %3152  ;;  %vm9048_vm1 = vmpackc.low %vm3365_vm6, %vm3364_vm14 }
 0x47b   :  { %6535 = vmatprep.subr.msk.bf16.mxu1 %vm6339_vm13, %v13252_v48 }
 0x47c   :  { %s6570_s1 = spop %6569 }
 0x47d   :  { %v9041_v30 = vstv %s6570_s1 }
 0x47e   :  { %6536 = vmatpush3.bf16.msk.msra.mxu1 %vm6339_vm13, %v13252_v48  ;;  %vm871_vm0 = vcmp.eq.f32.partialorder %v8778_v22, %v9041_v30  ;;  %vm872_vm2 = vcmp.eq.f32.partialorder %v8782_v33, %v9041_v30  ;;  %vm873_vm3 = vcmp.eq.f32.partialorder %v8776_v11, %v9041_v30  ;;  %vm874_vm5 = vcmp.eq.f32.partialorder %v8780_v51, %v9041_v30  ;;  %v9079_v13 = vpop.permute.xlu1 %3162  ;;  %vm9095_vm13 = vmpackc.low %vm3367_vm15, %vm3366_vm8 }
 0x47f   :  { %6537 = vmatprep.subr.msk.bf16.mxu1 %vm9048_vm1, %v13252_v48  ;;  %vm875_vm4 = vcmp.eq.f32.partialorder %v8790_v25, %v9041_v30  ;;  %vm876_vm9 = vcmp.eq.f32.partialorder %v8801_v60, %v9041_v30  ;;  %vm877_vm10 = vcmp.eq.f32.partialorder %v8786_v62, %v9041_v30  ;;  %vm880_vm12 = vcmp.eq.f32.partialorder %v8819_v42, %v9041_v30  ;;  %v9171_v42 = vpop.permute.xlu0 %3177 }
 0x480   :  { %vm882_vm6 = vcmp.eq.f32.partialorder %v8815_v43, %v9041_v30  ;;  %vm884_vm11 = vcmp.eq.f32.partialorder %v8835_v9, %v9041_v30  ;;  %vm885_vm7 = vcmp.eq.f32.partialorder %v8824_v37, %v9041_v30  ;;  %vm886_vm14 = vcmp.eq.f32.partialorder %v8831_v46, %v9041_v30 }
 0x481   :  { %v887_v15 = vsel %vm871_vm0, %v13405_v23, -1e+30  ;;  %v888_v52 = vsel %vm872_vm2, %v13406_v26, -1e+30  ;;  %v889_v44 = vsel %vm873_vm3, %v8102_v59, -1e+30  ;;  %vm13407_vm15 = vcmp.eq.f32.partialorder %v8796_v45, %v9041_v30 }
 0x482   :  { %6538 = vmatpush3.bf16.msk.msra.mxu1 %vm9048_vm1, %v13252_v48  ;;  %v891_v22 = vsel %vm875_vm4, %v8113_v58, -1e+30  ;;  %v892_v33 = vsel %vm876_vm9, %v8117_v7, -1e+30  ;;  %v890_v8 = vsel %vm874_vm5, %v8107_v18, -1e+30  ;;  %vm3213_vm1 = vcmp.ge.f32.partialorder %v8997_v34, %v9022_v41 }
 0x483   :  { %6539 = vmatprep.subr.msk.bf16.mxu1 %vm9095_vm13, %v13252_v48  ;;  %v893_v59 = vsel %vm877_vm10, %v8123_v49, -1e+30  ;;  %v894_v58 = vsel %vm13407_vm15, %v8129_v61, -1e+30  ;;  %v903_v11 = vmax.f32 %v887_v15, %v891_v22  ;;  %vm3212_vm0 = vcmp.ge.f32.partialorder %v8997_v34, %v9020_v14  ;;  %v9153_v49 = vpop.permute.xlu1 %3172  ;;  %v13411_v15 = vld [vmem:[#allocation120_spill] sm:$0xff]  ;;  %v13412_v26 = vld [vmem:[#allocation123_spill] sm:$0xff] }
 0x484   :  { %v904_v7 = vmax.f32 %v888_v52, %v892_v33  ;;  %vm3215_vm2 = vcmp.ge.f32.partialorder %v8997_v34, %v9039_v16  ;;  %vm3214_vm3 = vcmp.ge.f32.partialorder %v8997_v34, %v9034_v50  ;;  %vm13408_vm5 = vcmp.eq.f32.partialorder %v8811_v39, %v9041_v30  ;;  %vm6347_vm4 = vmpackc.low %vm3213_vm1, %vm3212_vm0  ;;  %v13413_v52 = vld [vmem:[#allocation125_spill] sm:$0xff]  ;;  %v13415_v22 = vld [vmem:[#allocation122_spill] sm:$0xff] }
 0x485   :  { %v895_v62 = vsel %vm13408_vm5, %v8135_v0, -1e+30  ;;  %v905_v18 = vmax.f32 %v889_v44, %v893_v59  ;;  %v896_v61 = vsel %vm880_vm12, %v8141_v57, -1e+30  ;;  %vm13409_vm8 = vcmp.eq.f32.partialorder %v8808_v32, %v9041_v30  ;;  %vm6349_vm10 = vmpackc.low %vm3215_vm2, %vm3214_vm3  ;;  %v13414_v44 = vld [vmem:[#allocation121_spill] sm:$0xff]  ;;  %v13417_v33 = vld [vmem:[#allocation127_spill] sm:$0xff] }
 0x486   :  { %6540 = vmatpush3.bf16.msk.msra.mxu1 %vm9095_vm13, %v13252_v48  ;;  %v897_v60 = vsel %vm13409_vm8, %v8147_v54, -1e+30  ;;  %v906_v45 = vmax.f32 %v890_v8, %v894_v58  ;;  %v907_v51 = vmax.f32 %v903_v11, %v895_v62  ;;  %v898_v0 = vsel %vm882_vm6, %v8151_v55, -1e+30  ;;  %v13419_v8 = vld [vmem:[#allocation126_spill] sm:$0xff]  ;;  %v13421_v59 = vld [vmem:[#allocation55_spill] sm:$0xff] }
 0x487   :  { %vm13410_vm9 = vcmp.eq.f32.partialorder %v8827_v40, %v9041_v30  ;;  %v908_v39 = vmax.f32 %v904_v7, %v896_v61  ;;  %v909_v57 = vmax.f32 %v905_v18, %v897_v60  ;;  %v900_v54 = vsel %vm884_vm11, %v8159_v5, -1e+30  ;;  %v9195_v5 = vpop.permute.xlu1 %3182  ;;  %v13422_v11 = vld [vmem:[#allocation128_spill] sm:$0xff]  ;;  %v13423_v7 = vld [vmem:[#allocation63_spill] sm:$0xff] }
 0x488   :  { %v899_v25 = vsel %vm13410_vm9, %v8155_v21, -1e+30  ;;  %v901_v55 = vsel %vm885_vm7, %v8163_v29, -1e+30  ;;  %v910_v21 = vmax.f32 %v906_v45, %v898_v0  ;;  %v902_v43 = vsel %vm886_vm14, %v8166_v53, -1e+30  ;;  %v9201_v29 = vpop.permute.xlu0 %3187 }
 0x489   :  { %6542 = vmatmul.mubr.msk.bf16.vlgmr.msra.gmra.mrb[16].mxu1 %vm6347_vm4, %v13252_v48  ;;  %v911_v32 = vmax.f32 %v907_v51, %v899_v25  ;;  %v912_v40 = vmax.f32 %v908_v39, %v900_v54  ;;  %v913_v19 = vmax.f32 %v909_v57, %v901_v55  ;;  %vm3216_vm11 = vcmp.ge.f32.partialorder %v8997_v34, %v9079_v13  ;;  %v13424_v18 = vld [vmem:[#allocation56_spill] sm:$0xff]  ;;  %v13425_v60 = vld [vmem:[#allocation67_spill] sm:$0xff]  ;;  %v13426_v51 = vld [vmem:[#allocation65_spill] sm:$0xff] }
 0x48a   :  { %6545 = vmatprep.mubr.msk.bf16.mxu1 %vm6349_vm10, %v13252_v48  ;;  %v914_v3 = vmax.f32 %v910_v21, %v902_v43  ;;  %vm3218_vm7 = vcmp.ge.f32.partialorder %v8997_v34, %v9153_v49  ;;  %vm3217_vm12 = vcmp.ge.f32.partialorder %v8997_v34, %v9109_v10  ;;  %vm3219_vm13 = vcmp.ge.f32.partialorder %v8997_v34, %v9171_v42  ;;  %v13427_v25 = vld [vmem:[#allocation57_spill] sm:$0xff]  ;;  %v13429_v21 = vld [vmem:[#allocation131_spill] sm:$0xff]  ;;  %v13431_v43 = vld [vmem:[#allocation130_spill] sm:$0xff] }
 0x48b   :  { %v915_v20 = vmax.f32 %v911_v32, %v912_v40  ;;  %vm6351_vm6 = vmpackc.low %vm3217_vm12, %vm3216_vm11  ;;  %v9209_v53 = vpop.permute.xlu1 %3192  ;;  %vm3220_vm15 = vcmp.ge.f32.partialorder %v8997_v34, %v9195_v5  ;;  %vm3221_vm0 = vcmp.ge.f32.partialorder %v8997_v34, %v9201_v29  ;;  %v13428_v57 = vld [vmem:[#allocation69_spill] sm:$0xff] }
 0x48c   :  { %v916_v37 = vmax.f32 %v913_v19, %v914_v3  ;;  %vm6353_vm14 = vmpackc.low %vm3219_vm13, %vm3218_vm7  ;;  %v9211_v9 = vpop.permute.xlu0 %3197  ;;  %vm3222_vm1 = vcmp.ge.f32.partialorder %v8997_v34, %v9209_v53  ;;  %v13430_v32 = vld [vmem:[#allocation133_spill] sm:$0xff]  ;;  %v13432_v19 = vld [vmem:[#allocation132_spill] sm:$0xff] }
 0x48d   :  { %vm3223_vm2 = vcmp.ge.f32.partialorder %v8997_v34, %v9211_v9  ;;  %vm6355_vm3 = vmpackc.low %vm3221_vm0, %vm3220_vm15  ;;  %v13433_v3 = vld [vmem:[#allocation58_spill] sm:$0xff] }
 0x48e   :  { %v9203_v46 = vmax.f32 %v915_v20, %v916_v37  ;;  %vm6357_vm5 = vmpackc.low %vm3223_vm2, %vm3222_vm1  ;;  %v13434_v37 = vld [vmem:[#allocation71_spill] sm:$0xff] }
 0x48f   :  { %v9222_v30 = vpop.permute.xlu1 %3202 }
 0x490   :  { %v9225_v63 = vpop.permute.xlu0 %3207  ;;  %vm3224_vm8 = vcmp.ge.f32.partialorder %v8997_v34, %v9222_v30 }
 0x491   :  { %6546 = vmatmul.mubr.msk.bf16.gmra.mrb[20].mxu1 %vm6351_vm6, %v13252_v48  ;;  %vm3225_vm4 = vcmp.ge.f32.partialorder %v8997_v34, %v9225_v63  ;;  %v13416_v34 = vld [vmem:[#allocation124_spill] sm:$0xff] }
 0x492   :  { %6549 = vmatprep.mubr.msk.bf16.mxu1 %vm6353_vm14, %v13252_v48  ;;  %vm6359_vm9 = vmpackc.low %vm3225_vm4, %vm3224_vm8 }
 0x499   :  { %6550 = vmatmul.mubr.msk.bf16.gmra.mrb[24].mxu1 %vm6355_vm3, %v13252_v48 }
 0x49a   :  { %6553 = vmatprep.mubr.msk.bf16.mxu1 %vm6357_vm5, %v13252_v48 }
 0x4a1   :  { %6554 = vmatmul.mubr.msk.bf16.gmra.mrb[28].mxu1 %vm6359_vm9, %v13252_v48  ;;  %v13418_v48 = vld [vmem:[#allocation129_spill] sm:$0xff] }
 0x4a4   :  { %s6584_s26 = spop %6583 }
 0x4a5   :  { %v1767_v23 = vstv %s6584_s26 }
 0x4a6   :  { %vm1768_vm10 = vcmp.eq.f32.partialorder %v8842_v36, %v1767_v23  ;;  %vm1769_vm11 = vcmp.eq.f32.partialorder %v8846_v28, %v1767_v23  ;;  %vm1770_vm7 = vcmp.eq.f32.partialorder %v13411_v15, %v1767_v23  ;;  %vm1772_vm12 = vcmp.eq.f32.partialorder %v13412_v26, %v1767_v23  ;;  %v13420_v36 = vld [vmem:[#allocation9_spill] sm:$0xff] }
 0x4a7   :  { %vm1773_vm13 = vcmp.eq.f32.partialorder %v13413_v52, %v1767_v23  ;;  %vm1771_vm6 = vcmp.eq.f32.partialorder %v13414_v44, %v1767_v23  ;;  %vm1774_vm14 = vcmp.eq.f32.partialorder %v13415_v22, %v1767_v23  ;;  %vm1775_vm15 = vcmp.eq.f32.partialorder %v13416_v34, %v1767_v23  ;;  %v13435_v52 = vld [vmem:[#allocation61_spill] sm:$0xff] }
 0x4a8   :  { %vm1776_vm1 = vcmp.eq.f32.partialorder %v13417_v33, %v1767_v23  ;;  %vm1777_vm0 = vcmp.eq.f32.partialorder %v13418_v48, %v1767_v23  ;;  %vm1778_vm2 = vcmp.eq.f32.partialorder %v13419_v8, %v1767_v23  ;;  %v1784_v28 = vsel %vm1768_vm10, %v13420_v36, -1e+30  ;;  %v13438_v33 = vld [vmem:[#allocation75_spill] sm:$0xff] }
 0x4a9   :  { %v1785_v58 = vsel %vm1769_vm11, %v13421_v59, -1e+30  ;;  %vm1779_vm3 = vcmp.eq.f32.partialorder %v13422_v11, %v1767_v23  ;;  %v1786_v62 = vsel %vm1770_vm7, %v13423_v7, -1e+30  ;;  %v1788_v61 = vsel %vm1772_vm12, %v13424_v18, -1e+30 }
 0x4aa   :  { %v1789_v45 = vsel %vm1773_vm13, %v13425_v60, -1e+30  ;;  %v1787_v0 = vsel %vm1771_vm6, %v13426_v51, -1e+30  ;;  %v1790_v39 = vsel %vm1774_vm14, %v13427_v25, -1e+30  ;;  %v1800_v55 = vmax.f32 %v1784_v28, %v1788_v61 }
 0x4ab   :  { %v1791_v54 = vsel %vm1775_vm15, %v13428_v57, -1e+30  ;;  %vm1780_vm5 = vcmp.eq.f32.partialorder %v13429_v21, %v1767_v23  ;;  %vm1781_vm8 = vcmp.eq.f32.partialorder %v13430_v32, %v1767_v23  ;;  %vm1782_vm4 = vcmp.eq.f32.partialorder %v13431_v43, %v1767_v23  ;;  %v13436_v28 = vld [vmem:[#allocation73_spill] sm:$0xff]  ;;  %v13439_v60 = vld [vmem:[#allocation64_spill] sm:$0xff] }
 0x4ac   :  { %v1801_v40 = vmax.f32 %v1785_v58, %v1789_v45  ;;  %vm1783_vm9 = vcmp.eq.f32.partialorder %v13432_v19, %v1767_v23  ;;  %v1792_v20 = vsel %vm1776_vm1, %v13433_v3, -1e+30  ;;  %v1793_v15 = vsel %vm1777_vm0, %v13434_v37, -1e+30  ;;  %v13437_v58 = vld [vmem:[#allocation62_spill] sm:$0xff]  ;;  %v13440_v25 = vld [vmem:[#allocation77_spill] sm:$0xff] }
 0x4ad   :  { %v1802_v26 = vmax.f32 %v1786_v62, %v1790_v39  ;;  %v1794_v44 = vsel %vm1778_vm2, %v13435_v52, -1e+30  ;;  %v1803_v22 = vmax.f32 %v1787_v0, %v1791_v54  ;;  %v1804_v34 = vmax.f32 %v1800_v55, %v1792_v20  ;;  %v13442_v20 = vld [vmem:[#allocation8_spill] sm:$0xff] }
 0x4ae   :  { %v1805_v36 = vmax.f32 %v1801_v40, %v1793_v15  ;;  %v1795_v59 = vsel %vm1779_vm3, %v13436_v28, -1e+30  ;;  %v1796_v7 = vsel %vm1780_vm5, %v13437_v58, -1e+30  ;;  %v1797_v18 = vsel %vm1781_vm8, %v13438_v33, -1e+30 }
 0x4af   :  { %v1806_v61 = vmax.f32 %v1802_v26, %v1794_v44  ;;  %v1798_v48 = vsel %vm1782_vm4, %v13439_v60, -1e+30  ;;  %v1807_v45 = vmax.f32 %v1803_v22, %v1795_v59  ;;  %v1808_v62 = vmax.f32 %v1804_v34, %v1796_v7  ;;  %v13446_v28 = vld [vmem:[#allocation135_spill] sm:$0xff]  ;;  %v13447_v59 = vld [vmem:[#allocation137_spill] sm:$0xff]  ;;  %v13448_v58 = vld [vmem:[#allocation134_spill] sm:$0xff] }
 0x4b0   :  { %v1809_v51 = vmax.f32 %v1805_v36, %v1797_v18  ;;  %v1799_v8 = vsel %vm1783_vm9, %v13440_v25, -1e+30  ;;  %vm3620_vm10 = vcmp.gt.f32.partialorder %v13442_v20, -14.1951  ;;  %v13443_v23 = vmov 0  ;;  %v13449_v7 = vld [vmem:[#allocation25_spill] sm:$0xff] }
 0x4b1   :  { %v1810_v0 = vmax.f32 %v1806_v61, %v1798_v48  ;;  %v1811_v39 = vmax.f32 %v1807_v45, %v1799_v8  ;;  %v13450_v33 = vld [vmem:[#allocation28_spill] sm:$0xff]  ;;  %v13452_v61 = vld [vmem:[#allocation19_spill] sm:$0xff]  ;;  %v13458_v8 = vld [vmem:[#allocation26_spill] sm:$0xff] }
 0x4b2   :  { %v1812_v57 = vmax.f32 %v1808_v62, %v1809_v51  ;;  %v13451_v18 = vld [vmem:[#allocation136_spill] sm:$0xff]  ;;  %v13453_v60 = vld [vmem:[#allocation27_spill] sm:$0xff]  ;;  %v13456_v62 = vld [vmem:[#allocation30_spill] sm:$0xff] }
 0x4b3   :  { %v1813_v54 = vmax.f32 %v1810_v0, %v1811_v39  ;;  %v13454_v48 = vld [vmem:[#allocation32_spill] sm:$0xff]  ;;  %v13457_v51 = vld [vmem:[#allocation83_spill] sm:$0xff]  ;;  %v13459_v39 = vld [vmem:[#allocation34_spill] sm:$0xff] }
 0x4b4   :  { %v13455_v45 = vld [vmem:[#allocation36_spill] sm:$0xff] }
 0x4b5   :  { %v1814_v11 = vmax.f32 %v1812_v57, %v1813_v54  ;;  %v13460_v57 = vld [vmem:[#allocation31_spill] sm:$0xff] }
 0x4b7   :  { %v1815_v55 = vrot.slane %v1814_v11, 4 }
 0x4b9   :  { %v1816_v21 = vmax.f32 %v1814_v11, %v1815_v55  ;;  %v13461_v11 = vld [vmem:[#allocation42_spill] sm:$0xff] }
 0x4bb   :  { %v1817_v32 = vrot.slane %v1816_v21, 2 }
 0x4bd   :  { %v1818_v43 = vmax.f32 %v1816_v21, %v1817_v32  ;;  %v13462_v21 = vld [vmem:[#allocation101_spill] sm:$0xff] }
 0x4bf   :  { %v1819_v40 = vrot.slane %v1818_v43, 1 }
 0x4c1   :  { %v9274_v3 = vmax.f32 %v1818_v43, %v1819_v40  ;;  %v13463_v43 = vld [vmem:[#allocation33_spill] sm:$0xff] }
 0x4c3   :  { %13441 = vst [vmem:[#allocation12_spill] sm:$0xff] %v9274_v3  ;;  %vm3616_vm11 = vcmp.gt.f32.partialorder %v9274_v3, -1e+29  ;;  %vm3628_vm7 = vcmp.gt.f32.partialorder %v9274_v3, -3.1887 }
 0x4c4   :  { %vm3624_vm12 = vmand %vm3616_vm11, %vm3620_vm10 }
 0x4c5   :  { %vm9279_vm13 = vmand %vm3624_vm12, %vm3628_vm7 }
 0x4c6   :  { %v13444_v23 = vsel %vm9279_vm13, 4294967295, %v13443_v23  ;;  %v3636_v19 = vsel %vm9279_vm13, %v9274_v3, -3.1887 }
 0x4c7   :  { %13445 = vst [vmem:[#allocation43_spill] sm:$0xff] %v13444_v23  ;;  %3671 = vxpose.xlu1.b32.start.end [1/1] (short) %v3636_v19, 128  ;;  %v13464_v19 = vld [vmem:[#allocation102_spill] sm:$0xff] }
 0x4d6   :  { %v2656_v37 = vpop.xlane.xlu1 %2655 }
 0x4d7   :  { %v2657_v15 = vrot.slane %v2656_v37, 4 }
 0x4d9   :  { %v2658_v26 = vmin.f32 %v2656_v37, %v2657_v15  ;;  %v13465_v15 = vld [vmem:[#allocation103_spill] sm:$0xff] }
 0x4db   :  { %v2659_v52 = vrot.slane %v2658_v26, 2 }
 0x4dd   :  { %v2660_v44 = vmin.f32 %v2658_v26, %v2659_v52 }
 0x4df   :  { %v2661_v22 = vrot.slane %v2660_v44, 1 }
 0x4e1   :  { %v2662_v34 = vmin.f32 %v2660_v44, %v2661_v22  ;;  %v13466_v44 = vld [vmem:[#allocation40_spill] sm:$0xff]  ;;  %v13467_v22 = vld [vmem:[#allocation38_spill] sm:$0xff] }
 0x4e3   :  { %6597 = vpush %v2662_v34 }
 0x514   :  { %s6598_s27 = spop %6597 }
 0x515   :  { %v2664_v36 = vstv %s6598_s27 }
 0x516   :  { %vm2665_vm6 = vcmp.eq.f32.partialorder %v13446_v28, %v2664_v36  ;;  %vm2666_vm14 = vcmp.eq.f32.partialorder %v13447_v59, %v2664_v36  ;;  %vm2667_vm15 = vcmp.eq.f32.partialorder %v13448_v58, %v2664_v36  ;;  %vm2669_vm1 = vcmp.eq.f32.partialorder %v13449_v7, %v2664_v36  ;;  %v13468_v28 = vld [vmem:[#allocation108_spill] sm:$0xff]  ;;  %v13469_v58 = vld [vmem:[#allocation109_spill] sm:$0xff] }
 0x517   :  { %vm2670_vm0 = vcmp.eq.f32.partialorder %v13450_v33, %v2664_v36  ;;  %vm2668_vm2 = vcmp.eq.f32.partialorder %v13451_v18, %v2664_v36  ;;  %vm2671_vm3 = vcmp.eq.f32.partialorder %v13452_v61, %v2664_v36  ;;  %vm2672_vm5 = vcmp.eq.f32.partialorder %v13453_v60, %v2664_v36  ;;  %v13470_v18 = vld [vmem:[#allocation110_spill] sm:$0xff] }
 0x518   :  { %vm2673_vm8 = vcmp.eq.f32.partialorder %v13454_v48, %v2664_v36  ;;  %vm2674_vm4 = vcmp.eq.f32.partialorder %v13455_v45, %v2664_v36  ;;  %vm2675_vm9 = vcmp.eq.f32.partialorder %v13456_v62, %v2664_v36  ;;  %v2681_v25 = vsel %vm2665_vm6, %v13457_v51, -1e+30  ;;  %v13473_v48 = vld [vmem:[#allocation117_spill] sm:$0xff] }
 0x519   :  { %v2682_v0 = vsel %vm2666_vm14, %v13458_v8, -1e+30  ;;  %vm2676_vm10 = vcmp.eq.f32.partialorder %v13459_v39, %v2664_v36  ;;  %v2683_v54 = vsel %vm2667_vm15, %v13460_v57, -1e+30  ;;  %v2685_v55 = vsel %vm2669_vm1, %v13461_v11, -1e+30 }
 0x51a   :  { %v2686_v32 = vsel %vm2670_vm0, %v13462_v21, -1e+30  ;;  %v2684_v40 = vsel %vm2668_vm2, %v13463_v43, -1e+30  ;;  %v2687_v37 = vsel %vm2671_vm3, %v13464_v19, -1e+30  ;;  %v2697_v52 = vmax.f32 %v2681_v25, %v2685_v55 }
 0x51b   :  { %v2688_v26 = vsel %vm2672_vm5, %v13465_v15, -1e+30  ;;  %vm2677_vm11 = vcmp.eq.f32.partialorder %v13466_v44, %v2664_v36  ;;  %vm2678_vm7 = vcmp.eq.f32.partialorder %v8973_v12, %v2664_v36  ;;  %vm2679_vm12 = vcmp.eq.f32.partialorder %v13467_v22, %v2664_v36  ;;  %v13471_v25 = vld [vmem:[#allocation111_spill] sm:$0xff]  ;;  %v13474_v21 = vld [vmem:[#allocation118_spill] sm:$0xff] }
 0x51c   :  { %v2698_v34 = vmax.f32 %v2682_v0, %v2686_v32  ;;  %vm2680_vm6 = vcmp.eq.f32.partialorder %v8969_v6, %v2664_v36  ;;  %v2689_v59 = vsel %vm2673_vm8, %v13468_v28, -1e+30  ;;  %v2690_v7 = vsel %vm2674_vm4, %v13469_v58, -1e+30  ;;  %v13472_v0 = vld [vmem:[#allocation116_spill] sm:$0xff]  ;;  %v13475_v19 = vld [vmem:[#allocation119_spill] sm:$0xff] }
 0x51d   :  { %v2699_v33 = vmax.f32 %v2683_v54, %v2687_v37  ;;  %v2691_v61 = vsel %vm2675_vm9, %v13470_v18, -1e+30  ;;  %v2700_v60 = vmax.f32 %v2684_v40, %v2688_v26  ;;  %v2701_v12 = vmax.f32 %v2697_v52, %v2689_v59 }
 0x51e   :  { %v2702_v51 = vmax.f32 %v2698_v34, %v2690_v7  ;;  %v2692_v8 = vsel %vm2676_vm10, %v13471_v25, -1e+30  ;;  %v2693_v57 = vsel %vm2677_vm11, %v13472_v0, -1e+30  ;;  %v2694_v11 = vsel %vm2678_vm7, %v13473_v48, -1e+30 }
 0x51f   :  { %v2703_v55 = vmax.f32 %v2699_v33, %v2691_v61  ;;  %v2695_v45 = vsel %vm2679_vm12, %v13474_v21, -1e+30  ;;  %v2704_v32 = vmax.f32 %v2700_v60, %v2692_v8  ;;  %v2705_v54 = vmax.f32 %v2701_v12, %v2693_v57 }
 0x520   :  { %v2706_v43 = vmax.f32 %v2702_v51, %v2694_v11  ;;  %v2696_v62 = vsel %vm2680_vm6, %v13475_v19, -1e+30 }
 0x521   :  { %v2707_v40 = vmax.f32 %v2703_v55, %v2695_v45  ;;  %v2708_v37 = vmax.f32 %v2704_v32, %v2696_v62 }
 0x522   :  { %v2709_v15 = vmax.f32 %v2705_v54, %v2706_v43 }
 0x523   :  { %v2710_v26 = vmax.f32 %v2707_v40, %v2708_v37 }
 0x525   :  { %v9328_v39 = vmax.f32 %v2709_v15, %v2710_v26 }
 0x55c   :  { %v9330_v52 = vpop.f32.mrb[16].mxu1 }
 0x55d   :  { %v9332_v44 = vpop.f32.mrb[17].mxu1  ;;  %vm3507_vm14 = vcmp.ge.f32.partialorder %v9330_v52, 116.0 }
 0x55e   :  { %v9334_v22 = vpop.f32.mrb[18].mxu1  ;;  %vm3505_vm15 = vcmp.ge.f32.partialorder %v9332_v44, 116.0  ;;  %v3523_v28 = vsel %vm3507_vm14, %v9330_v52, 129.0 }
 0x55f   :  { %v9336_v34 = vpop.f32.mrb[19].mxu1  ;;  %vm3508_vm1 = vcmp.ge.f32.partialorder %v9334_v22, 116.0  ;;  %v3521_v7 = vsel %vm3505_vm15, %v9332_v44, 129.0 }
 0x560   :  { %vm3506_vm2 = vcmp.ge.f32.partialorder %v9336_v34, 116.0  ;;  %v3524_v60 = vsel %vm3508_vm1, %v9334_v22, 129.0 }
 0x561   :  { %v3522_v25 = vsel %vm3506_vm2, %v9336_v34, 129.0 }
 0x564   :  { %v9340_v6 = vpop.f32.mrb[20].mxu1 }
 0x565   :  { %vm3511_vm0 = vcmp.ge.f32.partialorder %v9340_v6, 116.0  ;;  %v9344_v36 = vpop.f32.mrb[21].mxu1 }
 0x566   :  { %v3527_v59 = vsel %vm3511_vm0, %v9340_v6, 129.0  ;;  %vm3509_vm3 = vcmp.ge.f32.partialorder %v9344_v36, 116.0  ;;  %v9350_v58 = vpop.f32.mrb[22].mxu1 }
 0x567   :  { %v3539_v33 = vmin.f32 %v3523_v28, %v3527_v59  ;;  %v3525_v18 = vsel %vm3509_vm3, %v9344_v36, 129.0  ;;  %vm3512_vm5 = vcmp.ge.f32.partialorder %v9350_v58, 116.0  ;;  %v9355_v61 = vpop.f32.mrb[23].mxu1 }
 0x568   :  { %v3537_v12 = vmin.f32 %v3521_v7, %v3525_v18  ;;  %v3528_v51 = vsel %vm3512_vm5, %v9350_v58, 129.0  ;;  %vm3510_vm8 = vcmp.ge.f32.partialorder %v9355_v61, 116.0 }
 0x569   :  { %v3540_v8 = vmin.f32 %v3524_v60, %v3528_v51  ;;  %v3526_v0 = vsel %vm3510_vm8, %v9355_v61, 129.0 }
 0x56a   :  { %v3538_v57 = vmin.f32 %v3522_v25, %v3526_v0 }
 0x56c   :  { %v9362_v48 = vpop.f32.mrb[24].mxu1 }
 0x56d   :  { %vm3515_vm4 = vcmp.ge.f32.partialorder %v9362_v48, 116.0  ;;  %v9365_v11 = vpop.f32.mrb[25].mxu1 }
 0x56e   :  { %v3531_v55 = vsel %vm3515_vm4, %v9362_v48, 129.0  ;;  %vm3513_vm9 = vcmp.ge.f32.partialorder %v9365_v11, 116.0  ;;  %v9369_v21 = vpop.f32.mrb[26].mxu1 }
 0x56f   :  { %v3543_v45 = vmin.f32 %v3539_v33, %v3531_v55  ;;  %v3529_v32 = vsel %vm3513_vm9, %v9365_v11, 129.0  ;;  %vm3516_vm10 = vcmp.ge.f32.partialorder %v9369_v21, 116.0  ;;  %v9373_v54 = vpop.f32.mrb[27].mxu1 }
 0x570   :  { %v3541_v43 = vmin.f32 %v3537_v12, %v3529_v32  ;;  %v3532_v19 = vsel %vm3516_vm10, %v9369_v21, 129.0  ;;  %vm3514_vm11 = vcmp.ge.f32.partialorder %v9373_v54, 116.0 }
 0x571   :  { %v3544_v62 = vmin.f32 %v3540_v8, %v3532_v19  ;;  %v3530_v40 = vsel %vm3514_vm11, %v9373_v54, 129.0 }
 0x572   :  { %v3542_v37 = vmin.f32 %v3538_v57, %v3530_v40 }
 0x574   :  { %v9378_v15 = vpop.f32.mrb[28].mxu1 }
 0x575   :  { %vm3519_vm7 = vcmp.ge.f32.partialorder %v9378_v15, 116.0  ;;  %v9381_v26 = vpop.f32.mrb[29].mxu1 }
 0x576   :  { %v3535_v28 = vsel %vm3519_vm7, %v9378_v15, 129.0  ;;  %vm3517_vm12 = vcmp.ge.f32.partialorder %v9381_v26, 116.0  ;;  %v9385_v59 = vpop.f32.mrb[30].mxu1 }
 0x577   :  { %v3547_v7 = vmin.f32 %v3543_v45, %v3535_v28  ;;  %v3533_v33 = vsel %vm3517_vm12, %v9381_v26, 129.0  ;;  %vm3520_vm6 = vcmp.ge.f32.partialorder %v9385_v59, 116.0  ;;  %v9389_v18 = vpop.f32.mrb[31].mxu1  ;;  %v918_v45 = vrot.slane %v9203_v46, 4 }
 0x578   :  { %v3545_v60 = vmin.f32 %v3541_v43, %v3533_v33  ;;  %v3536_v12 = vsel %vm3520_vm6, %v9385_v59, 129.0  ;;  %vm3518_vm14 = vcmp.ge.f32.partialorder %v9389_v18, 116.0  ;;  %v13477_v33 = vld [vmem:[#allocation11_spill] sm:$0xff] }
 0x579   :  { %v3548_v51 = vmin.f32 %v3544_v62, %v3536_v12  ;;  %v3534_v25 = vsel %vm3518_vm14, %v9389_v18, 129.0  ;;  %v919_v32 = vmax.f32 %v9203_v46, %v918_v45  ;;  %vm3619_vm1 = vcmp.gt.f32.partialorder %v13477_v33, -14.1951 }
 0x57a   :  { %v3546_v8 = vmin.f32 %v3542_v37, %v3534_v25  ;;  %v13478_v62 = vmov 0  ;;  %v2712_v37 = vrot.slane %v9328_v39, 4 }
 0x57b   :  { %v3550_v0 = vmin.f32 %v3547_v7, %v3548_v51  ;;  %v920_v19 = vrot.slane %v919_v32, 2 }
 0x57c   :  { %v3549_v57 = vmin.f32 %v3545_v60, %v3546_v8  ;;  %v2713_v7 = vmax.f32 %v9328_v39, %v2712_v37  ;;  %v13482_v8 = vld [vmem:[#allocation18_spill] sm:$0xff] }
 0x57d   :  { %v921_v40 = vmax.f32 %v919_v32, %v920_v19  ;;  %vm3621_vm8 = vcmp.gt.f32.partialorder %v13482_v8, -14.1951  ;;  %v3687_v19 = vpop.trf.xlu1 }
 0x57e   :  { %v3551_v55 = vmin.f32 %v3549_v57, %v3550_v0  ;;  %v2714_v60 = vrot.slane %v2713_v7, 2  ;;  %v13483_v0 = vmov 0 }
 0x57f   :  { %v922_v28 = vrot.slane %v921_v40, 1 }
 0x580   :  { %3552 = vmin.xlane.f32.xlu0 %v3551_v55  ;;  %v2715_v12 = vmax.f32 %v2713_v7, %v2714_v60 }
 0x581   :  { %v9396_v43 = vmax.f32 %v921_v40, %v922_v28  ;;  %v3688_v37 = vpop.trf.xlu1 }
 0x582   :  { %v2716_v51 = vrot.slane %v2715_v12, 1 }
 0x583   :  { %13476 = vst [vmem:[#allocation44_spill] sm:$0xff] %v9396_v43  ;;  %vm3615_vm15 = vcmp.gt.f32.partialorder %v9396_v43, -1e+29  ;;  %vm3627_vm2 = vcmp.gt.f32.partialorder %v9396_v43, -3.1887 }
 0x584   :  { %vm3623_vm0 = vmand %vm3615_vm15, %vm3619_vm1  ;;  %v9410_v25 = vmax.f32 %v2715_v12, %v2716_v51 }
 0x585   :  { %vm9401_vm3 = vmand %vm3623_vm0, %vm3627_vm2  ;;  %v3689_v7 = vpop.trf.xlu1 }
 0x586   :  { %v13479_v62 = vsel %vm9401_vm3, 4294967295, %v13478_v62  ;;  %v3635_v46 = vsel %vm9401_vm3, %v9396_v43, -3.1887  ;;  %13481 = vst [vmem:[#allocation123_spill] sm:$0xff] %v9410_v25  ;;  %vm3617_vm5 = vcmp.gt.f32.partialorder %v9410_v25, -1e+29 }
 0x587   :  { %13480 = vst [vmem:[#allocation120_spill] sm:$0xff] %v13479_v62  ;;  %vm3625_vm4 = vmand %vm3617_vm5, %vm3621_vm8  ;;  %vm3629_vm9 = vcmp.gt.f32.partialorder %v9410_v25, -3.1887 }
 0x588   :  { %vm9415_vm10 = vmand %vm3625_vm4, %vm3629_vm9 }
 0x589   :  { %v13484_v0 = vsel %vm9415_vm10, 4294967295, %v13483_v0  ;;  %v3637_v39 = vsel %vm9415_vm10, %v9410_v25, -3.1887  ;;  %v3690_v60 = vpop.trf.xlu1 }
 0x58a   :  { %13485 = vst [vmem:[#allocation125_spill] sm:$0xff] %v13484_v0 }
 0x58d   :  { %v9422_v12 = vpop.trf.xlu1 }
 0x591   :  { %v3692_v23 = vpop.trf.xlu1 }
 0x595   :  { %v9424_v62 = vpop.trf.xlu1 }
 0x5ad   :  { %3639 = vxpose.xlu0.b32.start.end [1/1] (short) %v3635_v46, 128 }
 0x5ea   :  { %3703 = vxpose.xlu0.b32.start.end [1/1] (short) %v3637_v39, 128 }
 0x60d   :  { %v3553_v57 = vpop.xlane.xlu0 %3552 }
 0x60e   :  { %v3554_v55 = vrot.slane %v3553_v57, 4 }
 0x610   :  { %v3555_v45 = vmin.f32 %v3553_v57, %v3554_v55  ;;  %v9426_v55 = vpop.trf.xlu1 }
 0x612   :  { %v3556_v32 = vrot.slane %v3555_v45, 2 }
 0x614   :  { %v3557_v40 = vmin.f32 %v3555_v45, %v3556_v32 }
 0x616   :  { %v3558_v28 = vrot.slane %v3557_v40, 1 }
 0x618   :  { %v3559_v46 = vmin.f32 %v3557_v40, %v3558_v28  ;;  %v9428_v40 = vpop.trf.xlu1 }
 0x61a   :  { %6611 = vpush %v3559_v46 }
 0x61c   :  { %v9430_v46 = vpop.trf.xlu1 }
 0x620   :  { %v9432_v25 = vpop.trf.xlu1 }
 0x62d   :  { %v3655_v51 = vpop.trf.xlu0 }
 0x62e   :  { %5135 = vperm.xlu1 %6627, %v3655_v51  }
 0x631   :  { %v3656_v0 = vpop.trf.xlu0 }
 0x632   :  { %5215 = vperm.xlu1 %6627, %v3687_v19  }
 0x635   :  { %v3657_v39 = vpop.trf.xlu0 }
 0x636   :  { %5220 = vperm.xlu1 %6627, %v3688_v37  }
 0x639   :  { %v3658_v57 = vpop.trf.xlu0 }
 0x63a   :  { %5145 = vperm.xlu1 %6627, %v3657_v39  }
 0x63d   :  { %v3659_v45 = vpop.trf.xlu0 }
 0x63e   :  { %5150 = vperm.xlu1 %6627, %v3658_v57  }
 0x641   :  { %v3660_v32 = vpop.trf.xlu0 }
 0x642   :  { %5230 = vperm.xlu1 %6627, %v3690_v60  }
 0x645   :  { %v3661_v28 = vpop.trf.xlu0 }
 0x646   :  { %5155 = vperm.xlu1 %6627, %v3659_v45  }
 0x649   :  { %v3662_v51 = vpop.trf.xlu0 }
 0x64a   :  { %5160 = vperm.xlu1 %6627, %v3660_v32  }
 0x64b   :  { %s6612_s28 = spop %6611 }
 0x64c   :  { %v3561_v19 = vstv %s6612_s28 }
 0x64d   :  { %v3663_v37 = vpop.trf.xlu0  ;;  %vm3562_vm11 = vcmp.eq.f32.partialorder %v9332_v44, %v3561_v19  ;;  %vm3563_vm7 = vcmp.eq.f32.partialorder %v9336_v34, %v3561_v19  ;;  %vm3564_vm12 = vcmp.eq.f32.partialorder %v9330_v52, %v3561_v19  ;;  %vm3566_vm6 = vcmp.eq.f32.partialorder %v9344_v36, %v3561_v19 }
 0x64e   :  { %5240 = vperm.xlu1 %6627, %v3692_v23   ;;  %vm3567_vm14 = vcmp.eq.f32.partialorder %v9355_v61, %v3561_v19  ;;  %vm3565_vm15 = vcmp.eq.f32.partialorder %v9334_v22, %v3561_v19  ;;  %vm3568_vm1 = vcmp.eq.f32.partialorder %v9340_v6, %v3561_v19  ;;  %vm3569_vm0 = vcmp.eq.f32.partialorder %v9350_v58, %v3561_v19 }
 0x64f   :  { %5140 = vperm.xlu0 %6626, %v3656_v0   ;;  %vm3570_vm2 = vcmp.eq.f32.partialorder %v9365_v11, %v3561_v19  ;;  %vm3571_vm5 = vcmp.eq.f32.partialorder %v9373_v54, %v3561_v19  ;;  %vm3572_vm8 = vcmp.eq.f32.partialorder %v9362_v48, %v3561_v19  ;;  %v3578_v44 = vsel %vm3562_vm11, %v9007_v1, -1e+30  ;;  %v3698_v1 = vpop.trf.xlu1 }
 0x650   :  { %v3579_v52 = vsel %vm3563_vm7, %v9002_v38, -1e+30  ;;  %vm3573_vm4 = vcmp.eq.f32.partialorder %v9369_v21, %v3561_v19  ;;  %v3580_v22 = vsel %vm3564_vm12, %v9020_v14, -1e+30  ;;  %v3582_v34 = vsel %vm3566_vm6, %v9034_v50, -1e+30 }
 0x651   :  { %v3664_v23 = vpop.trf.xlu0  ;;  %v3583_v6 = vsel %vm3567_vm14, %v9039_v16, -1e+30  ;;  %v3581_v36 = vsel %vm3565_vm15, %v9022_v41, -1e+30  ;;  %v3584_v58 = vsel %vm3568_vm1, %v9079_v13, -1e+30  ;;  %v3594_v0 = vmax.f32 %v3578_v44, %v3582_v34 }
 0x652   :  { %5165 = vperm.xlu1 %6627, %v3661_v28   ;;  %v3585_v61 = vsel %vm3569_vm0, %v9109_v10, -1e+30  ;;  %vm3574_vm9 = vcmp.eq.f32.partialorder %v9381_v26, %v3561_v19  ;;  %vm3575_vm11 = vcmp.eq.f32.partialorder %v9389_v18, %v3561_v19  ;;  %vm3576_vm7 = vcmp.eq.f32.partialorder %v9378_v15, %v3561_v19 }
 0x653   :  { %5225 = vperm.xlu0 %6626, %v3689_v7   ;;  %v3595_v38 = vmax.f32 %v3579_v52, %v3583_v6  ;;  %vm3577_vm12 = vcmp.eq.f32.partialorder %v9385_v59, %v3561_v19  ;;  %v3586_v41 = vsel %vm3570_vm2, %v9153_v49, -1e+30  ;;  %v3587_v50 = vsel %vm3571_vm5, %v9171_v42, -1e+30 }
 0x654   :  { %v3596_v16 = vmax.f32 %v3580_v22, %v3584_v58  ;;  %v3588_v13 = vsel %vm3572_vm8, %v9195_v5, -1e+30  ;;  %v3597_v10 = vmax.f32 %v3581_v36, %v3585_v61  ;;  %v3598_v7 = vmax.f32 %v3594_v0, %v3586_v41  ;;  %v13488_v41 = vld [vmem:[#allocation41_spill] sm:$0xff] }
 0x655   :  { %v3665_v14 = vpop.trf.xlu0  ;;  %v3599_v60 = vmax.f32 %v3595_v38, %v3587_v50  ;;  %v3589_v11 = vsel %vm3573_vm4, %v9201_v29, -1e+30  ;;  %v3590_v49 = vsel %vm3574_vm9, %v9209_v53, -1e+30  ;;  %v3591_v42 = vsel %vm3575_vm11, %v9211_v9, -1e+30  ;;  %v3699_v53 = vpop.trf.xlu1 }
 0x656   :  { %5170 = vperm.xlu1 %6627, %v3662_v51   ;;  %v3600_v54 = vmax.f32 %v3596_v16, %v3588_v13  ;;  %v3592_v5 = vsel %vm3576_vm7, %v9222_v30, -1e+30  ;;  %v3601_v48 = vmax.f32 %v3597_v10, %v3589_v11  ;;  %v3602_v39 = vmax.f32 %v3598_v7, %v3590_v49  ;;  %v13489_v13 = vld [vmem:[#allocation59_spill] sm:$0xff]  ;;  %v13490_v10 = vld [vmem:[#allocation13_spill] sm:$0xff] }
 0x657   :  { %5235 = vperm.xlu0 %6626, %v9422_v12   ;;  %v3603_v12 = vmax.f32 %v3599_v60, %v3591_v42  ;;  %v3593_v29 = vsel %vm3577_vm12, %v9225_v63, -1e+30  ;;  %v9494_v50 = vadd.s32 16, %v13488_v41  ;;  %vm4109_vm6 = vcmp.eq.f32.partialorder %v13490_v10, %v13489_v13 }
 0x658   :  { %v3604_v21 = vmax.f32 %v3600_v54, %v3592_v5  ;;  %v3605_v26 = vmax.f32 %v3601_v48, %v3593_v29  ;;  %v9503_v60 = vadd.s32 24, %v13488_v41  ;;  %v9506_v11 = vadd.s32 32, %v13488_v41 }
 0x659   :  { %v3666_v57 = vpop.trf.xlu0  ;;  %v3606_v18 = vmax.f32 %v3602_v39, %v3603_v12  ;;  %v3700_v15 = vpop.trf.xlu1  ;;  %v9509_v49 = vadd.s32 40, %v13488_v41  ;;  %v9512_v42 = vadd.s32 48, %v13488_v41  ;;  %v9515_v54 = vadd.s32 56, %v13488_v41 }
 0x65a   :  { %5250 = vperm.xlu1 %6627, %v9426_v55   ;;  %v3607_v9 = vmax.f32 %v3604_v21, %v3605_v26  ;;  %v3789_v48 = vadd.s32 128, %v13488_v41  ;;  %v9524_v39 = vadd.s32 64, %v13488_v41  ;;  %v9527_v12 = vadd.s32 72, %v13488_v41 }
 0x65b   :  { %5245 = vperm.xlu0 %6626, %v9424_v62   ;;  %vm3853_vm1 = vcmp.gt.f32.partialorder %v13490_v10, %v13489_v13  ;;  %v9539_v29 = vadd.s32 136, %v13488_v41  ;;  %v9542_v21 = vadd.s32 80, %v13488_v41  ;;  %vm13655_vm3 = vcmp.eq.f32.partialorder %v13587_v4, %v13489_v13 }
 0x65c   :  { %v3608_v30 = vmax.f32 %v3606_v18, %v3607_v9  ;;  %v13494_v18 = vld [vmem:[#allocation10_spill] sm:$0xff]  ;;  %v9550_v9 = vadd.s32 8, %v13488_v41 }
 0x65d   :  { %v3667_v45 = vpop.trf.xlu0  ;;  %v3701_v59 = vpop.trf.xlu1  ;;  %vm3622_vm5 = vcmp.gt.f32.partialorder %v13494_v18, -14.1951 }
 0x65e   :  { %5175 = vperm.xlu1 %6627, %v3663_v37   ;;  %v3609_v52 = vrot.slane %v3608_v30, 4 }
 0x65f   :  { %5255 = vperm.xlu0 %6626, %v9428_v40  }
 0x660   :  { %v3610_v34 = vmax.f32 %v3608_v30, %v3609_v52  ;;  %v13495_v30 = vld [vmem:[#allocation79_spill] sm:$0xff]  ;;  %v9634_v52 = vadd.s32 176, %v13488_v41 }
 0x661   :  { %v3668_v32 = vpop.trf.xlu0  ;;  %v3702_v62 = vpop.trf.xlu1  ;;  %vm3854_vm8 = vcmp.gt.f32.partialorder %v13490_v10, %v13495_v30  ;;  %vm4110_vm4 = vcmp.eq.f32.partialorder %v13490_v10, %v13495_v30 }
 0x662   :  { %5180 = vperm.xlu1 %6627, %v3664_v23   ;;  %v3611_v36 = vrot.slane %v3610_v34, 2 }
 0x663   :  { %5265 = vperm.xlu0 %6626, %v9432_v25  }
 0x664   :  { %v3612_v61 = vmax.f32 %v3610_v34, %v3611_v36  ;;  %v13507_v34 = vmov 0  ;;  %v9665_v36 = vadd.s32 184, %v13488_v41 }
 0x665   :  { %v3669_v63 = vpop.trf.xlu0 }
 0x666   :  { %5260 = vperm.xlu1 %6627, %v9430_v46  }
 0x667   :  { %5275 = vperm.xlu0 %6626, %v3699_v53   ;;  %v9545_v53 = vadd.s32 88, %v13488_v41 }
 0x669   :  { %v3670_v55 = vpop.trf.xlu0 }
 0x66a   :  { %5185 = vperm.xlu1 %6627, %v3665_v14   ;;  %v3613_v14 = vrot.slane %v3612_v61, 1 }
 0x66b   :  { %5285 = vperm.xlu0 %6626, %v3701_v59  }
 0x66c   :  { %v9500_v7 = vmax.f32 %v3612_v61, %v3613_v14 }
 0x66d   :  { %v3719_v28 = vpop.trf.xlu0 }
 0x66e   :  { %5190 = vperm.xlu1 %6627, %v3666_v57   ;;  %13491 = vst [vmem:[#allocation122_spill] sm:$0xff] %v9500_v7  ;;  %vm3618_vm2 = vcmp.gt.f32.partialorder %v9500_v7, -1e+29  ;;  %v13524_v57 = vld [vmem:[#allocation16_spill] sm:$0xff] }
 0x66f   :  { %5290 = vperm.xlu0 %6626, %v3702_v62   ;;  %vm13600_vm10 = vcmp.gt.f32.partialorder %v13524_v57, %v13495_v30 }
 0x671   :  { %v3720_v51 = vpop.trf.xlu0 }
 0x672   :  { %5270 = vperm.xlu1 %6627, %v3698_v1   ;;  %v13487_v1 = vlaneseq }
 0x673   :  { %5295 = vperm.xlu0 %6626, %v3719_v28   ;;  %v9592_v28 = vadd.s32 144, %v13488_v41 }
 0x674   :  { %v9491_v38 = vand.u32 127, %v13487_v1  ;;  %v13516_v1 = vld [vmem:[#allocation15_spill] sm:$0xff] }
 0x675   :  { %v3721_v40 = vpop.trf.xlu0 }
 0x676   :  { %5195 = vperm.xlu1 %6627, %v3667_v45   ;;  %vm4365_vm14 = vcmp.lt.s32.totalorder %v13488_v41, %v9491_v38  ;;  %v9518_v5 = vadd.s32 128, %v9491_v38  ;;  %v9553_v45 = vadd.s32 96, %v13488_v41  ;;  %v9933_v43 = vadd.s32 256, %v9491_v38 }
 0x677   :  { %5300 = vperm.xlu0 %6626, %v3720_v51   ;;  %vm9534_vm0 = vmand %vm4109_vm6, %vm4365_vm14  ;;  %vm3630_vm14 = vcmp.gt.f32.partialorder %v9500_v7, -3.1887  ;;  %v9595_v51 = vadd.s32 160, %v13488_v41 }
 0x678   :  { %vm9574_vm7 = vmor %vm3853_vm1, %vm9534_vm0  ;;  %vm4430_vm12 = vcmp.lt.s32.totalorder %v3789_v48, %v9518_v5  ;;  %vm13512_vm0 = vcmp.eq.f32.partialorder %v13490_v10, %v8669_v47  ;;  %v9708_v48 = vadd.s32 208, %v13488_v41 }
 0x679   :  { %v3722_v19 = vpop.trf.xlu0  ;;  %vm9582_vm6 = vmand %vm3618_vm2, %vm3622_vm5 }
 0x67a   :  { %5200 = vperm.xlu1 %6627, %v3668_v32   ;;  %v9563_v32 = vadd.s32 112, %v13488_v41  ;;  %vm9607_vm5 = vmor %vm3854_vm8, %vm4110_vm4 }
 0x67b   :  { %5305 = vperm.xlu0 %6626, %v3721_v40  }
 0x67d   :  { %v3723_v25 = vpop.trf.xlu0 }
 0x67e   :  { %5205 = vperm.xlu1 %6627, %v3669_v63   ;;  %v13496_v63 = vld [vmem:[#allocation89_spill] sm:$0xff] }
 0x67f   :  { %5310 = vperm.xlu0 %6626, %v3722_v19   ;;  %vm3855_vm9 = vcmp.gt.f32.partialorder %v13490_v10, %v13496_v63  ;;  %vm4111_vm11 = vcmp.eq.f32.partialorder %v13490_v10, %v13496_v63  ;;  %v13582_v19 = vld [vmem:[#allocation45_spill] sm:$0xff] }
 0x680   :  { %vm9622_vm15 = vmor %vm3855_vm9, %vm4111_vm11 }
 0x681   :  { %v3724_v46 = vpop.trf.xlu0  ;;  %vm9640_vm9 = vmand %vm9582_vm6, %vm3630_vm14 }
 0x682   :  { %5210 = vperm.xlu1 %6627, %v3670_v55   ;;  %v9580_v55 = vadd.s32 120, %v13488_v41  ;;  %v13508_v34 = vsel %vm9640_vm9, 4294967295, %v13507_v34  ;;  %v3638_v14 = vsel %vm9640_vm9, %v9500_v7, -3.1887 }
 0x683   :  { %5315 = vperm.xlu0 %6626, %v3723_v25   ;;  %v13503_v25 = vld [vmem:[#allocation66_spill] sm:$0xff]  ;;  %13509 = vst [vmem:[#allocation124_spill] sm:$0xff] %v13508_v34 }
 0x684   :  { %vm4174_vm1 = vcmp.eq.f32.partialorder %v13503_v25, %v13495_v30  ;;  %vm13525_vm11 = vcmp.eq.f32.partialorder %v13503_v25, %v13496_v63 }
 0x685   :  { %v3725_v37 = vpop.trf.xlu0  ;;  %vm9656_vm6 = vmand %vm4174_vm1, %vm4430_vm12  ;;  %vm13513_vm12 = vcmp.gt.f32.partialorder %v13490_v10, %v8669_v47 }
 0x686   :  { %5280 = vperm.xlu1 %6627, %v3700_v15   ;;  %v9560_v15 = vadd.s32 104, %v13488_v41  ;;  %vm9676_vm1 = vmor %vm13513_vm12, %vm13512_vm0  ;;  %vm13518_vm12 = vcmp.lt.s32.totalorder %v9494_v50, %v9491_v38 }
 0x687   :  { %5320 = vperm.xlu0 %6626, %v3724_v46   ;;  %v9614_v46 = vadd.s32 152, %v13488_v41 }
 0x689   :  { %v3726_v23 = vpop.trf.xlu0 }
 0x68b   :  { %5325 = vperm.xlu0 %6626, %v3725_v37  }
 0x68d   :  { %v3727_v44 = vpop.trf.xlu0 }
 0x68f   :  { %5330 = vperm.xlu0 %6626, %v3726_v23   ;;  %v13506_v23 = vld [vmem:[#allocation14_spill] sm:$0xff] }
 0x690   :  { %vm4117_vm4 = vcmp.eq.f32.partialorder %v13506_v23, %v13489_v13  ;;  %vm13537_vm2 = vcmp.gt.f32.partialorder %v13506_v23, %v13495_v30 }
 0x691   :  { %v9488_v22 = vpop.trf.xlu0  ;;  %vm9699_vm14 = vmand %vm4117_vm4, %vm13518_vm12  ;;  %vm13521_vm12 = vcmp.gt.f32.partialorder %v13503_v25, %v13495_v30  ;;  %vm13526_vm4 = vcmp.gt.f32.partialorder %v13503_v25, %v13496_v63 }
 0x692   :  { %13486 = vst [vmem:[#allocation121_spill] sm:$0xff] %v9488_v22  ;;  %vm9721_vm8 = vmor %vm13521_vm12, %vm9656_vm6 }
 0x693   :  { %5335 = vperm.xlu0 %6626, %v3727_v44   ;;  %v9631_v44 = vadd.s32 168, %v13488_v41  ;;  %vm9737_vm9 = vmor %vm13526_vm4, %vm13525_vm11  ;;  %vm13529_vm4 = vcmp.lt.s32.totalorder %v9539_v29, %v9518_v5 }
 0x695   :  { %v3729_v6 = vpop.trf.xlu0 }
 0x697   :  { %5345 = vperm.xlu0 %6626, %v3729_v6  }
 0x699   :  { %v3730_v58 = vpop.trf.xlu0 }
 0x69b   :  { %5350 = vperm.xlu0 %6626, %v3730_v58   ;;  %v9668_v58 = vadd.s32 192, %v13488_v41 }
 0x69d   :  { %v3731_v0 = vpop.trf.xlu0 }
 0x69f   :  { %5355 = vperm.xlu0 %6626, %v3731_v0  }
 0x6a1   :  { %v3732_v16 = vpop.trf.xlu0 }
 0x6a3   :  { %5360 = vperm.xlu0 %6626, %v3732_v16   ;;  %v13517_v16 = vld [vmem:[#allocation80_spill] sm:$0xff] }
 0x6a5   :  { %v3733_v26 = vpop.trf.xlu0 }
 0x6a7   :  { %5365 = vperm.xlu0 %6626, %v3733_v26  }
 0x6a9   :  { %v3734_v40 = vpop.trf.xlu0 }
 0x6ab   :  { %5370 = vperm.xlu0 %6626, %v3734_v40  }
 0x6ad   :  { %v5136_v0 = vpop.permute.xlu1 %5135 }
 0x6ae   :  { %v5453_v26 = vsel %vm9574_vm7, %v5136_v0, -3.1887  ;;  %v5454_v59 = vsel %vm9607_vm5, %v5136_v0, -3.1887  ;;  %v5455_v40 = vsel %vm9622_vm15, %v5136_v0, -3.1887  ;;  %vm13530_vm7 = vcmp.eq.f32.partialorder %v13517_v16, %v13495_v30 }
 0x6af   :  { %3735 = vxpose.xlu1.b32.start.end [1/1] (short) %v3638_v14, 128  ;;  %v5456_v6 = vsel %vm9676_vm1, %v5136_v0, -3.1887  ;;  %vm9765_vm0 = vmand %vm13530_vm7, %vm13529_vm4  ;;  %vm13533_vm15 = vcmp.gt.f32.partialorder %v13506_v23, %v13489_v13  ;;  %vm13536_vm1 = vcmp.eq.f32.partialorder %v13506_v23, %v13495_v30  ;;  %vm13540_vm7 = vcmp.eq.f32.partialorder %v13506_v23, %v13496_v63 }
 0x6b0   :  { %vm9774_vm5 = vmor %vm13533_vm15, %vm9699_vm14  ;;  %vm13541_vm4 = vcmp.gt.f32.partialorder %v13506_v23, %v13496_v63 }
 0x6b1   :  { %v5216_v14 = vpop.permute.xlu1 %5215  ;;  %vm9784_vm12 = vmor %vm13537_vm2, %vm13536_vm1  ;;  %vm13544_vm2 = vcmp.eq.f32.partialorder %v13503_v25, %v8669_v47  ;;  %vm13545_vm1 = vcmp.gt.f32.partialorder %v13503_v25, %v8669_v47 }
 0x6b2   :  { %vm9794_vm14 = vmor %vm13541_vm4, %vm13540_vm7  ;;  %vm13548_vm7 = vcmp.gt.f32.partialorder %v13503_v25, %v13489_v13  ;;  %v5518_v10 = vsel %vm9721_vm8, %v5216_v14, -3.1887  ;;  %v5519_v7 = vsel %vm9737_vm9, %v5216_v14, -3.1887  ;;  %vm4180_vm4 = vcmp.eq.f32.partialorder %v13517_v16, %v8669_v47 }
 0x6b3   :  { %vm9808_vm6 = vmor %vm13545_vm1, %vm13544_vm2  ;;  %v5517_v0 = vsel %vm13548_vm7, %v5216_v14, -3.1887  ;;  %v5778_v50 = vmax.f32 %v5454_v59, %v5518_v10  ;;  %v5847_v62 = vmax.f32 %v5455_v40, %v5519_v7  ;;  %vm13549_vm9 = vcmp.lt.s32.totalorder %v9503_v60, %v9491_v38 }
 0x6b4   :  { %v5709_v25 = vmax.f32 %v5453_v26, %v5517_v0  ;;  %v5520_v3 = vsel %vm9808_vm6, %v5216_v14, -3.1887  ;;  %vm13550_vm2 = vcmp.eq.f32.partialorder %v13516_v1, %v13489_v13  ;;  %vm13553_vm1 = vcmp.gt.f32.partialorder %v13517_v16, %v13495_v30  ;;  %v13560_v26 = vld [vmem:[#allocation17_spill] sm:$0xff] }
 0x6b5   :  { %vm9839_vm15 = vmand %vm13550_vm2, %vm13549_vm9  ;;  %v5916_v18 = vmax.f32 %v5456_v6, %v5520_v3  ;;  %v9861_v3 = vadd.s32 200, %v13488_v41  ;;  %vm3921_vm7 = vcmp.gt.f32.partialorder %v13517_v16, %v13489_v13  ;;  %v5221_v34 = vpop.permute.xlu1 %5220  ;;  %v9878_v59 = vadd.s32 224, %v13488_v41 }
 0x6b6   :  { %vm9850_vm6 = vmor %vm13553_vm1, %vm9765_vm0  ;;  %vm13556_vm0 = vcmp.eq.f32.partialorder %v13517_v16, %v13496_v63  ;;  %vm13557_vm1 = vcmp.gt.f32.partialorder %v13517_v16, %v13496_v63  ;;  %v9881_v40 = vadd.s32 216, %v13488_v41  ;;  %vm13561_vm9 = vcmp.gt.f32.partialorder %v13517_v16, %v8669_v47 }
 0x6b7   :  { %vm9871_vm11 = vmor %vm13557_vm1, %vm13556_vm0  ;;  %v5521_v6 = vsel %vm3921_vm7, %v5221_v34, -3.1887  ;;  %v5522_v14 = vsel %vm9850_vm6, %v5221_v34, -3.1887  ;;  %vm13563_vm7 = vcmp.gt.f32.partialorder %v13506_v23, %v8669_v47  ;;  %vm13630_vm13 = vcmp.gt.f32.partialorder %v13560_v26, %v13496_v63 }
 0x6b8   :  { %vm4948_vm0 = vmor %vm13561_vm9, %vm4180_vm4  ;;  %v5523_v61 = vsel %vm9871_vm11, %v5221_v34, -3.1887  ;;  %v5710_v16 = vmax.f32 %v5709_v25, %v5521_v6  ;;  %v5779_v0 = vmax.f32 %v5778_v50, %v5522_v14  ;;  %vm13562_vm11 = vcmp.eq.f32.partialorder %v13506_v23, %v8669_v47 }
 0x6b9   :  { %v5848_v10 = vmax.f32 %v5847_v62, %v5523_v61  ;;  %v5524_v7 = vsel %vm4948_vm0, %v5221_v34, -3.1887  ;;  %vm9909_vm6 = vmor %vm13563_vm7, %vm13562_vm11  ;;  %vm13566_vm9 = vcmp.gt.f32.partialorder %v13516_v1, %v13489_v13  ;;  %v9927_v23 = vadd.s32 240, %v13488_v41  ;;  %v5146_v50 = vpop.permute.xlu1 %5145 }
 0x6ba   :  { %v5917_v8 = vmax.f32 %v5916_v18, %v5524_v7  ;;  %vm9918_vm2 = vmor %vm13566_vm9, %vm9839_vm15  ;;  %v9930_v18 = vadd.s32 248, %v13488_v41  ;;  %vm13569_vm15 = vcmp.eq.f32.partialorder %v13516_v1, %v13495_v30  ;;  %vm13570_vm11 = vcmp.gt.f32.partialorder %v13516_v1, %v13495_v30 }
 0x6bb   :  { %vm9941_vm7 = vmor %vm13570_vm11, %vm13569_vm15  ;;  %v9948_v34 = vadd.s32 256, %v13488_v41  ;;  %v9951_v6 = vadd.s32 264, %v13488_v41  ;;  %v9954_v14 = vadd.s32 272, %v13488_v41  ;;  %v9957_v61 = vadd.s32 280, %v13488_v41 }
 0x6bc   :  { %v5461_v7 = vsel %vm9774_vm5, %v5146_v50, -3.1887  ;;  %v5462_v20 = vsel %vm9784_vm12, %v5146_v50, -3.1887  ;;  %v5463_v33 = vsel %vm9794_vm14, %v5146_v50, -3.1887  ;;  %vm4186_vm15 = vcmp.eq.f32.partialorder %v13577_v17, %v13495_v30 }
 0x6bd   :  { %13573 = vst [vmem:[#allocation127_spill] sm:$0xff] %v9948_v34  ;;  %13574 = vst [vmem:[#allocation129_spill] sm:$0xff] %v9951_v6  ;;  %vm13578_vm11 = vcmp.lt.s32.totalorder %v9506_v11, %v9491_v38  ;;  %vm13579_vm9 = vcmp.eq.f32.partialorder %v13524_v57, %v13489_v13  ;;  %v5711_v29 = vmax.f32 %v5710_v16, %v5461_v7  ;;  %v5464_v31 = vsel %vm9909_vm6, %v5146_v50, -3.1887  ;;  %v13592_v16 = vld [vmem:[#allocation60_spill] sm:$0xff]  ;;  %v13760_v6 = vld [vmem:[#allocation87_spill] sm:$0xff] }
 0x6be   :  { %13575 = vst [vmem:[#allocation126_spill] sm:$0xff] %v9954_v14  ;;  %13576 = vst [vmem:[#allocation9_spill] sm:$0xff] %v9957_v61  ;;  %v5780_v37 = vmax.f32 %v5779_v0, %v5462_v20  ;;  %v5849_v24 = vmax.f32 %v5848_v10, %v5463_v33  ;;  %vm13583_vm14 = vcmp.eq.f32.partialorder %v13516_v1, %v13496_v63  ;;  %v13623_v33 = vmov 0 }
 0x6bf   :  { %vm9973_vm0 = vmand %vm13579_vm9, %vm13578_vm11  ;;  %vm13584_vm9 = vcmp.gt.f32.partialorder %v13516_v1, %v13496_v63  ;;  %v5918_v20 = vmax.f32 %v5917_v8, %v5464_v31  ;;  %vm13588_vm6 = vcmp.eq.f32.partialorder %v13516_v1, %v8669_v47  ;;  %vm13589_vm4 = vcmp.gt.f32.partialorder %v13516_v1, %v8669_v47  ;;  %v5151_v31 = vpop.permute.xlu1 %5150 }
 0x6c0   :  { %vm9989_vm11 = vmor %vm13584_vm9, %vm13583_vm14  ;;  %vm3930_vm12 = vcmp.gt.f32.partialorder %v13577_v17, %v13495_v30  ;;  %vm13593_vm14 = vcmp.lt.s32.totalorder %v9614_v46, %v9518_v5  ;;  %vm13596_vm9 = vcmp.gt.f32.partialorder %v13524_v57, %v13489_v13  ;;  %v5465_v0 = vsel %vm9918_vm2, %v5151_v31, -3.1887 }
 0x6c1   :  { %vm10003_vm8 = vmor %vm13589_vm4, %vm13588_vm6  ;;  %vm13599_vm4 = vcmp.eq.f32.partialorder %v13524_v57, %v13495_v30  ;;  %v5466_v10 = vsel %vm9941_vm7, %v5151_v31, -3.1887  ;;  %v5467_v60 = vsel %vm9989_vm11, %v5151_v31, -3.1887  ;;  %vm13612_vm11 = vcmp.gt.f32.partialorder %v13524_v57, %v8669_v47 }
 0x6c2   :  { %vm10027_vm5 = vmand %vm4186_vm15, %vm13593_vm14  ;;  %vm13603_vm15 = vcmp.eq.f32.partialorder %v13524_v57, %v13496_v63  ;;  %vm13604_vm14 = vcmp.gt.f32.partialorder %v13524_v57, %v13496_v63  ;;  %v5781_v25 = vmax.f32 %v5780_v37, %v5466_v10  ;;  %v5850_v62 = vmax.f32 %v5849_v24, %v5467_v60  ;;  %v13615_v24 = vld [vmem:[#allocation47_spill] sm:$0xff] }
 0x6c3   :  { %vm10036_vm1 = vmor %vm13596_vm9, %vm9973_vm0  ;;  %v5468_v7 = vsel %vm10003_vm8, %v5151_v31, -3.1887  ;;  %vm13625_vm7 = vcmp.eq.f32.partialorder %v13560_v26, %v13495_v30  ;;  %v13627_v31 = vmov 0  ;;  %v10580_v61 = vadd.s32 320, %v13488_v41 }
 0x6c4   :  { %vm10046_vm6 = vmor %vm13600_vm10, %vm13599_vm4  ;;  %vm13607_vm4 = vcmp.lt.s32.totalorder %v9509_v49, %v9491_v38  ;;  %v10092_v49 = vmax.f32 %v5711_v29, %v5465_v0  ;;  %v5919_v29 = vmax.f32 %v5918_v20, %v5468_v7  ;;  %vm3929_vm10 = vcmp.gt.f32.partialorder %v13577_v17, %v13489_v13  ;;  %v5231_v20 = vpop.permute.xlu1 %5230  ;;  %v13633_v0 = vld [vmem:[#allocation68_spill] sm:$0xff] }
 0x6c5   :  { %vm10056_vm0 = vmor %vm13604_vm14, %vm13603_vm15  ;;  %vm13608_vm15 = vcmp.eq.f32.partialorder %v13560_v26, %v13489_v13  ;;  %v5529_v60 = vsel %vm3929_vm10, %v5231_v20, -3.1887  ;;  %vm13681_vm10 = vcmp.gt.f32.partialorder %v13582_v19, %v13495_v30  ;;  %13742 = vst [vmem:[#allocation65_spill] sm:$0xff] %v10580_v61  ;;  %v10583_v14 = vadd.s32 336, %v13488_v41 }
 0x6c6   :  { %vm10076_vm14 = vmand %vm13608_vm15, %vm13607_vm4  ;;  %vm13611_vm15 = vcmp.eq.f32.partialorder %v13524_v57, %v8669_v47  ;;  %vm13626_vm4 = vcmp.gt.f32.partialorder %v13560_v26, %v13495_v30 }
 0x6c7   :  { %vm10102_vm9 = vmor %vm13612_vm11, %vm13611_vm15  ;;  %vm13622_vm15 = vcmp.gt.f32.partialorder %v13560_v26, %v13489_v13  ;;  %13743 = vst [vmem:[#allocation57_spill] sm:$0xff] %v10583_v14 }
 0x6c8   :  { %vm10119_vm11 = vmor %vm3930_vm12, %vm10027_vm5  ;;  %vm13618_vm5 = vcmp.eq.f32.partialorder %v13577_v17, %v13496_v63  ;;  %vm13619_vm12 = vcmp.gt.f32.partialorder %v13577_v17, %v13496_v63 }
 0x6c9   :  { %vm10139_vm2 = vmor %vm13619_vm12, %vm13618_vm5  ;;  %vm13629_vm12 = vcmp.eq.f32.partialorder %v13560_v26, %v13496_v63  ;;  %v5530_v50 = vsel %vm10119_vm11, %v5231_v20, -3.1887 }
 0x6ca   :  { %vm10148_vm8 = vmor %vm13622_vm15, %vm10076_vm14  ;;  %vm4115_vm15 = vcmp.eq.f32.partialorder %v13592_v16, %v13496_v63  ;;  %v5531_v7 = vsel %vm10139_vm2, %v5231_v20, -3.1887  ;;  %v5782_v57 = vmax.f32 %v5781_v25, %v5530_v50  ;;  %vm13638_vm2 = vcmp.eq.f32.partialorder %v13560_v26, %v8669_v47 }
 0x6cb   :  { %v13624_v33 = vsel %vm10148_vm8, 4294967295, %v13623_v33  ;;  %vm10158_vm5 = vmor %vm13626_vm4, %vm13625_vm7  ;;  %vm13634_vm4 = vcmp.eq.f32.partialorder %v13577_v17, %v8669_v47  ;;  %v5851_v37 = vmax.f32 %v5850_v62, %v5531_v7  ;;  %vm13647_vm7 = vcmp.lt.s32.totalorder %v9512_v42, %v9491_v38  ;;  %v13651_v62 = vld [vmem:[#allocation70_spill] sm:$0xff] }
 0x6cc   :  { %v13628_v31 = vsel %vm10158_vm5, 4294967295, %v13627_v31  ;;  %vm10168_vm14 = vmor %vm13630_vm13, %vm13629_vm12  ;;  %vm13635_vm5 = vcmp.gt.f32.partialorder %v13577_v17, %v8669_v47  ;;  %v5713_v17 = vmax.f32 %v10092_v49, %v5529_v60  ;;  %v13642_v49 = vld [vmem:[#allocation48_spill] sm:$0xff]  ;;  %vm13643_vm12 = vcmp.lt.s32.totalorder %v9550_v9, %v9491_v38 }
 0x6cd   :  { %vm10184_vm8 = vmor %vm13635_vm5, %vm13634_vm4  ;;  %vm13639_vm4 = vcmp.gt.f32.partialorder %v13560_v26, %v8669_v47  ;;  %vm13648_vm13 = vcmp.eq.f32.partialorder %v13582_v19, %v13489_v13  ;;  %v13653_v60 = vld [vmem:[#allocation84_spill] sm:$0xff]  ;;  %v13686_v9 = vmov 0  ;;  %v13738_v50 = vmov 0 }
 0x6ce   :  { %v5532_v56 = vsel %vm10184_vm8, %v5231_v20, -3.1887  ;;  %vm10213_vm5 = vmor %vm13639_vm4, %vm13638_vm2  ;;  %vm13644_vm2 = vcmp.eq.f32.partialorder %v13592_v16, %v13489_v13 }
 0x6cf   :  { %v5920_v25 = vmax.f32 %v5919_v29, %v5532_v56  ;;  %vm10231_vm4 = vmand %vm13644_vm2, %vm13643_vm12  ;;  %v5156_v56 = vpop.permute.xlu1 %5155  ;;  %v13652_v29 = vld [vmem:[#allocation72_spill] sm:$0xff]  ;;  %vm13669_vm2 = vcmp.eq.f32.partialorder %v13633_v0, %v13495_v30 }
 0x6d0   :  { %vm10247_vm12 = vmand %vm13648_vm13, %vm13647_vm7  ;;  %v5469_v42 = vsel %vm10036_vm1, %v5156_v56, -3.1887  ;;  %v5470_v20 = vsel %vm10046_vm6, %v5156_v56, -3.1887  ;;  %v5471_v10 = vsel %vm10056_vm0, %v5156_v56, -3.1887  ;;  %vm4194_vm7 = vcmp.eq.f32.partialorder %v13653_v60, %v13495_v30 }
 0x6d1   :  { %vm13654_vm13 = vcmp.lt.s32.totalorder %v9515_v54, %v9491_v38  ;;  %v5714_v1 = vmax.f32 %v5713_v17, %v5469_v42  ;;  %v5783_v46 = vmax.f32 %v5782_v57, %v5470_v20  ;;  %v5852_v2 = vmax.f32 %v5851_v37, %v5471_v10 }
 0x6d2   :  { %vm10275_vm11 = vmand %vm13655_vm3, %vm13654_vm13  ;;  %v5472_v7 = vsel %vm10102_vm9, %v5156_v56, -3.1887  ;;  %vm13658_vm3 = vcmp.gt.f32.partialorder %v13592_v16, %v13489_v13  ;;  %vm13661_vm13 = vcmp.eq.f32.partialorder %v13592_v16, %v13495_v30  ;;  %vm13662_vm1 = vcmp.gt.f32.partialorder %v13592_v16, %v13495_v30 }
 0x6d3   :  { %vm10290_vm0 = vmor %vm13658_vm3, %vm10231_vm4  ;;  %vm13665_vm9 = vcmp.gt.f32.partialorder %v13592_v16, %v13496_v63  ;;  %v5921_v57 = vmax.f32 %v5920_v25, %v5472_v7  ;;  %v13672_v25 = vld [vmem:[#allocation74_spill] sm:$0xff]  ;;  %v5161_v26 = vpop.permute.xlu1 %5160  ;;  %v13678_v42 = vmov 0  ;;  %vm13680_vm3 = vcmp.eq.f32.partialorder %v13582_v19, %v13495_v30 }
 0x6d4   :  { %vm10300_vm6 = vmor %vm13662_vm1, %vm13661_vm13  ;;  %vm13668_vm13 = vcmp.lt.s32.totalorder %v9592_v28, %v9518_v5  ;;  %v10341_v28 = vadd.s32 232, %v13488_v41  ;;  %vm13674_vm1 = vcmp.lt.s32.totalorder %v9631_v44, %v9518_v5  ;;  %v13682_v44 = vmov 0 }
 0x6d5   :  { %vm10310_vm4 = vmor %vm13665_vm9, %vm4115_vm15  ;;  %vm13677_vm9 = vcmp.gt.f32.partialorder %v13582_v19, %v13489_v13  ;;  %v5475_v7 = vsel %vm10168_vm14, %v5161_v26, -3.1887  ;;  %v5476_v22 = vsel %vm10213_vm5, %v5161_v26, -3.1887  ;;  %vm13709_vm5 = vcmp.lt.s32.totalorder %v9595_v51, %v9518_v5  ;;  %v13714_v51 = vld [vmem:[#allocation49_spill] sm:$0xff] }
 0x6d6   :  { %vm10326_vm15 = vmand %vm13669_vm2, %vm13668_vm13  ;;  %13673 = vst [vmem:[#allocation55_spill] sm:$0xff] %v10341_v28  ;;  %v5853_v8 = vmax.f32 %v5852_v2, %v5475_v7  ;;  %v5922_v2 = vmax.f32 %v5921_v57, %v5476_v22  ;;  %v13722_v22 = vld [vmem:[#allocation86_spill] sm:$0xff]  ;;  %v10521_v57 = vadd.s32 288, %v13488_v41  ;;  %v10524_v56 = vadd.s32 296, %v13488_v41 }
 0x6d7   :  { %vm10357_vm8 = vmand %vm4194_vm7, %vm13674_vm1  ;;  %vm13684_vm7 = vcmp.eq.f32.partialorder %v13582_v19, %v13496_v63  ;;  %vm13685_vm1 = vcmp.gt.f32.partialorder %v13582_v19, %v13496_v63  ;;  %v13730_v7 = vmov 0  ;;  %v10574_v28 = vadd.s32 304, %v13488_v41 }
 0x6d8   :  { %vm10366_vm13 = vmor %vm13677_vm9, %vm10247_vm12  ;;  %vm13698_vm9 = vcmp.lt.s32.totalorder %v9524_v39, %v9491_v38  ;;  %13723 = vst [vmem:[#allocation128_spill] sm:$0xff] %v10521_v57  ;;  %v10577_v57 = vadd.s32 312, %v13488_v41  ;;  %v5141_v41 = vpop.permute.xlu0 %5140 }
 0x6d9   :  { %v13679_v42 = vsel %vm10366_vm13, 4294967295, %v13678_v42  ;;  %vm10376_vm2 = vmor %vm13681_vm10, %vm13680_vm3  ;;  %vm13688_vm13 = vnez %v13624_v33  ;;  %vm13689_vm10 = vnez %v13628_v31  ;;  %v13696_v33 = vmov 0  ;;  %13724 = vst [vmem:[#allocation63_spill] sm:$0xff] %v10524_v56  ;;  %v13884_v56 = vld [vmem:[#allocation90_spill] sm:$0xff] }
 0x6da   :  { %v13683_v44 = vsel %vm10376_vm2, 4294967295, %v13682_v44  ;;  %vm10386_vm12 = vmor %vm13685_vm1, %vm13684_vm7  ;;  %v5473_v20 = vsel %vm13688_vm13, %v5161_v26, -3.1887  ;;  %v5474_v10 = vsel %vm13689_vm10, %v5161_v26, -3.1887  ;;  %vm13690_vm7 = vcmp.eq.f32.partialorder %v13592_v16, %v8669_v47  ;;  %13740 = vst [vmem:[#allocation56_spill] sm:$0xff] %v10574_v28 }
 0x6db   :  { %v13687_v9 = vsel %vm10386_vm12, 4294967295, %v13686_v9  ;;  %vm13691_vm1 = vcmp.gt.f32.partialorder %v13592_v16, %v8669_v47  ;;  %vm13694_vm13 = vcmp.eq.f32.partialorder %v13582_v19, %v8669_v47  ;;  %vm13695_vm10 = vcmp.gt.f32.partialorder %v13582_v19, %v8669_v47  ;;  %13741 = vst [vmem:[#allocation67_spill] sm:$0xff] %v10577_v57 }
 0x6dc   :  { %vm10406_vm12 = vmor %vm13691_vm1, %vm13690_vm7  ;;  %vm13699_vm3 = vcmp.eq.f32.partialorder %v13615_v24, %v13489_v13  ;;  %v13700_v19 = vmov 0  ;;  %v10444_v16 = vmax.f32 %v5714_v1, %v5473_v20  ;;  %v5784_v31 = vmax.f32 %v5783_v46, %v5474_v10  ;;  %v13713_v46 = vld [vmem:[#allocation76_spill] sm:$0xff]  ;;  %v5241_v10 = vpop.permute.xlu1 %5240 }
 0x6dd   :  { %vm10416_vm14 = vmor %vm13695_vm10, %vm13694_vm13  ;;  %vm13702_vm10 = vcmp.gt.f32.partialorder %v13633_v0, %v13495_v30  ;;  %vm13710_vm7 = vcmp.eq.f32.partialorder %v13651_v62, %v13495_v30  ;;  %v13720_v26 = vmov 0  ;;  %vm13733_vm2 = vcmp.gt.f32.partialorder %v13587_v4, %v13495_v30 }
 0x6de   :  { %v13697_v33 = vsel %vm10416_vm14, 4294967295, %v13696_v33  ;;  %vm10440_vm14 = vmand %vm13699_vm3, %vm13698_vm9  ;;  %vm13705_vm9 = vcmp.eq.f32.partialorder %v13633_v0, %v13496_v63  ;;  %vm13706_vm3 = vcmp.gt.f32.partialorder %v13633_v0, %v13496_v63  ;;  %v13751_v28 = vmov 0 }
 0x6df   :  { %v13701_v19 = vsel %vm10440_vm14, 4294967295, %v13700_v19  ;;  %vm10455_vm1 = vmor %vm13702_vm10, %vm10326_vm15 }
 0x6e0   :  { %vm10465_vm13 = vmor %vm13706_vm3, %vm13705_vm9  ;;  %vm13718_vm9 = vcmp.eq.f32.partialorder %v13633_v0, %v8669_v47  ;;  %vm13719_vm3 = vcmp.gt.f32.partialorder %v13633_v0, %v8669_v47  ;;  %v5166_v11 = vpop.permute.xlu1 %5165 }
 0x6e1   :  { %v13708_v35 = vsel %vm10465_vm13, 4294967295, %v13707_v35  ;;  %vm10475_vm15 = vmand %vm13710_vm7, %vm13709_vm5  ;;  %vm13715_vm5 = vcmp.gt.f32.partialorder %v13653_v60, %v13495_v30 }
 0x6e2   :  { %vm10496_vm10 = vmor %vm13715_vm5, %vm10357_vm8  ;;  %vm13729_vm5 = vcmp.gt.f32.partialorder %v13587_v4, %v13489_v13  ;;  %vm13732_vm8 = vcmp.eq.f32.partialorder %v13587_v4, %v13495_v30 }
 0x6e3   :  { %vm10506_vm14 = vmor %vm13719_vm3, %vm13718_vm9  ;;  %vm13725_vm9 = vcmp.eq.f32.partialorder %v13653_v60, %v13496_v63  ;;  %vm13726_vm3 = vcmp.gt.f32.partialorder %v13653_v60, %v13496_v63  ;;  %v5538_v61 = vsel %vm10496_vm10, %v5241_v10, -3.1887  ;;  %vm13754_vm10 = vcmp.eq.f32.partialorder %v13642_v49, %v13489_v13 }
 0x6e4   :  { %v13721_v26 = vsel %vm10506_vm14, 4294967295, %v13720_v26  ;;  %vm10532_vm7 = vmor %vm13726_vm3, %vm13725_vm9  ;;  %vm13736_vm3 = vcmp.eq.f32.partialorder %v13587_v4, %v13496_v63  ;;  %vm13737_vm14 = vcmp.gt.f32.partialorder %v13587_v4, %v13496_v63  ;;  %v5785_v37 = vmax.f32 %v5784_v31, %v5538_v61 }
 0x6e5   :  { %vm10541_vm13 = vmor %vm13729_vm5, %vm10275_vm11  ;;  %v5539_v14 = vsel %vm10532_vm7, %v5241_v10, -3.1887  ;;  %vm13749_vm5 = vcmp.eq.f32.partialorder %v13587_v4, %v8669_v47  ;;  %v5458_v31 = vsel %vm10300_vm6, %v5141_v41, -3.1887  ;;  %vm13774_vm6 = vcmp.gt.f32.partialorder %v13651_v62, %v8669_v47 }
 0x6e6   :  { %v13731_v7 = vsel %vm10541_vm13, 4294967295, %v13730_v7  ;;  %vm10551_vm9 = vmor %vm13733_vm2, %vm13732_vm8  ;;  %vm13748_vm8 = vcmp.gt.f32.partialorder %v13653_v60, %v13489_v13  ;;  %v5854_v20 = vmax.f32 %v5853_v8, %v5539_v14  ;;  %v13761_v14 = vld [vmem:[#allocation50_spill] sm:$0xff]  ;;  %v5459_v8 = vsel %vm10310_vm4, %v5141_v41, -3.1887 }
 0x6e7   :  { %vm10561_vm11 = vmor %vm13737_vm14, %vm13736_vm3  ;;  %vm13744_vm14 = vcmp.eq.f32.partialorder %v13653_v60, %v8669_v47  ;;  %vm13745_vm3 = vcmp.gt.f32.partialorder %v13653_v60, %v8669_v47  ;;  %v5537_v57 = vsel %vm13748_vm8, %v5241_v10, -3.1887  ;;  %vm13753_vm8 = vcmp.lt.s32.totalorder %v9527_v12, %v9491_v38 }
 0x6e8   :  { %v13739_v50 = vsel %vm10561_vm11, 4294967295, %v13738_v50  ;;  %vm10591_vm2 = vmor %vm13745_vm3, %vm13744_vm14  ;;  %vm13750_vm14 = vcmp.gt.f32.partialorder %v13587_v4, %v8669_v47  ;;  %v5716_v60 = vmax.f32 %v10444_v16, %v5537_v57  ;;  %v5457_v16 = vsel %vm10290_vm0, %v5141_v41, -3.1887 }
 0x6e9   :  { %vm10608_vm3 = vmor %vm13750_vm14, %vm13749_vm5  ;;  %v5540_v34 = vsel %vm10591_vm2, %v5241_v10, -3.1887  ;;  %vm13757_vm14 = vcmp.gt.f32.partialorder %v13651_v62, %v13495_v30  ;;  %vm13763_vm2 = vcmp.eq.f32.partialorder %v13652_v29, %v13495_v30  ;;  %v5786_v54 = vmax.f32 %v5785_v37, %v5458_v31  ;;  %v13789_v31 = vld [vmem:[#allocation78_spill] sm:$0xff] }
 0x6ea   :  { %v13752_v28 = vsel %vm10608_vm3, 4294967295, %v13751_v28  ;;  %vm10632_vm3 = vmand %vm13754_vm10, %vm13753_vm8  ;;  %v5923_v61 = vmax.f32 %v5922_v2, %v5540_v34  ;;  %v5717_v34 = vmax.f32 %v5716_v60, %v5457_v16  ;;  %v5855_v17 = vmax.f32 %v5854_v20, %v5459_v8  ;;  %v5226_v60 = vpop.permute.xlu0 %5225  ;;  %v13839_v16 = vld [vmem:[#allocation51_spill] sm:$0xff] }
 0x6eb   :  { %vm10646_vm13 = vmor %vm13757_vm14, %vm10475_vm15  ;;  %vm13762_vm14 = vcmp.lt.s32.totalorder %v9634_v52, %v9518_v5  ;;  %v5460_v52 = vsel %vm10406_vm12, %v5141_v41, -3.1887  ;;  %vm13766_vm4 = vcmp.eq.f32.partialorder %v13651_v62, %v13496_v63  ;;  %vm13770_vm15 = vnez %v13679_v42 }
 0x6ec   :  { %vm10674_vm7 = vmand %vm13763_vm2, %vm13762_vm14  ;;  %vm13767_vm2 = vcmp.gt.f32.partialorder %v13651_v62, %v13496_v63  ;;  %v5924_v27 = vmax.f32 %v5923_v61, %v5460_v52  ;;  %v5477_v41 = vsel %vm13770_vm15, %v5166_v11, -3.1887  ;;  %vm13771_vm5 = vnez %v13683_v44 }
 0x6ed   :  { %vm10692_vm14 = vmor %vm13767_vm2, %vm13766_vm4  ;;  %v5478_v57 = vsel %vm13771_vm5, %v5166_v11, -3.1887  ;;  %vm13772_vm4 = vnez %v13687_v9  ;;  %vm13773_vm2 = vcmp.eq.f32.partialorder %v13651_v62, %v8669_v47  ;;  %v5718_v42 = vmax.f32 %v5717_v34, %v5477_v41 }
 0x6ee   :  { %v5479_v10 = vsel %vm13772_vm4, %v5166_v11, -3.1887  ;;  %vm10714_vm8 = vmor %vm13774_vm6, %vm13773_vm2  ;;  %v5787_v44 = vmax.f32 %v5786_v54, %v5478_v57  ;;  %vm13777_vm5 = vnez %v13697_v33  ;;  %vm13778_vm6 = vcmp.gt.f32.partialorder %v13652_v29, %v13495_v30 }
 0x6ef   :  { %v5856_v20 = vmax.f32 %v5855_v17, %v5479_v10  ;;  %v5480_v9 = vsel %vm13777_vm5, %v5166_v11, -3.1887  ;;  %vm10729_vm2 = vmor %vm13778_vm6, %vm10674_vm7  ;;  %v13779_v61 = vmov 0  ;;  %vm13781_vm15 = vcmp.eq.f32.partialorder %v13652_v29, %v13496_v63 }
 0x6f0   :  { %v13780_v61 = vsel %vm10729_vm2, 4294967295, %v13779_v61  ;;  %vm13782_vm12 = vcmp.gt.f32.partialorder %v13652_v29, %v13496_v63  ;;  %v13783_v33 = vmov 0  ;;  %vm13785_vm5 = vcmp.lt.s32.totalorder %v9668_v58, %v9518_v5 }
 0x6f1   :  { %vm10739_vm10 = vmor %vm13782_vm12, %vm13781_vm15  ;;  %vm13786_vm4 = vcmp.eq.f32.partialorder %v13672_v25, %v13495_v30  ;;  %v5925_v8 = vmax.f32 %v5924_v27, %v5480_v9  ;;  %vm13790_vm12 = vcmp.gt.f32.partialorder %v13633_v0, %v13489_v13  ;;  %v5526_v58 = vsel %vm10455_vm1, %v5226_v60, -3.1887  ;;  %v13838_v9 = vld [vmem:[#allocation81_spill] sm:$0xff] }
 0x6f2   :  { %v13784_v33 = vsel %vm10739_vm10, 4294967295, %v13783_v33  ;;  %vm10749_vm7 = vmand %vm13786_vm4, %vm13785_vm5  ;;  %v5525_v1 = vsel %vm13790_vm12, %v5226_v60, -3.1887  ;;  %vm13791_vm15 = vnez %v13708_v35  ;;  %vm13792_vm4 = vcmp.lt.s32.totalorder %v9665_v36, %v9518_v5  ;;  %v5171_v36 = vpop.permute.xlu1 %5170 }
 0x6f3   :  { %v5527_v34 = vsel %vm13791_vm15, %v5226_v60, -3.1887  ;;  %vm13793_vm5 = vcmp.eq.f32.partialorder %v13722_v22, %v13495_v30  ;;  %v5719_v0 = vmax.f32 %v5718_v42, %v5525_v1  ;;  %v5788_v39 = vmax.f32 %v5787_v44, %v5526_v58 }
 0x6f4   :  { %vm10770_vm6 = vmand %vm13793_vm5, %vm13792_vm4  ;;  %v5857_v35 = vmax.f32 %v5856_v20, %v5527_v34  ;;  %vm13796_vm1 = vnez %v13721_v26  ;;  %vm13797_vm15 = vcmp.eq.f32.partialorder %v13652_v29, %v8669_v47  ;;  %vm13798_vm4 = vcmp.gt.f32.partialorder %v13652_v29, %v8669_v47 }
 0x6f5   :  { %v5528_v17 = vsel %vm13796_vm1, %v5226_v60, -3.1887  ;;  %vm10786_vm5 = vmor %vm13798_vm4, %vm13797_vm15  ;;  %vm13801_vm0 = vnez %v13701_v19  ;;  %vm13802_vm12 = vcmp.gt.f32.partialorder %v13615_v24, %v13489_v13  ;;  %v13803_v11 = vmov 0  ;;  %v5236_v60 = vpop.permute.xlu0 %5235 }
 0x6f6   :  { %vm10795_vm11 = vmor %vm13802_vm12, %vm13801_vm0  ;;  %vm13805_vm1 = vcmp.eq.f32.partialorder %v13615_v24, %v13495_v30  ;;  %vm13806_vm10 = vcmp.gt.f32.partialorder %v13615_v24, %v13495_v30  ;;  %v13807_v26 = vmov 0  ;;  %vm13809_vm15 = vcmp.eq.f32.partialorder %v13615_v24, %v13496_v63 }
 0x6f7   :  { %v13804_v11 = vsel %vm10795_vm11, 4294967295, %v13803_v11  ;;  %vm10805_vm2 = vmor %vm13806_vm10, %vm13805_vm1  ;;  %vm13810_vm4 = vcmp.gt.f32.partialorder %v13615_v24, %v13496_v63  ;;  %v13811_v19 = vmov 0  ;;  %v5926_v27 = vmax.f32 %v5925_v8, %v5528_v17  ;;  %v5251_v17 = vpop.permute.xlu1 %5250 }
 0x6f8   :  { %v13808_v26 = vsel %vm10805_vm2, 4294967295, %v13807_v26  ;;  %vm10815_vm0 = vmor %vm13810_vm4, %vm13809_vm15  ;;  %vm13813_vm10 = vnez %v13731_v7  ;;  %v5482_v57 = vsel %vm10551_vm9, %v5171_v36, -3.1887  ;;  %vm13814_vm1 = vnez %v13739_v50 }
 0x6f9   :  { %v13812_v19 = vsel %vm10815_vm0, 4294967295, %v13811_v19  ;;  %v5481_v41 = vsel %vm13813_vm10, %v5171_v36, -3.1887  ;;  %v5483_v10 = vsel %vm13814_vm1, %v5171_v36, -3.1887  ;;  %vm13815_vm15 = vcmp.eq.f32.partialorder %v13615_v24, %v8669_v47 }
 0x6fa   :  { %vm13816_vm4 = vcmp.gt.f32.partialorder %v13615_v24, %v8669_v47  ;;  %v13817_v42 = vmov 0  ;;  %vm13819_vm10 = vcmp.lt.s32.totalorder %v9708_v48, %v9518_v5  ;;  %vm13820_vm9 = vcmp.eq.f32.partialorder %v13713_v46, %v13495_v30 }
 0x6fb   :  { %vm10835_vm12 = vmor %vm13816_vm4, %vm13815_vm15  ;;  %vm13824_vm1 = vcmp.eq.f32.partialorder %v13714_v51, %v13489_v13  ;;  %v13825_v48 = vmov 0  ;;  %v5720_v24 = vmax.f32 %v5719_v0, %v5481_v41  ;;  %v5789_v7 = vmax.f32 %v5788_v39, %v5482_v57 }
 0x6fc   :  { %v13818_v42 = vsel %vm10835_vm12, 4294967295, %v13817_v42  ;;  %vm10845_vm11 = vmand %vm13820_vm9, %vm13819_vm10  ;;  %vm13823_vm9 = vcmp.lt.s32.totalorder %v9542_v21, %v9491_v38  ;;  %v5858_v50 = vmax.f32 %v5857_v35, %v5483_v10  ;;  %vm13827_vm4 = vnez %v13752_v28 }
 0x6fd   :  { %vm10867_vm2 = vmand %vm13824_vm1, %vm13823_vm9  ;;  %v5484_v44 = vsel %vm13827_vm4, %v5171_v36, -3.1887  ;;  %vm13828_vm10 = vcmp.gt.f32.partialorder %v13722_v22, %v13495_v30  ;;  %vm13831_vm9 = vcmp.gt.f32.partialorder %v13672_v25, %v13495_v30  ;;  %vm13834_vm4 = vcmp.eq.f32.partialorder %v13672_v25, %v13496_v63 }
 0x6fe   :  { %v13826_v48 = vsel %vm10867_vm2, 4294967295, %v13825_v48  ;;  %vm10878_vm15 = vmor %vm13828_vm10, %vm10770_vm6  ;;  %vm13835_vm6 = vcmp.gt.f32.partialorder %v13672_v25, %v13496_v63  ;;  %v5927_v8 = vmax.f32 %v5926_v27, %v5484_v44  ;;  %v5534_v58 = vsel %vm10646_vm13, %v5236_v60, -3.1887 }
 0x6ff   :  { %vm10889_vm12 = vmor %vm13831_vm9, %vm10749_vm7  ;;  %v5535_v34 = vsel %vm10692_vm14, %v5236_v60, -3.1887  ;;  %vm13841_vm7 = vcmp.eq.f32.partialorder %v13722_v22, %v13496_v63  ;;  %vm13842_vm2 = vcmp.gt.f32.partialorder %v13722_v22, %v13496_v63  ;;  %v5790_v2 = vmax.f32 %v5789_v7, %v5534_v58 }
 0x700   :  { %vm10899_vm10 = vmor %vm13835_vm6, %vm13834_vm4  ;;  %vm13840_vm6 = vcmp.gt.f32.partialorder %v13651_v62, %v13489_v13  ;;  %vm13845_vm4 = vcmp.eq.f32.partialorder %v13672_v25, %v8669_v47  ;;  %v5859_v0 = vmax.f32 %v5858_v50, %v5535_v34  ;;  %v5536_v39 = vsel %vm10714_vm8, %v5236_v60, -3.1887 }
 0x701   :  { %v5533_v1 = vsel %vm13840_vm6, %v5236_v60, -3.1887  ;;  %vm10928_vm9 = vmor %vm13842_vm2, %vm13841_vm7  ;;  %vm13846_vm6 = vcmp.gt.f32.partialorder %v13672_v25, %v8669_v47  ;;  %vm13849_vm2 = vcmp.eq.f32.partialorder %v13722_v22, %v8669_v47  ;;  %vm13850_vm7 = vcmp.gt.f32.partialorder %v13722_v22, %v8669_v47  ;;  %v5246_v60 = vpop.permute.xlu0 %5245 }
 0x702   :  { %vm10938_vm13 = vmor %vm13846_vm6, %vm13845_vm4  ;;  %v5721_v12 = vmax.f32 %v5720_v24, %v5533_v1  ;;  %vm13853_vm6 = vcmp.gt.f32.partialorder %v13642_v49, %v13489_v13  ;;  %v13854_v36 = vmov 0  ;;  %vm13856_vm8 = vcmp.eq.f32.partialorder %v13642_v49, %v13495_v30 }
 0x703   :  { %vm10954_vm4 = vmor %vm13850_vm7, %vm13849_vm2  ;;  %vm13857_vm0 = vcmp.gt.f32.partialorder %v13642_v49, %v13495_v30  ;;  %vm13860_vm7 = vcmp.eq.f32.partialorder %v13642_v49, %v13496_v63  ;;  %vm13861_vm1 = vcmp.gt.f32.partialorder %v13642_v49, %v13496_v63  ;;  %v13862_v4 = vmov 0 }
 0x704   :  { %vm10963_vm14 = vmor %vm13853_vm6, %vm10632_vm3  ;;  %v5928_v27 = vmax.f32 %v5927_v8, %v5536_v39  ;;  %v5546_v57 = vsel %vm10878_vm15, %v5251_v17, -3.1887  ;;  %v5547_v10 = vsel %vm10928_vm9, %v5251_v17, -3.1887  ;;  %v13867_v24 = vmov 0  ;;  %v13885_v8 = vld [vmem:[#allocation52_spill] sm:$0xff] }
 0x705   :  { %v13855_v36 = vsel %vm10963_vm14, 4294967295, %v13854_v36  ;;  %vm10973_vm2 = vmor %vm13857_vm0, %vm13856_vm8  ;;  %vm13864_vm0 = vcmp.gt.f32.partialorder %v13722_v22, %v13489_v13  ;;  %vm13866_vm8 = vcmp.gt.f32.partialorder %v13642_v49, %v8669_v47  ;;  %vm13870_vm15 = vcmp.eq.f32.partialorder %v13760_v6, %v13495_v30 }
 0x706   :  { %vm10983_vm3 = vmor %vm13861_vm1, %vm13860_vm7  ;;  %v5545_v41 = vsel %vm13864_vm0, %v5251_v17, -3.1887  ;;  %vm13865_vm1 = vcmp.eq.f32.partialorder %v13642_v49, %v8669_v47  ;;  %vm13869_vm0 = vcmp.lt.s32.totalorder %v9861_v3, %v9518_v5  ;;  %vm13874_vm9 = vcmp.eq.f32.partialorder %v13761_v14, %v13489_v13 }
 0x707   :  { %v13863_v4 = vsel %vm10983_vm3, 4294967295, %v13862_v4  ;;  %vm11004_vm7 = vmor %vm13866_vm8, %vm13865_vm1  ;;  %v13875_v3 = vmov 0  ;;  %v5722_v49 = vmax.f32 %v5721_v12, %v5545_v41  ;;  %v5791_v7 = vmax.f32 %v5790_v2, %v5546_v57  ;;  %v5256_v41 = vpop.permute.xlu0 %5255 }
 0x708   :  { %v13868_v24 = vsel %vm11004_vm7, 4294967295, %v13867_v24  ;;  %vm11014_vm6 = vmand %vm13870_vm15, %vm13869_vm0  ;;  %vm13873_vm15 = vcmp.lt.s32.totalorder %v9545_v53, %v9491_v38  ;;  %v5860_v50 = vmax.f32 %v5859_v0, %v5547_v10  ;;  %v5548_v44 = vsel %vm10954_vm4, %v5251_v17, -3.1887  ;;  %v5176_v0 = vpop.permute.xlu1 %5175 }
 0x709   :  { %vm11036_vm3 = vmand %vm13874_vm9, %vm13873_vm15  ;;  %vm13877_vm0 = vcmp.gt.f32.partialorder %v13713_v46, %v13495_v30  ;;  %vm13880_vm9 = vcmp.eq.f32.partialorder %v13713_v46, %v13496_v63  ;;  %vm13881_vm15 = vcmp.gt.f32.partialorder %v13713_v46, %v13496_v63  ;;  %v5929_v1 = vmax.f32 %v5928_v27, %v5548_v44 }
 0x70a   :  { %v13876_v3 = vsel %vm11036_vm3, 4294967295, %v13875_v3  ;;  %vm11049_vm1 = vmor %vm13877_vm0, %vm10845_vm11  ;;  %vm13887_vm4 = vnez %v13780_v61  ;;  %vm13888_vm14 = vnez %v13784_v33  ;;  %vm13889_vm11 = vcmp.eq.f32.partialorder %v13713_v46, %v8669_v47 }
 0x70b   :  { %vm11059_vm7 = vmor %vm13881_vm15, %vm13880_vm9  ;;  %vm13886_vm15 = vcmp.gt.f32.partialorder %v13652_v29, %v13489_v13  ;;  %v5542_v34 = vsel %vm13887_vm4, %v5246_v60, -3.1887  ;;  %v5543_v54 = vsel %vm13888_vm14, %v5246_v60, -3.1887  ;;  %vm13890_vm8 = vcmp.gt.f32.partialorder %v13713_v46, %v8669_v47 }
 0x70c   :  { %v5541_v58 = vsel %vm13886_vm15, %v5246_v60, -3.1887  ;;  %vm11088_vm0 = vmor %vm13890_vm8, %vm13889_vm11  ;;  %v5792_v61 = vmax.f32 %v5791_v7, %v5542_v34  ;;  %v5861_v33 = vmax.f32 %v5860_v50, %v5543_v54  ;;  %v5544_v2 = vsel %vm10786_vm5, %v5246_v60, -3.1887  ;;  %v13908_v60 = vld [vmem:[#allocation21_spill] sm:$0xff]  ;;  %v14006_v54 = vld [vmem:[#allocation20_spill] sm:$0xff] }
 0x70d   :  { %v5723_v29 = vmax.f32 %v5722_v49, %v5541_v58  ;;  %vm13893_vm8 = vcmp.gt.f32.partialorder %v13760_v6, %v13495_v30  ;;  %v13894_v39 = vmov 0  ;;  %v5930_v52 = vmax.f32 %v5929_v1, %v5544_v2  ;;  %v5181_v58 = vpop.permute.xlu1 %5180 }
 0x70e   :  { %vm11105_vm4 = vmor %vm13893_vm8, %vm11014_vm6  ;;  %vm13896_vm5 = vnez %v13804_v11  ;;  %vm13897_vm15 = vnez %v13808_v26  ;;  %vm13898_vm14 = vnez %v13812_v19  ;;  %vm13899_vm6 = vcmp.lt.s32.totalorder %v9878_v59, %v9518_v5  ;;  %v13983_v59 = vld [vmem:[#allocation129_spill] sm:$0xff] }
 0x70f   :  { %v13895_v39 = vsel %vm11105_vm4, 4294967295, %v13894_v39  ;;  %v5485_v35 = vsel %vm13896_vm5, %v5176_v0, -3.1887  ;;  %v5486_v17 = vsel %vm13897_vm15, %v5176_v0, -3.1887  ;;  %vm13900_vm8 = vcmp.eq.f32.partialorder %v13789_v31, %v13495_v30 }
 0x710   :  { %v5487_v27 = vsel %vm13898_vm14, %v5176_v0, -3.1887  ;;  %vm11125_vm11 = vmand %vm13900_vm8, %vm13899_vm6  ;;  %v5724_v11 = vmax.f32 %v5723_v29, %v5485_v35  ;;  %v5793_v26 = vmax.f32 %v5792_v61, %v5486_v17  ;;  %vm13903_vm15 = vnez %v13818_v42  ;;  %v13909_v42 = vld [vmem:[#allocation53_spill] sm:$0xff] }
 0x711   :  { %v5862_v10 = vmax.f32 %v5861_v33, %v5487_v27  ;;  %v5488_v19 = vsel %vm13903_vm15, %v5176_v0, -3.1887  ;;  %vm13904_vm14 = vcmp.eq.f32.partialorder %v13760_v6, %v13496_v63  ;;  %vm13905_vm9 = vcmp.gt.f32.partialorder %v13760_v6, %v13496_v63  ;;  %v5266_v0 = vpop.permute.xlu0 %5265 }
 0x712   :  { %vm11139_vm4 = vmor %vm13905_vm9, %vm13904_vm14  ;;  %v5931_v22 = vmax.f32 %v5930_v52, %v5488_v19  ;;  %vm13910_vm9 = vcmp.gt.f32.partialorder %v13672_v25, %v13489_v13  ;;  %v5550_v7 = vsel %vm10889_vm12, %v5256_v41, -3.1887  ;;  %v5551_v50 = vsel %vm10899_vm10, %v5256_v41, -3.1887 }
 0x713   :  { %v5549_v49 = vsel %vm13910_vm9, %v5256_v41, -3.1887  ;;  %vm13911_vm14 = vcmp.eq.f32.partialorder %v13760_v6, %v8669_v47  ;;  %vm13912_vm15 = vcmp.gt.f32.partialorder %v13760_v6, %v8669_v47  ;;  %v5794_v28 = vmax.f32 %v5793_v26, %v5550_v7  ;;  %v13955_v26 = vld [vmem:[#allocation85_spill] sm:$0xff] }
 0x714   :  { %vm11166_vm8 = vmor %vm13912_vm15, %vm13911_vm14  ;;  %v5725_v25 = vmax.f32 %v5724_v11, %v5549_v49  ;;  %v5863_v20 = vmax.f32 %v5862_v10, %v5551_v50  ;;  %v5552_v1 = vsel %vm10938_vm13, %v5256_v41, -3.1887  ;;  %vm13915_vm12 = vcmp.gt.f32.partialorder %v13789_v31, %v13495_v30 }
 0x715   :  { %vm11181_vm10 = vmor %vm13915_vm12, %vm11125_vm11  ;;  %vm13918_vm15 = vnez %v13826_v48  ;;  %vm13919_vm14 = vcmp.gt.f32.partialorder %v13714_v51, %v13489_v13  ;;  %vm13922_vm13 = vcmp.eq.f32.partialorder %v13714_v51, %v13495_v30  ;;  %vm13923_vm9 = vcmp.gt.f32.partialorder %v13714_v51, %v13495_v30 }
 0x716   :  { %vm11190_vm3 = vmor %vm13919_vm14, %vm13918_vm15  ;;  %v13924_v62 = vmov 0  ;;  %vm13926_vm11 = vcmp.eq.f32.partialorder %v13714_v51, %v13496_v63  ;;  %vm13927_vm12 = vcmp.gt.f32.partialorder %v13714_v51, %v13496_v63  ;;  %v13928_v48 = vmov 0 }
 0x717   :  { %vm11200_vm5 = vmor %vm13923_vm9, %vm13922_vm13  ;;  %v5932_v29 = vmax.f32 %v5931_v22, %v5552_v1  ;;  %vm13930_vm9 = vnez %v13855_v36  ;;  %v5490_v33 = vsel %vm10973_vm2, %v5181_v58, -3.1887  ;;  %vm13931_vm13 = vnez %v13863_v4  ;;  %v5261_v22 = vpop.permute.xlu1 %5260  ;;  %v5276_v1 = vpop.permute.xlu0 %5275 }
 0x718   :  { %v13925_v62 = vsel %vm11200_vm5, 4294967295, %v13924_v62  ;;  %vm11210_vm15 = vmor %vm13927_vm12, %vm13926_vm11  ;;  %v5489_v61 = vsel %vm13930_vm9, %v5181_v58, -3.1887  ;;  %v5491_v2 = vsel %vm13931_vm13, %v5181_v58, -3.1887  ;;  %vm13932_vm11 = vcmp.eq.f32.partialorder %v13714_v51, %v8669_v47 }
 0x719   :  { %v13929_v48 = vsel %vm11210_vm15, 4294967295, %v13928_v48  ;;  %vm13933_vm12 = vcmp.gt.f32.partialorder %v13714_v51, %v8669_v47  ;;  %v13934_v52 = vmov 0  ;;  %vm13936_vm9 = vcmp.lt.s32.totalorder %v9927_v23, %v9518_v5 }
 0x71a   :  { %vm11230_vm14 = vmor %vm13933_vm12, %vm13932_vm11  ;;  %vm13937_vm2 = vcmp.eq.f32.partialorder %v13838_v9, %v13495_v30  ;;  %vm13941_vm13 = vcmp.eq.f32.partialorder %v13839_v16, %v13489_v13  ;;  %v13942_v23 = vmov 0  ;;  %v5726_v51 = vmax.f32 %v5725_v25, %v5489_v61 }
 0x71b   :  { %v13935_v52 = vsel %vm11230_vm14, 4294967295, %v13934_v52  ;;  %vm11240_vm6 = vmand %vm13937_vm2, %vm13936_vm9  ;;  %vm13940_vm2 = vcmp.lt.s32.totalorder %v9553_v45, %v9491_v38  ;;  %v5795_v37 = vmax.f32 %v5794_v28, %v5490_v33  ;;  %v5864_v4 = vmax.f32 %v5863_v20, %v5491_v2  ;;  %v5286_v11 = vpop.permute.xlu0 %5285 }
 0x71c   :  { %vm11262_vm5 = vmand %vm13941_vm13, %vm13940_vm2  ;;  %vm13944_vm12 = vnez %v13868_v24  ;;  %vm13945_vm11 = vcmp.eq.f32.partialorder %v13789_v31, %v13496_v63  ;;  %vm13946_vm9 = vcmp.gt.f32.partialorder %v13789_v31, %v13496_v63  ;;  %v13949_v24 = vld [vmem:[#allocation54_spill] sm:$0xff]  ;;  %vm13950_vm13 = vcmp.gt.f32.partialorder %v13713_v46, %v13489_v13  ;;  %v13956_v46 = vld [vmem:[#allocation127_spill] sm:$0xff] }
 0x71d   :  { %v13943_v23 = vsel %vm11262_vm5, 4294967295, %v13942_v23  ;;  %v5492_v35 = vsel %vm13944_vm12, %v5181_v58, -3.1887  ;;  %vm11274_vm14 = vmor %vm13946_vm9, %vm13945_vm11  ;;  %v5557_v27 = vsel %vm13950_vm13, %v5266_v0, -3.1887  ;;  %vm13951_vm12 = vcmp.eq.f32.partialorder %v13789_v31, %v8669_v47 }
 0x71e   :  { %v5933_v17 = vmax.f32 %v5932_v29, %v5492_v35  ;;  %v5558_v41 = vsel %vm11049_vm1, %v5266_v0, -3.1887  ;;  %v5559_v57 = vsel %vm11059_vm7, %v5266_v0, -3.1887  ;;  %vm13952_vm11 = vcmp.gt.f32.partialorder %v13789_v31, %v8669_v47  ;;  %v5186_v35 = vpop.permute.xlu1 %5185 }
 0x71f   :  { %vm11305_vm5 = vmor %vm13952_vm11, %vm13951_vm12  ;;  %v5727_v53 = vmax.f32 %v5726_v51, %v5557_v27  ;;  %v5796_v10 = vmax.f32 %v5795_v37, %v5558_v41  ;;  %v5865_v21 = vmax.f32 %v5864_v4, %v5559_v57  ;;  %v5560_v19 = vsel %vm11088_vm0, %v5266_v0, -3.1887  ;;  %v5291_v51 = vpop.permute.xlu0 %5290 }
 0x720   :  { %vm13957_vm7 = vcmp.gt.f32.partialorder %v13838_v9, %v13495_v30  ;;  %vm13960_vm12 = vnez %v13876_v3  ;;  %vm13961_vm11 = vcmp.gt.f32.partialorder %v13761_v14, %v13489_v13  ;;  %vm13964_vm0 = vcmp.eq.f32.partialorder %v13761_v14, %v13495_v30 }
 0x721   :  { %vm11320_vm1 = vmor %vm13957_vm7, %vm11240_vm6  ;;  %vm13965_vm13 = vcmp.gt.f32.partialorder %v13761_v14, %v13495_v30  ;;  %v13966_v12 = vmov 0  ;;  %vm13968_vm6 = vcmp.eq.f32.partialorder %v13761_v14, %v13496_v63  ;;  %vm13969_vm7 = vcmp.gt.f32.partialorder %v13761_v14, %v13496_v63 }
 0x722   :  { %vm11329_vm9 = vmor %vm13961_vm11, %vm13960_vm12  ;;  %v13970_v3 = vmov 0  ;;  %v5934_v50 = vmax.f32 %v5933_v17, %v5560_v19  ;;  %v5555_v20 = vsel %vm11139_vm4, %v5261_v22, -3.1887  ;;  %v13976_v58 = vmov 0 }
 0x723   :  { %vm11339_vm2 = vmor %vm13965_vm13, %vm13964_vm0  ;;  %vm13972_vm13 = vcmp.gt.f32.partialorder %v13760_v6, %v13489_v13  ;;  %vm13973_vm0 = vnez %v13895_v39  ;;  %v13982_v39 = vld [vmem:[#allocation91_spill] sm:$0xff]  ;;  %vm13984_vm4 = vcmp.lt.s32.totalorder %v9560_v15, %v9491_v38  ;;  %v5866_v61 = vmax.f32 %v5865_v21, %v5555_v20  ;;  %v14022_v20 = vld [vmem:[#allocation88_spill] sm:$0xff] }
 0x724   :  { %v13967_v12 = vsel %vm11339_vm2, 4294967295, %v13966_v12  ;;  %vm11349_vm12 = vmor %vm13969_vm7, %vm13968_vm6  ;;  %v5553_v25 = vsel %vm13972_vm13, %v5261_v22, -3.1887  ;;  %v5554_v28 = vsel %vm13973_vm0, %v5261_v22, -3.1887  ;;  %vm13974_vm6 = vcmp.eq.f32.partialorder %v13761_v14, %v8669_v47 }
 0x725   :  { %v13971_v3 = vsel %vm11349_vm12, 4294967295, %v13970_v3  ;;  %vm13975_vm7 = vcmp.gt.f32.partialorder %v13761_v14, %v8669_v47  ;;  %vm13978_vm13 = vcmp.lt.s32.totalorder %v9930_v18, %v9518_v5  ;;  %vm13979_vm0 = vcmp.eq.f32.partialorder %v13884_v56, %v13495_v30 }
 0x726   :  { %vm11370_vm11 = vmor %vm13975_vm7, %vm13974_vm6  ;;  %vm13985_vm12 = vcmp.eq.f32.partialorder %v13885_v8, %v13489_v13  ;;  %v5728_v14 = vmax.f32 %v5727_v53, %v5553_v25  ;;  %v5797_v29 = vmax.f32 %v5796_v10, %v5554_v28  ;;  %v5556_v33 = vsel %vm11166_vm8, %v5261_v22, -3.1887 }
 0x727   :  { %v13977_v58 = vsel %vm11370_vm11, 4294967295, %v13976_v58  ;;  %vm11380_vm15 = vmand %vm13979_vm0, %vm13978_vm13  ;;  %vm13988_vm11 = vcmp.eq.f32.partialorder %v13838_v9, %v13496_v63  ;;  %vm13989_vm0 = vcmp.gt.f32.partialorder %v13838_v9, %v13496_v63  ;;  %v5935_v44 = vmax.f32 %v5934_v50, %v5556_v33 }
 0x728   :  { %vm11404_vm2 = vmand %vm13985_vm12, %vm13984_vm4  ;;  %vm13992_vm6 = vcmp.gt.f32.partialorder %v13789_v31, %v13489_v13  ;;  %v5566_v0 = vsel %vm11181_vm10, %v5276_v1, -3.1887  ;;  %v5567_v36 = vsel %vm11274_vm14, %v5276_v1, -3.1887  ;;  %v5568_v4 = vsel %vm11305_vm5, %v5276_v1, -3.1887 }
 0x729   :  { %vm11416_vm7 = vmor %vm13989_vm0, %vm13988_vm11  ;;  %v5565_v2 = vsel %vm13992_vm6, %v5276_v1, -3.1887  ;;  %vm13993_vm11 = vcmp.eq.f32.partialorder %v13838_v9, %v8669_v47  ;;  %vm13994_vm0 = vcmp.gt.f32.partialorder %v13838_v9, %v8669_v47  ;;  %v5798_v34 = vmax.f32 %v5797_v29, %v5566_v0  ;;  %v5191_v29 = vpop.permute.xlu1 %5190 }
 0x72a   :  { %vm11441_vm13 = vmor %vm13994_vm0, %vm13993_vm11  ;;  %v5729_v31 = vmax.f32 %v5728_v14, %v5565_v2  ;;  %v5867_v37 = vmax.f32 %v5866_v61, %v5567_v36  ;;  %vm13997_vm10 = vcmp.gt.f32.partialorder %v13884_v56, %v13495_v30  ;;  %v5936_v17 = vmax.f32 %v5935_v44, %v5568_v4 }
 0x72b   :  { %vm11456_vm14 = vmor %vm13997_vm10, %vm11380_vm15  ;;  %v5493_v27 = vsel %vm11190_vm3, %v5186_v35, -3.1887  ;;  %vm14000_vm5 = vnez %v13925_v62  ;;  %vm14001_vm8 = vnez %v13929_v48  ;;  %vm14002_vm15 = vcmp.lt.s32.totalorder %v9881_v40, %v9518_v5  ;;  %v14007_v62 = vld [vmem:[#allocation126_spill] sm:$0xff] }
 0x72c   :  { %v5494_v41 = vsel %vm14000_vm5, %v5186_v35, -3.1887  ;;  %v5495_v57 = vsel %vm14001_vm8, %v5186_v35, -3.1887  ;;  %vm14003_vm10 = vcmp.eq.f32.partialorder %v13908_v60, %v13495_v30  ;;  %vm14008_vm3 = vcmp.lt.s32.totalorder %v9563_v32, %v9491_v38 }
 0x72d   :  { %vm11476_vm6 = vmand %vm14003_vm10, %vm14002_vm15  ;;  %vm14009_vm5 = vcmp.eq.f32.partialorder %v13909_v42, %v13489_v13  ;;  %v5730_v48 = vmax.f32 %v5729_v31, %v5493_v27  ;;  %v5799_v10 = vmax.f32 %v5798_v34, %v5494_v41  ;;  %v5868_v21 = vmax.f32 %v5867_v37, %v5495_v57  ;;  %v5271_v57 = vpop.permute.xlu1 %5270 }
 0x72e   :  { %vm11500_vm11 = vmand %vm14009_vm5, %vm14008_vm3  ;;  %vm14012_vm4 = vnez %v13935_v52  ;;  %vm14013_vm0 = vcmp.eq.f32.partialorder %v13884_v56, %v13496_v63  ;;  %vm14014_vm10 = vcmp.gt.f32.partialorder %v13884_v56, %v13496_v63  ;;  %v5574_v50 = vsel %vm11320_vm1, %v5286_v11, -3.1887 }
 0x72f   :  { %v5496_v19 = vsel %vm14012_vm4, %v5186_v35, -3.1887  ;;  %vm11512_vm15 = vmor %vm14014_vm10, %vm14013_vm0  ;;  %vm14017_vm10 = vcmp.gt.f32.partialorder %v13838_v9, %v13489_v13  ;;  %v5575_v25 = vsel %vm11416_vm7, %v5286_v11, -3.1887  ;;  %vm14018_vm8 = vcmp.eq.f32.partialorder %v13884_v56, %v8669_v47  ;;  %v14023_v9 = vld [vmem:[#allocation9_spill] sm:$0xff] }
 0x730   :  { %v5937_v52 = vmax.f32 %v5936_v17, %v5496_v19  ;;  %v5573_v22 = vsel %vm14017_vm10, %v5286_v11, -3.1887  ;;  %vm14019_vm12 = vcmp.gt.f32.partialorder %v13884_v56, %v8669_v47  ;;  %v5800_v1 = vmax.f32 %v5799_v10, %v5574_v50  ;;  %v14087_v50 = vld [vmem:[#allocation128_spill] sm:$0xff] }
 0x731   :  { %vm11541_vm4 = vmor %vm14019_vm12, %vm14018_vm8  ;;  %v5731_v49 = vmax.f32 %v5730_v48, %v5573_v22  ;;  %v5869_v6 = vmax.f32 %v5868_v21, %v5575_v25  ;;  %v5576_v14 = vsel %vm11441_vm13, %v5286_v11, -3.1887  ;;  %vm14024_vm1 = vcmp.gt.f32.partialorder %v13908_v60, %v13495_v30  ;;  %v14086_v22 = vld [vmem:[#allocation23_spill] sm:$0xff] }
 0x732   :  { %vm11556_vm7 = vmor %vm14024_vm1, %vm11476_vm6  ;;  %vm14027_vm12 = vnez %v13943_v23  ;;  %vm14028_vm8 = vcmp.gt.f32.partialorder %v13839_v16, %v13489_v13  ;;  %vm14031_vm13 = vcmp.eq.f32.partialorder %v13839_v16, %v13495_v30  ;;  %vm14032_vm10 = vcmp.gt.f32.partialorder %v13839_v16, %v13495_v30 }
 0x733   :  { %vm11565_vm0 = vmor %vm14028_vm8, %vm14027_vm12  ;;  %v14033_v15 = vmov 0  ;;  %vm14035_vm6 = vcmp.eq.f32.partialorder %v13839_v16, %v13496_v63  ;;  %vm14036_vm1 = vcmp.gt.f32.partialorder %v13839_v16, %v13496_v63  ;;  %v14037_v23 = vmov 0 }
 0x734   :  { %vm11575_vm5 = vmor %vm14032_vm10, %vm14031_vm13  ;;  %v5938_v44 = vmax.f32 %v5937_v52, %v5576_v14  ;;  %v5497_v2 = vsel %vm11329_vm9, %v5191_v29, -3.1887  ;;  %vm14039_vm10 = vnez %v13967_v12  ;;  %vm14040_vm13 = vnez %v13971_v3  ;;  %v5296_v52 = vpop.permute.xlu0 %5295 }
 0x735   :  { %v14034_v15 = vsel %vm11575_vm5, 4294967295, %v14033_v15  ;;  %vm11585_vm12 = vmor %vm14036_vm1, %vm14035_vm6  ;;  %v5498_v0 = vsel %vm14039_vm10, %v5191_v29, -3.1887  ;;  %v5499_v36 = vsel %vm14040_vm13, %v5191_v29, -3.1887  ;;  %vm14041_vm6 = vcmp.eq.f32.partialorder %v13908_v60, %v13496_v63 }
 0x736   :  { %v14038_v23 = vsel %vm11585_vm12, 4294967295, %v14037_v23  ;;  %vm14042_vm1 = vcmp.gt.f32.partialorder %v13908_v60, %v13496_v63  ;;  %vm14045_vm9 = vcmp.eq.f32.partialorder %v13839_v16, %v8669_v47  ;;  %vm14046_vm10 = vcmp.gt.f32.partialorder %v13839_v16, %v8669_v47  ;;  %v14146_v16 = vld [vmem:[#allocation63_spill] sm:$0xff] }
 0x737   :  { %vm11603_vm3 = vmor %vm14042_vm1, %vm14041_vm6  ;;  %v14047_v7 = vmov 0  ;;  %v5732_v12 = vmax.f32 %v5731_v49, %v5497_v2  ;;  %v5801_v3 = vmax.f32 %v5800_v1, %v5498_v0  ;;  %v5870_v34 = vmax.f32 %v5869_v6, %v5499_v36  ;;  %v14097_v2 = vld [vmem:[#allocation22_spill] sm:$0xff]  ;;  %v14098_v0 = vld [vmem:[#allocation55_spill] sm:$0xff] }
 0x738   :  { %vm11613_vm8 = vmor %vm14046_vm10, %vm14045_vm9  ;;  %vm14049_vm9 = vcmp.lt.s32.totalorder %v9580_v55, %v9491_v38  ;;  %vm14050_vm10 = vcmp.eq.f32.partialorder %v13949_v24, %v13489_v13  ;;  %vm14053_vm6 = vnez %v13977_v58  ;;  %vm14054_vm1 = vcmp.lt.s32.totalorder %v13956_v46, %v9933_v43 }
 0x739   :  { %v14048_v7 = vsel %vm11613_vm8, 4294967295, %v14047_v7  ;;  %vm11633_vm8 = vmand %vm14050_vm10, %vm14049_vm9  ;;  %v5500_v37 = vsel %vm14053_vm6, %v5191_v29, -3.1887  ;;  %vm14055_vm5 = vcmp.eq.f32.partialorder %v13955_v26, %v13496_v63  ;;  %vm14058_vm6 = vcmp.gt.f32.partialorder %v13884_v56, %v13489_v13 }
 0x73a   :  { %vm11645_vm13 = vmand %vm14055_vm5, %vm14054_vm1  ;;  %v5939_v58 = vmax.f32 %v5938_v44, %v5500_v37  ;;  %v5577_v46 = vsel %vm14058_vm6, %v5291_v51, -3.1887  ;;  %v5578_v4 = vsel %vm11456_vm14, %v5291_v51, -3.1887  ;;  %v5579_v35 = vsel %vm11512_vm15, %v5291_v51, -3.1887 }
 0x73b   :  { %vm14059_vm5 = vcmp.eq.f32.partialorder %v13908_v60, %v8669_v47  ;;  %vm14060_vm1 = vcmp.gt.f32.partialorder %v13908_v60, %v8669_v47  ;;  %v5733_v56 = vmax.f32 %v5732_v12, %v5577_v46  ;;  %v5802_v45 = vmax.f32 %v5801_v3, %v5578_v4  ;;  %v5196_v12 = vpop.permute.xlu1 %5195 }
 0x73c   :  { %vm11668_vm10 = vmor %vm14060_vm1, %vm14059_vm5  ;;  %v5871_v27 = vmax.f32 %v5870_v34, %v5579_v35  ;;  %v5580_v41 = vsel %vm11541_vm4, %v5291_v51, -3.1887  ;;  %vm14063_vm14 = vcmp.lt.s32.totalorder %v13983_v59, %v9933_v43  ;;  %vm14064_vm15 = vcmp.eq.f32.partialorder %v13982_v39, %v13496_v63  ;;  %v5301_v35 = vpop.permute.xlu0 %5300 }
 0x73d   :  { %vm11684_vm5 = vmand %vm14064_vm15, %vm14063_vm14  ;;  %vm14067_vm1 = vcmp.gt.f32.partialorder %v13885_v8, %v13489_v13  ;;  %v14068_v53 = vmov 0  ;;  %vm14070_vm4 = vcmp.eq.f32.partialorder %v13885_v8, %v13495_v30  ;;  %vm14071_vm6 = vcmp.gt.f32.partialorder %v13885_v8, %v13495_v30 }
 0x73e   :  { %vm11693_vm12 = vmor %vm14067_vm1, %vm11404_vm2  ;;  %vm14074_vm14 = vcmp.eq.f32.partialorder %v13885_v8, %v13496_v63  ;;  %vm14075_vm15 = vcmp.gt.f32.partialorder %v13885_v8, %v13496_v63  ;;  %v5940_v48 = vmax.f32 %v5939_v58, %v5580_v41  ;;  %v5562_v21 = vsel %vm11556_vm7, %v5271_v57, -3.1887 }
 0x73f   :  { %v14069_v53 = vsel %vm11693_vm12, 4294967295, %v14068_v53  ;;  %vm11703_vm9 = vmor %vm14071_vm6, %vm14070_vm4  ;;  %vm14078_vm6 = vcmp.gt.f32.partialorder %v13908_v60, %v13489_v13  ;;  %v5563_v19 = vsel %vm11603_vm3, %v5271_v57, -3.1887  ;;  %vm14079_vm4 = vcmp.gt.f32.partialorder %v13955_v26, %v13496_v63  ;;  %v14156_v60 = vld [vmem:[#allocation56_spill] sm:$0xff] }
 0x740   :  { %vm11713_vm2 = vmor %vm14075_vm15, %vm14074_vm14  ;;  %v5561_v10 = vsel %vm14078_vm6, %v5271_v57, -3.1887  ;;  %vm14082_vm15 = vcmp.eq.f32.partialorder %v13885_v8, %v8669_v47  ;;  %vm14083_vm6 = vcmp.gt.f32.partialorder %v13885_v8, %v8669_v47  ;;  %v5803_v28 = vmax.f32 %v5802_v45, %v5562_v21  ;;  %v5306_v8 = vpop.permute.xlu0 %5305 }
 0x741   :  { %vm11733_vm14 = vmor %vm14079_vm4, %vm11645_vm13  ;;  %v5734_v25 = vmax.f32 %v5733_v56, %v5561_v10  ;;  %v5872_v49 = vmax.f32 %v5871_v27, %v5563_v19  ;;  %v5564_v1 = vsel %vm11668_vm10, %v5271_v57, -3.1887  ;;  %vm14088_vm4 = vcmp.eq.f32.partialorder %v13955_v26, %v8669_v47  ;;  %v5201_v10 = vpop.permute.xlu1 %5200 }
 0x742   :  { %vm11743_vm7 = vmor %vm14083_vm6, %vm14082_vm15  ;;  %vm14089_vm15 = vcmp.gt.f32.partialorder %v13955_v26, %v8669_v47  ;;  %v5941_v6 = vmax.f32 %v5940_v48, %v5564_v1  ;;  %vm14092_vm12 = vcmp.gt.f32.partialorder %v13955_v26, %v13489_v13  ;;  %v5583_v61 = vsel %vm11733_vm14, %v5296_v52, -3.1887 }
 0x743   :  { %vm11759_vm6 = vmor %vm14089_vm15, %vm14088_vm4  ;;  %v5581_v14 = vsel %vm14092_vm12, %v5296_v52, -3.1887  ;;  %vm14093_vm4 = vcmp.gt.f32.partialorder %v13955_v26, %v13495_v30  ;;  %vm14094_vm15 = vcmp.gt.f32.partialorder %v13982_v39, %v13496_v63  ;;  %v5873_v51 = vmax.f32 %v5872_v49, %v5583_v61  ;;  %v14155_v61 = vld [vmem:[#allocation92_spill] sm:$0xff] }
 0x744   :  { %v5582_v29 = vsel %vm14093_vm4, %v5296_v52, -3.1887  ;;  %vm11784_vm1 = vmor %vm14094_vm15, %vm11684_vm5  ;;  %v5735_v26 = vmax.f32 %v5734_v25, %v5581_v14  ;;  %v5584_v31 = vsel %vm11759_vm6, %v5296_v52, -3.1887  ;;  %vm14099_vm14 = vcmp.lt.s32.totalorder %v14007_v62, %v9933_v43  ;;  %v14145_v52 = vld [vmem:[#allocation93_spill] sm:$0xff] }
 0x745   :  { %v5804_v36 = vmax.f32 %v5803_v28, %v5582_v29  ;;  %vm14100_vm5 = vcmp.eq.f32.partialorder %v14006_v54, %v13496_v63  ;;  %vm14103_vm15 = vcmp.gt.f32.partialorder %v13909_v42, %v13489_v13  ;;  %vm14106_vm6 = vcmp.eq.f32.partialorder %v13909_v42, %v13495_v30 }
 0x746   :  { %vm11800_vm4 = vmand %vm14100_vm5, %vm14099_vm14  ;;  %vm14107_vm12 = vcmp.gt.f32.partialorder %v13909_v42, %v13495_v30  ;;  %vm14110_vm14 = vcmp.eq.f32.partialorder %v13909_v42, %v13496_v63  ;;  %vm14111_vm5 = vcmp.gt.f32.partialorder %v13909_v42, %v13496_v63  ;;  %v14112_v40 = vmov 0 }
 0x747   :  { %vm11809_vm10 = vmor %vm14103_vm15, %vm11500_vm11  ;;  %v5942_v37 = vmax.f32 %v5941_v6, %v5584_v31  ;;  %v5501_v55 = vsel %vm11565_vm0, %v5196_v12, -3.1887  ;;  %vm14116_vm3 = vcmp.eq.f32.partialorder %v13982_v39, %v8669_v47  ;;  %vm14120_vm0 = vcmp.eq.f32.partialorder %v13909_v42, %v8669_v47 }
 0x748   :  { %vm11819_vm13 = vmor %vm14107_vm12, %vm14106_vm6  ;;  %vm14114_vm12 = vnez %v14034_v15  ;;  %vm14115_vm6 = vnez %v14038_v23  ;;  %v14122_v33 = vmov 0  ;;  %v5736_v15 = vmax.f32 %v5735_v26, %v5501_v55  ;;  %v5206_v55 = vpop.permute.xlu1 %5205 }
 0x749   :  { %vm11829_vm11 = vmor %vm14111_vm5, %vm14110_vm14  ;;  %v5502_v58 = vsel %vm14114_vm12, %v5196_v12, -3.1887  ;;  %v5503_v46 = vsel %vm14115_vm6, %v5196_v12, -3.1887  ;;  %vm14117_vm14 = vcmp.gt.f32.partialorder %v13982_v39, %v8669_v47  ;;  %vm14121_vm12 = vcmp.gt.f32.partialorder %v13909_v42, %v8669_v47 }
 0x74a   :  { %v14113_v40 = vsel %vm11829_vm11, 4294967295, %v14112_v40  ;;  %vm11847_vm5 = vmor %vm14117_vm14, %vm14116_vm3  ;;  %v5805_v23 = vmax.f32 %v5804_v36, %v5502_v58  ;;  %v5874_v17 = vmax.f32 %v5873_v51, %v5503_v46  ;;  %vm14124_vm14 = vnez %v14048_v7 }
 0x74b   :  { %vm11857_vm15 = vmor %vm14121_vm12, %vm14120_vm0  ;;  %v5504_v56 = vsel %vm14124_vm14, %v5196_v12, -3.1887  ;;  %vm14125_vm12 = vcmp.lt.s32.totalorder %v14023_v9, %v9933_v43  ;;  %vm14126_vm6 = vcmp.eq.f32.partialorder %v14022_v20, %v13496_v63  ;;  %vm14129_vm14 = vcmp.gt.f32.partialorder %v13982_v39, %v13489_v13 }
 0x74c   :  { %v14123_v33 = vsel %vm11857_vm15, 4294967295, %v14122_v33  ;;  %vm11877_vm15 = vmand %vm14126_vm6, %vm14125_vm12  ;;  %v5943_v7 = vmax.f32 %v5942_v37, %v5504_v56  ;;  %v5585_v45 = vsel %vm14129_vm14, %v5301_v35, -3.1887  ;;  %vm14130_vm0 = vcmp.gt.f32.partialorder %v13982_v39, %v13495_v30 }
 0x74d   :  { %v5586_v27 = vsel %vm14130_vm0, %v5301_v35, -3.1887  ;;  %v5587_v9 = vsel %vm11784_vm1, %v5301_v35, -3.1887  ;;  %vm14131_vm6 = vcmp.gt.f32.partialorder %v14006_v54, %v13496_v63  ;;  %v5737_v39 = vmax.f32 %v5736_v15, %v5585_v45  ;;  %v5311_v15 = vpop.permute.xlu0 %5310  ;;  %v14183_v45 = vld [vmem:[#allocation67_spill] sm:$0xff] }
 0x74e   :  { %vm11896_vm12 = vmor %vm14131_vm6, %vm11800_vm4  ;;  %v5806_v57 = vmax.f32 %v5805_v23, %v5586_v27  ;;  %v5875_v11 = vmax.f32 %v5874_v17, %v5587_v9  ;;  %v5588_v48 = vsel %vm11847_vm5, %v5301_v35, -3.1887  ;;  %vm14134_vm1 = vcmp.eq.f32.partialorder %v14006_v54, %v8669_v47 }
 0x74f   :  { %vm14135_vm4 = vcmp.gt.f32.partialorder %v14006_v54, %v8669_v47  ;;  %vm14138_vm6 = vcmp.gt.f32.partialorder %v13949_v24, %v13489_v13  ;;  %vm14141_vm5 = vcmp.eq.f32.partialorder %v13949_v24, %v13495_v30  ;;  %vm14142_vm14 = vcmp.gt.f32.partialorder %v13949_v24, %v13495_v30 }
 0x750   :  { %vm11912_vm0 = vmor %vm14135_vm4, %vm14134_vm1  ;;  %v5944_v25 = vmax.f32 %v5943_v7, %v5588_v48  ;;  %v5506_v49 = vsel %vm11703_vm9, %v5201_v10, -3.1887  ;;  %v5507_v1 = vsel %vm11713_vm2, %v5201_v10, -3.1887  ;;  %v5508_v14 = vsel %vm11743_vm7, %v5201_v10, -3.1887 }
 0x751   :  { %vm11921_vm3 = vmor %vm14138_vm6, %vm11633_vm8  ;;  %vm14147_vm8 = vnez %v14069_v53  ;;  %v5807_v59 = vmax.f32 %v5806_v57, %v5506_v49  ;;  %v5876_v18 = vmax.f32 %v5875_v11, %v5507_v1  ;;  %vm14151_vm9 = vcmp.eq.f32.partialorder %v14022_v20, %v8669_v47  ;;  %v14182_v7 = vld [vmem:[#allocation95_spill] sm:$0xff] }
 0x752   :  { %vm11931_vm11 = vmor %vm14142_vm14, %vm14141_vm5  ;;  %v5505_v28 = vsel %vm14147_vm8, %v5201_v10, -3.1887  ;;  %vm14148_vm14 = vcmp.gt.f32.partialorder %v14022_v20, %v13496_v63  ;;  %vm14152_vm2 = vcmp.gt.f32.partialorder %v14022_v20, %v8669_v47  ;;  %v5945_v44 = vmax.f32 %v5944_v25, %v5508_v14  ;;  %v5316_v25 = vpop.permute.xlu0 %5315 }
 0x753   :  { %vm11950_vm6 = vmor %vm14148_vm14, %vm11877_vm15  ;;  %v5738_v53 = vmax.f32 %v5737_v39, %v5505_v28  ;;  %vm3997_vm14 = vcmp.gt.f32.partialorder %v14086_v22, %v13489_v13  ;;  %vm14157_vm1 = vcmp.gt.f32.partialorder %v14006_v54, %v13489_v13  ;;  %v5591_v51 = vsel %vm11896_vm12, %v5306_v8, -3.1887  ;;  %v5211_v39 = vpop.permute.xlu1 %5210 }
 0x754   :  { %vm11966_vm15 = vmor %vm14152_vm2, %vm14151_vm9  ;;  %v5589_v26 = vsel %vm14157_vm1, %v5306_v8, -3.1887  ;;  %vm14158_vm9 = vcmp.gt.f32.partialorder %v14006_v54, %v13495_v30  ;;  %vm14159_vm2 = vcmp.eq.f32.partialorder %v13949_v24, %v13496_v63  ;;  %vm14160_vm8 = vcmp.gt.f32.partialorder %v13949_v24, %v13496_v63 }
 0x755   :  { %v5590_v36 = vsel %vm14158_vm9, %v5306_v8, -3.1887  ;;  %vm11992_vm4 = vmor %vm14160_vm8, %vm14159_vm2  ;;  %v5739_v12 = vmax.f32 %v5738_v53, %v5589_v26  ;;  %v5877_v54 = vmax.f32 %v5876_v18, %v5591_v51  ;;  %v5592_v37 = vsel %vm11912_vm0, %v5306_v8, -3.1887 }
 0x756   :  { %v5808_v3 = vmax.f32 %v5807_v59, %v5590_v36  ;;  %vm14163_vm12 = vcmp.lt.s32.totalorder %v14087_v50, %v9933_v43  ;;  %vm14164_vm9 = vcmp.eq.f32.partialorder %v14086_v22, %v13496_v63  ;;  %v5946_v46 = vmax.f32 %v5945_v44, %v5592_v37 }
 0x757   :  { %vm12006_vm8 = vmand %vm14164_vm9, %vm14163_vm12  ;;  %v5509_v50 = vsel %vm11809_vm10, %v5206_v55, -3.1887  ;;  %v5510_v4 = vsel %vm11819_vm13, %v5206_v55, -3.1887  ;;  %vm14167_vm12 = vnez %v14113_v40  ;;  %vm14168_vm9 = vcmp.eq.f32.partialorder %v13949_v24, %v8669_v47 }
 0x758   :  { %v5511_v35 = vsel %vm14167_vm12, %v5206_v55, -3.1887  ;;  %vm14169_vm1 = vcmp.gt.f32.partialorder %v13949_v24, %v8669_v47  ;;  %v5740_v34 = vmax.f32 %v5739_v12, %v5509_v50  ;;  %v5809_v62 = vmax.f32 %v5808_v3, %v5510_v4  ;;  %v5321_v3 = vpop.permute.xlu0 %5320 }
 0x759   :  { %vm12028_vm7 = vmor %vm14169_vm1, %vm14168_vm9  ;;  %v5878_v17 = vmax.f32 %v5877_v54, %v5511_v35  ;;  %vm14172_vm13 = vnez %v14123_v33  ;;  %vm14173_vm12 = vcmp.lt.s32.totalorder %v14098_v0, %v9518_v5  ;;  %vm14174_vm0 = vcmp.eq.f32.partialorder %v14097_v2, %v13495_v30  ;;  %v14210_v35 = vld [vmem:[#allocation94_spill] sm:$0xff] }
 0x75a   :  { %v5512_v40 = vsel %vm14172_vm13, %v5206_v55, -3.1887  ;;  %vm12042_vm2 = vmand %vm14174_vm0, %vm14173_vm12  ;;  %vm4001_vm1 = vcmp.gt.f32.partialorder %v14145_v52, %v13489_v13  ;;  %vm4002_vm9 = vcmp.gt.f32.partialorder %v14145_v52, %v13495_v30  ;;  %vm14177_vm5 = vcmp.gt.f32.partialorder %v14022_v20, %v13489_v13  ;;  %v14234_v54 = vld [vmem:[#allocation98_spill] sm:$0xff] }
 0x75b   :  { %v5947_v5 = vmax.f32 %v5946_v46, %v5512_v40  ;;  %v5593_v0 = vsel %vm14177_vm5, %v5311_v15, -3.1887  ;;  %vm14178_vm0 = vcmp.gt.f32.partialorder %v14022_v20, %v13495_v30  ;;  %v5595_v56 = vsel %vm11950_vm6, %v5311_v15, -3.1887 }
 0x75c   :  { %v5594_v33 = vsel %vm14178_vm0, %v5311_v15, -3.1887  ;;  %vm14179_vm12 = vcmp.gt.f32.partialorder %v14086_v22, %v13496_v63  ;;  %vm4267_vm13 = vcmp.eq.f32.partialorder %v14182_v7, %v13496_v63  ;;  %vm4523_vm5 = vcmp.lt.s32.totalorder %v14183_v45, %v9933_v43  ;;  %v14221_v45 = vld [vmem:[#allocation97_spill] sm:$0xff] }
 0x75d   :  { %vm12067_vm10 = vmor %vm14179_vm12, %vm12006_vm8  ;;  %v5741_v20 = vmax.f32 %v5740_v34, %v5593_v0  ;;  %v5810_v27 = vmax.f32 %v5809_v62, %v5594_v33  ;;  %v5879_v9 = vmax.f32 %v5878_v17, %v5595_v56  ;;  %v5596_v41 = vsel %vm11966_vm15, %v5311_v15, -3.1887  ;;  %v14211_v17 = vld [vmem:[#allocation121_spill] sm:$0xff] }
 0x75e   :  { %vm14184_vm6 = vcmp.eq.f32.partialorder %v14086_v22, %v8669_v47  ;;  %vm14185_vm8 = vcmp.gt.f32.partialorder %v14086_v22, %v8669_v47  ;;  %v5948_v11 = vmax.f32 %v5947_v5, %v5596_v41  ;;  %v5513_v48 = vsel %vm11921_vm3, %v5211_v39, -3.1887  ;;  %5340 = vperm.xlu1 %6627, %v14211_v17   ;;  %v5326_v5 = vpop.permute.xlu0 %5325  ;;  %v14219_v0 = vld [vmem:[#allocation65_spill] sm:$0xff] }
 0x75f   :  { %vm12083_vm0 = vmor %vm14185_vm8, %vm14184_vm6  ;;  %v5514_v10 = vsel %vm11931_vm11, %v5211_v39, -3.1887  ;;  %v5515_v21 = vsel %vm11992_vm4, %v5211_v39, -3.1887  ;;  %vm14188_vm15 = vcmp.gt.f32.partialorder %v14097_v2, %v13495_v30  ;;  %vm4005_vm6 = vcmp.gt.f32.partialorder %v14155_v61, %v13489_v13  ;;  %v14220_v33 = vld [vmem:[#allocation41_spill] sm:$0xff] }
 0x760   :  { %vm12098_vm12 = vmor %vm14188_vm15, %vm12042_vm2  ;;  %vm4006_vm3 = vcmp.gt.f32.partialorder %v14155_v61, %v13495_v30  ;;  %v5742_v19 = vmax.f32 %v5741_v20, %v5513_v48  ;;  %v5811_v32 = vmax.f32 %v5810_v27, %v5514_v10  ;;  %v5880_v49 = vmax.f32 %v5879_v9, %v5515_v21  ;;  %v14222_v41 = vld [vmem:[#allocation57_spill] sm:$0xff] }
 0x761   :  { %v5516_v1 = vsel %vm12028_vm7, %v5211_v39, -3.1887  ;;  %vm14191_vm11 = vcmp.eq.f32.partialorder %v14097_v2, %v13496_v63  ;;  %vm14192_vm4 = vcmp.gt.f32.partialorder %v14097_v2, %v13496_v63  ;;  %v5597_v53 = vsel %vm3997_vm14, %v5316_v25, -3.1887 }
 0x762   :  { %vm12114_vm2 = vmor %vm14192_vm4, %vm14191_vm11  ;;  %v5949_v6 = vmax.f32 %v5948_v11, %v5516_v1  ;;  %vm14195_vm8 = vcmp.gt.f32.partialorder %v14086_v22, %v13495_v30  ;;  %v5599_v18 = vsel %vm12067_vm10, %v5316_v25, -3.1887  ;;  %vm14196_vm7 = vcmp.lt.s32.totalorder %v14146_v16, %v9933_v43  ;;  %v5281_v16 = vpop.permute.xlu1 %5280  ;;  %v5331_v48 = vpop.permute.xlu0 %5330 }
 0x763   :  { %v5598_v59 = vsel %vm14195_vm8, %v5316_v25, -3.1887  ;;  %vm14197_vm15 = vcmp.eq.f32.partialorder %v14145_v52, %v13496_v63  ;;  %v5743_v29 = vmax.f32 %v5742_v19, %v5597_v53  ;;  %v5881_v26 = vmax.f32 %v5880_v49, %v5599_v18 }
 0x764   :  { %vm12132_vm11 = vmand %vm14197_vm15, %vm14196_vm7  ;;  %v5812_v44 = vmax.f32 %v5811_v32, %v5598_v59  ;;  %v5600_v22 = vsel %vm12083_vm0, %v5316_v25, -3.1887  ;;  %vm14200_vm14 = vcmp.eq.f32.partialorder %v14097_v2, %v8669_v47  ;;  %vm14201_vm10 = vcmp.gt.f32.partialorder %v14097_v2, %v8669_v47  ;;  %v14225_v59 = vld [vmem:[#allocation24_spill] sm:$0xff] }
 0x765   :  { %vm4996_vm4 = vmor %vm14201_vm10, %vm14200_vm14  ;;  %v5950_v36 = vmax.f32 %v5949_v6, %v5600_v22  ;;  %vm14202_vm8 = vcmp.gt.f32.partialorder %v14097_v2, %v13489_v13  ;;  %v5570_v31 = vsel %vm12098_vm12, %v5281_v16, -3.1887  ;;  %v5571_v12 = vsel %vm12114_vm2, %v5281_v16, -3.1887 }
 0x766   :  { %v5569_v51 = vsel %vm14202_vm8, %v5281_v16, -3.1887  ;;  %vm14203_vm0 = vcmp.lt.s32.totalorder %v14156_v60, %v9933_v43  ;;  %vm14204_vm7 = vcmp.eq.f32.partialorder %v14155_v61, %v13496_v63  ;;  %v5813_v2 = vmax.f32 %v5812_v44, %v5570_v31  ;;  %v5336_v6 = vpop.permute.xlu0 %5335 }
 0x767   :  { %vm12157_vm15 = vmand %vm14204_vm7, %vm14203_vm0  ;;  %v5744_v37 = vmax.f32 %v5743_v29, %v5569_v51  ;;  %v5882_v55 = vmax.f32 %v5881_v26, %v5571_v12  ;;  %v5572_v58 = vsel %vm4996_vm4, %v5281_v16, -3.1887  ;;  %vm14207_vm12 = vcmp.gt.f32.partialorder %v14145_v52, %v13496_v63 }
 0x768   :  { %vm5027_vm2 = vmor %vm14207_vm12, %vm12132_vm11  ;;  %v5951_v46 = vmax.f32 %v5950_v36, %v5572_v58  ;;  %vm14208_vm14 = vcmp.eq.f32.partialorder %v14145_v52, %v8669_v47  ;;  %vm14209_vm10 = vcmp.gt.f32.partialorder %v14145_v52, %v8669_v47  ;;  %v5601_v60 = vsel %vm4001_vm1, %v5321_v3, -3.1887 }
 0x769   :  { %vm5028_vm8 = vmor %vm14209_vm10, %vm14208_vm14  ;;  %v5602_v50 = vsel %vm4002_vm9, %v5321_v3, -3.1887  ;;  %v5603_v4 = vsel %vm5027_vm2, %v5321_v3, -3.1887  ;;  %vm4015_vm11 = vcmp.gt.f32.partialorder %v14210_v35, %v13496_v63  ;;  %v5745_v15 = vmax.f32 %v5744_v37, %v5601_v60 }
 0x76a   :  { %v5814_v23 = vmax.f32 %v5813_v2, %v5602_v50  ;;  %v5883_v34 = vmax.f32 %v5882_v55, %v5603_v4  ;;  %v5604_v62 = vsel %vm5028_vm8, %v5321_v3, -3.1887  ;;  %vm14212_vm4 = vcmp.gt.f32.partialorder %v14155_v61, %v13496_v63  ;;  %vm4779_vm14 = vmand %vm4267_vm13, %vm4523_vm5  ;;  %v5346_v36 = vpop.permute.xlu0 %5345 }
 0x76b   :  { %vm12186_vm1 = vmor %vm14212_vm4, %vm12157_vm15  ;;  %v5952_v52 = vmax.f32 %v5951_v46, %v5604_v62  ;;  %vm14215_vm9 = vcmp.eq.f32.partialorder %v14155_v61, %v8669_v47  ;;  %vm14216_vm0 = vcmp.gt.f32.partialorder %v14155_v61, %v8669_v47  ;;  %vm4271_vm12 = vcmp.eq.f32.partialorder %v14210_v35, %v13496_v63 }
 0x76c   :  { %vm12196_vm7 = vmor %vm14216_vm0, %vm14215_vm9  ;;  %vm4527_vm15 = vcmp.lt.s32.totalorder %v14219_v0, %v9933_v43  ;;  %v3816_v56 = vadd.s32 344, %v14220_v33  ;;  %v5605_v42 = vsel %vm4005_vm6, %v5326_v5, -3.1887  ;;  %v5606_v20 = vsel %vm4006_vm3, %v5326_v5, -3.1887 }
 0x76d   :  { %v5607_v27 = vsel %vm12186_vm1, %v5326_v5, -3.1887  ;;  %vm4011_vm2 = vcmp.gt.f32.partialorder %v14182_v7, %v13496_v63  ;;  %v5608_v9 = vsel %vm12196_vm7, %v5326_v5, -3.1887  ;;  %vm4012_vm6 = vcmp.gt.f32.partialorder %v14182_v7, %v8669_v47  ;;  %vm4783_vm9 = vmand %vm4271_vm12, %vm4527_vm15 }
 0x76e   :  { %vm4268_vm3 = vcmp.eq.f32.partialorder %v14182_v7, %v8669_v47  ;;  %v12228_v61 = vadd.s32 352, %v14220_v33  ;;  %vm4009_vm10 = vcmp.gt.f32.partialorder %v14182_v7, %v13489_v13  ;;  %vm4010_vm8 = vcmp.gt.f32.partialorder %v14182_v7, %v13495_v30  ;;  %vm5035_vm4 = vmor %vm4011_vm2, %vm4779_vm14 }
 0x76f   :  { %vm4279_vm13 = vcmp.eq.f32.partialorder %v14221_v45, %v13496_v63  ;;  %vm4535_vm5 = vcmp.lt.s32.totalorder %v14222_v41, %v9933_v43  ;;  %v5746_v39 = vmax.f32 %v5745_v15, %v5605_v42  ;;  %v5815_v57 = vmax.f32 %v5814_v23, %v5606_v20  ;;  %vm5036_vm1 = vmor %vm4012_vm6, %vm4268_vm3  ;;  %v5351_v15 = vpop.permute.xlu0 %5350  ;;  %v14237_v23 = vld [vmem:[#allocation99_spill] sm:$0xff]  ;;  %v14240_v41 = vld [vmem:[#allocation100_spill] sm:$0xff] }
 0x770   :  { %v5884_v11 = vmax.f32 %v5883_v34, %v5607_v27  ;;  %v12239_v10 = vadd.s32 360, %v14220_v33  ;;  %v5953_v21 = vmax.f32 %v5952_v52, %v5608_v9  ;;  %v5609_v25 = vsel %vm4009_vm10, %v5331_v48, -3.1887  ;;  %vm4791_vm3 = vmand %vm4279_vm13, %vm4535_vm5  ;;  %v14242_v42 = vld [vmem:[#allocation96_spill] sm:$0xff] }
 0x771   :  { %v5610_v28 = vsel %vm4010_vm8, %v5331_v48, -3.1887  ;;  %v5611_v19 = vsel %vm5035_vm4, %v5331_v48, -3.1887  ;;  %v5747_v7 = vmax.f32 %v5746_v39, %v5609_v25  ;;  %v5612_v1 = vsel %vm5036_vm1, %v5331_v48, -3.1887  ;;  %vm12270_vm10 = vmor %vm4015_vm11, %vm4783_vm9 }
 0x772   :  { %v5816_v32 = vmax.f32 %v5815_v57, %v5610_v28  ;;  %v5885_v49 = vmax.f32 %v5884_v11, %v5611_v19  ;;  %v5954_v8 = vmax.f32 %v5953_v21, %v5612_v1  ;;  %vm4013_vm0 = vcmp.gt.f32.partialorder %v14210_v35, %v13489_v13 }
 0x773   :  { %vm4016_vm7 = vcmp.gt.f32.partialorder %v14210_v35, %v8669_v47  ;;  %vm4272_vm2 = vcmp.eq.f32.partialorder %v14210_v35, %v8669_v47  ;;  %vm4014_vm14 = vcmp.gt.f32.partialorder %v14210_v35, %v13495_v30  ;;  %vm4023_vm15 = vcmp.gt.f32.partialorder %v14221_v45, %v13496_v63  ;;  %v5356_v27 = vpop.permute.xlu0 %5355 }
 0x774   :  { %vm4024_vm8 = vcmp.gt.f32.partialorder %v14221_v45, %v8669_v47  ;;  %vm4280_vm4 = vcmp.eq.f32.partialorder %v14221_v45, %v8669_v47  ;;  %vm4283_vm1 = vcmp.eq.f32.partialorder %v14225_v59, %v13496_v63  ;;  %vm4539_vm12 = vcmp.lt.s32.totalorder %v3816_v56, %v9933_v43  ;;  %vm12281_vm6 = vmor %vm4016_vm7, %vm4272_vm2 }
 0x775   :  { %vm4025_vm11 = vcmp.gt.f32.partialorder %v14225_v59, %v13489_v13  ;;  %vm4543_vm13 = vcmp.lt.s32.totalorder %v12228_v61, %v9933_v43  ;;  %vm4547_vm5 = vcmp.lt.s32.totalorder %v12239_v10, %v9933_v43  ;;  %v12292_v14 = vadd.s32 368, %v14220_v33  ;;  %vm12305_vm9 = vmor %vm4023_vm15, %vm4791_vm3 }
 0x776   :  { %v5613_v29 = vsel %vm4013_vm0, %v5336_v6, -3.1887  ;;  %v5614_v44 = vsel %vm4014_vm14, %v5336_v6, -3.1887  ;;  %v5615_v26 = vsel %vm12270_vm10, %v5336_v6, -3.1887  ;;  %vm4026_vm7 = vcmp.gt.f32.partialorder %v14225_v59, %v13495_v30  ;;  %vm4795_vm15 = vmand %vm4283_vm1, %vm4539_vm12 }
 0x777   :  { %v5616_v16 = vsel %vm12281_vm6, %v5336_v6, -3.1887  ;;  %vm4027_vm0 = vcmp.gt.f32.partialorder %v14225_v59, %v13496_v63  ;;  %vm4028_vm2 = vcmp.gt.f32.partialorder %v14225_v59, %v8669_v47  ;;  %vm4284_vm14 = vcmp.eq.f32.partialorder %v14225_v59, %v8669_v47  ;;  %vm12330_vm6 = vmor %vm4024_vm8, %vm4280_vm4  ;;  %v5361_v21 = vpop.permute.xlu0 %5360 }
 0x778   :  { %vm14232_vm3 = vcmp.gt.f32.partialorder %v14221_v45, %v13489_v13  ;;  %vm14233_vm10 = vcmp.gt.f32.partialorder %v14221_v45, %v13495_v30  ;;  %v5623_v3 = vsel %vm12305_vm9, %v5346_v36, -3.1887  ;;  %vm4287_vm12 = vcmp.eq.f32.partialorder %v14234_v54, %v13496_v63  ;;  %vm12346_vm8 = vmor %vm4027_vm0, %vm4795_vm15 }
 0x779   :  { %v5621_v31 = vsel %vm14232_vm3, %v5346_v36, -3.1887  ;;  %v5622_v12 = vsel %vm14233_vm10, %v5346_v36, -3.1887  ;;  %v5748_v37 = vmax.f32 %v5747_v7, %v5613_v29  ;;  %v5817_v2 = vmax.f32 %v5816_v32, %v5614_v44  ;;  %vm4799_vm0 = vmand %vm4287_vm12, %vm4543_vm13  ;;  %v14241_v7 = vld [vmem:[#allocation29_spill] sm:$0xff] }
 0x77a   :  { %v5886_v55 = vmax.f32 %v5885_v49, %v5615_v26  ;;  %v5624_v58 = vsel %vm12330_vm6, %v5346_v36, -3.1887  ;;  %v5955_v46 = vmax.f32 %v5954_v8, %v5616_v16  ;;  %vm4031_vm4 = vcmp.gt.f32.partialorder %v14234_v54, %v13496_v63  ;;  %vm5052_vm6 = vmor %vm4028_vm2, %vm4284_vm14 }
 0x77b   :  { %vm4032_vm1 = vcmp.gt.f32.partialorder %v14234_v54, %v8669_v47  ;;  %vm4288_vm9 = vcmp.eq.f32.partialorder %v14234_v54, %v8669_v47  ;;  %v5749_v50 = vmax.f32 %v5748_v37, %v5621_v31  ;;  %v5818_v4 = vmax.f32 %v5817_v2, %v5622_v12  ;;  %vm12380_vm2 = vmor %vm4031_vm4, %vm4799_vm0  ;;  %v5366_v53 = vpop.permute.xlu0 %5365 }
 0x77c   :  { %v5887_v35 = vmax.f32 %v5886_v55, %v5623_v3  ;;  %vm4291_vm15 = vcmp.eq.f32.partialorder %v14237_v23, %v13496_v63  ;;  %v5956_v34 = vmax.f32 %v5955_v46, %v5624_v58  ;;  %v5625_v62 = vsel %vm4025_vm11, %v5351_v15, -3.1887  ;;  %v3751_v58 = vpop.trf.xlu1 }
 0x77d   :  { %v5626_v17 = vsel %vm4026_vm7, %v5351_v15, -3.1887  ;;  %v5627_v40 = vsel %vm12346_vm8, %v5351_v15, -3.1887  ;;  %v5750_v52 = vmax.f32 %v5749_v50, %v5625_v62  ;;  %v5628_v0 = vsel %vm5052_vm6, %v5351_v15, -3.1887  ;;  %vm4803_vm12 = vmand %vm4291_vm15, %vm4547_vm5  ;;  %5375 = vperm.xlu0 %6626, %v3751_v58  }
 0x77e   :  { %v5819_v24 = vmax.f32 %v5818_v4, %v5626_v17  ;;  %v5888_v5 = vmax.f32 %v5887_v35, %v5627_v40  ;;  %v5957_v56 = vmax.f32 %v5956_v34, %v5628_v0  ;;  %vm4029_vm13 = vcmp.gt.f32.partialorder %v14234_v54, %v13489_v13  ;;  %vm5056_vm8 = vmor %vm4032_vm1, %vm4288_vm9 }
 0x77f   :  { %vm4551_vm11 = vcmp.lt.s32.totalorder %v12292_v14, %v9933_v43  ;;  %v3820_v20 = vadd.s32 376, %v14220_v33  ;;  %vm4030_vm7 = vcmp.gt.f32.partialorder %v14234_v54, %v13495_v30  ;;  %vm4035_vm14 = vcmp.gt.f32.partialorder %v14237_v23, %v13496_v63  ;;  %v5371_v36 = vpop.permute.xlu0 %5370 }
 0x780   :  { %vm4036_vm3 = vcmp.gt.f32.partialorder %v14237_v23, %v8669_v47  ;;  %vm4292_vm10 = vcmp.eq.f32.partialorder %v14237_v23, %v8669_v47  ;;  %v5629_v9 = vsel %vm4029_vm13, %v5356_v27, -3.1887  ;;  %v5630_v61 = vsel %vm4030_vm7, %v5356_v27, -3.1887  ;;  %vm5059_vm1 = vmor %vm4035_vm14, %vm4803_vm12  ;;  %v3752_v46 = vpop.trf.xlu1 }
 0x781   :  { %v5631_v45 = vsel %vm12380_vm2, %v5356_v27, -3.1887  ;;  %vm4295_vm4 = vcmp.eq.f32.partialorder %v14240_v41, %v13496_v63  ;;  %v5751_v39 = vmax.f32 %v5750_v52, %v5629_v9  ;;  %v5820_v57 = vmax.f32 %v5819_v24, %v5630_v61  ;;  %vm5060_vm7 = vmor %vm4036_vm3, %vm4292_vm10  ;;  %5380 = vperm.xlu0 %6626, %v3752_v46  }
 0x782   :  { %v5889_v11 = vmax.f32 %v5888_v5, %v5631_v45  ;;  %v5632_v48 = vsel %vm5056_vm8, %v5356_v27, -3.1887  ;;  %vm4033_vm5 = vcmp.gt.f32.partialorder %v14237_v23, %v13489_v13  ;;  %vm4555_vm9 = vcmp.lt.s32.totalorder %v3820_v20, %v9933_v43  ;;  %vm4807_vm2 = vmand %vm4295_vm4, %vm4551_vm11 }
 0x783   :  { %v5958_v10 = vmax.f32 %v5957_v56, %v5632_v48  ;;  %vm4034_vm0 = vcmp.gt.f32.partialorder %v14237_v23, %v13495_v30  ;;  %vm4039_vm15 = vcmp.gt.f32.partialorder %v14240_v41, %v13496_v63  ;;  %vm4040_vm6 = vcmp.gt.f32.partialorder %v14240_v41, %v8669_v47 }
 0x784   :  { %vm4296_vm13 = vcmp.eq.f32.partialorder %v14240_v41, %v8669_v47  ;;  %v5633_v25 = vsel %vm4033_vm5, %v5361_v21, -3.1887  ;;  %v5634_v28 = vsel %vm4034_vm0, %v5361_v21, -3.1887  ;;  %v5635_v19 = vsel %vm5059_vm1, %v5361_v21, -3.1887  ;;  %vm5063_vm12 = vmor %vm4039_vm15, %vm4807_vm2  ;;  %v3753_v60 = vpop.trf.xlu1 }
 0x785   :  { %vm4299_vm14 = vcmp.eq.f32.partialorder %v14241_v7, %v13496_v63  ;;  %v5752_v32 = vmax.f32 %v5751_v39, %v5633_v25  ;;  %v5821_v49 = vmax.f32 %v5820_v57, %v5634_v28  ;;  %v5890_v1 = vmax.f32 %v5889_v11, %v5635_v19  ;;  %vm5064_vm3 = vmor %vm4040_vm6, %vm4296_vm13  ;;  %5385 = vperm.xlu0 %6626, %v3753_v60   ;;  %v14244_v25 = vld [vmem:[#allocation37_spill] sm:$0xff] }
 0x786   :  { %v5636_v8 = vsel %vm5060_vm7, %v5361_v21, -3.1887  ;;  %vm4037_vm11 = vcmp.gt.f32.partialorder %v14240_v41, %v13489_v13  ;;  %vm4038_vm8 = vcmp.gt.f32.partialorder %v14240_v41, %v13495_v30  ;;  %vm4043_vm10 = vcmp.gt.f32.partialorder %v14241_v7, %v13496_v63  ;;  %vm4811_vm1 = vmand %vm4299_vm14, %vm4555_vm9 }
 0x787   :  { %v5959_v6 = vmax.f32 %v5958_v10, %v5636_v8  ;;  %vm4044_vm4 = vcmp.gt.f32.partialorder %v14241_v7, %v8669_v47  ;;  %v5637_v59 = vsel %vm4037_vm11, %v5366_v53, -3.1887  ;;  %v5638_v18 = vsel %vm4038_vm8, %v5366_v53, -3.1887  ;;  %vm5067_vm6 = vmor %vm4043_vm10, %vm4811_vm1  ;;  %v14243_v10 = vld [vmem:[#allocation35_spill] sm:$0xff] }
 0x788   :  { %v5639_v14 = vsel %vm5063_vm12, %v5366_v53, -3.1887  ;;  %vm4300_vm5 = vcmp.eq.f32.partialorder %v14241_v7, %v8669_v47  ;;  %v5753_v29 = vmax.f32 %v5752_v32, %v5637_v59  ;;  %v5822_v44 = vmax.f32 %v5821_v49, %v5638_v18  ;;  %v3754_v50 = vpop.trf.xlu1  ;;  %v14245_v59 = vld [vmem:[#allocation39_spill] sm:$0xff] }
 0x789   :  { %v5891_v26 = vmax.f32 %v5890_v1, %v5639_v14  ;;  %v5640_v22 = vsel %vm5064_vm3, %v5366_v53, -3.1887  ;;  %vm4041_vm0 = vcmp.gt.f32.partialorder %v14241_v7, %v13489_v13  ;;  %vm4042_vm15 = vcmp.gt.f32.partialorder %v14241_v7, %v13495_v30  ;;  %vm5068_vm13 = vmor %vm4044_vm4, %vm4300_vm5  ;;  %5390 = vperm.xlu0 %6626, %v3754_v50  }
 0x78a   :  { %v5960_v16 = vmax.f32 %v5959_v6, %v5640_v22  ;;  %v5641_v51 = vsel %vm4041_vm0, %v5371_v36, -3.1887  ;;  %v5642_v31 = vsel %vm4042_vm15, %v5371_v36, -3.1887  ;;  %v5643_v12 = vsel %vm5067_vm6, %v5371_v36, -3.1887 }
 0x78b   :  { %v12464_v3 = vmax.f32 %v5753_v29, %v5641_v51  ;;  %v12466_v54 = vmax.f32 %v5822_v44, %v5642_v31  ;;  %v5892_v37 = vmax.f32 %v5891_v26, %v5643_v12  ;;  %v5644_v2 = vsel %vm5068_vm13, %v5371_v36, -3.1887  ;;  %v14248_v51 = vld [vmem:[#allocation141_spill] sm:$0xff] }
 0x78c   :  { %v5961_v55 = vmax.f32 %v5960_v16, %v5644_v2  ;;  %v3755_v4 = vpop.trf.xlu1  ;;  %v3814_v56 = vadd.s32 328, %v14220_v33  ;;  %vm4275_vm9 = vcmp.eq.f32.partialorder %v14242_v42, %v13496_v63  ;;  %vm4019_vm7 = vcmp.gt.f32.partialorder %v14242_v42, %v13496_v63 }
 0x78d   :  { %5395 = vperm.xlu0 %6626, %v3755_v4   ;;  %vm4020_vm12 = vcmp.gt.f32.partialorder %v14242_v42, %v8669_v47  ;;  %vm4276_vm11 = vcmp.eq.f32.partialorder %v14242_v42, %v8669_v47  ;;  %vm4017_vm8 = vcmp.gt.f32.partialorder %v14242_v42, %v13489_v13  ;;  %vm4018_vm3 = vcmp.gt.f32.partialorder %v14242_v42, %v13495_v30 }
 0x78e   :  { %vm4531_vm2 = vcmp.lt.s32.totalorder %v3814_v56, %v9933_v43  ;;  %vm5044_vm4 = vmor %vm4020_vm12, %vm4276_vm11  ;;  %v12485_v11 = vadd.s32 384, %v9491_v38  ;;  %v3821_v48 = vadd.s32 384, %v14220_v33  ;;  %vm4304_vm5 = vcmp.eq.f32.partialorder %v14243_v10, %v8669_v47 }
 0x78f   :  { %vm4787_vm14 = vmand %vm4275_vm9, %vm4531_vm2  ;;  %v3822_v21 = vadd.s32 392, %v14220_v33  ;;  %vm4048_vm0 = vcmp.gt.f32.partialorder %v14243_v10, %v8669_v47  ;;  %vm4308_vm6 = vcmp.eq.f32.partialorder %v14244_v25, %v8669_v47  ;;  %v3823_v38 = vadd.s32 400, %v14220_v33 }
 0x790   :  { %v3756_v35 = vpop.trf.xlu1  ;;  %vm5043_vm10 = vmor %vm4019_vm7, %vm4787_vm14  ;;  %vm4560_vm1 = vcmp.lt.s32.totalorder %v3821_v48, %v12485_v11  ;;  %vm4045_vm9 = vcmp.gt.f32.partialorder %v14243_v10, %v13489_v13  ;;  %vm4046_vm2 = vcmp.gt.f32.partialorder %v14243_v10, %v13495_v30  ;;  %vm4047_vm7 = vcmp.gt.f32.partialorder %v14243_v10, %v13496_v63 }
 0x791   :  { %5400 = vperm.xlu0 %6626, %v3756_v35   ;;  %vm4816_vm15 = vmand %vm4304_vm5, %vm4560_vm1  ;;  %vm4564_vm13 = vcmp.lt.s32.totalorder %v3822_v21, %v12485_v11  ;;  %vm4052_vm12 = vcmp.gt.f32.partialorder %v14244_v25, %v8669_v47  ;;  %v3824_v18 = vadd.s32 408, %v14220_v33  ;;  %vm4051_vm5 = vcmp.gt.f32.partialorder %v14244_v25, %v13496_v63  ;;  %v14253_v21 = vld [vmem:[#allocation106_spill] sm:$0xff] }
 0x792   :  { %vm5072_vm14 = vmor %vm4048_vm0, %vm4816_vm15  ;;  %v3825_v29 = vadd.s32 416, %v14220_v33  ;;  %vm4053_vm0 = vcmp.gt.f32.partialorder %v14245_v59, %v13489_v13  ;;  %vm4054_vm15 = vcmp.gt.f32.partialorder %v14245_v59, %v13495_v30  ;;  %v3826_v31 = vadd.s32 424, %v14220_v33 }
 0x793   :  { %vm4820_vm11 = vmand %vm4308_vm6, %vm4564_vm13  ;;  %vm4056_vm6 = vcmp.gt.f32.partialorder %v14245_v59, %v8669_v47 }
 0x794   :  { %v3757_v15 = vpop.trf.xlu1  ;;  %vm12525_vm1 = vmor %vm4052_vm12, %vm4820_vm11 }
 0x795   :  { %5405 = vperm.xlu0 %6626, %v3757_v15  }
 0x798   :  { %v3758_v23 = vpop.trf.xlu1 }
 0x799   :  { %5410 = vperm.xlu0 %6626, %v3758_v23   ;;  %v14249_v23 = vld [vmem:[#allocation104_spill] sm:$0xff] }
 0x79c   :  { %v3759_v34 = vpop.trf.xlu1 }
 0x79d   :  { %5415 = vperm.xlu0 %6626, %v3759_v34  }
 0x7a0   :  { %v3760_v62 = vpop.trf.xlu1 }
 0x7a1   :  { %5420 = vperm.xlu0 %6626, %v3760_v62  }
 0x7a4   :  { %v3761_v17 = vpop.trf.xlu1 }
 0x7a5   :  { %5425 = vperm.xlu0 %6626, %v3761_v17  }
 0x7a8   :  { %v3762_v40 = vpop.trf.xlu1 }
 0x7a9   :  { %5430 = vperm.xlu0 %6626, %v3762_v40  }
 0x7ac   :  { %v3763_v52 = vpop.trf.xlu1 }
 0x7ad   :  { %5435 = vperm.xlu0 %6626, %v3763_v52  }
 0x7b0   :  { %v3764_v24 = vpop.trf.xlu1 }
 0x7b1   :  { %5440 = vperm.xlu0 %6626, %v3764_v24  }
 0x7b4   :  { %v3765_v5 = vpop.trf.xlu1 }
 0x7b5   :  { %5445 = vperm.xlu0 %6626, %v3765_v5   ;;  %v3827_v5 = vadd.s32 432, %v14220_v33 }
 0x7b8   :  { %v3766_v0 = vpop.trf.xlu1 }
 0x7b9   :  { %5450 = vperm.xlu0 %6626, %v3766_v0   ;;  %v14252_v0 = vld [vmem:[#allocation105_spill] sm:$0xff] }
 0x7dd   :  { %v5341_v20 = vpop.permute.xlu1 %5340 }
 0x7de   :  { %v5617_v43 = vsel %vm4017_vm8, %v5341_v20, -3.1887  ;;  %v5618_v27 = vsel %vm4018_vm3, %v5341_v20, -3.1887  ;;  %v5619_v9 = vsel %vm5043_vm10, %v5341_v20, -3.1887  ;;  %vm4312_vm8 = vcmp.eq.f32.partialorder %v14245_v59, %v8669_v47 }
 0x7df   :  { %v5755_v61 = vmax.f32 %v12464_v3, %v5617_v43  ;;  %v5824_v45 = vmax.f32 %v12466_v54, %v5618_v27  ;;  %v5893_v41 = vmax.f32 %v5892_v37, %v5619_v9  ;;  %v5620_v39 = vsel %vm5044_vm4, %v5341_v20, -3.1887 }
 0x7e0   :  { %v5962_v57 = vmax.f32 %v5961_v55, %v5620_v39  ;;  %vm4568_vm3 = vcmp.lt.s32.totalorder %v3823_v38, %v12485_v11  ;;  %vm4049_vm10 = vcmp.gt.f32.partialorder %v14244_v25, %v13489_v13  ;;  %vm4050_vm4 = vcmp.gt.f32.partialorder %v14244_v25, %v13495_v30 }
 0x7e1   :  { %vm4824_vm13 = vmand %vm4312_vm8, %vm4568_vm3  ;;  %vm4320_vm8 = vcmp.eq.f32.partialorder %v14249_v23, %v8669_v47  ;;  %vm4576_vm3 = vcmp.lt.s32.totalorder %v3825_v29, %v12485_v11  ;;  %v3828_v25 = vadd.s32 440, %v14220_v33 }
 0x7e2   :  { %vm5080_vm12 = vmor %vm4056_vm6, %vm4824_vm13  ;;  %vm4580_vm6 = vcmp.lt.s32.totalorder %v3826_v31, %v12485_v11  ;;  %vm4061_vm13 = vcmp.gt.f32.partialorder %v14249_v23, %v13489_v13  ;;  %v14255_v31 = vld [vmem:[#allocation112_spill] sm:$0xff] }
 0x7fc   :  { %v5376_v28 = vpop.permute.xlu0 %5375 }
 0x7fd   :  { %v5645_v19 = vsel %vm4045_vm9, %v5376_v28, -3.1887  ;;  %v5646_v7 = vsel %vm4046_vm2, %v5376_v28, -3.1887  ;;  %v5647_v32 = vsel %vm4047_vm7, %v5376_v28, -3.1887  ;;  %vm4055_vm9 = vcmp.gt.f32.partialorder %v14245_v59, %v13496_v63 }
 0x7fe   :  { %v5756_v49 = vmax.f32 %v5755_v61, %v5645_v19  ;;  %v5825_v1 = vmax.f32 %v5824_v45, %v5646_v7  ;;  %v5894_v8 = vmax.f32 %v5893_v41, %v5647_v32  ;;  %v5648_v6 = vsel %vm5072_vm14, %v5376_v28, -3.1887 }
 0x7ff   :  { %v5963_v53 = vmax.f32 %v5962_v57, %v5648_v6  ;;  %vm4316_vm2 = vcmp.eq.f32.partialorder %v14248_v51, %v8669_v47  ;;  %vm4572_vm7 = vcmp.lt.s32.totalorder %v3824_v18, %v12485_v11  ;;  %vm4060_vm14 = vcmp.gt.f32.partialorder %v14248_v51, %v8669_v47 }
 0x800   :  { %v5381_v14 = vpop.permute.xlu0 %5380  ;;  %vm4828_vm11 = vmand %vm4316_vm2, %vm4572_vm7  ;;  %vm4063_vm2 = vcmp.gt.f32.partialorder %v14249_v23, %v13496_v63  ;;  %vm4324_vm7 = vcmp.eq.f32.partialorder %v14252_v0, %v8669_v47  ;;  %v3829_v59 = vadd.s32 448, %v14220_v33 }
 0x801   :  { %v5649_v26 = vsel %vm4049_vm10, %v5381_v14, -3.1887  ;;  %v5650_v22 = vsel %vm4050_vm4, %v5381_v14, -3.1887  ;;  %v5651_v16 = vsel %vm4051_vm5, %v5381_v14, -3.1887  ;;  %vm4057_vm10 = vcmp.gt.f32.partialorder %v14248_v51, %v13489_v13 }
 0x802   :  { %v5652_v36 = vsel %vm12525_vm1, %v5381_v14, -3.1887  ;;  %v5757_v12 = vmax.f32 %v5756_v49, %v5649_v26  ;;  %v5826_v3 = vmax.f32 %v5825_v1, %v5650_v22  ;;  %v5895_v54 = vmax.f32 %v5894_v8, %v5651_v16  ;;  %vm12570_vm1 = vmor %vm4060_vm14, %vm4828_vm11 }
 0x803   :  { %v5964_v2 = vmax.f32 %v5963_v53, %v5652_v36  ;;  %vm4058_vm4 = vcmp.gt.f32.partialorder %v14248_v51, %v13495_v30  ;;  %vm4059_vm5 = vcmp.gt.f32.partialorder %v14248_v51, %v13496_v63  ;;  %vm4068_vm14 = vcmp.gt.f32.partialorder %v14252_v0, %v8669_v47  ;;  %vm4836_vm11 = vmand %vm4324_vm7, %vm4580_vm6  ;;  %v14254_v53 = vld [vmem:[#allocation107_spill] sm:$0xff] }
 0x804   :  { %v5386_v37 = vpop.permute.xlu0 %5385  ;;  %vm4332_vm6 = vcmp.eq.f32.partialorder %v14254_v53, %v8669_v47  ;;  %vm4071_vm7 = vcmp.gt.f32.partialorder %v14253_v21, %v13496_v63 }
 0x805   :  { %v5653_v55 = vsel %vm4053_vm0, %v5386_v37, -3.1887  ;;  %v5654_v58 = vsel %vm4054_vm15, %v5386_v37, -3.1887  ;;  %v5655_v46 = vsel %vm4055_vm9, %v5386_v37, -3.1887  ;;  %vm4064_vm0 = vcmp.gt.f32.partialorder %v14249_v23, %v8669_v47  ;;  %vm4832_vm15 = vmand %vm4320_vm8, %vm4576_vm3 }
 0x806   :  { %v5758_v60 = vmax.f32 %v5757_v12, %v5653_v55  ;;  %v5827_v50 = vmax.f32 %v5826_v3, %v5654_v58  ;;  %v5896_v4 = vmax.f32 %v5895_v54, %v5655_v46  ;;  %v5656_v35 = vsel %vm5080_vm12, %v5386_v37, -3.1887  ;;  %vm5088_vm12 = vmor %vm4064_vm0, %vm4832_vm15 }
 0x807   :  { %v5965_v15 = vmax.f32 %v5964_v2, %v5656_v35  ;;  %vm4062_vm9 = vcmp.gt.f32.partialorder %v14249_v23, %v13495_v30  ;;  %vm4328_vm8 = vcmp.eq.f32.partialorder %v14253_v21, %v8669_v47  ;;  %vm4584_vm3 = vcmp.lt.s32.totalorder %v3827_v5, %v12485_v11 }
 0x808   :  { %v5391_v34 = vpop.permute.xlu0 %5390  ;;  %vm4072_vm0 = vcmp.gt.f32.partialorder %v14253_v21, %v8669_v47  ;;  %vm4840_vm15 = vmand %vm4328_vm8, %vm4584_vm3  ;;  %vm4336_vm8 = vcmp.eq.f32.partialorder %v14255_v31, %v8669_v47  ;;  %vm4592_vm3 = vcmp.lt.s32.totalorder %v3829_v59, %v12485_v11  ;;  %v3830_v12 = vadd.s32 456, %v14220_v33 }
 0x809   :  { %v5657_v17 = vsel %vm4057_vm10, %v5391_v34, -3.1887  ;;  %v5658_v40 = vsel %vm4058_vm4, %v5391_v34, -3.1887  ;;  %v5659_v52 = vsel %vm4059_vm5, %v5391_v34, -3.1887  ;;  %vm4065_vm10 = vcmp.gt.f32.partialorder %v14252_v0, %v13489_v13 }
 0x80a   :  { %v5660_v24 = vsel %vm12570_vm1, %v5391_v34, -3.1887  ;;  %v5759_v56 = vmax.f32 %v5758_v60, %v5657_v17  ;;  %v5828_v42 = vmax.f32 %v5827_v50, %v5658_v40  ;;  %v5897_v20 = vmax.f32 %v5896_v4, %v5659_v52  ;;  %vm5092_vm1 = vmor %vm4068_vm14, %vm4836_vm11  ;;  %v14256_v4 = vld [vmem:[#allocation113_spill] sm:$0xff] }
 0x80b   :  { %v5966_v27 = vmax.f32 %v5965_v15, %v5660_v24  ;;  %vm4066_vm4 = vcmp.gt.f32.partialorder %v14252_v0, %v13495_v30  ;;  %vm4067_vm5 = vcmp.gt.f32.partialorder %v14252_v0, %v13496_v63  ;;  %vm5096_vm14 = vmor %vm4072_vm0, %vm4840_vm15  ;;  %vm4080_vm0 = vcmp.gt.f32.partialorder %v14255_v31, %v8669_v47 }
 0x80c   :  { %v5396_v43 = vpop.permute.xlu0 %5395  ;;  %vm4848_vm15 = vmand %vm4336_vm8, %vm4592_vm3  ;;  %v3831_v5 = vadd.s32 464, %v14220_v33  ;;  %v3832_v0 = vadd.s32 472, %v14220_v33  ;;  %vm4081_vm8 = vcmp.gt.f32.partialorder %v14256_v4, %v13489_v13  ;;  %vm4082_vm3 = vcmp.gt.f32.partialorder %v14256_v4, %v13495_v30 }
 0x80d   :  { %v5661_v9 = vsel %vm4061_vm13, %v5396_v43, -3.1887  ;;  %v5662_v61 = vsel %vm4062_vm9, %v5396_v43, -3.1887  ;;  %v5663_v45 = vsel %vm4063_vm2, %v5396_v43, -3.1887  ;;  %vm4588_vm13 = vcmp.lt.s32.totalorder %v3828_v25, %v12485_v11 }
 0x80e   :  { %v5760_v41 = vmax.f32 %v5759_v56, %v5661_v9  ;;  %v5829_v39 = vmax.f32 %v5828_v42, %v5662_v61  ;;  %v5898_v57 = vmax.f32 %v5897_v20, %v5663_v45  ;;  %v5664_v48 = vsel %vm5088_vm12, %v5396_v43, -3.1887  ;;  %vm4844_vm11 = vmand %vm4332_vm6, %vm4588_vm13 }
 0x80f   :  { %v5967_v10 = vmax.f32 %v5966_v27, %v5664_v48  ;;  %vm4069_vm9 = vcmp.gt.f32.partialorder %v14253_v21, %v13489_v13  ;;  %vm4070_vm2 = vcmp.gt.f32.partialorder %v14253_v21, %v13495_v30  ;;  %vm4076_vm12 = vcmp.gt.f32.partialorder %v14254_v53, %v8669_v47  ;;  %v14258_v21 = vld [vmem:[#allocation115_spill] sm:$0xff] }
 0x810   :  { %v5401_v38 = vpop.permute.xlu0 %5400  ;;  %vm4340_vm6 = vcmp.eq.f32.partialorder %v14256_v4, %v8669_v47  ;;  %vm4596_vm13 = vcmp.lt.s32.totalorder %v3830_v12, %v12485_v11  ;;  %v3833_v42 = vadd.s32 480, %v14220_v33  ;;  %v3834_v48 = vadd.s32 488, %v14220_v33  ;;  %v14275_v12 = vld [vmem:[#allocation140_spill] sm:$0xff] }
 0x811   :  { %v5665_v28 = vsel %vm4065_vm10, %v5401_v38, -3.1887  ;;  %v5666_v19 = vsel %vm4066_vm4, %v5401_v38, -3.1887  ;;  %v5667_v7 = vsel %vm4067_vm5, %v5401_v38, -3.1887  ;;  %vm4073_vm10 = vcmp.gt.f32.partialorder %v14254_v53, %v13489_v13 }
 0x812   :  { %v5761_v32 = vmax.f32 %v5760_v41, %v5665_v28  ;;  %v5830_v49 = vmax.f32 %v5829_v39, %v5666_v19  ;;  %v5899_v1 = vmax.f32 %v5898_v57, %v5667_v7  ;;  %v5668_v8 = vsel %vm5092_vm1, %v5401_v38, -3.1887  ;;  %vm5100_vm1 = vmor %vm4076_vm12, %vm4844_vm11  ;;  %v14261_v7 = vld [vmem:[#allocation138_spill] sm:$0xff] }
 0x813   :  { %v5968_v6 = vmax.f32 %v5967_v10, %v5668_v8  ;;  %vm4074_vm4 = vcmp.gt.f32.partialorder %v14254_v53, %v13495_v30  ;;  %vm4075_vm5 = vcmp.gt.f32.partialorder %v14254_v53, %v13496_v63  ;;  %vm4084_vm12 = vcmp.gt.f32.partialorder %v14256_v4, %v8669_v47  ;;  %vm4852_vm11 = vmand %vm4340_vm6, %vm4596_vm13  ;;  %v14257_v10 = vld [vmem:[#allocation114_spill] sm:$0xff] }
 0x814   :  { %v5406_v18 = vpop.permute.xlu0 %5405  ;;  %vm4086_vm6 = vcmp.gt.f32.partialorder %v14257_v10, %v13495_v30  ;;  %vm4087_vm13 = vcmp.gt.f32.partialorder %v14257_v10, %v13496_v63  ;;  %v12701_v25 = vadd.s32 504, %v14220_v33  ;;  %v3835_v19 = vadd.s32 496, %v14220_v33  ;;  %v14264_v33 = vld [vmem:[#allocation139_spill] sm:$0xff] }
 0x815   :  { %v5669_v14 = vsel %vm4069_vm9, %v5406_v18, -3.1887  ;;  %v5670_v29 = vsel %vm4070_vm2, %v5406_v18, -3.1887  ;;  %v5671_v44 = vsel %vm4071_vm7, %v5406_v18, -3.1887  ;;  %vm4077_vm9 = vcmp.gt.f32.partialorder %v14255_v31, %v13489_v13 }
 0x816   :  { %v5762_v26 = vmax.f32 %v5761_v32, %v5669_v14  ;;  %v5831_v22 = vmax.f32 %v5830_v49, %v5670_v29  ;;  %v5900_v16 = vmax.f32 %v5899_v1, %v5671_v44  ;;  %v5672_v36 = vsel %vm5096_vm14, %v5406_v18, -3.1887  ;;  %vm5104_vm14 = vmor %vm4080_vm0, %vm4848_vm15  ;;  %v14269_v14 = vld [vmem:[#allocation142_spill] sm:$0xff] }
 0x817   :  { %v5969_v51 = vmax.f32 %v5968_v6, %v5672_v36  ;;  %vm4078_vm2 = vcmp.gt.f32.partialorder %v14255_v31, %v13495_v30  ;;  %vm4079_vm7 = vcmp.gt.f32.partialorder %v14255_v31, %v13496_v63  ;;  %vm4600_vm0 = vcmp.lt.s32.totalorder %v3831_v5, %v12485_v11 }
 0x818   :  { %v5411_v3 = vpop.permute.xlu0 %5410  ;;  %vm4604_vm15 = vcmp.lt.s32.totalorder %v3832_v0, %v12485_v11 }
 0x819   :  { %v5673_v54 = vsel %vm4073_vm10, %v5411_v3, -3.1887  ;;  %v5674_v37 = vsel %vm4074_vm4, %v5411_v3, -3.1887  ;;  %v5675_v2 = vsel %vm4075_vm5, %v5411_v3, -3.1887  ;;  %vm4083_vm10 = vcmp.gt.f32.partialorder %v14256_v4, %v13496_v63  ;;  %vm5108_vm4 = vmor %vm4084_vm12, %vm4852_vm11 }
 0x81a   :  { %v5763_v55 = vmax.f32 %v5762_v26, %v5673_v54  ;;  %v5832_v58 = vmax.f32 %v5831_v22, %v5674_v37  ;;  %v5901_v46 = vmax.f32 %v5900_v16, %v5675_v2  ;;  %v5676_v60 = vsel %vm5100_vm1, %v5411_v3, -3.1887  ;;  %v14286_v54 = vld [vmem:[#allocation18_spill] sm:$0xff] }
 0x81b   :  { %v5970_v50 = vmax.f32 %v5969_v51, %v5676_v60  ;;  %vm4085_vm5 = vcmp.gt.f32.partialorder %v14257_v10, %v13489_v13  ;;  %vm4344_vm1 = vcmp.eq.f32.partialorder %v14257_v10, %v8669_v47  ;;  %vm4348_vm12 = vcmp.eq.f32.partialorder %v14258_v21, %v8669_v47 }
 0x81c   :  { %v5416_v35 = vpop.permute.xlu0 %5415  ;;  %vm12703_vm11 = vmand %vm4344_vm1, %vm4600_vm0  ;;  %vm4098_vm1 = vcmp.gt.f32.partialorder %v14264_v33, %v13495_v30  ;;  %vm4099_vm0 = vcmp.gt.f32.partialorder %v14264_v33, %v13496_v63 }
 0x81d   :  { %v5677_v15 = vsel %vm4077_vm9, %v5416_v35, -3.1887  ;;  %v5678_v23 = vsel %vm4078_vm2, %v5416_v35, -3.1887  ;;  %v5679_v34 = vsel %vm4079_vm7, %v5416_v35, -3.1887  ;;  %vm4088_vm9 = vcmp.gt.f32.partialorder %v14257_v10, %v8669_v47 }
 0x81e   :  { %v12660_v62 = vmax.f32 %v5763_v55, %v5677_v15  ;;  %v12662_v17 = vmax.f32 %v5832_v58, %v5678_v23  ;;  %v5902_v40 = vmax.f32 %v5901_v46, %v5679_v34  ;;  %v5680_v52 = vsel %vm5104_vm14, %v5416_v35, -3.1887  ;;  %vm12723_vm14 = vmand %vm4348_vm12, %vm4604_vm15 }
 0x81f   :  { %v5971_v24 = vmax.f32 %v5970_v50, %v5680_v52  ;;  %vm4608_vm2 = vcmp.lt.s32.totalorder %v3833_v42, %v12485_v11  ;;  %vm4089_vm7 = vcmp.gt.f32.partialorder %v14258_v21, %v13489_v13  ;;  %vm12740_vm15 = vmor %vm4088_vm9, %vm12703_vm11  ;;  %vm4356_vm12 = vcmp.eq.f32.partialorder %v14264_v33, %v8669_v47 }
 0x820   :  { %v5421_v56 = vpop.permute.xlu0 %5420  ;;  %vm4616_vm11 = vcmp.lt.s32.totalorder %v3835_v19, %v12485_v11  ;;  %vm4360_vm9 = vcmp.eq.f32.partialorder %v14269_v14, %v8669_v47 }
 0x821   :  { %v5681_v20 = vsel %vm4081_vm8, %v5421_v56, -3.1887  ;;  %v5682_v43 = vsel %vm4082_vm3, %v5421_v56, -3.1887  ;;  %v5683_v27 = vsel %vm4083_vm10, %v5421_v56, -3.1887  ;;  %vm4092_vm3 = vcmp.gt.f32.partialorder %v14258_v21, %v8669_v47 }
 0x822   :  { %v5765_v9 = vmax.f32 %v12660_v62, %v5681_v20  ;;  %v5834_v61 = vmax.f32 %v12662_v17, %v5682_v43  ;;  %v12678_v45 = vmax.f32 %v5902_v40, %v5683_v27  ;;  %v5684_v41 = vsel %vm5108_vm4, %v5421_v56, -3.1887 }
 0x823   :  { %v5972_v39 = vmax.f32 %v5971_v24, %v5684_v41  ;;  %vm4352_vm8 = vcmp.eq.f32.partialorder %v14261_v7, %v8669_v47  ;;  %vm4096_vm10 = vcmp.gt.f32.partialorder %v14261_v7, %v8669_v47  ;;  %vm4097_vm4 = vcmp.gt.f32.partialorder %v14264_v33, %v13489_v13 }
 0x824   :  { %v5426_v57 = vpop.permute.xlu0 %5425 }
 0x825   :  { %v5685_v1 = vsel %vm4085_vm5, %v5426_v57, -3.1887  ;;  %v5686_v8 = vsel %vm4086_vm6, %v5426_v57, -3.1887  ;;  %v5687_v6 = vsel %vm4087_vm13, %v5426_v57, -3.1887  ;;  %vm12761_vm5 = vmand %vm4352_vm8, %vm4608_vm2  ;;  %vm4100_vm6 = vcmp.gt.f32.partialorder %v14264_v33, %v8669_v47 }
 0x826   :  { %v5688_v53 = vsel %vm12740_vm15, %v5426_v57, -3.1887  ;;  %vm4104_vm13 = vcmp.gt.f32.partialorder %v14269_v14, %v8669_v47  ;;  %vm12775_vm15 = vmor %vm4092_vm3, %vm12723_vm14  ;;  %vm14272_vm2 = vcmp.gt.f32.partialorder %v14258_v21, %v13495_v30  ;;  %vm14273_vm8 = vcmp.gt.f32.partialorder %v14258_v21, %v13496_v63 }
 0x827   :  { %v5766_v16 = vmax.f32 %v5765_v9, %v5685_v1  ;;  %v5835_v36 = vmax.f32 %v5834_v61, %v5686_v8  ;;  %v5904_v51 = vmax.f32 %v12678_v45, %v5687_v6  ;;  %vm4108_vm3 = vcmp.gt.f32.partialorder %v14275_v12, %v8669_v47 }
 0x828   :  { %v5431_v28 = vpop.permute.xlu0 %5430  ;;  %v5973_v3 = vmax.f32 %v5972_v39, %v5688_v53 }
 0x829   :  { %v5689_v44 = vsel %vm4089_vm7, %v5431_v28, -3.1887  ;;  %v5690_v26 = vsel %vm14272_vm2, %v5431_v28, -3.1887  ;;  %v5691_v22 = vsel %vm14273_vm8, %v5431_v28, -3.1887  ;;  %vm14274_vm7 = vcmp.lt.s32.totalorder %v3834_v48, %v12485_v11  ;;  %vm12805_vm2 = vmor %vm4096_vm10, %vm12761_vm5 }
 0x82a   :  { %v5692_v31 = vsel %vm12775_vm15, %v5431_v28, -3.1887  ;;  %vm4868_vm14 = vmand %vm4356_vm12, %vm14274_vm7  ;;  %vm14278_vm15 = vcmp.gt.f32.partialorder %v14261_v7, %v13489_v13  ;;  %vm14279_vm12 = vcmp.gt.f32.partialorder %v14261_v7, %v13495_v30  ;;  %vm14280_vm8 = vcmp.gt.f32.partialorder %v14261_v7, %v13496_v63 }
 0x82b   :  { %v5767_v58 = vmax.f32 %v5766_v16, %v5689_v44  ;;  %v5836_v46 = vmax.f32 %v5835_v36, %v5690_v26  ;;  %v5905_v60 = vmax.f32 %v5904_v51, %v5691_v22  ;;  %v5974_v35 = vmax.f32 %v5973_v3, %v5692_v31  ;;  %vm12823_vm10 = vmor %vm4100_vm6, %vm4868_vm14  ;;  %v14284_v22 = vld [vmem:[#allocation11_spill] sm:$0xff]  ;;  %v14285_v36 = vld [vmem:[#allocation8_spill] sm:$0xff] }
 0x82c   :  { %v5436_v18 = vpop.permute.xlu0 %5435  ;;  %vm4102_vm5 = vcmp.gt.f32.partialorder %v14269_v14, %v13495_v30  ;;  %vm4103_vm6 = vcmp.gt.f32.partialorder %v14269_v14, %v13496_v63  ;;  %vm4105_vm14 = vcmp.gt.f32.partialorder %v14275_v12, %v13489_v13  ;;  %v6361_v16 = vadd.f32 14.1951, %v14284_v22 }
 0x82d   :  { %v5693_v37 = vsel %vm14278_vm15, %v5436_v18, -3.1887  ;;  %v5694_v2 = vsel %vm14279_vm12, %v5436_v18, -3.1887  ;;  %v5695_v55 = vsel %vm14280_vm8, %v5436_v18, -3.1887 }
 0x82e   :  { %v5696_v50 = vsel %vm12805_vm2, %v5436_v18, -3.1887  ;;  %v5768_v17 = vmax.f32 %v5767_v58, %v5693_v37  ;;  %v5837_v40 = vmax.f32 %v5836_v46, %v5694_v2  ;;  %v5906_v52 = vmax.f32 %v5905_v60, %v5695_v55  ;;  %v14287_v55 = vld [vmem:[#allocation10_spill] sm:$0xff] }
 0x82f   :  { %v5975_v5 = vmax.f32 %v5974_v35, %v5696_v50  ;;  %vm4107_vm2 = vcmp.gt.f32.partialorder %v14275_v12, %v13496_v63  ;;  %v6362_v51 = vadd.f32 14.1951, %v14285_v36  ;;  %v6363_v37 = vadd.f32 14.1951, %v14286_v54 }
 0x830   :  { %v5441_v4 = vpop.permute.xlu0 %5440  ;;  %v6364_v58 = vadd.f32 14.1951, %v14287_v55  ;;  %v5989_v35 = vmax.f32 %v6361_v16, 0.0 }
 0x831   :  { %v5697_v23 = vsel %vm4097_vm4, %v5441_v4, -3.1887  ;;  %v5698_v34 = vsel %vm4098_vm1, %v5441_v4, -3.1887  ;;  %v5699_v62 = vsel %vm4099_vm0, %v5441_v4, -3.1887  ;;  %vm4872_vm4 = vmand %vm4360_vm9, %vm4616_vm11  ;;  %vm4101_vm1 = vcmp.gt.f32.partialorder %v14269_v14, %v13489_v13 }
 0x832   :  { %v5700_v24 = vsel %vm12823_vm10, %v5441_v4, -3.1887  ;;  %vm4364_vm0 = vcmp.eq.f32.partialorder %v14275_v12, %v8669_v47  ;;  %v5769_v0 = vmax.f32 %v5768_v17, %v5697_v23  ;;  %v5838_v56 = vmax.f32 %v5837_v40, %v5698_v34  ;;  %vm5128_vm9 = vmor %vm4104_vm13, %vm4872_vm4  ;;  %v14288_v34 = vld [vmem:[#allocation44_spill] sm:$0xff] }
 0x833   :  { %v5907_v42 = vmax.f32 %v5906_v52, %v5699_v62  ;;  %v5976_v43 = vmax.f32 %v5975_v5, %v5700_v24  ;;  %vm14283_vm11 = vcmp.lt.s32.totalorder %v12701_v25, %v12485_v11  ;;  %vm4106_vm13 = vcmp.gt.f32.partialorder %v14275_v12, %v13495_v30  ;;  %v14289_v17 = vld [vmem:[#allocation12_spill] sm:$0xff]  ;;  %v14290_v52 = vld [vmem:[#allocation123_spill] sm:$0xff] }
 0x834   :  { %v5446_v20 = vpop.permute.xlu0 %5445  ;;  %vm4876_vm7 = vmand %vm4364_vm0, %vm14283_vm11  ;;  %v5990_v15 = vmax.f32 %v6362_v51, 0.0  ;;  %v5991_v23 = vmax.f32 %v6363_v37, 0.0  ;;  %v5992_v5 = vmax.f32 %v6364_v58, 0.0 }
 0x835   :  { %v5701_v27 = vsel %vm4101_vm1, %v5446_v20, -3.1887  ;;  %v5702_v9 = vsel %vm4102_vm5, %v5446_v20, -3.1887  ;;  %v5703_v61 = vsel %vm4103_vm6, %v5446_v20, -3.1887  ;;  %vm5132_vm15 = vmor %vm4108_vm3, %vm4876_vm7 }
 0x836   :  { %v5770_v45 = vmax.f32 %v5769_v0, %v5701_v27  ;;  %v5839_v41 = vmax.f32 %v5838_v56, %v5702_v9  ;;  %v5908_v39 = vmax.f32 %v5907_v42, %v5703_v61  ;;  %v5704_v57 = vsel %vm5128_vm9, %v5446_v20, -3.1887  ;;  %v14291_v0 = vld [vmem:[#allocation122_spill] sm:$0xff] }
 0x837   :  { %v5977_v48 = vmax.f32 %v5976_v43, %v5704_v57  ;;  %vm6009_vm3 = vcmask 1040384  }
 0x838   :  { %v5451_v10 = vpop.permute.xlu0 %5450 }
 0x839   :  { %v5705_v11 = vsel %vm4105_vm14, %v5451_v10, -3.1887  ;;  %v5706_v21 = vsel %vm4106_vm13, %v5451_v10, -3.1887  ;;  %v5707_v25 = vsel %vm4107_vm2, %v5451_v10, -3.1887 }
 0x83a   :  { %v5771_v38 = vmax.f32 %v5770_v45, %v5705_v11  ;;  %v5840_v28 = vmax.f32 %v5839_v41, %v5706_v21  ;;  %v5909_v19 = vmax.f32 %v5908_v39, %v5707_v25  ;;  %v5708_v7 = vsel %vm5132_vm15, %v5451_v10, -3.1887  ;;  %v14292_v39 = vld [vmem:[#allocation120_spill] sm:$0xff]  ;;  %v14296_v11 = vld [vmem:[#allocation125_spill] sm:$0xff] }
 0x83b   :  { %v5978_v32 = vmax.f32 %v5977_v48, %v5708_v7  ;;  %vm14293_vm12 = vnez %v14292_v39  ;;  %v14294_v48 = vld [vmem:[#allocation43_spill] sm:$0xff]  ;;  %vm14297_vm10 = vnez %v14296_v11 }
 0x83c   :  { %v5772_v13 = vrot.slane %v5771_v38, 4  ;;  %v5841_v33 = vrot.slane %v5840_v28, 4  ;;  %v5910_v49 = vrot.slane %v5909_v19, 4  ;;  %vm14295_vm8 = vnez %v14294_v48 }
 0x83d   :  { %v5979_v30 = vrot.slane %v5978_v32, 4 }
 0x83e   :  { %v5773_v1 = vmax.f32 %v5771_v38, %v5772_v13  ;;  %v5842_v8 = vmax.f32 %v5840_v28, %v5841_v33  ;;  %v5911_v63 = vmax.f32 %v5909_v19, %v5910_v49  ;;  %v14298_v28 = vld [vmem:[#allocation124_spill] sm:$0xff] }
 0x83f   :  { %v5980_v6 = vmax.f32 %v5978_v32, %v5979_v30  ;;  %vm14299_vm4 = vnez %v14298_v28 }
 0x840   :  { %v5774_v53 = vrot.slane %v5773_v1, 2  ;;  %v5843_v59 = vrot.slane %v5842_v8, 2  ;;  %v5912_v47 = vrot.slane %v5911_v63, 2 }
 0x841   :  { %v5981_v18 = vrot.slane %v5980_v6, 2 }
 0x842   :  { %v5775_v14 = vmax.f32 %v5773_v1, %v5774_v53  ;;  %v5844_v29 = vmax.f32 %v5842_v8, %v5843_v59  ;;  %v5913_v44 = vmax.f32 %v5911_v63, %v5912_v47 }
 0x843   :  { %v5982_v26 = vmax.f32 %v5980_v6, %v5981_v18 }
 0x844   :  { %v5776_v31 = vrot.slane %v5775_v14, 1  ;;  %v5845_v12 = vrot.slane %v5844_v29, 1  ;;  %v5914_v3 = vrot.slane %v5913_v44, 1 }
 0x845   :  { %v5983_v2 = vrot.slane %v5982_v26, 1 }
 0x846   :  { %v5777_v46 = vmax.f32 %v5775_v14, %v5776_v31  ;;  %v5846_v60 = vmax.f32 %v5844_v29, %v5845_v12  ;;  %v5915_v50 = vmax.f32 %v5913_v44, %v5914_v3 }
 0x847   :  { %v5984_v4 = vmax.f32 %v5982_v26, %v5983_v2 }
 0x848   :  { %v5993_v62 = vsub.f32 %v14288_v34, %v5777_v46  ;;  %v5994_v40 = vsub.f32 %v14289_v17, %v5846_v60  ;;  %v5995_v24 = vsub.f32 %v14290_v52, %v5915_v50 }
 0x849   :  { %v5996_v56 = vsub.f32 %v14291_v0, %v5984_v4 }
 0x84a   :  { %v5997_v42 = vmax.f32 %v5993_v62, 0.0  ;;  %v5998_v20 = vmax.f32 %v5994_v40, 0.0  ;;  %v5999_v43 = vmax.f32 %v5995_v24, 0.0 }
 0x84b   :  { %v6000_v27 = vmax.f32 %v5996_v56, 0.0 }
 0x84c   :  { %v6001_v9 = vmul.f32 %v5997_v42, %v5989_v35  ;;  %v6002_v61 = vmul.f32 %v5998_v20, %v5990_v15  ;;  %v6003_v45 = vmul.f32 %v5999_v43, %v5991_v23 }
 0x84d   :  { %v6004_v41 = vmul.f32 %v6000_v27, %v5992_v5 }
 0x84e   :  { %v6005_v57 = vsel %vm14293_vm12, %v6001_v9, 0.0  ;;  %v6006_v10 = vsel %vm14295_vm8, %v6002_v61, 0.0  ;;  %v6007_v21 = vsel %vm14297_vm10, %v6003_v45, 0.0 }
 0x84f   :  { %v6010_v25 = vsel %vm6009_vm3, %v6005_v57, 0.0  ;;  %v6011_v38 = vsel %vm6009_vm3, %v6006_v10, 0.0  ;;  %v6008_v19 = vsel %vm14299_vm4, %v6004_v41, 0.0  ;;  %v6013_v32 = vsel %vm6009_vm3, %v6007_v21, 0.0 }
 0x850   :  { %v6012_v7 = vadd.f32 %v6011_v38, %v6010_v25  ;;  %v6015_v33 = vsel %vm6009_vm3, %v6008_v19, 0.0 }
 0x852   :  { %v6014_v13 = vadd.f32 %v6013_v32, %v6012_v7 }
 0x854   :  { %v6016_v49 = vadd.f32 %v6015_v33, %v6014_v13 }
 0x856   :  { %6017 = vadd.xlane.f32.xlu0 %v6016_v49 }
 0x8e3   :  { %v6018_v30 = vpop.xlane.xlu0 %6017 }
 0x8e4   :  { %v6019_v1 = vrot.slane %v6018_v30, 4 }
 0x8e6   :  { %v6020_v8 = vadd.f32 %v6019_v1, %v6018_v30 }
 0x8e8   :  { %v6021_v63 = vrot.slane %v6020_v8, 2 }
 0x8ea   :  { %v6022_v6 = vadd.f32 %v6021_v63, %v6020_v8 }
 0x8ec   :  { %v6023_v53 = vrot.slane %v6022_v6, 1 }
 0x8ee   :  { %v6024_v59 = vadd.f32 %v6023_v53, %v6022_v6 }
 0x8f0   :  { %6613 = vpush %v6024_v59 }
 0x921   :  { %s6614_s29 = spop %6613 }
 0x922   :  { %6027 = sst [smem:[#allocation5]] %s6614_s29 }
 0x923   :  { %6696 = shalt.err (!%p6693_p5)
}
 0x924   :  { %s6710_s9 = smov [#allocation5]  }
 0x925   :  { %6035 = dma.smem_to_hbm %s6710_s9, 16, %s12899_s2, [#allocation4]  }
 0x926   :  { %6699 = dma.done.wait [#allocation4], 16  }
 0x927   :  { %6700 = vsyncadd [#allocation4], 4294967280 }
 0x928   :  { %6039 = sfence }
 0x929   :  { %6040 = vsyncpa [#allocation3], 1 }
 0x92a   :  { %6041 = vsyncpa [#allocation4], 1 }

</bundles_post_ra>
